<compile_context>
chip_gen: v7x
topology: tpu7x:2x2x1
jax: 0.10.0
libtpu: 0.0.40
codegen_flags: <defaults>
</compile_context>

<pallas_src>
import functools

import jax
import jax.numpy as jnp
from jax.experimental import pallas as pl
from jax.experimental.pallas import tpu as pltpu

# Keep the plain-JAX reference matmuls f32-accurate so the correctness check is tight.
jax.config.update("jax_default_matmul_precision", "highest")


# ----------------------------------------------------------------------------
# Fused Pallas kernel: one block of batch rows per grid step.
# ----------------------------------------------------------------------------
def _fused_conf_attn_kernel(xq_ref, xk_ref, xv_ref, rel_ref, absf_ref, absb_ref,
                            w_ref, b_ref, cw_ref, cb_ref,
                            o_ref, oc_ref, *, head_num, head_dim, b_blk):
    """Confidence gates + QKV projection + MHA + output projection, b_blk batches."""
    _, n, hidden = xq_ref.shape
    conf_dim = rel_ref.shape[2]
    H = hidden
    M = b_blk * n
    inv_sqrt = 1.0 / (head_dim ** 0.5)

    # ---- confidence gates (rel/abs sigmoid projections fused in-kernel) ----
    # rel gate, per (batch-in-block, position): sigmoid(rel . wr + br)
    wr = cw_ref[0:1, :]                                                 # (1, C)
    rel_logit = jnp.sum(rel_ref[...] * wr[None], axis=-1, keepdims=True) + cb_ref[0]
    sig_rel = 1.0 / (1.0 + jnp.exp(-rel_logit))                         # (b_blk, n, 1)

    # abs gate along the key axis (key j indexes batch j; module requires b == n)
    wa = cw_ref[1:2, :]                                                 # (1, C)
    abs_logit = jnp.sum(absf_ref[...] * wa, axis=-1, keepdims=True) + cb_ref[1]
    sig_abs = 1.0 / (1.0 + jnp.exp(-abs_logit))                         # (n, 1)

    # conf[bb, j] = sig_rel[bb, j] * sig_abs[j]; fold 1/sqrt(head_dim) in too.
    conf = (sig_rel * sig_abs[None]) * inv_sqrt                         # (b_blk, n, 1)
    conf_col = conf.reshape(M, 1)                                       # per-key column scale

    # ---- Q/K/V projections: full-K matmuls on packed VMEM-resident weights ----
    xq = xq_ref[...].reshape(M, H)
    xk = xk_ref[...].reshape(M, H)
    xv = xv_ref[...].reshape(M, H)
    q = jnp.dot(xq, w_ref[0:H, :], preferred_element_type=jnp.float32) + b_ref[0:1, :]
    k = jnp.dot(xk, w_ref[H:2 * H, :], preferred_element_type=jnp.float32) + b_ref[1:2, :]
    v = jnp.dot(xv, w_ref[2 * H:3 * H, :], preferred_element_type=jnp.float32) + b_ref[2:3, :]
    # score = (q.k)/sqrt(hd) * conf(key)  ==  q . (k * conf(key)/sqrt(hd))
    k = k * conf_col

    # ---- per-head attention, batched over the b_blk batch rows -------------
    ctx_parts = []
    for h in range(head_num):                     # small head_num, statically unrolled
        hs = slice(h * head_dim, (h + 1) * head_dim)
        q_h = q[:, hs].reshape(b_blk, n, head_dim)
        k_h = k[:, hs].reshape(b_blk, n, head_dim)
        v_h = v[:, hs].reshape(b_blk, n, head_dim)
        s = jnp.einsum('bqd,bkd->bqk', q_h, k_h, preferred_element_type=jnp.float32)
        m = jnp.max(s, axis=-1, keepdims=True)
        e = jnp.exp(s - m)
        p = e * pl.reciprocal(jnp.sum(e, axis=-1, keepdims=True), approx=True)
        # TODO(synk): dropout on attention weights omitted (inference-mode identity).
        ctx_h = jnp.einsum('bqk,bkd->bqd', p, v_h, preferred_element_type=jnp.float32)
        ctx_parts.append(ctx_h.reshape(M, head_dim))
    ctx = jnp.concatenate(ctx_parts, axis=-1)                           # (M, H), merged heads

    # ---- output projection: a single full-K matmul through w_concat --------
    out = jnp.dot(ctx, w_ref[3 * H:4 * H, :],
                  preferred_element_type=jnp.float32) + b_ref[3:4, :]
    o_ref[...] = out.reshape(b_blk, n, H).astype(o_ref.dtype)

    # ---- out_confidence -----------------------------------------------------
    # softmax rows sum to 1 and every key carries the same per-head abs
    # confidence, so the reference bmm reduces to broadcasting this block's
    # abs_confidence over the sequence axis (matches reference to ~1e-7).
    oc_ref[...] = jnp.broadcast_to(absb_ref[...],
                                   (b_blk, n, conf_dim)).astype(oc_ref.dtype)


def _forward_impl(params, query, key, value, abs_confidence, rel_confidence, *,
                  head_num, head_dim):
    b, n, hidden = query.shape
    conf_dim = rel_confidence.shape[-1]

    # Two parallel grid steps when possible (keeps both v7x TensorCores busy,
    # minimal per-step overhead on v5e/v6e); otherwise one block per batch row.
    num_blocks = 2 if (b >= 2 and b % 2 == 0) else b
    b_blk = b // num_blocks

    abs_flat = abs_confidence.reshape(b, conf_dim)   # bitcast view for the key-axis gate

    kern = functools.partial(_fused_conf_attn_kernel, head_num=head_num,
                             head_dim=head_dim, b_blk=b_blk)

    out, out_confidence = pl.pallas_call(
        kern,
        out_shape=(jax.ShapeDtypeStruct((b, n, hidden), jnp.float32),
                   jax.ShapeDtypeStruct((b, n, conf_dim), jnp.float32)),
        grid=(num_blocks,),
        in_specs=[
            pl.BlockSpec((b_blk, n, hidden), lambda i: (i, 0, 0)),     # query
            pl.BlockSpec((b_blk, n, hidden), lambda i: (i, 0, 0)),     # key
            pl.BlockSpec((b_blk, n, hidden), lambda i: (i, 0, 0)),     # value
            pl.BlockSpec((b_blk, n, conf_dim), lambda i: (i, 0, 0)),   # rel_confidence
            pl.BlockSpec((b, conf_dim), lambda i: (0, 0)),             # abs_conf (all rows, key gate)
            pl.BlockSpec((b_blk, 1, conf_dim), lambda i: (i, 0, 0)),   # abs_conf (block rows, out_conf)
            pl.BlockSpec((4 * hidden, hidden), lambda i: (0, 0)),      # packed wq|wk|wv|wc (pre-transposed)
            pl.BlockSpec((4, hidden), lambda i: (0, 0)),               # packed bq|bk|bv|bc
            pl.BlockSpec((2, conf_dim), lambda i: (0, 0)),             # packed wr|wa
            pl.BlockSpec(memory_space=pltpu.MemorySpace.SMEM),         # [br, ba] scalars
        ],
        out_specs=(pl.BlockSpec((b_blk, n, hidden), lambda i: (i, 0, 0)),
                   pl.BlockSpec((b_blk, n, conf_dim), lambda i: (i, 0, 0))),
        compiler_params=pltpu.CompilerParams(
            dimension_semantics=("parallel",)),
    )(query, key, value, rel_confidence, abs_flat, abs_confidence,
      params['w_all'], params['b_all'], params['cw'], params['cb'])
    return out, out_confidence


# ----------------------------------------------------------------------------
# Module wrapper
# ----------------------------------------------------------------------------
class ConfidenceAttentionPallas:
    def __init__(self, hidden_dim, confidence_dim, head_num=8, dropout=0.1, *, key=None):
        assert hidden_dim % head_num == 0
        assert confidence_dim % head_num == 0
        self.hidden_dim = hidden_dim
        self.head_num = head_num
        self.head_dim = hidden_dim // head_num
        self.confidence_dim = confidence_dim
        self.confidence_head_dim = confidence_dim // head_num

        key = jax.random.PRNGKey(42) if key is None else key
        ks = jax.random.split(key, 6)

        def xavier(k, out_f, in_f):
            bound = (6.0 / (in_f + out_f)) ** 0.5
            return jax.random.uniform(k, (out_f, in_f), jnp.float32, -bound, bound)

        def default_linear(k, out_f, in_f):
            kw, kb = jax.random.split(k)
            bound = 1.0 / (in_f ** 0.5)
            w = jax.random.uniform(kw, (out_f, in_f), jnp.float32, -bound, bound)
            b = jax.random.uniform(kb, (out_f,), jnp.float32, -bound, bound)
            return w, b

        H, C = hidden_dim, confidence_dim
        self.wq = xavier(ks[0], H, H); self.bq = jnp.zeros((H,), jnp.float32)
        self.wk = xavier(ks[1], H, H); self.bk = jnp.zeros((H,), jnp.float32)
        self.wv = xavier(ks[2], H, H); self.bv = jnp.zeros((H,), jnp.float32)
        self.wa, self.ba = default_linear(ks[3], 1, C)   # proj_abs_c
        self.wr, self.br = default_linear(ks[4], 1, C)   # proj_rel_c
        self.wc, self.bc = default_linear(ks[5], H, H)   # w_concat

        # Kernel-ready parameters, packed ONCE at init:
        #   w_all: rows [wq^T; wk^T; wv^T; wc^T]  (nn.Linear stores (out,in))
        #   b_all: rows [bq; bk; bv; bc]
        #   cw:    rows [wr; wa]    cb: [br, ba]
        self._pt = dict(
            w_all=jnp.concatenate([self.wq.T, self.wk.T, self.wv.T, self.wc.T], axis=0),
            b_all=jnp.stack([self.bq, self.bk, self.bv, self.bc], axis=0),
            cw=jnp.stack([self.wr[0], self.wa[0]], axis=0),
            cb=jnp.array([self.br[0], self.ba[0]], jnp.float32),
        )
        self._forward = jax.jit(functools.partial(
            _forward_impl, head_num=self.head_num, head_dim=self.head_dim))

    def params(self):
        return dict(wq=self.wq, bq=self.bq, wk=self.wk, bk=self.bk,
                    wv=self.wv, bv=self.bv, wa=self.wa, ba=self.ba,
                    wr=self.wr, br=self.br, wc=self.wc, bc=self.bc)

    def __call__(self, query, key, value, abs_confidence, rel_confidence, mask=None):
        # TODO(synk): optional `mask` path (masked_fill with -inf) not implemented.
        assert mask is None
        b, n, _ = query.shape
        assert abs_confidence.shape == (b, 1, self.confidence_dim) and b == n, \
            "module semantics require abs_confidence of shape (b,1,C) with b == n"
        return self._forward(self._pt, query, key, value, abs_confidence, rel_confidence)


# ----------------------------------------------------------------------------
# Pure-JAX reference (mirrors the PyTorch forward line by line)
# ----------------------------------------------------------------------------
def reference_forward(p, query, key, value, abs_confidence, rel_confidence, head_num):
    b, n, H = query.shape
    hd = H // head_num
    C = abs_confidence.shape[-1]
    chd = C // head_num

    q = query @ p["wq"].T + p["bq"]
    k = key @ p["wk"].T + p["bk"]
    v = value @ p["wv"].T + p["bv"]

    def split(x):   # 'b n (h hd) -> (b h) n hd'
        return x.reshape(b, n, head_num, hd).transpose(0, 2, 1, 3).reshape(b * head_num, n, hd)

    q, k, v = split(q), split(k), split(v)

    rel_c = jax.nn.sigmoid(rel_confidence @ p["wr"].T + p["br"])          # (b, n, 1)
    abs_c = jax.nn.sigmoid(abs_confidence @ p["wa"].T + p["ba"])          # (b, 1, 1)
    confidence = rel_c * jnp.transpose(abs_c, (1, 0, 2))                  # (b, n, 1)
    confidence = jnp.tile(confidence, (1, 1, head_num))                   # (b, n, h)
    confidence = confidence.transpose(0, 2, 1).reshape(b * head_num, n)   # '(b h) n'

    score = q @ jnp.swapaxes(k, -2, -1) / (hd ** 0.5)
    score = score * confidence[:, None, :]
    score = jax.nn.softmax(score, axis=-1)

    out = score @ v
    out = out.reshape(b, head_num, n, hd).transpose(0, 2, 1, 3).reshape(b, n, H)
    out = out @ p["wc"].T + p["bc"]

    absr = jnp.tile(abs_confidence, (1, abs_confidence.shape[0], 1))      # (b, b, C)
    absr = absr.reshape(b, b, head_num, chd).transpose(0, 2, 1, 3).reshape(b * head_num, b, chd)
    out_conf = score @ absr
    out_conf = out_conf.reshape(b, head_num, n, chd).transpose(0, 2, 1, 3).reshape(b, n, C)
    return out, out_conf


# ----------------------------------------------------------------------------
if __name__ == "__main__":
    HIDDEN, CONF, HEADS = 64, 32, 8
    B = N = 8   # forward semantics require batch == seq_len

    root = jax.random.PRNGKey(0)
    kq, kk, kv, ka, kr = jax.random.split(root, 5)
    query = jax.random.normal(kq, (B, N, HIDDEN), jnp.float32)
    key_in = jax.random.normal(kk, (B, N, HIDDEN), jnp.float32)
    value = jax.random.normal(kv, (B, N, HIDDEN), jnp.float32)
    abs_confidence = jax.random.normal(ka, (B, 1, CONF), jnp.float32)
    rel_confidence = jax.random.normal(kr, (B, N, CONF), jnp.float32)

    module = ConfidenceAttentionPallas(HIDDEN, CONF, HEADS, key=jax.random.PRNGKey(42))

    out, out_conf = module(query, key_in, value, abs_confidence, rel_confidence)
    jax.block_until_ready((out, out_conf))

    ref_out, ref_conf = reference_forward(module.params(), query, key_in, value,
                                          abs_confidence, rel_confidence, HEADS)
    assert out.shape == (B, N, HIDDEN) and out_conf.shape == (B, N, CONF)
    assert bool(jnp.all(jnp.isfinite(out))) and bool(jnp.all(jnp.isfinite(out_conf)))
    assert jnp.allclose(out, ref_out, rtol=5e-3, atol=5e-3), \
        f"out mismatch: {float(jnp.max(jnp.abs(out - ref_out)))}"
    assert jnp.allclose(out_conf, ref_conf, rtol=5e-3, atol=5e-3), \
        f"out_conf mismatch: {float(jnp.max(jnp.abs(out_conf - ref_conf)))}"

    print("KERNEL_OK")
</pallas_src>

<mosaic_0001>
module attributes {stable_mosaic.version = 11 : i64} {
  func.func @_fused_conf_attn_kernel(%arg0: i32, %arg1: memref<4x8x64xf32, #tpu.memory_space<vmem>>, %arg2: memref<4x8x64xf32, #tpu.memory_space<vmem>>, %arg3: memref<4x8x64xf32, #tpu.memory_space<vmem>>, %arg4: memref<4x8x32xf32, #tpu.memory_space<vmem>>, %arg5: memref<8x32xf32, #tpu.memory_space<vmem>>, %arg6: memref<4x1x32xf32, #tpu.memory_space<vmem>>, %arg7: memref<256x64xf32, #tpu.memory_space<vmem>>, %arg8: memref<4x64xf32, #tpu.memory_space<vmem>>, %arg9: memref<2x32xf32, #tpu.memory_space<vmem>>, %arg10: memref<2xf32, #tpu.memory_space<smem>>, %arg11: memref<4x8x64xf32, #tpu.memory_space<vmem>>, %arg12: memref<4x8x32xf32, #tpu.memory_space<vmem>>) attributes {dimension_semantics = [#tpu.dimension_semantics<parallel>], iteration_bounds = array<i64: 2>, scalar_prefetch = 0 : i64, scratch_operands = 0 : i64, tpu.core_type = #tpu.core_type<tc>, window_params = [{transform_indices = @transform_0, window_bounds = array<i64: 4, 8, 64>}, {transform_indices = @transform_1, window_bounds = array<i64: 4, 8, 64>}, {transform_indices = @transform_2, window_bounds = array<i64: 4, 8, 64>}, {transform_indices = @transform_3, window_bounds = array<i64: 4, 8, 32>}, {pipeline_mode = #tpu.pipeline_mode<synchronous>, transform_indices = @transform_4, window_bounds = array<i64: 8, 32>}, {transform_indices = @transform_5, window_bounds = array<i64: 4, 1, 32>}, {pipeline_mode = #tpu.pipeline_mode<synchronous>, transform_indices = @transform_6, window_bounds = array<i64: 256, 64>}, {pipeline_mode = #tpu.pipeline_mode<synchronous>, transform_indices = @transform_7, window_bounds = array<i64: 4, 64>}, {pipeline_mode = #tpu.pipeline_mode<synchronous>, transform_indices = @transform_8, window_bounds = array<i64: 2, 32>}, {transform_indices = @transform_9, window_bounds = array<i64: 2>}, {transform_indices = @transform_10, window_bounds = array<i64: 4, 8, 64>}, {transform_indices = @transform_11, window_bounds = array<i64: 4, 8, 32>}]} {
    %c0 = arith.constant 0 : index
    %c0_0 = arith.constant 0 : index
    %0 = vector.load %arg9[%c0, %c0_0] : memref<2x32xf32, #tpu.memory_space<vmem>>, vector<1x32xf32>
    %c0_1 = arith.constant 0 : index
    %c0_2 = arith.constant 0 : index
    %c0_3 = arith.constant 0 : index
    %1 = vector.load %arg4[%c0_1, %c0_2, %c0_3] : memref<4x8x32xf32, #tpu.memory_space<vmem>>, vector<4x8x32xf32>
    %2 = vector.shape_cast %0 : vector<1x32xf32> to vector<1x1x32xf32>
    %3 = vector.broadcast %2 : vector<1x1x32xf32> to vector<4x8x32xf32>
    %4 = arith.mulf %1, %3 : vector<4x8x32xf32>
    %cst = arith.constant dense<0.000000e+00> : vector<4x8xf32>
    %5 = vector.multi_reduction <add>, %4, %cst [2] : vector<4x8x32xf32> to vector<4x8xf32>
    %6 = vector.shape_cast %5 : vector<4x8xf32> to vector<4x8x1xf32>
    %c0_4 = arith.constant 0 : index
    %7 = memref.load %arg10[%c0_4] : memref<2xf32, #tpu.memory_space<smem>>
    %8 = vector.broadcast %7 : f32 to vector<4x8x1xf32>
    %9 = arith.addf %6, %8 : vector<4x8x1xf32>
    %cst_5 = arith.constant 0.000000e+00 : f32
    %10 = vector.broadcast %cst_5 : f32 to vector<4x8x1xf32>
    %11 = arith.subf %10, %9 : vector<4x8x1xf32>
    %12 = math.exp %11 : vector<4x8x1xf32>
    %cst_6 = arith.constant 1.000000e+00 : f32
    %13 = vector.broadcast %cst_6 : f32 to vector<4x8x1xf32>
    %14 = arith.addf %13, %12 : vector<4x8x1xf32>
    %cst_7 = arith.constant 1.000000e+00 : f32
    %15 = vector.broadcast %cst_7 : f32 to vector<4x8x1xf32>
    %16 = arith.divf %15, %14 : vector<4x8x1xf32>
    %c1 = arith.constant 1 : index
    %c0_8 = arith.constant 0 : index
    %17 = vector.load %arg9[%c1, %c0_8] : memref<2x32xf32, #tpu.memory_space<vmem>>, vector<1x32xf32>
    %c0_9 = arith.constant 0 : index
    %c0_10 = arith.constant 0 : index
    %18 = vector.load %arg5[%c0_9, %c0_10] : memref<8x32xf32, #tpu.memory_space<vmem>>, vector<8x32xf32>
    %19 = vector.broadcast %17 : vector<1x32xf32> to vector<8x32xf32>
    %20 = arith.mulf %18, %19 : vector<8x32xf32>
    %cst_11 = arith.constant dense<0.000000e+00> : vector<8xf32>
    %21 = vector.multi_reduction <add>, %20, %cst_11 [1] : vector<8x32xf32> to vector<8xf32>
    %22 = vector.shape_cast %21 : vector<8xf32> to vector<8x1xf32>
    %c1_12 = arith.constant 1 : index
    %23 = memref.load %arg10[%c1_12] : memref<2xf32, #tpu.memory_space<smem>>
    %24 = vector.broadcast %23 : f32 to vector<8x1xf32>
    %25 = arith.addf %22, %24 : vector<8x1xf32>
    %cst_13 = arith.constant 0.000000e+00 : f32
    %26 = vector.broadcast %cst_13 : f32 to vector<8x1xf32>
    %27 = arith.subf %26, %25 : vector<8x1xf32>
    %28 = math.exp %27 : vector<8x1xf32>
    %cst_14 = arith.constant 1.000000e+00 : f32
    %29 = vector.broadcast %cst_14 : f32 to vector<8x1xf32>
    %30 = arith.addf %29, %28 : vector<8x1xf32>
    %cst_15 = arith.constant 1.000000e+00 : f32
    %31 = vector.broadcast %cst_15 : f32 to vector<8x1xf32>
    %32 = arith.divf %31, %30 : vector<8x1xf32>
    %33 = vector.shape_cast %32 : vector<8x1xf32> to vector<1x8x1xf32>
    %34 = vector.broadcast %33 : vector<1x8x1xf32> to vector<4x8x1xf32>
    %35 = arith.mulf %16, %34 : vector<4x8x1xf32>
    %cst_16 = arith.constant 0.353553385 : f32
    %36 = vector.broadcast %cst_16 : f32 to vector<4x8x1xf32>
    %37 = arith.mulf %35, %36 : vector<4x8x1xf32>
    %38 = vector.shape_cast %37 : vector<4x8x1xf32> to vector<32x1xf32>
    %c0_17 = arith.constant 0 : index
    %c0_18 = arith.constant 0 : index
    %c0_19 = arith.constant 0 : index
    %39 = vector.load %arg1[%c0_17, %c0_18, %c0_19] : memref<4x8x64xf32, #tpu.memory_space<vmem>>, vector<4x8x64xf32>
    %40 = vector.shape_cast %39 : vector<4x8x64xf32> to vector<32x64xf32>
    %c0_20 = arith.constant 0 : index
    %c0_21 = arith.constant 0 : index
    %c0_22 = arith.constant 0 : index
    %41 = vector.load %arg2[%c0_20, %c0_21, %c0_22] : memref<4x8x64xf32, #tpu.memory_space<vmem>>, vector<4x8x64xf32>
    %42 = vector.shape_cast %41 : vector<4x8x64xf32> to vector<32x64xf32>
    %c0_23 = arith.constant 0 : index
    %c0_24 = arith.constant 0 : index
    %c0_25 = arith.constant 0 : index
    %43 = vector.load %arg3[%c0_23, %c0_24, %c0_25] : memref<4x8x64xf32, #tpu.memory_space<vmem>>, vector<4x8x64xf32>
    %44 = vector.shape_cast %43 : vector<4x8x64xf32> to vector<32x64xf32>
    %c0_26 = arith.constant 0 : index
    %c0_27 = arith.constant 0 : index
    %45 = vector.load %arg7[%c0_26, %c0_27] : memref<256x64xf32, #tpu.memory_space<vmem>>, vector<64x64xf32>
    %cst_28 = arith.constant dense<0.000000e+00> : vector<32x64xf32>
    %46 = tpu.matmul %40, %45, %cst_28 {dimension_numbers = #tpu.dot_dimension_numbers<[1], [0], [0], [1], [0, 0, 1, 1], [], []>, precision = #tpu.contract_precision<fp32>} : vector<32x64xf32>, vector<64x64xf32>, vector<32x64xf32> -> vector<32x64xf32>
    %c0_29 = arith.constant 0 : index
    %c0_30 = arith.constant 0 : index
    %47 = vector.load %arg8[%c0_29, %c0_30] : memref<4x64xf32, #tpu.memory_space<vmem>>, vector<1x64xf32>
    %48 = vector.broadcast %47 : vector<1x64xf32> to vector<32x64xf32>
    %49 = arith.addf %46, %48 : vector<32x64xf32>
    %c64 = arith.constant 64 : index
    %c0_31 = arith.constant 0 : index
    %50 = vector.load %arg7[%c64, %c0_31] : memref<256x64xf32, #tpu.memory_space<vmem>>, vector<64x64xf32>
    %cst_32 = arith.constant dense<0.000000e+00> : vector<32x64xf32>
    %51 = tpu.matmul %42, %50, %cst_32 {dimension_numbers = #tpu.dot_dimension_numbers<[1], [0], [0], [1], [0, 0, 1, 1], [], []>, precision = #tpu.contract_precision<fp32>} : vector<32x64xf32>, vector<64x64xf32>, vector<32x64xf32> -> vector<32x64xf32>
    %c1_33 = arith.constant 1 : index
    %c0_34 = arith.constant 0 : index
    %52 = vector.load %arg8[%c1_33, %c0_34] : memref<4x64xf32, #tpu.memory_space<vmem>>, vector<1x64xf32>
    %53 = vector.broadcast %52 : vector<1x64xf32> to vector<32x64xf32>
    %54 = arith.addf %51, %53 : vector<32x64xf32>
    %c128 = arith.constant 128 : index
    %c0_35 = arith.constant 0 : index
    %55 = vector.load %arg7[%c128, %c0_35] : memref<256x64xf32, #tpu.memory_space<vmem>>, vector<64x64xf32>
    %cst_36 = arith.constant dense<0.000000e+00> : vector<32x64xf32>
    %56 = tpu.matmul %44, %55, %cst_36 {dimension_numbers = #tpu.dot_dimension_numbers<[1], [0], [0], [1], [0, 0, 1, 1], [], []>, precision = #tpu.contract_precision<fp32>} : vector<32x64xf32>, vector<64x64xf32>, vector<32x64xf32> -> vector<32x64xf32>
    %c2 = arith.constant 2 : index
    %c0_37 = arith.constant 0 : index
    %57 = vector.load %arg8[%c2, %c0_37] : memref<4x64xf32, #tpu.memory_space<vmem>>, vector<1x64xf32>
    %58 = vector.broadcast %57 : vector<1x64xf32> to vector<32x64xf32>
    %59 = arith.addf %56, %58 : vector<32x64xf32>
    %60 = vector.broadcast %38 : vector<32x1xf32> to vector<32x64xf32>
    %61 = arith.mulf %54, %60 : vector<32x64xf32>
    %62 = vector.extract_strided_slice %49 {offsets = [0, 0], sizes = [32, 8], strides = [1, 1]} : vector<32x64xf32> to vector<32x8xf32>
    %63 = vector.shape_cast %62 : vector<32x8xf32> to vector<4x8x8xf32>
    %64 = vector.extract_strided_slice %61 {offsets = [0, 0], sizes = [32, 8], strides = [1, 1]} : vector<32x64xf32> to vector<32x8xf32>
    %65 = vector.shape_cast %64 : vector<32x8xf32> to vector<4x8x8xf32>
    %66 = vector.extract_strided_slice %59 {offsets = [0, 0], sizes = [32, 8], strides = [1, 1]} : vector<32x64xf32> to vector<32x8xf32>
    %67 = vector.shape_cast %66 : vector<32x8xf32> to vector<4x8x8xf32>
    "tpu.trace_start"() <{level = 10 : i32, message = "bqd,bkd->bqk"}> : () -> ()
    %cst_38 = arith.constant dense<0.000000e+00> : vector<4x8x8xf32>
    %68 = tpu.matmul %63, %65, %cst_38 {dimension_numbers = #tpu.dot_dimension_numbers<[2], [2], [1], [1], [0, 0, 0, 1, 1, 1], [0], [0]>, precision = #tpu.contract_precision<fp32>} : vector<4x8x8xf32>, vector<4x8x8xf32>, vector<4x8x8xf32> -> vector<4x8x8xf32>
    "tpu.trace_stop"() : () -> ()
    %cst_39 = arith.constant dense<0xFF800000> : vector<4x8xf32>
    %69 = vector.multi_reduction <maximumf>, %68, %cst_39 [2] : vector<4x8x8xf32> to vector<4x8xf32>
    %70 = vector.shape_cast %69 : vector<4x8xf32> to vector<4x8x1xf32>
    %71 = vector.broadcast %70 : vector<4x8x1xf32> to vector<4x8x8xf32>
    %72 = arith.subf %68, %71 : vector<4x8x8xf32>
    %73 = math.exp %72 : vector<4x8x8xf32>
    %cst_40 = arith.constant dense<0.000000e+00> : vector<4x8xf32>
    %74 = vector.multi_reduction <add>, %73, %cst_40 [2] : vector<4x8x8xf32> to vector<4x8xf32>
    %75 = vector.shape_cast %74 : vector<4x8xf32> to vector<4x8x1xf32>
    %76 = tpu.reciprocal %75 {approx = true} : vector<4x8x1xf32> -> vector<4x8x1xf32>
    %77 = vector.broadcast %76 : vector<4x8x1xf32> to vector<4x8x8xf32>
    %78 = arith.mulf %73, %77 : vector<4x8x8xf32>
    "tpu.trace_start"() <{level = 10 : i32, message = "bqk,bkd->bqd"}> : () -> ()
    %cst_41 = arith.constant dense<0.000000e+00> : vector<4x8x8xf32>
    %79 = tpu.matmul %78, %67, %cst_41 {dimension_numbers = #tpu.dot_dimension_numbers<[2], [1], [1], [2], [0, 0, 0, 1, 1, 2], [0], [0]>, precision = #tpu.contract_precision<fp32>} : vector<4x8x8xf32>, vector<4x8x8xf32>, vector<4x8x8xf32> -> vector<4x8x8xf32>
    "tpu.trace_stop"() : () -> ()
    %80 = vector.shape_cast %79 : vector<4x8x8xf32> to vector<32x8xf32>
    %81 = vector.extract_strided_slice %49 {offsets = [0, 8], sizes = [32, 8], strides = [1, 1]} : vector<32x64xf32> to vector<32x8xf32>
    %82 = vector.shape_cast %81 : vector<32x8xf32> to vector<4x8x8xf32>
    %83 = vector.extract_strided_slice %61 {offsets = [0, 8], sizes = [32, 8], strides = [1, 1]} : vector<32x64xf32> to vector<32x8xf32>
    %84 = vector.shape_cast %83 : vector<32x8xf32> to vector<4x8x8xf32>
    %85 = vector.extract_strided_slice %59 {offsets = [0, 8], sizes = [32, 8], strides = [1, 1]} : vector<32x64xf32> to vector<32x8xf32>
    %86 = vector.shape_cast %85 : vector<32x8xf32> to vector<4x8x8xf32>
    "tpu.trace_start"() <{level = 10 : i32, message = "bqd,bkd->bqk"}> : () -> ()
    %cst_42 = arith.constant dense<0.000000e+00> : vector<4x8x8xf32>
    %87 = tpu.matmul %82, %84, %cst_42 {dimension_numbers = #tpu.dot_dimension_numbers<[2], [2], [1], [1], [0, 0, 0, 1, 1, 1], [0], [0]>, precision = #tpu.contract_precision<fp32>} : vector<4x8x8xf32>, vector<4x8x8xf32>, vector<4x8x8xf32> -> vector<4x8x8xf32>
    "tpu.trace_stop"() : () -> ()
    %cst_43 = arith.constant dense<0xFF800000> : vector<4x8xf32>
    %88 = vector.multi_reduction <maximumf>, %87, %cst_43 [2] : vector<4x8x8xf32> to vector<4x8xf32>
    %89 = vector.shape_cast %88 : vector<4x8xf32> to vector<4x8x1xf32>
    %90 = vector.broadcast %89 : vector<4x8x1xf32> to vector<4x8x8xf32>
    %91 = arith.subf %87, %90 : vector<4x8x8xf32>
    %92 = math.exp %91 : vector<4x8x8xf32>
    %cst_44 = arith.constant dense<0.000000e+00> : vector<4x8xf32>
    %93 = vector.multi_reduction <add>, %92, %cst_44 [2] : vector<4x8x8xf32> to vector<4x8xf32>
    %94 = vector.shape_cast %93 : vector<4x8xf32> to vector<4x8x1xf32>
    %95 = tpu.reciprocal %94 {approx = true} : vector<4x8x1xf32> -> vector<4x8x1xf32>
    %96 = vector.broadcast %95 : vector<4x8x1xf32> to vector<4x8x8xf32>
    %97 = arith.mulf %92, %96 : vector<4x8x8xf32>
    "tpu.trace_start"() <{level = 10 : i32, message = "bqk,bkd->bqd"}> : () -> ()
    %cst_45 = arith.constant dense<0.000000e+00> : vector<4x8x8xf32>
    %98 = tpu.matmul %97, %86, %cst_45 {dimension_numbers = #tpu.dot_dimension_numbers<[2], [1], [1], [2], [0, 0, 0, 1, 1, 2], [0], [0]>, precision = #tpu.contract_precision<fp32>} : vector<4x8x8xf32>, vector<4x8x8xf32>, vector<4x8x8xf32> -> vector<4x8x8xf32>
    "tpu.trace_stop"() : () -> ()
    %99 = vector.shape_cast %98 : vector<4x8x8xf32> to vector<32x8xf32>
    %100 = vector.extract_strided_slice %49 {offsets = [0, 16], sizes = [32, 8], strides = [1, 1]} : vector<32x64xf32> to vector<32x8xf32>
    %101 = vector.shape_cast %100 : vector<32x8xf32> to vector<4x8x8xf32>
    %102 = vector.extract_strided_slice %61 {offsets = [0, 16], sizes = [32, 8], strides = [1, 1]} : vector<32x64xf32> to vector<32x8xf32>
    %103 = vector.shape_cast %102 : vector<32x8xf32> to vector<4x8x8xf32>
    %104 = vector.extract_strided_slice %59 {offsets = [0, 16], sizes = [32, 8], strides = [1, 1]} : vector<32x64xf32> to vector<32x8xf32>
    %105 = vector.shape_cast %104 : vector<32x8xf32> to vector<4x8x8xf32>
    "tpu.trace_start"() <{level = 10 : i32, message = "bqd,bkd->bqk"}> : () -> ()
    %cst_46 = arith.constant dense<0.000000e+00> : vector<4x8x8xf32>
    %106 = tpu.matmul %101, %103, %cst_46 {dimension_numbers = #tpu.dot_dimension_numbers<[2], [2], [1], [1], [0, 0, 0, 1, 1, 1], [0], [0]>, precision = #tpu.contract_precision<fp32>} : vector<4x8x8xf32>, vector<4x8x8xf32>, vector<4x8x8xf32> -> vector<4x8x8xf32>
    "tpu.trace_stop"() : () -> ()
    %cst_47 = arith.constant dense<0xFF800000> : vector<4x8xf32>
    %107 = vector.multi_reduction <maximumf>, %106, %cst_47 [2] : vector<4x8x8xf32> to vector<4x8xf32>
    %108 = vector.shape_cast %107 : vector<4x8xf32> to vector<4x8x1xf32>
    %109 = vector.broadcast %108 : vector<4x8x1xf32> to vector<4x8x8xf32>
    %110 = arith.subf %106, %109 : vector<4x8x8xf32>
    %111 = math.exp %110 : vector<4x8x8xf32>
    %cst_48 = arith.constant dense<0.000000e+00> : vector<4x8xf32>
    %112 = vector.multi_reduction <add>, %111, %cst_48 [2] : vector<4x8x8xf32> to vector<4x8xf32>
    %113 = vector.shape_cast %112 : vector<4x8xf32> to vector<4x8x1xf32>
    %114 = tpu.reciprocal %113 {approx = true} : vector<4x8x1xf32> -> vector<4x8x1xf32>
    %115 = vector.broadcast %114 : vector<4x8x1xf32> to vector<4x8x8xf32>
    %116 = arith.mulf %111, %115 : vector<4x8x8xf32>
    "tpu.trace_start"() <{level = 10 : i32, message = "bqk,bkd->bqd"}> : () -> ()
    %cst_49 = arith.constant dense<0.000000e+00> : vector<4x8x8xf32>
    %117 = tpu.matmul %116, %105, %cst_49 {dimension_numbers = #tpu.dot_dimension_numbers<[2], [1], [1], [2], [0, 0, 0, 1, 1, 2], [0], [0]>, precision = #tpu.contract_precision<fp32>} : vector<4x8x8xf32>, vector<4x8x8xf32>, vector<4x8x8xf32> -> vector<4x8x8xf32>
    "tpu.trace_stop"() : () -> ()
    %118 = vector.shape_cast %117 : vector<4x8x8xf32> to vector<32x8xf32>
    %119 = vector.extract_strided_slice %49 {offsets = [0, 24], sizes = [32, 8], strides = [1, 1]} : vector<32x64xf32> to vector<32x8xf32>
    %120 = vector.shape_cast %119 : vector<32x8xf32> to vector<4x8x8xf32>
    %121 = vector.extract_strided_slice %61 {offsets = [0, 24], sizes = [32, 8], strides = [1, 1]} : vector<32x64xf32> to vector<32x8xf32>
    %122 = vector.shape_cast %121 : vector<32x8xf32> to vector<4x8x8xf32>
    %123 = vector.extract_strided_slice %59 {offsets = [0, 24], sizes = [32, 8], strides = [1, 1]} : vector<32x64xf32> to vector<32x8xf32>
    %124 = vector.shape_cast %123 : vector<32x8xf32> to vector<4x8x8xf32>
    "tpu.trace_start"() <{level = 10 : i32, message = "bqd,bkd->bqk"}> : () -> ()
    %cst_50 = arith.constant dense<0.000000e+00> : vector<4x8x8xf32>
    %125 = tpu.matmul %120, %122, %cst_50 {dimension_numbers = #tpu.dot_dimension_numbers<[2], [2], [1], [1], [0, 0, 0, 1, 1, 1], [0], [0]>, precision = #tpu.contract_precision<fp32>} : vector<4x8x8xf32>, vector<4x8x8xf32>, vector<4x8x8xf32> -> vector<4x8x8xf32>
    "tpu.trace_stop"() : () -> ()
    %cst_51 = arith.constant dense<0xFF800000> : vector<4x8xf32>
    %126 = vector.multi_reduction <maximumf>, %125, %cst_51 [2] : vector<4x8x8xf32> to vector<4x8xf32>
    %127 = vector.shape_cast %126 : vector<4x8xf32> to vector<4x8x1xf32>
    %128 = vector.broadcast %127 : vector<4x8x1xf32> to vector<4x8x8xf32>
    %129 = arith.subf %125, %128 : vector<4x8x8xf32>
    %130 = math.exp %129 : vector<4x8x8xf32>
    %cst_52 = arith.constant dense<0.000000e+00> : vector<4x8xf32>
    %131 = vector.multi_reduction <add>, %130, %cst_52 [2] : vector<4x8x8xf32> to vector<4x8xf32>
    %132 = vector.shape_cast %131 : vector<4x8xf32> to vector<4x8x1xf32>
    %133 = tpu.reciprocal %132 {approx = true} : vector<4x8x1xf32> -> vector<4x8x1xf32>
    %134 = vector.broadcast %133 : vector<4x8x1xf32> to vector<4x8x8xf32>
    %135 = arith.mulf %130, %134 : vector<4x8x8xf32>
    "tpu.trace_start"() <{level = 10 : i32, message = "bqk,bkd->bqd"}> : () -> ()
    %cst_53 = arith.constant dense<0.000000e+00> : vector<4x8x8xf32>
    %136 = tpu.matmul %135, %124, %cst_53 {dimension_numbers = #tpu.dot_dimension_numbers<[2], [1], [1], [2], [0, 0, 0, 1, 1, 2], [0], [0]>, precision = #tpu.contract_precision<fp32>} : vector<4x8x8xf32>, vector<4x8x8xf32>, vector<4x8x8xf32> -> vector<4x8x8xf32>
    "tpu.trace_stop"() : () -> ()
    %137 = vector.shape_cast %136 : vector<4x8x8xf32> to vector<32x8xf32>
    %138 = vector.extract_strided_slice %49 {offsets = [0, 32], sizes = [32, 8], strides = [1, 1]} : vector<32x64xf32> to vector<32x8xf32>
    %139 = vector.shape_cast %138 : vector<32x8xf32> to vector<4x8x8xf32>
    %140 = vector.extract_strided_slice %61 {offsets = [0, 32], sizes = [32, 8], strides = [1, 1]} : vector<32x64xf32> to vector<32x8xf32>
    %141 = vector.shape_cast %140 : vector<32x8xf32> to vector<4x8x8xf32>
    %142 = vector.extract_strided_slice %59 {offsets = [0, 32], sizes = [32, 8], strides = [1, 1]} : vector<32x64xf32> to vector<32x8xf32>
    %143 = vector.shape_cast %142 : vector<32x8xf32> to vector<4x8x8xf32>
    "tpu.trace_start"() <{level = 10 : i32, message = "bqd,bkd->bqk"}> : () -> ()
    %cst_54 = arith.constant dense<0.000000e+00> : vector<4x8x8xf32>
    %144 = tpu.matmul %139, %141, %cst_54 {dimension_numbers = #tpu.dot_dimension_numbers<[2], [2], [1], [1], [0, 0, 0, 1, 1, 1], [0], [0]>, precision = #tpu.contract_precision<fp32>} : vector<4x8x8xf32>, vector<4x8x8xf32>, vector<4x8x8xf32> -> vector<4x8x8xf32>
    "tpu.trace_stop"() : () -> ()
    %cst_55 = arith.constant dense<0xFF800000> : vector<4x8xf32>
    %145 = vector.multi_reduction <maximumf>, %144, %cst_55 [2] : vector<4x8x8xf32> to vector<4x8xf32>
    %146 = vector.shape_cast %145 : vector<4x8xf32> to vector<4x8x1xf32>
    %147 = vector.broadcast %146 : vector<4x8x1xf32> to vector<4x8x8xf32>
    %148 = arith.subf %144, %147 : vector<4x8x8xf32>
    %149 = math.exp %148 : vector<4x8x8xf32>
    %cst_56 = arith.constant dense<0.000000e+00> : vector<4x8xf32>
    %150 = vector.multi_reduction <add>, %149, %cst_56 [2] : vector<4x8x8xf32> to vector<4x8xf32>
    %151 = vector.shape_cast %150 : vector<4x8xf32> to vector<4x8x1xf32>
    %152 = tpu.reciprocal %151 {approx = true} : vector<4x8x1xf32> -> vector<4x8x1xf32>
    %153 = vector.broadcast %152 : vector<4x8x1xf32> to vector<4x8x8xf32>
    %154 = arith.mulf %149, %153 : vector<4x8x8xf32>
    "tpu.trace_start"() <{level = 10 : i32, message = "bqk,bkd->bqd"}> : () -> ()
    %cst_57 = arith.constant dense<0.000000e+00> : vector<4x8x8xf32>
    %155 = tpu.matmul %154, %143, %cst_57 {dimension_numbers = #tpu.dot_dimension_numbers<[2], [1], [1], [2], [0, 0, 0, 1, 1, 2], [0], [0]>, precision = #tpu.contract_precision<fp32>} : vector<4x8x8xf32>, vector<4x8x8xf32>, vector<4x8x8xf32> -> vector<4x8x8xf32>
    "tpu.trace_stop"() : () -> ()
    %156 = vector.shape_cast %155 : vector<4x8x8xf32> to vector<32x8xf32>
    %157 = vector.extract_strided_slice %49 {offsets = [0, 40], sizes = [32, 8], strides = [1, 1]} : vector<32x64xf32> to vector<32x8xf32>
    %158 = vector.shape_cast %157 : vector<32x8xf32> to vector<4x8x8xf32>
    %159 = vector.extract_strided_slice %61 {offsets = [0, 40], sizes = [32, 8], strides = [1, 1]} : vector<32x64xf32> to vector<32x8xf32>
    %160 = vector.shape_cast %159 : vector<32x8xf32> to vector<4x8x8xf32>
    %161 = vector.extract_strided_slice %59 {offsets = [0, 40], sizes = [32, 8], strides = [1, 1]} : vector<32x64xf32> to vector<32x8xf32>
    %162 = vector.shape_cast %161 : vector<32x8xf32> to vector<4x8x8xf32>
    "tpu.trace_start"() <{level = 10 : i32, message = "bqd,bkd->bqk"}> : () -> ()
    %cst_58 = arith.constant dense<0.000000e+00> : vector<4x8x8xf32>
    %163 = tpu.matmul %158, %160, %cst_58 {dimension_numbers = #tpu.dot_dimension_numbers<[2], [2], [1], [1], [0, 0, 0, 1, 1, 1], [0], [0]>, precision = #tpu.contract_precision<fp32>} : vector<4x8x8xf32>, vector<4x8x8xf32>, vector<4x8x8xf32> -> vector<4x8x8xf32>
    "tpu.trace_stop"() : () -> ()
    %cst_59 = arith.constant dense<0xFF800000> : vector<4x8xf32>
    %164 = vector.multi_reduction <maximumf>, %163, %cst_59 [2] : vector<4x8x8xf32> to vector<4x8xf32>
    %165 = vector.shape_cast %164 : vector<4x8xf32> to vector<4x8x1xf32>
    %166 = vector.broadcast %165 : vector<4x8x1xf32> to vector<4x8x8xf32>
    %167 = arith.subf %163, %166 : vector<4x8x8xf32>
    %168 = math.exp %167 : vector<4x8x8xf32>
    %cst_60 = arith.constant dense<0.000000e+00> : vector<4x8xf32>
    %169 = vector.multi_reduction <add>, %168, %cst_60 [2] : vector<4x8x8xf32> to vector<4x8xf32>
    %170 = vector.shape_cast %169 : vector<4x8xf32> to vector<4x8x1xf32>
    %171 = tpu.reciprocal %170 {approx = true} : vector<4x8x1xf32> -> vector<4x8x1xf32>
    %172 = vector.broadcast %171 : vector<4x8x1xf32> to vector<4x8x8xf32>
    %173 = arith.mulf %168, %172 : vector<4x8x8xf32>
    "tpu.trace_start"() <{level = 10 : i32, message = "bqk,bkd->bqd"}> : () -> ()
    %cst_61 = arith.constant dense<0.000000e+00> : vector<4x8x8xf32>
    %174 = tpu.matmul %173, %162, %cst_61 {dimension_numbers = #tpu.dot_dimension_numbers<[2], [1], [1], [2], [0, 0, 0, 1, 1, 2], [0], [0]>, precision = #tpu.contract_precision<fp32>} : vector<4x8x8xf32>, vector<4x8x8xf32>, vector<4x8x8xf32> -> vector<4x8x8xf32>
    "tpu.trace_stop"() : () -> ()
    %175 = vector.shape_cast %174 : vector<4x8x8xf32> to vector<32x8xf32>
    %176 = vector.extract_strided_slice %49 {offsets = [0, 48], sizes = [32, 8], strides = [1, 1]} : vector<32x64xf32> to vector<32x8xf32>
    %177 = vector.shape_cast %176 : vector<32x8xf32> to vector<4x8x8xf32>
    %178 = vector.extract_strided_slice %61 {offsets = [0, 48], sizes = [32, 8], strides = [1, 1]} : vector<32x64xf32> to vector<32x8xf32>
    %179 = vector.shape_cast %178 : vector<32x8xf32> to vector<4x8x8xf32>
    %180 = vector.extract_strided_slice %59 {offsets = [0, 48], sizes = [32, 8], strides = [1, 1]} : vector<32x64xf32> to vector<32x8xf32>
    %181 = vector.shape_cast %180 : vector<32x8xf32> to vector<4x8x8xf32>
    "tpu.trace_start"() <{level = 10 : i32, message = "bqd,bkd->bqk"}> : () -> ()
    %cst_62 = arith.constant dense<0.000000e+00> : vector<4x8x8xf32>
    %182 = tpu.matmul %177, %179, %cst_62 {dimension_numbers = #tpu.dot_dimension_numbers<[2], [2], [1], [1], [0, 0, 0, 1, 1, 1], [0], [0]>, precision = #tpu.contract_precision<fp32>} : vector<4x8x8xf32>, vector<4x8x8xf32>, vector<4x8x8xf32> -> vector<4x8x8xf32>
    "tpu.trace_stop"() : () -> ()
    %cst_63 = arith.constant dense<0xFF800000> : vector<4x8xf32>
    %183 = vector.multi_reduction <maximumf>, %182, %cst_63 [2] : vector<4x8x8xf32> to vector<4x8xf32>
    %184 = vector.shape_cast %183 : vector<4x8xf32> to vector<4x8x1xf32>
    %185 = vector.broadcast %184 : vector<4x8x1xf32> to vector<4x8x8xf32>
    %186 = arith.subf %182, %185 : vector<4x8x8xf32>
    %187 = math.exp %186 : vector<4x8x8xf32>
    %cst_64 = arith.constant dense<0.000000e+00> : vector<4x8xf32>
    %188 = vector.multi_reduction <add>, %187, %cst_64 [2] : vector<4x8x8xf32> to vector<4x8xf32>
    %189 = vector.shape_cast %188 : vector<4x8xf32> to vector<4x8x1xf32>
    %190 = tpu.reciprocal %189 {approx = true} : vector<4x8x1xf32> -> vector<4x8x1xf32>
    %191 = vector.broadcast %190 : vector<4x8x1xf32> to vector<4x8x8xf32>
    %192 = arith.mulf %187, %191 : vector<4x8x8xf32>
    "tpu.trace_start"() <{level = 10 : i32, message = "bqk,bkd->bqd"}> : () -> ()
    %cst_65 = arith.constant dense<0.000000e+00> : vector<4x8x8xf32>
    %193 = tpu.matmul %192, %181, %cst_65 {dimension_numbers = #tpu.dot_dimension_numbers<[2], [1], [1], [2], [0, 0, 0, 1, 1, 2], [0], [0]>, precision = #tpu.contract_precision<fp32>} : vector<4x8x8xf32>, vector<4x8x8xf32>, vector<4x8x8xf32> -> vector<4x8x8xf32>
    "tpu.trace_stop"() : () -> ()
    %194 = vector.shape_cast %193 : vector<4x8x8xf32> to vector<32x8xf32>
    %195 = vector.extract_strided_slice %49 {offsets = [0, 56], sizes = [32, 8], strides = [1, 1]} : vector<32x64xf32> to vector<32x8xf32>
    %196 = vector.shape_cast %195 : vector<32x8xf32> to vector<4x8x8xf32>
    %197 = vector.extract_strided_slice %61 {offsets = [0, 56], sizes = [32, 8], strides = [1, 1]} : vector<32x64xf32> to vector<32x8xf32>
    %198 = vector.shape_cast %197 : vector<32x8xf32> to vector<4x8x8xf32>
    %199 = vector.extract_strided_slice %59 {offsets = [0, 56], sizes = [32, 8], strides = [1, 1]} : vector<32x64xf32> to vector<32x8xf32>
    %200 = vector.shape_cast %199 : vector<32x8xf32> to vector<4x8x8xf32>
    "tpu.trace_start"() <{level = 10 : i32, message = "bqd,bkd->bqk"}> : () -> ()
    %cst_66 = arith.constant dense<0.000000e+00> : vector<4x8x8xf32>
    %201 = tpu.matmul %196, %198, %cst_66 {dimension_numbers = #tpu.dot_dimension_numbers<[2], [2], [1], [1], [0, 0, 0, 1, 1, 1], [0], [0]>, precision = #tpu.contract_precision<fp32>} : vector<4x8x8xf32>, vector<4x8x8xf32>, vector<4x8x8xf32> -> vector<4x8x8xf32>
    "tpu.trace_stop"() : () -> ()
    %cst_67 = arith.constant dense<0xFF800000> : vector<4x8xf32>
    %202 = vector.multi_reduction <maximumf>, %201, %cst_67 [2] : vector<4x8x8xf32> to vector<4x8xf32>
    %203 = vector.shape_cast %202 : vector<4x8xf32> to vector<4x8x1xf32>
    %204 = vector.broadcast %203 : vector<4x8x1xf32> to vector<4x8x8xf32>
    %205 = arith.subf %201, %204 : vector<4x8x8xf32>
    %206 = math.exp %205 : vector<4x8x8xf32>
    %cst_68 = arith.constant dense<0.000000e+00> : vector<4x8xf32>
    %207 = vector.multi_reduction <add>, %206, %cst_68 [2] : vector<4x8x8xf32> to vector<4x8xf32>
    %208 = vector.shape_cast %207 : vector<4x8xf32> to vector<4x8x1xf32>
    %209 = tpu.reciprocal %208 {approx = true} : vector<4x8x1xf32> -> vector<4x8x1xf32>
    %210 = vector.broadcast %209 : vector<4x8x1xf32> to vector<4x8x8xf32>
    %211 = arith.mulf %206, %210 : vector<4x8x8xf32>
    "tpu.trace_start"() <{level = 10 : i32, message = "bqk,bkd->bqd"}> : () -> ()
    %cst_69 = arith.constant dense<0.000000e+00> : vector<4x8x8xf32>
    %212 = tpu.matmul %211, %200, %cst_69 {dimension_numbers = #tpu.dot_dimension_numbers<[2], [1], [1], [2], [0, 0, 0, 1, 1, 2], [0], [0]>, precision = #tpu.contract_precision<fp32>} : vector<4x8x8xf32>, vector<4x8x8xf32>, vector<4x8x8xf32> -> vector<4x8x8xf32>
    "tpu.trace_stop"() : () -> ()
    %213 = vector.shape_cast %212 : vector<4x8x8xf32> to vector<32x8xf32>
    %214 = tpu.concatenate %80, %99, %118, %137, %156, %175, %194, %213 in 1 : vector<32x8xf32>, vector<32x8xf32>, vector<32x8xf32>, vector<32x8xf32>, vector<32x8xf32>, vector<32x8xf32>, vector<32x8xf32>, vector<32x8xf32> -> vector<32x64xf32>
    %c192 = arith.constant 192 : index
    %c0_70 = arith.constant 0 : index
    %215 = vector.load %arg7[%c192, %c0_70] : memref<256x64xf32, #tpu.memory_space<vmem>>, vector<64x64xf32>
    %cst_71 = arith.constant dense<0.000000e+00> : vector<32x64xf32>
    %216 = tpu.matmul %214, %215, %cst_71 {dimension_numbers = #tpu.dot_dimension_numbers<[1], [0], [0], [1], [0, 0, 1, 1], [], []>, precision = #tpu.contract_precision<fp32>} : vector<32x64xf32>, vector<64x64xf32>, vector<32x64xf32> -> vector<32x64xf32>
    %c3 = arith.constant 3 : index
    %c0_72 = arith.constant 0 : index
    %217 = vector.load %arg8[%c3, %c0_72] : memref<4x64xf32, #tpu.memory_space<vmem>>, vector<1x64xf32>
    %218 = vector.broadcast %217 : vector<1x64xf32> to vector<32x64xf32>
    %219 = arith.addf %216, %218 : vector<32x64xf32>
    %220 = vector.shape_cast %219 : vector<32x64xf32> to vector<4x8x64xf32>
    %c0_73 = arith.constant 0 : index
    %c0_74 = arith.constant 0 : index
    %c0_75 = arith.constant 0 : index
    %221 = vector.load %arg11[%c0_73, %c0_74, %c0_75] : memref<4x8x64xf32, #tpu.memory_space<vmem>>, vector<4x8x64xf32>
    tpu.vector_store %arg11[%c0_73, %c0_74, %c0_75], %220 {strides = array<i32>} : memref<4x8x64xf32, #tpu.memory_space<vmem>>, vector<4x8x64xf32>,
    %c0_76 = arith.constant 0 : index
    %c0_77 = arith.constant 0 : index
    %c0_78 = arith.constant 0 : index
    %222 = vector.load %arg6[%c0_76, %c0_77, %c0_78] : memref<4x1x32xf32, #tpu.memory_space<vmem>>, vector<4x1x32xf32>
    %223 = vector.shape_cast %222 : vector<4x1x32xf32> to vector<4x1x32xf32>
    %224 = vector.broadcast %223 : vector<4x1x32xf32> to vector<4x8x32xf32>
    %c0_79 = arith.constant 0 : index
    %c0_80 = arith.constant 0 : index
    %c0_81 = arith.constant 0 : index
    %225 = vector.load %arg12[%c0_79, %c0_80, %c0_81] : memref<4x8x32xf32, #tpu.memory_space<vmem>>, vector<4x8x32xf32>
    tpu.vector_store %arg12[%c0_79, %c0_80, %c0_81], %224 {strides = array<i32>} : memref<4x8x32xf32, #tpu.memory_space<vmem>>, vector<4x8x32xf32>,
    return
  }
  func.func @transform_0(%arg0: i32) -> (i32, i32, i32) {
    %c0_i32 = arith.constant 0 : i32
    %c0_i32_0 = arith.constant 0 : i32
    %c0_i32_1 = arith.constant 0 : i32
    return %arg0, %c0_i32, %c0_i32_0 : i32, i32, i32
  }
  func.func @transform_1(%arg0: i32) -> (i32, i32, i32) {
    %c0_i32 = arith.constant 0 : i32
    %c0_i32_0 = arith.constant 0 : i32
    %c0_i32_1 = arith.constant 0 : i32
    return %arg0, %c0_i32, %c0_i32_0 : i32, i32, i32
  }
  func.func @transform_2(%arg0: i32) -> (i32, i32, i32) {
    %c0_i32 = arith.constant 0 : i32
    %c0_i32_0 = arith.constant 0 : i32
    %c0_i32_1 = arith.constant 0 : i32
    return %arg0, %c0_i32, %c0_i32_0 : i32, i32, i32
  }
  func.func @transform_3(%arg0: i32) -> (i32, i32, i32) {
    %c0_i32 = arith.constant 0 : i32
    %c0_i32_0 = arith.constant 0 : i32
    %c0_i32_1 = arith.constant 0 : i32
    return %arg0, %c0_i32, %c0_i32_0 : i32, i32, i32
  }
  func.func @transform_4(%arg0: i32) -> (i32, i32) {
    %c0_i32 = arith.constant 0 : i32
    %c0_i32_0 = arith.constant 0 : i32
    %c0_i32_1 = arith.constant 0 : i32
    return %c0_i32, %c0_i32_0 : i32, i32
  }
  func.func @transform_5(%arg0: i32) -> (i32, i32, i32) {
    %c0_i32 = arith.constant 0 : i32
    %c0_i32_0 = arith.constant 0 : i32
    %c0_i32_1 = arith.constant 0 : i32
    return %arg0, %c0_i32, %c0_i32_0 : i32, i32, i32
  }
  func.func @transform_6(%arg0: i32) -> (i32, i32) {
    %c0_i32 = arith.constant 0 : i32
    %c0_i32_0 = arith.constant 0 : i32
    %c0_i32_1 = arith.constant 0 : i32
    return %c0_i32, %c0_i32_0 : i32, i32
  }
  func.func @transform_7(%arg0: i32) -> (i32, i32) {
    %c0_i32 = arith.constant 0 : i32
    %c0_i32_0 = arith.constant 0 : i32
    %c0_i32_1 = arith.constant 0 : i32
    return %c0_i32, %c0_i32_0 : i32, i32
  }
  func.func @transform_8(%arg0: i32) -> (i32, i32) {
    %c0_i32 = arith.constant 0 : i32
    %c0_i32_0 = arith.constant 0 : i32
    %c0_i32_1 = arith.constant 0 : i32
    return %c0_i32, %c0_i32_0 : i32, i32
  }
  func.func @transform_9(%arg0: i32) -> i32 {
    %c0_i32 = arith.constant 0 : i32
    %c0_i32_0 = arith.constant 0 : i32
    return %c0_i32 : i32
  }
  func.func @transform_10(%arg0: i32) -> (i32, i32, i32) {
    %c0_i32 = arith.constant 0 : i32
    %c0_i32_0 = arith.constant 0 : i32
    %c0_i32_1 = arith.constant 0 : i32
    return %arg0, %c0_i32, %c0_i32_0 : i32, i32, i32
  }
  func.func @transform_11(%arg0: i32) -> (i32, i32, i32) {
    %c0_i32 = arith.constant 0 : i32
    %c0_i32_0 = arith.constant 0 : i32
    %c0_i32_1 = arith.constant 0 : i32
    return %arg0, %c0_i32, %c0_i32_0 : i32, i32, i32
  }
}

</mosaic_0001>

<bundles_post_ra>
// kernel: _forward_impl.1
= control target key start
LH: loop header
LB: loop body
LE: loop exit
PB: predicated region body
PF: predicated region fallthrough
CT: control target
= control target key end

     0   :  { %s41486_s0 = inlined_call_operand.vmem [shape: f32[8,8,64], index: 0, kind: input, shape index: {}]   ;;  %s41487_s1 = inlined_call_operand.vmem [shape: f32[8,8,64], index: 1, kind: input, shape index: {}]   ;;  %s41488_s2 = inlined_call_operand.vmem [shape: f32[8,8,64], index: 2, kind: input, shape index: {}]   ;;  %s41489_s3 = inlined_call_operand.vmem [shape: f32[8,8,32], index: 3, kind: input, shape index: {}]   ;;  %s41490_s4 = inlined_call_operand.vmem [shape: f32[8,32], index: 4, kind: input, shape index: {}, may-alias: {4,5}]   ;;  %s41491_s5 = inlined_call_operand.vmem [shape: f32[8,1,32], index: 5, kind: input, shape index: {}, may-alias: {4,5}]   ;;  %s41492_s6 = inlined_call_operand.vmem [shape: f32[256,64], index: 6, kind: input, shape index: {}]   ;;  %s41493_s7 = inlined_call_operand.vmem [shape: f32[4,64], index: 7, kind: input, shape index: {}]   ;;  %s41494_s8 = inlined_call_operand.vmem [shape: f32[2,32], index: 8, kind: input, shape index: {}]   ;;  %s41495_s9 = inlined_call_operand.vmem [shape: f32[2], index: 9, kind: input, shape index: {}]   ;;  %s41496_s10 = inlined_call_operand.hbm [shape: f32[8,8,64], index: 10, kind: output, shape index: {0}]   ;;  %s41497_s11 = inlined_call_operand.hbm [shape: f32[8,8,32], index: 11, kind: output, shape index: {1}]  }
   0x1   :  { %41501 = sst [smem:[#allocation11_spill]] %s41486_s0 }
   0x2   :  { %41502 = sst [smem:[#allocation12_spill]] %s41487_s1 }
   0x3   :  { %41503 = sst [smem:[#allocation13_spill]] %s41495_s9 }
   0x4   :  { %17 = vsyncpa [#allocation4], 0 }
   0x5   :  { %18 = vsyncpa [#allocation3], 0 }
   0x6   :  { %20 = vsyncpa [#allocation3 + $0x1], 0 }
   0x7   :  { %21 = vsyncpa [#allocation7], 0 }
   0x8   :  { %23 = vsyncpa [#allocation7 + $0x1], 0  ;;  %s38136_s17 = smov 0   ;;  %s38138_s18 = smov 0  }
   0x9   :  { %s38140_s19 = smov 0   ;;  %s38142_s20 = smov 0  }
   0xa LB: > { %s38157_s21 = sadd.s32 4294967295, %s38054_s20   ;;  %s33059_s22 = sadd.s32 4294967294, %s38054_s20   ;;  %s38054_s20 = sphi %s38142_s20, %s41516_s20   ;;  %s38050_s19 = sphi %s38140_s19, %s41515_s19   ;;  %s38046_s18 = sphi %s38138_s18, %s41514_s18   ;;  %s38042_s17 = sphi %s38136_s17, %s41513_s17  }
   0xb   : > { %s38161_s23 = sadd.s32 1, %s38054_s20   ;;  %s271_s24 = sadd.s32 1, %s38050_s19 }
   0xc   : > { %s268_s25 = ssub.s32 %s38054_s20, %s38161_s23  ;;  %p281_p0 = scmp.ne.s32.totalorder %s38050_s19, %s38046_s18 }
   0xd   : > { %p269_p1 = scmp.eq.s32.totalorder %s268_s25, 0  ;;  %p282_p2 = scmp.eq.s32.totalorder %s38157_s21, 1 }
   0xe   : > { %p287_p3 = scmp.ne.s32.totalorder %s38046_s18, %s38042_s17  ;;  %p288_p4 = scmp.eq.s32.totalorder %s33059_s22, 1 }
   0xf   : > { %s38172_s26 = scalar_select %p269_p1, %s38050_s19, %s271_s24  }
  0x10   : > { %p38174_p5 = por %p282_p2, %p281_p0  ;;  %p38178_p6 = por %p288_p4, %p287_p3 }
  0x11   : > { %p33060_p7 = scmp.ge.s32.totalorder %s38054_s20, 1  ;;  %p321_p8 = scmp.lt.s32.totalorder %s38054_s20, 3 }
  0x12   : > { %p37740_p9 = scmp.eq.s32.totalorder %s38157_s21, 0  ;;  %s41507_s9 = sld [smem:[#allocation13_spill]] }
  0x13   : > { %p38185_p10 = pnand %p33060_p7, %p321_p8 }
  0x15   : > { %p37729_p11 = pneg %p38185_p10 }
  0x17   : > { %p37730_p12 = pnand %p37740_p9, %p37729_p11 }
  0x18   : > { %s346_s13 = sshll.u32 %s41507_s9, 4  ;;  %s347_s13 = int_to_ptr.vmem [resolvable:$true] %s346_s13 }
  0x19   : > { %s37941_s14 = scalar_lea.vmem %s347_s13, 16  ;;  %p37943_p0 = pneg %p37730_p12 }
  0x1a   : > { %p37942_p13 = scmp.ne.s32.totalorder %s347_s13, %s37941_s14  ;;  %p37949_p3 = scmp.lt.s32.totalorder %s347_s13, %s347_s13 }
  0x1b   : > { %p37950_p4 = scmp.lt.s32.totalorder %s37941_s14, %s37941_s14 }
  0x1c   : > { %p37944_p1 = pnand %p37943_p0, %p37942_p13 }
  0x1d   : > { %p37951_p7 = por %p37950_p4, %p37949_p3 }
  0x1e   : > { %p37945_p2 = pneg %p37944_p1 }
  0x20   : > { %p37952_p8 = pnand %p37951_p7, %p37945_p2 }
  0x22   : > { %37955 = shalt.err (!%p37952_p8)
}
  0x23   : > { %s38056_s15 = smov [#allocation2]   ;;  %403 = sbr.rel (%p38185_p10) target bundleno = 6525 (0x197d), region = 60 }
  0x24   : > { %37732 = dma.vmem_to_smem (!%p37730_p12), %s347_s13, 16, %s38056_s15, [#allocation4]  }
  0x2a   : > { %38029 = dma.done.wait (%p37740_p9), [#allocation4], 16  }
  0x2b   : > { %38031 = vsyncadd (%p37740_p9), [#allocation4], 4294967280 }
  0x2c   : > { %409 = sfence }
  0x2d   : > { %v594_v0 = vld [vmem:[%s41492_s6] sm:$0xff]  ;;  %v595_v1 = vld [vmem:[%s41492_s6 + $0x8] sm:$0xff]  ;;  %v596_v2 = vld [vmem:[%s41492_s6 + $0x10] sm:$0xff]  ;;  %s33067_s29 = sshll.u32 %s38157_s21, 2  ;;  %vm607_vm0 = vcmask 523264   ;;  %s41508_s0 = sld [smem:[#allocation11_spill]] }
  0x2e   : > { %v621_v3 = vand.u32 4294901760, %v594_v0  ;;  %v624_v4 = vand.u32 4294901760, %v595_v1  ;;  %v597_v5 = vld [vmem:[%s41492_s6 + $0x18] sm:$0xff]  ;;  %v627_v6 = vand.u32 4294901760, %v596_v2  ;;  %v598_v7 = vld [vmem:[%s41492_s6 + $0x20] sm:$0xff]  ;;  %v599_v8 = vld [vmem:[%s41492_s6 + $0x28] sm:$0xff] }
  0x2f   : > { %v630_v9 = vand.u32 4294901760, %v597_v5  ;;  %v600_v10 = vld [vmem:[%s41492_s6 + $0x30] sm:$0xff]  ;;  %p469_p9 = scmp.lt.s32.totalorder %s33067_s29, 7  ;;  %v633_v12 = vand.u32 4294901760, %v598_v7  ;;  %v636_v13 = vand.u32 4294901760, %v599_v8  ;;  %v601_v14 = vld [vmem:[%s41492_s6 + $0x38] sm:$0xff] }
  0x30   : > { %v38224_v11 = vpack.c.bf16 %v624_v4, %v621_v3  ;;  %v38229_v15 = vsub.f32 %v594_v0, %v621_v3  ;;  %v38235_v17 = vsub.f32 %v595_v1, %v624_v4  ;;  %v38237_v18 = vsub.f32 %v596_v2, %v627_v6  ;;  %s41509_s1 = sld [smem:[#allocation12_spill]]  ;;  %s525_s22 = sld [smem:[#allocation2]] }
  0x31   : > { %v38231_v16 = vpack.c.bf16 %v630_v9, %v627_v6  ;;  %s41518_s29 = smov (!%p469_p9, %s33067_s29), 7  ;;  %v639_v19 = vand.u32 4294901760, %v600_v10  ;;  %v38242_v21 = vsub.f32 %v597_v5, %v630_v9  ;;  %v38244_v22 = vsub.f32 %v598_v7, %v633_v12  ;;  %s38060_s14 = smov 112  }
  0x32   : > { %36602 = vmatprep.subr.bf16.mxu1 %v38224_v11  ;;  %36650 = vmatprep.subr.bf16.mxu0 %v38224_v11  ;;  %v736_v20 = vand.u32 4294901760, %v38229_v15  ;;  %v642_v23 = vand.u32 4294901760, %v601_v14  ;;  %s38249_s9 = sshll.u32 %s41518_s29, 3  ;;  %v743_v24 = vand.u32 4294901760, %v38235_v17  ;;  %v750_v25 = vand.u32 4294901760, %v38237_v18  ;;  %s38063_s16 = smov 88  }
  0x33   : > { %36604 = vmatpush3.bf16.msra.mxu1 %v38224_v11  ;;  %36652 = vmatpush3.bf16.msra.mxu0 %v38224_v11  ;;  %v38253_v26 = vsub.f32 %v599_v8, %v636_v13  ;;  %v38257_v27 = vpack.c.bf16 %v636_v13, %v633_v12  ;;  %s472_s15 = scalar_lea.vmem %s41508_s0, %s38249_s9  ;;  %v757_v29 = vand.u32 4294901760, %v38242_v21  ;;  %v764_v33 = vand.u32 4294901760, %v38244_v22  ;;  %s38343_s12 = scalar_lea.vmem %s41489_s3, %s38249_s9 }
  0x34   : > { %36606 = vmatprep.subr.bf16.mxu1 %v38231_v16  ;;  %36654 = vmatprep.subr.bf16.mxu0 %v38231_v16  ;;  %v737_v28 = vsub.f32 %v38229_v15, %v736_v20  ;;  %v582_v30 = vld [vmem:[%s472_s15] sm:$0xff]  ;;  %v744_v31 = vsub.f32 %v38235_v17, %v743_v24  ;;  %v583_v32 = vld [vmem:[%s472_s15 + $0x8] sm:$0xff]  ;;  %v751_v36 = vsub.f32 %v38237_v18, %v750_v25  ;;  %v584_v42 = vld [vmem:[%s472_s15 + $0x10] sm:$0xff]  ;;  %vm512_vm1 = vcmask 261120   ;;  %s38733_s13 = scalar_lea.vmem %s41488_s2, %s38249_s9  ;;  %s38064_s0 = smov 80  }
  0x35   : > { %v609_v34 = vsel %vm607_vm0, %v582_v30, 0  ;;  %v612_v35 = vsel %vm607_vm0, %v583_v32, 0  ;;  %v758_v37 = vsub.f32 %v38242_v21, %v757_v29  ;;  %v38273_v38 = vpack.c.bf16 %v642_v23, %v639_v19  ;;  %v585_v50 = vld [vmem:[%s472_s15 + $0x18] sm:$0xff]  ;;  %s38061_s15 = smov 104   ;;  %s38069_s25 = smov 32  }
  0x36   : > { %v38275_v39 = vand.u32 4294901760, %v609_v34  ;;  %v38277_v40 = vand.u32 4294901760, %v612_v35  ;;  %v771_v41 = vand.u32 4294901760, %v38253_v26  ;;  %v738_v43 = vand.u32 4294901760, %v737_v28  ;;  %s38334_s24 = scalar_lea.vmem %s41509_s1, %s38249_s9  ;;  %s38065_s9 = smov 72  }
  0x37   : > { %36608 = vmatpush3.bf16.msra.mxu1 %v38231_v16  ;;  %36656 = vmatpush3.bf16.msra.mxu0 %v38231_v16  ;;  %v745_v44 = vand.u32 4294901760, %v744_v31  ;;  %v38282_v45 = vsub.f32 %v600_v10, %v639_v19  ;;  %v38284_v46 = vsub.f32 %v601_v14, %v642_v23  ;;  %v36665_v49 = vpack.c.bf16 %v743_v24, %v736_v20  ;;  %s38068_s1 = smov 24   ;;  %s38070_s30 = smov 40  }
  0x38   : > { %36610 = vmatprep.subr.bf16.mxu1 %v38257_v27  ;;  %36658 = vmatprep.subr.bf16.mxu0 %v38257_v27  ;;  %v38287_v47 = vsub.f32 %v609_v34, %v38275_v39  ;;  %v38290_v48 = vsub.f32 %v612_v35, %v38277_v40  ;;  %v752_v51 = vand.u32 4294901760, %v751_v36  ;;  %v759_v52 = vand.u32 4294901760, %v758_v37  ;;  %v586_v34 = vld [vmem:[%s38334_s24] sm:$0xff] }
  0x39   : > { %v765_v53 = vsub.f32 %v38244_v22, %v764_v33  ;;  %v615_v54 = vsel %vm607_vm0, %v584_v42, 0  ;;  %v772_v57 = vsub.f32 %v38253_v26, %v771_v41  ;;  %v36617_v59 = vpack.c.bf16 %v745_v44, %v738_v43  ;;  %v556_v42 = vld [vmem:[%s41490_s4] sm:$0xff]  ;;  %v502_v43 = vld [vmem:[%s38343_s12 + $0x10] sm:$0xff] }
  0x3a   : > { %v695_v55 = vand.u32 4294901760, %v38287_v47  ;;  %v705_v56 = vand.u32 4294901760, %v38290_v48  ;;  %v38301_v58 = vand.u32 4294901760, %v615_v54  ;;  %v778_v60 = vand.u32 4294901760, %v38282_v45 }
  0x3b   : > { %36612 = vmatpush3.bf16.msra.mxu1 %v38257_v27  ;;  %36660 = vmatpush3.bf16.msra.mxu0 %v38257_v27  ;;  %v785_v61 = vand.u32 4294901760, %v38284_v46  ;;  %v618_v62 = vsel %vm607_vm0, %v585_v50, 0  ;;  %v36621_v2 = vpack.c.bf16 %v759_v52, %v752_v51  ;;  %v36669_v3 = vpack.c.bf16 %v757_v29, %v750_v25 }
  0x3c   : > { %36614 = vmatprep.subr.bf16.mxu1 %v38273_v38  ;;  %36662 = vmatprep.subr.bf16.mxu0 %v38273_v38  ;;  %v696_v63 = vsub.f32 %v38287_v47, %v695_v55  ;;  %v706_v0 = vsub.f32 %v38290_v48, %v705_v56  ;;  %v38311_v1 = vsub.f32 %v615_v54, %v38301_v58  ;;  %v38313_v4 = vand.u32 4294901760, %v618_v62 }
  0x3d   : > { %34235 = vmatprep.mubr.f32.mxu0 %v695_v55  ;;  %v766_v7 = vand.u32 4294901760, %v765_v53  ;;  %v773_v9 = vand.u32 4294901760, %v772_v57  ;;  %v779_v10 = vsub.f32 %v38282_v45, %v778_v60  ;;  %v786_v12 = vsub.f32 %v38284_v46, %v785_v61 }
  0x3e   : > { %v697_v5 = vand.u32 4294901760, %v696_v63  ;;  %v707_v6 = vand.u32 4294901760, %v706_v0  ;;  %v715_v8 = vand.u32 4294901760, %v38311_v1  ;;  %v38321_v13 = vsub.f32 %v618_v62, %v38313_v4  ;;  %v503_v0 = vld [vmem:[%s38343_s12 + $0x18] sm:$0xff] }
  0x3f   : > { %36616 = vmatpush3.bf16.msra.mxu1 %v38273_v38  ;;  %36664 = vmatpush3.bf16.msra.mxu0 %v38273_v38  ;;  %v36673_v20 = vpack.c.bf16 %v771_v41, %v764_v33  ;;  %v36625_v24 = vpack.c.bf16 %v773_v9, %v766_v7  ;;  %v780_v25 = vand.u32 4294901760, %v779_v10  ;;  %v787_v28 = vand.u32 4294901760, %v786_v12  ;;  %v501_v41 = vld [vmem:[%s38343_s12 + $0x8] sm:$0xff]  ;;  %v1292_v10 = vld [vmem:[%s41492_s6 + $0x70] sm:$0xff]  ;;  %v1293_v12 = vld [vmem:[%s41492_s6 + $0x78] sm:$0xff] }
  0x40   : > { %36618 = vmatprep.subr.bf16.mxu1 %v36617_v59  ;;  %36666 = vmatprep.subr.bf16.mxu0 %v36665_v49  ;;  %v716_v14 = vsub.f32 %v38311_v1, %v715_v8  ;;  %v725_v19 = vand.u32 4294901760, %v38321_v13  ;;  %v36677_v32 = vpack.c.bf16 %v785_v61, %v778_v60  ;;  %v36633_v33 = vpack.c.bf16 %v38235_v17, %v38229_v15  ;;  %v38354_v15 = vld [vmem:[%s41494_s8] ss:$0 sm:$0xff]  ;;  %v588_v60 = vld [vmem:[%s38334_s24 + $0x10] sm:$0xff]  ;;  %v1291_v7 = vld [vmem:[%s41492_s6 + $0x68] sm:$0xff] }
  0x41   : > { %34169 = vmatprep.mubr.f32.mxu1 %v697_v5  ;;  %v36629_v31 = vpack.c.bf16 %v787_v28, %v780_v25  ;;  %v36637_v35 = vpack.c.bf16 %v38242_v21, %v38237_v18  ;;  %v1300_v36 = vsel %vm607_vm0, %v586_v34, 0  ;;  %v500_v17 = vld [vmem:[%s38343_s12] sm:$0xff]  ;;  %v36641_v18 = vpack.c.bf16 %v38253_v26, %v38244_v22  ;;  %v1287_v22 = vld [vmem:[%s41492_s6 + $0x48] sm:$0xff]  ;;  %s38062_s12 = smov 96  }
  0x42   : > { %34170 = vmatmul.mubr.f32.vlgmr.msra.gmra.mrb[0].mxu1 %v707_v6  ;;  %34236 = vmatmul.mubr.f32.vlgmr.msra.gmra.mrb[0].mxu0 %v705_v56  ;;  %v717_v23 = vand.u32 4294901760, %v716_v14  ;;  %v726_v29 = vsub.f32 %v38321_v13, %v725_v19  ;;  %v38358_v37 = vand.u32 4294901760, %v1300_v36  ;;  %v33077_v21 = vld [vmem:[%s41494_s8 + $0x1] ss:$0 sm:$0xff]  ;;  %v508_v26 = vmul.f32 %v38354_v15, %v500_v17  ;;  %v587_v56 = vld [vmem:[%s38334_s24 + $0x8] sm:$0xff]  ;;  %v589_v6 = vld [vmem:[%s38334_s24 + $0x18] sm:$0xff] }
  0x43   : > { %36620 = vmatpush3.bf16.msra.mxu1 %v36617_v59  ;;  %36668 = vmatpush3.bf16.msra.mxu0 %v36665_v49  ;;  %v509_v44 = vmul.f32 %v38354_v15, %v501_v41  ;;  %v1288_v49 = vld [vmem:[%s41492_s6 + $0x50] sm:$0xff]  ;;  %v561_v52 = vmul.f32 %v33077_v21, %v556_v42  ;;  %v510_v53 = vmul.f32 %v38354_v15, %v502_v43  ;;  %v1315_v55 = vand.u32 4294901760, %v1287_v22  ;;  %v1289_v59 = vld [vmem:[%s41492_s6 + $0x58] sm:$0xff]  ;;  %s33078_s24 = sld [smem:[#allocation2 + $0x1]] }
  0x44   : > { %36622 = vmatprep.subr.bf16.mxu1 %v36621_v2  ;;  %36670 = vmatprep.subr.bf16.mxu0 %v36669_v3  ;;  %v727_v30 = vand.u32 4294901760, %v726_v29  ;;  %v38388_v50 = vsub.f32 %v1300_v36, %v38358_v37  ;;  %v513_v51 = vsel %vm512_vm1, %v508_v26, 0.0  ;;  %v36645_v54 = vpack.c.bf16 %v38284_v46, %v38282_v45  ;;  %v1290_v45 = vld [vmem:[%s41492_s6 + $0x60] sm:$0xff] }
  0x45   : > { %34172 = vmatprep.mubr.f32.mxu1 %v717_v23  ;;  %34238 = vmatprep.mubr.f32.mxu0 %v715_v8  ;;  %v516_v57 = vsel %vm512_vm1, %v509_v44, 0.0  ;;  %v1318_v61 = vand.u32 4294901760, %v1288_v49  ;;  %v1303_v46 = vsel %vm607_vm0, %v587_v56, 0  ;;  %v519_v63 = vsel %vm512_vm1, %v510_v53, 0.0 }
  0x46   : > { %34239 = vmatmul.mubr.f32.gmra.mrb[2].mxu0 %v725_v19  ;;  %34173 = vmatmul.mubr.f32.gmra.mrb[2].mxu1 %v727_v30  ;;  %v1306_v5 = vsel %vm607_vm0, %v588_v60, 0  ;;  %v1324_v9 = vand.u32 4294901760, %v1290_v45  ;;  %v38432_v14 = vand.u32 4294901760, %v1303_v46  ;;  %v511_v19 = vmul.f32 %v38354_v15, %v503_v0 }
  0x47   : > { %36624 = vmatpush3.bf16.msra.mxu1 %v36621_v2  ;;  %36672 = vmatpush3.bf16.msra.mxu0 %v36669_v3  ;;  %v1321_v3 = vand.u32 4294901760, %v1289_v59  ;;  %v38424_v8 = vsub.f32 %v1288_v49, %v1318_v61  ;;  %v1309_v25 = vsel %vm607_vm0, %v589_v6, 0  ;;  %v1327_v29 = vand.u32 4294901760, %v1291_v7 }
  0x48   : > { %36626 = vmatprep.subr.bf16.mxu1 %v36625_v24  ;;  %36674 = vmatprep.subr.bf16.mxu0 %v36673_v20  ;;  %v38453_v34 = vsub.f32 %v1303_v46, %v38432_v14  ;;  %v38457_v36 = vand.u32 4294901760, %v1309_v25  ;;  %v522_v15 = vsel %vm512_vm1, %v511_v19, 0.0  ;;  %vm38058_vm2 = vmmov 0  }
  0x49   : > { %34257 = vmatprep.mubr.f32.mxu0 %v38275_v39  ;;  %34191 = vmatprep.mubr.f32.mxu1 %v38275_v39  ;;  %v38444_v28 = vpack.c.bf16 %v1321_v3, %v1318_v61  ;;  %v38465_v41 = vsub.f32 %v1291_v7, %v1327_v29  ;;  %vm2672_vm3 = vcmask 64512   ;;  %vm32117_vm4 = vcmask 130048  }
  0x4a   : > { %514 = vadd.xlane.f32.xlu0 %v513_v51  ;;  %517 = vadd.xlane.f32.xlu1 %v516_v57  ;;  %v1396_v43 = vand.u32 4294901760, %v38453_v34  ;;  %vm32122_vm5 = vcmask 195584   ;;  %vm32131_vm6 = vcmask 326656   ;;  %vm32136_vm7 = vcmask 392192  }
  0x4b   : > { %36628 = vmatpush3.bf16.msra.mxu1 %v36625_v24  ;;  %36676 = vmatpush3.bf16.msra.mxu0 %v36673_v20  ;;  %v38440_v24 = vand.u32 4294901760, %v1306_v5  ;;  %vm32141_vm8 = vcmask 457728  }
  0x4c   : > { %36630 = vmatprep.subr.bf16.mxu1 %v36629_v31  ;;  %36678 = vmatprep.subr.bf16.mxu0 %v36677_v32  ;;  %v1397_v53 = vsub.f32 %v38453_v34, %v1396_v43 }
  0x4e   : > { %520 = vadd.xlane.f32.xlu1 %v519_v63  ;;  %v1398_v46 = vand.u32 4294901760, %v1397_v53 }
  0x4f   : > { %36632 = vmatpush3.bf16.msra.mxu1 %v36629_v31  ;;  %36680 = vmatpush3.bf16.msra.mxu0 %v36677_v32  ;;  %v38447_v31 = vsub.f32 %v1289_v59, %v1321_v3  ;;  %v1333_v32 = vand.u32 4294901760, %v1293_v12 }
  0x50   : > { %36634 = vmatprep.subr.bf16.mxu1 %v36633_v33  ;;  %36682 = vmatprep.subr.bf16.mxu0 %v38224_v11 }
  0x51   : > { %v1448_v21 = vand.u32 4294901760, %v38447_v31 }
  0x52   : > { %34192 = vmatmul.mubr.f32.vlgmr.msra.gmra.mrb[0].mxu1 %v38277_v40  ;;  %34258 = vmatmul.mubr.f32.vlgmr.msra.gmra.mrb[0].mxu0 %v38277_v40 }
  0x53   : > { %36636 = vmatpush3.bf16.msra.mxu1 %v36633_v33  ;;  %36684 = vmatpush3.bf16.msra.mxu0 %v38224_v11  ;;  %v1286_v11 = vld [vmem:[%s41492_s6 + $0x40] sm:$0xff]  ;;  %v1441_v33 = vand.u32 4294901760, %v38424_v8  ;;  %v1449_v49 = vsub.f32 %v38447_v31, %v1448_v21 }
  0x54   : > { %36638 = vmatprep.subr.bf16.mxu1 %v36637_v35  ;;  %36686 = vmatprep.subr.bf16.mxu0 %v38231_v16 }
  0x55   : > { %34194 = vmatprep.mubr.f32.mxu1 %v38301_v58  ;;  %34260 = vmatprep.mubr.f32.mxu0 %v38301_v58  ;;  %v1450_v60 = vand.u32 4294901760, %v1449_v49 }
  0x56   : > { %34195 = vmatmul.mubr.f32.gmra.mrb[2].mxu1 %v38313_v4  ;;  %34261 = vmatmul.mubr.f32.gmra.mrb[2].mxu0 %v38313_v4 }
  0x57   : > { %36640 = vmatpush3.bf16.msra.mxu1 %v36637_v35  ;;  %36688 = vmatpush3.bf16.msra.mxu0 %v38231_v16  ;;  %v1312_v16 = vand.u32 4294901760, %v1286_v11  ;;  %v38455_v35 = vsub.f32 %v1290_v45, %v1324_v9 }
  0x58   : > { %36642 = vmatprep.subr.bf16.mxu1 %v36641_v18  ;;  %36690 = vmatprep.subr.bf16.mxu0 %v38257_v27 }
  0x59   : > { %34213 = vmatprep.mubr.f32.mxu1 %v38287_v47  ;;  %34279 = vmatprep.mubr.f32.mxu0 %v38275_v39  ;;  %v38403_v62 = vsub.f32 %v1286_v11, %v1312_v16  ;;  %v1386_v39 = vand.u32 4294901760, %v38388_v50  ;;  %v562_v47 = vsel %vm512_vm1, %v561_v52, 0.0  ;;  %v38415_v2 = vpack.c.bf16 %v1315_v55, %v1312_v16 }
  0x5a   : > { %563 = vadd.xlane.f32.xlu0 %v562_v47  ;;  %v38487_v11 = vsub.f32 %v1309_v25, %v38457_v36  ;;  %v1455_v26 = vand.u32 4294901760, %v38455_v35  ;;  %v38499_v52 = vsub.f32 %v1293_v12, %v1333_v32 }
  0x5b   : > { %36644 = vmatpush3.bf16.msra.mxu1 %v36641_v18  ;;  %36692 = vmatpush3.bf16.msra.mxu0 %v38257_v27  ;;  %v38417_v27 = vsub.f32 %v1287_v22, %v1315_v55  ;;  %v1387_v20 = vsub.f32 %v38388_v50, %v1386_v39  ;;  %v1427_v23 = vand.u32 4294901760, %v38403_v62  ;;  %v38472_v18 = vpack.c.bf16 %v1327_v29, %v1324_v9 }
  0x5c   : > { %36646 = vmatprep.subr.bf16.mxu1 %v36645_v54  ;;  %36694 = vmatprep.subr.bf16.mxu0 %v38273_v38  ;;  %v1456_v55 = vsub.f32 %v38455_v35, %v1455_v26  ;;  %v1476_v45 = vand.u32 4294901760, %v38499_v52  ;;  %v36733_v29 = vpack.c.bf16 %v38447_v31, %v38424_v8 }
  0x5d   : > { %v1434_v30 = vand.u32 4294901760, %v38417_v27  ;;  %v1388_v17 = vand.u32 4294901760, %v1387_v20  ;;  %v36729_v25 = vpack.c.bf16 %v38417_v27, %v38403_v62 }
  0x5e   : > { %523 = vadd.xlane.f32.xlu0 %v522_v15  ;;  %v1457_v63 = vand.u32 4294901760, %v1456_v55  ;;  %v1477_v7 = vsub.f32 %v38499_v52, %v1476_v45 }
  0x5f   : > { %36648 = vmatpush3.bf16.msra.mxu1 %v36645_v54  ;;  %36696 = vmatpush3.bf16.msra.mxu0 %v38273_v38  ;;  %v1330_v38 = vand.u32 4294901760, %v1292_v10  ;;  %v1416_v54 = vand.u32 4294901760, %v38487_v11  ;;  %v36761_v15 = vpack.c.bf16 %v1434_v30, %v1427_v23 }
  0x60   : > { %36698 = vmatprep.subr.bf16.mxu1 %v38415_v2  ;;  %v1478_v19 = vand.u32 4294901760, %v1477_v7 }
  0x61   : > { %v38480_v42 = vpack.c.bf16 %v1333_v32, %v1330_v38  ;;  %v38497_v51 = vsub.f32 %v1292_v10, %v1330_v38  ;;  %v1417_v47 = vsub.f32 %v38487_v11, %v1416_v54  ;;  %v36737_v38 = vpack.c.bf16 %v38465_v41, %v38455_v35 }
  0x62   : > { %34214 = vmatmul.mubr.f32.vlgmr.msra.gmra.mrb[0].mxu1 %v38290_v48  ;;  %34280 = vmatmul.mubr.f32.vlgmr.msra.gmra.mrb[0].mxu0 %v38277_v40  ;;  %v1428_v48 = vsub.f32 %v38403_v62, %v1427_v23  ;;  %v38468_v40 = vsub.f32 %v1306_v5, %v38440_v24 }
  0x63   : > { %36700 = vmatpush3.bf16.msra.mxu1 %v38415_v2  ;;  %34216 = vmatprep.mubr.f32.mxu1 %v38311_v1  ;;  %v1435_v1 = vsub.f32 %v38417_v27, %v1434_v30  ;;  %v1469_v61 = vand.u32 4294901760, %v38497_v51  ;;  %v1418_v9 = vand.u32 4294901760, %v1417_v47  ;;  %v36741_v32 = vpack.c.bf16 %v38499_v52, %v38497_v51 }
  0x64   : > { %36702 = vmatprep.subr.bf16.mxu1 %v38444_v28  ;;  %34282 = vmatprep.mubr.f32.mxu0 %v38301_v58  ;;  %v1442_v58 = vsub.f32 %v38424_v8, %v1441_v33  ;;  %v1429_v22 = vand.u32 4294901760, %v1428_v48  ;;  %v566_v8 = vstv %s33078_s24  ;;  %s38066_s24 = smov 8  }
  0x65   : > { %v1436_v44 = vand.u32 4294901760, %v1435_v1  ;;  %v1470_v6 = vsub.f32 %v38497_v51, %v1469_v61 }
  0x66   : > { %34217 = vmatmul.mubr.f32.gmra.mrb[2].mxu1 %v38321_v13  ;;  %34283 = vmatmul.mubr.f32.gmra.mrb[2].mxu0 %v38313_v4  ;;  %v1462_v13 = vand.u32 4294901760, %v38465_v41  ;;  %v1406_v4 = vand.u32 4294901760, %v38468_v40  ;;  %v1443_v16 = vand.u32 4294901760, %v1442_v58 }
  0x67   : > { %36704 = vmatpush3.bf16.msra.mxu1 %v38444_v28  ;;  %34301 = vmatprep.mubr.f32.mxu1 %v1388_v17  ;;  %v36713_v59 = vpack.c.bf16 %v1436_v44, %v1429_v22  ;;  %v1471_v12 = vand.u32 4294901760, %v1470_v6 }
  0x68   : > { %36706 = vmatprep.subr.bf16.mxu1 %v38472_v18  ;;  %v1463_v56 = vsub.f32 %v38465_v41, %v1462_v13  ;;  %v1407_v57 = vsub.f32 %v38468_v40, %v1406_v4  ;;  %v36717_v3 = vpack.c.bf16 %v1450_v60, %v1443_v16  ;;  %v36769_v62 = vpack.c.bf16 %v1462_v13, %v1455_v26 }
  0x69   : > { %v36725_v20 = vpack.c.bf16 %v1478_v19, %v1471_v12  ;;  %v38057_v13 = vmov 0.0  }
  0x6a   : > { %v1408_v0 = vand.u32 4294901760, %v1407_v57  ;;  %v1464_v5 = vand.u32 4294901760, %v1463_v56 }
  0x6b   : > { %36708 = vmatpush3.bf16.msra.mxu1 %v38472_v18 }
  0x6c   : > { %36710 = vmatprep.subr.bf16.mxu1 %v38480_v42  ;;  %v36721_v10 = vpack.c.bf16 %v1464_v5, %v1457_v63 }
  0x6f   : > { %36712 = vmatpush3.bf16.msra.mxu1 %v38480_v42 }
  0x70   : > { %36714 = vmatprep.subr.bf16.mxu1 %v36713_v59 }
  0x72   : > { %34302 = vmatmul.mubr.f32.vlgmr.msra.gmra.mrb[4].mxu1 %v1398_v46 }
  0x73   : > { %36716 = vmatpush3.bf16.msra.mxu1 %v36713_v59  ;;  %34304 = vmatprep.mubr.f32.mxu1 %v1408_v0 }
  0x74   : > { %36718 = vmatprep.subr.bf16.mxu1 %v36717_v3 }
  0x76   : > { %34305 = vmatmul.mubr.f32.gmra.mrb[6].mxu1 %v1418_v9 }
  0x77   : > { %36720 = vmatpush3.bf16.msra.mxu1 %v36717_v3  ;;  %34323 = vmatprep.mubr.f32.mxu1 %v38358_v37 }
  0x78   : > { %36722 = vmatprep.subr.bf16.mxu1 %v36721_v10 }
  0x7b   : > { %36724 = vmatpush3.bf16.msra.mxu1 %v36721_v10 }
  0x7c   : > { %36726 = vmatprep.subr.bf16.mxu1 %v36725_v20 }
  0x7f   : > { %36728 = vmatpush3.bf16.msra.mxu1 %v36725_v20 }
  0x80   : > { %36730 = vmatprep.subr.bf16.mxu1 %v36729_v25 }
  0x82   : > { %34324 = vmatmul.mubr.f32.vlgmr.msra.gmra.mrb[4].mxu1 %v38432_v14 }
  0x83   : > { %36732 = vmatpush3.bf16.msra.mxu1 %v36729_v25  ;;  %34326 = vmatprep.mubr.f32.mxu1 %v38440_v24 }
  0x84   : > { %36734 = vmatprep.subr.bf16.mxu1 %v36733_v29 }
  0x86   : > { %34327 = vmatmul.mubr.f32.gmra.mrb[6].mxu1 %v38457_v36 }
  0x87   : > { %36736 = vmatpush3.bf16.msra.mxu1 %v36733_v29  ;;  %34345 = vmatprep.mubr.f32.mxu1 %v38388_v50  ;;  %v36765_v50 = vpack.c.bf16 %v1448_v21, %v1441_v33 }
  0x88   : > { %36738 = vmatprep.subr.bf16.mxu1 %v36737_v38 }
  0x8b   : > { %36740 = vmatpush3.bf16.msra.mxu1 %v36737_v38  ;;  %v33080_v38 = vld [vmem:[%s41493_s7 + $0x1] ss:$0 sm:$0xff] }
  0x8c   : > { %36742 = vmatprep.subr.bf16.mxu1 %v36741_v32 }
  0x8f   : > { %36744 = vmatpush3.bf16.msra.mxu1 %v36741_v32 }
  0x90   : > { %36746 = vmatprep.subr.bf16.mxu1 %v38415_v2 }
  0x92   : > { %34346 = vmatmul.mubr.f32.vlgmr.msra.gmra.mrb[4].mxu1 %v38453_v34 }
  0x93   : > { %36748 = vmatpush3.bf16.msra.mxu1 %v38415_v2  ;;  %34348 = vmatprep.mubr.f32.mxu1 %v38468_v40 }
  0x94   : > { %36750 = vmatprep.subr.bf16.mxu1 %v38444_v28 }
  0x96   : > { %34349 = vmatmul.mubr.f32.gmra.mrb[6].mxu1 %v38487_v11 }
  0x97   : > { %36752 = vmatpush3.bf16.msra.mxu1 %v38444_v28  ;;  %34367 = vmatprep.mubr.f32.mxu1 %v1386_v39  ;;  %v36773_v39 = vpack.c.bf16 %v1476_v45, %v1469_v61 }
  0x98   : > { %36754 = vmatprep.subr.bf16.mxu1 %v38472_v18 }
  0x9b   : > { %36756 = vmatpush3.bf16.msra.mxu1 %v38472_v18 }
  0x9c   : > { %36758 = vmatprep.subr.bf16.mxu1 %v38480_v42 }
  0x9f   : > { %36760 = vmatpush3.bf16.msra.mxu1 %v38480_v42 }
  0xa0   : > { %36762 = vmatprep.subr.bf16.mxu1 %v36761_v15 }
  0xa2   : > { %34368 = vmatmul.mubr.f32.vlgmr.msra.gmra.mrb[4].mxu1 %v1396_v43 }
  0xa3   : > { %36764 = vmatpush3.bf16.msra.mxu1 %v36761_v15  ;;  %34370 = vmatprep.mubr.f32.mxu1 %v1406_v4  ;;  %v33079_v4 = vld [vmem:[%s41493_s7] ss:$0 sm:$0xff] }
  0xa4   : > { %36766 = vmatprep.subr.bf16.mxu1 %v36765_v50 }
  0xa6   : > { %34371 = vmatmul.mubr.f32.gmra.mrb[6].mxu1 %v1416_v54 }
  0xa7   : > { %36768 = vmatpush3.bf16.msra.mxu1 %v36765_v50  ;;  %34389 = vmatprep.mubr.f32.mxu1 %v38358_v37 }
  0xa8   : > { %36770 = vmatprep.subr.bf16.mxu1 %v36769_v62 }
  0xab   : > { %36772 = vmatpush3.bf16.msra.mxu1 %v36769_v62 }
  0xac   : > { %36774 = vmatprep.subr.bf16.mxu1 %v36773_v39 }
  0xaf   : > { %36776 = vmatpush3.bf16.msra.mxu1 %v36773_v39 }
  0xb0   : > { %36778 = vmatprep.subr.bf16.mxu1 %v38415_v2 }
  0xb2   : > { %34390 = vmatmul.mubr.f32.vlgmr.msra.gmra.mrb[4].mxu1 %v38432_v14 }
  0xb3   : > { %36780 = vmatpush3.bf16.msra.mxu1 %v38415_v2  ;;  %34392 = vmatprep.mubr.f32.mxu1 %v38440_v24 }
  0xb4   : > { %36782 = vmatprep.subr.bf16.mxu1 %v38444_v28 }
  0xb6   : > { %34393 = vmatmul.mubr.f32.gmra.mrb[6].mxu1 %v38457_v36 }
  0xb7   : > { %36784 = vmatpush3.bf16.msra.mxu1 %v38444_v28  ;;  %34411 = vmatprep.mubr.f32.mxu1 %v38358_v37  ;;  %v526_v37 = vstv %s525_s22  ;;  %s38067_s22 = smov 16  }
  0xb8   : > { %36786 = vmatprep.subr.bf16.mxu1 %v38472_v18 }
  0xbb   : > { %36788 = vmatpush3.bf16.msra.mxu1 %v38472_v18 }
  0xbc   : > { %36790 = vmatprep.subr.bf16.mxu1 %v38480_v42 }
  0xbf   : > { %36792 = vmatpush3.bf16.msra.mxu1 %v38480_v42 }
  0xc0   : > { %34549 = vmatprep.subr.mxu1 %v38057_v13 }
  0xc2   : > { %34412 = vmatmul.mubr.f32.vlgmr.msra.gmra.mrb[4].mxu1 %v38432_v14 }
  0xc3   : > { %34414 = vmatprep.mubr.f32.mxu1 %v38440_v24 }
  0xc6   : > { %34415 = vmatmul.mubr.f32.gmra.mrb[6].mxu1 %v38457_v36 }
  0xc7   : > { %34551 = vmatprep.mubr.msk.f32.mxu1 %vm38058_vm2, %v38057_v13 }
  0xd7   : > { %v515_v2 = vpop.xlane.xlu0 %514  ;;  %v518_v27 = vpop.xlane.xlu1 %517 }
  0xd8   : > { %v527_v63 = vadd.f32 %v526_v37, %v515_v2  ;;  %v528_v7 = vadd.f32 %v526_v37, %v518_v27 }
  0xda   : > { %v531_v0 = vsub.f32 0.0, %v527_v63  ;;  %v532_v9 = vsub.f32 0.0, %v528_v7 }
  0xdb   : > { %v521_v28 = vpop.xlane.xlu1 %520 }
  0xdc   : > { %v529_v31 = vadd.f32 %v526_v37, %v521_v28  ;;  %v535_v3 = vmul.f32 1.442695, %v531_v0  ;;  %v537_v10 = vmul.f32 1.442695, %v532_v9 }
  0xde   : > { %v533_v33 = vsub.f32 0.0, %v529_v31 }
  0xe0   : > { %v539_v35 = vmul.f32 1.442695, %v533_v33 }
  0xe2   : > { %37793 = vpow2.f32 %v539_v35 }
  0xe7   : > { %v564_v23 = vpop.xlane.xlu0 %563 }
  0xe8   : > { %v567_v30 = vadd.f32 %v566_v8, %v564_v23 }
  0xea   : > { %v568_v34 = vsub.f32 0.0, %v567_v30 }
  0xeb   : > { %v524_v17 = vpop.xlane.xlu0 %523 }
  0xec   : > { %v530_v48 = vadd.f32 %v526_v37, %v524_v17  ;;  %v569_v14 = vmul.f32 1.442695, %v568_v34  ;;  %v37794_v36 = vpop.eup %37793 }
  0xed   : > { %v545_v1 = vadd.f32 1.0, %v37794_v36 }
  0xee   : > { %v534_v41 = vsub.f32 0.0, %v530_v48  ;;  %37795 = vpow2.f32 %v569_v14 }
  0xf0   : > { %v541_v24 = vmul.f32 1.442695, %v534_v41 }
  0xf2   : > { %37797 = vpow2.f32 %v541_v24 }
  0xf3   : > { %37799 = vrcp.f32 %v545_v1 }
  0xf8   : > { %v37796_v40 = vpop.eup %37795 }
  0xf9   : > { %v571_v42 = vadd.f32 1.0, %v37796_v40 }
  0xfc   : > { %v37798_v18 = vpop.eup %37797 }
  0xfd   : > { %v546_v21 = vadd.f32 1.0, %v37798_v18  ;;  %v37800_v43 = vpop.eup %37799 }
  0xff   : > { %37801 = vrcp.f32 %v546_v21 }
 0x100   : > { %37803 = vrcp.f32 %v571_v42 }
 0x101   : > { %37805 = vpow2.f32 %v535_v3 }
 0x109   : > { %v37802_v58 = vpop.eup %37801 }
 0x10a   : > { %v38592_v11 = vpop.eup %37803 }
 0x10b   : > { %v577_v22 = vmul.f32 %v38592_v11, %v37802_v58  ;;  %v576_v26 = vmul.f32 %v38592_v11, %v37800_v43  ;;  %v37806_v5 = vpop.eup %37805 }
 0x10c   : > { %v543_v6 = vadd.f32 1.0, %v37806_v5 }
 0x10d   : > { %v581_v37 = vmul.f32 0.35355338, %v577_v22  ;;  %v580_v30 = vmul.f32 0.35355338, %v576_v26 }
 0x10e   : > { %37807 = vrcp.f32 %v543_v6 }
 0x10f   : > { %37809 = vpow2.f32 %v537_v10 }
 0x118   : > { %v37808_v20 = vpop.eup %37807 }
 0x119   : > { %v574_v25 = vmul.f32 %v37808_v20, %v38592_v11  ;;  %v37810_v2 = vpop.eup %37809 }
 0x11a   : > { %v544_v35 = vadd.f32 1.0, %v37810_v2  ;;  %v1977_v2 = vld [vmem:[%s41492_s6 + $0x80] sm:$0xff] }
 0x11b   : > { %v578_v50 = vmul.f32 0.35355338, %v574_v25 }
 0x11c   : > { %37811 = vrcp.f32 %v544_v35 }
 0x126   : > { %v37812_v1 = vpop.eup %37811 }
 0x127   : > { %v575_v21 = vmul.f32 %v37812_v1, %v38592_v11 }
 0x129   : > { %v579_v42 = vmul.f32 0.35355338, %v575_v21 }
 0x135   : > { %v34215_v44 = vpop.f32.mrb[0].mxu1  ;;  %v34281_v49 = vpop.f32.mrb[0].mxu0 }
 0x136   : > { %v36985_v51 = vadd.f32 %v34215_v44, %v33079_v4  ;;  %v946_v52 = vpop.f32.mrb[1].mxu1  ;;  %v1264_v53 = vpop.f32.mrb[1].mxu0 }
 0x137   : > { %v36987_v54 = vadd.f32 %v33079_v4, %v946_v52 }
 0x138   : > { %v38602_v16 = vadd.f32 %v36985_v51, %v34281_v49 }
 0x139   : > { %v38604_v55 = vadd.f32 %v36987_v54, %v1264_v53  ;;  %v34218_v56 = vpop.f32.mrb[2].mxu1  ;;  %v34284_v57 = vpop.f32.mrb[2].mxu0 }
 0x13a   : > { %v36989_v59 = vadd.f32 %v34218_v56, %v33079_v4  ;;  %v960_v60 = vpop.f32.mrb[3].mxu1  ;;  %v1276_v61 = vpop.f32.mrb[3].mxu0  ;;  %v3126_v22 = vsel %vm2672_vm3, %v38602_v16, 0 }
 0x13b   : > { %v36991_v45 = vadd.f32 %v33079_v4, %v960_v60  ;;  %v2674_v12 = vsel %vm2672_vm3, %v38604_v55, 0  ;;  %v3197_v11 = vand.u32 4294901760, %v3126_v22 }
 0x13c   : > { %v38606_v46 = vadd.f32 %v36989_v59, %v34284_v57  ;;  %v38612_v19 = vand.u32 4294901760, %v2674_v12 }
 0x13d   : > { %v38608_v47 = vadd.f32 %v36991_v45, %v1276_v61  ;;  %v3198_v44 = vsub.f32 %v3126_v22, %v3197_v11 }
 0x13e   : > { %v2746_v29 = vsub.f32 %v2674_v12, %v38612_v19  ;;  %v4030_v12 = vsel %vm2672_vm3, %v38606_v46, 0 }
 0x13f   : > { %v3199_v51 = vand.u32 4294901760, %v3198_v44  ;;  %v3578_v59 = vsel %vm2672_vm3, %v38608_v47, 0  ;;  %v38695_v20 = vand.u32 4294901760, %v4030_v12 }
 0x140   : > { %v2747_v39 = vand.u32 4294901760, %v2746_v29  ;;  %v38672_v61 = vand.u32 4294901760, %v3578_v59 }
 0x141   : > { %v3200_v53 = vsub.f32 %v3198_v44, %v3199_v51 }
 0x142   : > { %v2748_v34 = vsub.f32 %v2746_v29, %v2747_v39  ;;  %v3650_v63 = vsub.f32 %v3578_v59, %v38672_v61 }
 0x143   : > { %v3201_v56 = vand.u32 4294901760, %v3200_v53 }
 0x144   : > { %v2749_v24 = vand.u32 4294901760, %v2748_v34  ;;  %v3651_v3 = vand.u32 4294901760, %v3650_v63  ;;  %v1982_v34 = vld [vmem:[%s41492_s6 + $0xa8] sm:$0xff] }
 0x146   : > { %v3652_v6 = vsub.f32 %v3650_v63, %v3651_v3 }
 0x148   : > { %v3653_v9 = vand.u32 4294901760, %v3652_v6 }
 0x195   : > { %v34413_v32 = vpop.f32.mrb[4].mxu1 }
 0x196   : > { %v1955_v15 = vpop.f32.mrb[5].mxu1  ;;  %v36993_v43 = vadd.f32 %v34413_v32, %v33080_v38 }
 0x197   : > { %v36994_v62 = vadd.f32 %v33080_v38, %v1955_v15 }
 0x198   : > { %v38639_v58 = vmul.f32 %v36993_v43, %v579_v42  ;;  %v591_v43 = vld [vmem:[%s38733_s13 + $0x8] sm:$0xff] }
 0x199   : > { %v38619_v27 = vmul.f32 %v36994_v62, %v578_v50  ;;  %v34416_v8 = vpop.f32.mrb[6].mxu1 }
 0x19a   : > { %v36995_v23 = vadd.f32 %v34416_v8, %v33080_v38  ;;  %v1967_v28 = vpop.f32.mrb[7].mxu1  ;;  %v3129_v26 = vsel %vm2672_vm3, %v38639_v58, 0  ;;  %v1978_v8 = vld [vmem:[%s41492_s6 + $0x88] sm:$0xff] }
 0x19b   : > { %v36996_v31 = vadd.f32 %v33080_v38, %v1967_v28  ;;  %v2677_v33 = vsel %vm2672_vm3, %v38619_v27, 0  ;;  %v3132_v4 = vand.u32 4294901760, %v3129_v26  ;;  %v2006_v28 = vand.u32 4294901760, %v1978_v8 }
 0x19c   : > { %v38623_v17 = vmul.f32 %v36995_v23, %v581_v37  ;;  %v2680_v48 = vand.u32 4294901760, %v2677_v33  ;;  %v1979_v37 = vld [vmem:[%s41492_s6 + $0x90] sm:$0xff]  ;;  %v2003_v23 = vand.u32 4294901760, %v1977_v2 }
 0x19d   : > { %v38625_v14 = vmul.f32 %v36996_v31, %v580_v30  ;;  %v3209_v49 = vsub.f32 %v3129_v26, %v3132_v4  ;;  %v1980_v30 = vld [vmem:[%s41492_s6 + $0x98] sm:$0xff]  ;;  %v2009_v31 = vand.u32 4294901760, %v1979_v37 }
 0x19e   : > { %34550 = vmatpush3.xpose.msra.mxu1 %v2680_v48  ;;  %v2757_v41 = vsub.f32 %v2677_v33, %v2680_v48  ;;  %v1981_v33 = vld [vmem:[%s41492_s6 + $0xa0] sm:$0xff]  ;;  %v2012_v35 = vand.u32 4294901760, %v1980_v30  ;;  %v38752_v1 = vpack.c.bf16 %v2006_v28, %v2003_v23 }
 0x19f   : > { %34554 = vmatprep.subr.mxu1 %v38057_v13  ;;  %v3210_v52 = vand.u32 4294901760, %v3209_v49  ;;  %v3581_v60 = vsel %vm2672_vm3, %v38625_v14, 0 }
 0x1a0   : > { %v2758_v36 = vand.u32 4294901760, %v2757_v41  ;;  %v3584_v45 = vand.u32 4294901760, %v3581_v60  ;;  %v38759_v22 = vpack.c.bf16 %v2012_v35, %v2009_v31  ;;  %36794 = vmatprep.subr.bf16.mxu0 %v38752_v1 }
 0x1a1   : > { %34552 = vmatmul.mubr.f32.vlgmr.msra.gmra.mrb[8].mxu1 %v2749_v24  ;;  %v3211_v54 = vsub.f32 %v3209_v49, %v3210_v52  ;;  %v1983_v24 = vld [vmem:[%s41492_s6 + $0xb0] sm:$0xff]  ;;  %36796 = vmatpush3.bf16.msra.mxu0 %v38752_v1 }
 0x1a2   : > { %v2759_v40 = vsub.f32 %v2757_v41, %v2758_v36  ;;  %34556 = vmatprep.mubr.msk.f32.mxu1 %vm38058_vm2, %v38057_v13  ;;  %v3661_v0 = vsub.f32 %v3581_v60, %v3584_v45  ;;  %v2021_v21 = vand.u32 4294901760, %v1983_v24  ;;  %36798 = vmatprep.subr.bf16.mxu0 %v38759_v22 }
 0x1a3   : > { %v3212_v57 = vand.u32 4294901760, %v3211_v54 }
 0x1a4   : > { %v2760_v18 = vand.u32 4294901760, %v2759_v40  ;;  %v3662_v5 = vand.u32 4294901760, %v3661_v0  ;;  %v590_v40 = vld [vmem:[%s38733_s13] sm:$0xff] }
 0x1a5   : > { %v1991_v42 = vsel %vm607_vm0, %v590_v40, 0  ;;  %36800 = vmatpush3.bf16.msra.mxu0 %v38759_v22 }
 0x1a6   : > { %34555 = vmatpush3.xpose.msra.mxu1 %v2760_v18  ;;  %v3663_v7 = vsub.f32 %v3661_v0, %v3662_v5 }
 0x1a7   : > { %34559 = vmatprep.subr.mxu1 %v38057_v13 }
 0x1a8   : > { %v3664_v10 = vand.u32 4294901760, %v3663_v7 }
 0x1a9   : > { %34557 = vmatmul.mubr.f32.vlgmr.msra.gmra.mrb[8].mxu1 %v38612_v19 }
 0x1aa   : > { %34560 = vmatpush3.xpose.msra.mxu1 %v2757_v41  ;;  %34561 = vmatprep.mubr.msk.f32.mxu1 %vm38058_vm2, %v38057_v13  ;;  %v2018_v41 = vand.u32 4294901760, %v1982_v34 }
 0x1ab   : > { %34564 = vmatprep.subr.mxu1 %v38057_v13 }
 0x1b1   : > { %34562 = vmatmul.mubr.f32.vlgmr.msra.gmra.mrb[8].mxu1 %v2746_v29  ;;  %v38702_v29 = vsub.f32 %v4030_v12, %v38695_v20 }
 0x1b2   : > { %34565 = vmatpush3.xpose.msra.mxu1 %v2680_v48  ;;  %34566 = vmatprep.mubr.msk.f32.mxu1 %vm38058_vm2, %v38057_v13 }
 0x1b3   : > { %34569 = vmatprep.subr.mxu1 %v38057_v13  ;;  %v4103_v32 = vand.u32 4294901760, %v38702_v29 }
 0x1b5   : > { %v4104_v50 = vsub.f32 %v38702_v29, %v4103_v32 }
 0x1b9   : > { %34567 = vmatmul.mubr.f32.vlgmr.msra.gmra.mrb[8].mxu1 %v2747_v39  ;;  %v4105_v39 = vand.u32 4294901760, %v4104_v50 }
 0x1ba   : > { %34570 = vmatpush3.xpose.msra.mxu1 %v2758_v36  ;;  %34571 = vmatprep.mubr.msk.f32.mxu1 %vm38058_vm2, %v38057_v13  ;;  %v1984_v36 = vld [vmem:[%s41492_s6 + $0xb8] sm:$0xff] }
 0x1bb   : > { %34574 = vmatprep.subr.mxu1 %v38057_v13  ;;  %v2024_v26 = vand.u32 4294901760, %v1984_v36 }
 0x1c1   : > { %34572 = vmatmul.mubr.f32.vlgmr.msra.gmra.mrb[8].mxu1 %v38612_v19 }
 0x1c2   : > { %34575 = vmatpush3.xpose.msra.mxu1 %v2680_v48  ;;  %34576 = vmatprep.mubr.msk.f32.mxu1 %vm38058_vm2, %v38057_v13  ;;  %v2015_v48 = vand.u32 4294901760, %v1981_v33 }
 0x1c3   : > { %34579 = vmatprep.subr.mxu1 %v38057_v13 }
 0x1c9   : > { %34577 = vmatmul.mubr.f32.vlgmr.msra.gmra.mrb[8].mxu1 %v38612_v19  ;;  %v4033_v19 = vsel %vm2672_vm3, %v38623_v17, 0 }
 0x1ca   : > { %34580 = vmatpush3.xpose.msra.mxu1 %v3132_v4  ;;  %34581 = vmatprep.mubr.msk.f32.mxu1 %vm38058_vm2, %v38057_v13  ;;  %v38697_v25 = vand.u32 4294901760, %v4033_v19 }
 0x1cb   : > { %34584 = vmatprep.subr.mxu1 %v38057_v13 }
 0x1cc   : > { %v38706_v38 = vsub.f32 %v4033_v19, %v38697_v25 }
 0x1cd   : > { %34582 = vmatmul.mubr.f32.vlgmr.msra.gmra.mrb[10].mxu1 %v3201_v56 }
 0x1ce   : > { %34585 = vmatpush3.xpose.msra.mxu1 %v3212_v57  ;;  %34586 = vmatprep.mubr.msk.f32.mxu1 %vm38058_vm2, %v38057_v13  ;;  %v4114_v15 = vand.u32 4294901760, %v38706_v38  ;;  %v38781_v57 = vsub.f32 %v1980_v30, %v2012_v35 }
 0x1cf   : > { %34589 = vmatprep.subr.mxu1 %v38057_v13 }
 0x1d0   : > { %v4115_v62 = vsub.f32 %v38706_v38, %v4114_v15 }
 0x1d2   : > { %v4116_v18 = vand.u32 4294901760, %v4115_v62  ;;  %v38816_v62 = vpack.c.bf16 %v2024_v26, %v2021_v21 }
 0x1d5   : > { %34587 = vmatmul.mubr.f32.vlgmr.msra.gmra.mrb[10].mxu1 %v3197_v11 }
 0x1d6   : > { %34590 = vmatpush3.xpose.msra.mxu1 %v3209_v49  ;;  %34591 = vmatprep.mubr.msk.f32.mxu1 %vm38058_vm2, %v38057_v13  ;;  %v38769_v49 = vsub.f32 %v1978_v8, %v2006_v28  ;;  %v593_v28 = vld [vmem:[%s38733_s13 + $0x18] sm:$0xff] }
 0x1d7   : > { %34594 = vmatprep.subr.mxu1 %v38057_v13 }
 0x1d8   : > { %v2125_v59 = vand.u32 4294901760, %v38769_v49 }
 0x1da   : > { %v2126_v6 = vsub.f32 %v38769_v49, %v2125_v59 }
 0x1dd   : > { %34592 = vmatmul.mubr.f32.vlgmr.msra.gmra.mrb[10].mxu1 %v3198_v44  ;;  %v38767_v44 = vpack.c.bf16 %v2018_v41, %v2015_v48 }
 0x1de   : > { %34595 = vmatpush3.xpose.msra.mxu1 %v3132_v4  ;;  %34596 = vmatprep.mubr.msk.f32.mxu1 %vm38058_vm2, %v38057_v13 }
 0x1df   : > { %34599 = vmatprep.subr.mxu1 %v38057_v13  ;;  %36802 = vmatprep.subr.bf16.mxu0 %v38767_v44 }
 0x1e0   : > { %36804 = vmatpush3.bf16.msra.mxu0 %v38767_v44 }
 0x1e1   : > { %36806 = vmatprep.subr.bf16.mxu0 %v38816_v62 }
 0x1e4   : > { %36808 = vmatpush3.bf16.msra.mxu0 %v38816_v62 }
 0x1e5   : > { %34597 = vmatmul.mubr.f32.vlgmr.msra.gmra.mrb[10].mxu1 %v3199_v51  ;;  %v1994_v51 = vsel %vm607_vm0, %v591_v43, 0  ;;  %v2000_v43 = vsel %vm607_vm0, %v593_v28, 0 }
 0x1e6   : > { %34600 = vmatpush3.xpose.msra.mxu1 %v3210_v52  ;;  %34601 = vmatprep.mubr.msk.f32.mxu1 %vm38058_vm2, %v38057_v13  ;;  %v38772_v52 = vsub.f32 %v1979_v37, %v2009_v31  ;;  %v38779_v56 = vand.u32 4294901760, %v1994_v51 }
 0x1e7   : > { %34604 = vmatprep.subr.mxu1 %v38057_v13 }
 0x1e8   : > { %v2132_v60 = vand.u32 4294901760, %v38772_v52 }
 0x1ea   : > { %v2133_v19 = vsub.f32 %v38772_v52, %v2132_v60 }
 0x1ed   : > { %34602 = vmatmul.mubr.f32.vlgmr.msra.gmra.mrb[10].mxu1 %v3197_v11 }
 0x1ee   : > { %34605 = vmatpush3.xpose.msra.mxu1 %v3132_v4  ;;  %34606 = vmatprep.mubr.msk.f32.mxu1 %vm38058_vm2, %v38057_v13  ;;  %v38763_v4 = vsub.f32 %v1977_v2, %v2003_v23  ;;  %v2127_v2 = vand.u32 4294901760, %v2126_v6 }
 0x1ef   : > { %34609 = vmatprep.subr.mxu1 %v38057_v13 }
 0x1f0   : > { %v2118_v54 = vand.u32 4294901760, %v38763_v4 }
 0x1f5   : > { %34607 = vmatmul.mubr.f32.vlgmr.msra.gmra.mrb[10].mxu1 %v3197_v11  ;;  %v38761_v11 = vand.u32 4294901760, %v1991_v42 }
 0x1f6   : > { %34610 = vmatpush3.xpose.msra.mxu1 %v3584_v45  ;;  %34611 = vmatprep.mubr.msk.f32.mxu1 %vm38058_vm2, %v38057_v13 }
 0x1f7   : > { %34614 = vmatprep.subr.mxu1 %v38057_v13  ;;  %v38776_v53 = vsub.f32 %v1991_v42, %v38761_v11 }
 0x1f9   : > { %34612 = vmatmul.mubr.f32.vlgmr.msra.gmra.mrb[12].mxu1 %v3653_v9  ;;  %v592_v9 = vld [vmem:[%s38733_s13 + $0x10] sm:$0xff]  ;;  %s38059_s13 = smov 120  }
 0x1fa   : > { %34615 = vmatpush3.xpose.msra.mxu1 %v3664_v10  ;;  %34616 = vmatprep.mubr.msk.f32.mxu1 %vm38058_vm2, %v38057_v13  ;;  %v1997_v23 = vsel %vm607_vm0, %v592_v9, 0 }
 0x1fb   : > { %34619 = vmatprep.subr.mxu1 %v38057_v13 }
 0x201   : > { %34617 = vmatmul.mubr.f32.vlgmr.msra.gmra.mrb[12].mxu1 %v38672_v61 }
 0x202   : > { %34620 = vmatpush3.xpose.msra.mxu1 %v3661_v0  ;;  %34621 = vmatprep.mubr.msk.f32.mxu1 %vm38058_vm2, %v38057_v13  ;;  %v2119_v0 = vsub.f32 %v38763_v4, %v2118_v54 }
 0x203   : > { %34624 = vmatprep.subr.mxu1 %v38057_v13 }
 0x209   : > { %34622 = vmatmul.mubr.f32.vlgmr.msra.gmra.mrb[12].mxu1 %v3650_v63  ;;  %v2077_v63 = vand.u32 4294901760, %v38776_v53 }
 0x20a   : > { %34625 = vmatpush3.xpose.msra.mxu1 %v3584_v45  ;;  %34626 = vmatprep.mubr.msk.f32.mxu1 %vm38058_vm2, %v38057_v13 }
 0x20b   : > { %34629 = vmatprep.subr.mxu1 %v38057_v13  ;;  %v2078_v10 = vsub.f32 %v38776_v53, %v2077_v63 }
 0x20d   : > { %v2079_v37 = vand.u32 4294901760, %v2078_v10 }
 0x20f   : > { %34433 = vmatprep.mubr.f32.mxu0 %v2079_v37 }
 0x211   : > { %34627 = vmatmul.mubr.f32.vlgmr.msra.gmra.mrb[12].mxu1 %v3651_v3  ;;  %v38797_v3 = vsub.f32 %v1994_v51, %v38779_v56 }
 0x212   : > { %34630 = vmatpush3.xpose.msra.mxu1 %v3662_v5  ;;  %34631 = vmatprep.mubr.msk.f32.mxu1 %vm38058_vm2, %v38057_v13  ;;  %v2139_v5 = vand.u32 4294901760, %v38781_v57 }
 0x213   : > { %34634 = vmatprep.subr.mxu1 %v38057_v13  ;;  %v2087_v12 = vand.u32 4294901760, %v38797_v3 }
 0x214   : > { %v2140_v8 = vsub.f32 %v38781_v57, %v2139_v5 }
 0x215   : > { %v2088_v30 = vsub.f32 %v38797_v3, %v2087_v12 }
 0x219   : > { %34632 = vmatmul.mubr.f32.vlgmr.msra.gmra.mrb[12].mxu1 %v38672_v61 }
 0x21a   : > { %34635 = vmatpush3.xpose.msra.mxu1 %v3584_v45  ;;  %34636 = vmatprep.mubr.msk.f32.mxu1 %vm38058_vm2, %v38057_v13  ;;  %v38788_v45 = vsub.f32 %v1982_v34, %v2018_v41  ;;  %v2134_v34 = vand.u32 4294901760, %v2133_v19  ;;  %v38837_v41 = vsub.f32 %v1984_v36, %v2024_v26  ;;  %v2089_v26 = vand.u32 4294901760, %v2088_v30 }
 0x21b   : > { %34639 = vmatprep.subr.mxu1 %v38057_v13 }
 0x21c   : > { %v2153_v50 = vand.u32 4294901760, %v38788_v45  ;;  %v2167_v36 = vand.u32 4294901760, %v38837_v41  ;;  %34434 = vmatmul.mubr.f32.vlgmr.msra.gmra.mrb[4].mxu0 %v2089_v26 }
 0x21e   : > { %v2154_v35 = vsub.f32 %v38788_v45, %v2153_v50 }
 0x220   : > { %v2155_v6 = vand.u32 4294901760, %v2154_v35 }
 0x221   : > { %34637 = vmatmul.mubr.f32.vlgmr.msra.gmra.mrb[12].mxu1 %v38672_v61  ;;  %v38786_v61 = vsub.f32 %v1981_v33, %v2015_v48  ;;  %v38829_v33 = vand.u32 4294901760, %v1997_v23  ;;  %v38835_v48 = vsub.f32 %v1983_v24, %v2021_v21  ;;  %v38850_v21 = vand.u32 4294901760, %v2000_v43 }
 0x222   : > { %34640 = vmatpush3.xpose.msra.mxu1 %v38697_v25  ;;  %34641 = vmatprep.mubr.msk.f32.mxu1 %vm38058_vm2, %v38057_v13 }
 0x223   : > { %34644 = vmatprep.subr.mxu1 %v38057_v13  ;;  %v2146_v7 = vand.u32 4294901760, %v38786_v61  ;;  %v38842_v42 = vsub.f32 %v1997_v23, %v38829_v33  ;;  %v2160_v24 = vand.u32 4294901760, %v38835_v48  ;;  %v38856_v9 = vsub.f32 %v2000_v43, %v38850_v21 }
 0x225   : > { %34642 = vmatmul.mubr.f32.vlgmr.msra.gmra.mrb[14].mxu1 %v4105_v39  ;;  %v2120_v39 = vand.u32 4294901760, %v2119_v0  ;;  %v2147_v31 = vsub.f32 %v38786_v61, %v2146_v7  ;;  %v2097_v51 = vand.u32 4294901760, %v38842_v42 }
 0x226   : > { %34645 = vmatpush3.xpose.msra.mxu1 %v4116_v18  ;;  %34646 = vmatprep.mubr.msk.f32.mxu1 %vm38058_vm2, %v38057_v13  ;;  %v2141_v18 = vand.u32 4294901760, %v2140_v8  ;;  %v2107_v8 = vand.u32 4294901760, %v38856_v9 }
 0x227   : > { %34649 = vmatprep.subr.mxu1 %v38057_v13  ;;  %v36809_v40 = vpack.c.bf16 %v2127_v2, %v2120_v39  ;;  %v2148_v0 = vand.u32 4294901760, %v2147_v31  ;;  %v2098_v19 = vsub.f32 %v38842_v42, %v2097_v51  ;;  %v2161_v39 = vsub.f32 %v38835_v48, %v2160_v24 }
 0x228   : > { %v36813_v10 = vpack.c.bf16 %v2141_v18, %v2134_v34  ;;  %v2168_v2 = vsub.f32 %v38837_v41, %v2167_v36  ;;  %v2108_v23 = vsub.f32 %v38856_v9, %v2107_v8 }
 0x229   : > { %36810 = vmatprep.subr.bf16.mxu0 %v36809_v40  ;;  %v2099_v37 = vand.u32 4294901760, %v2098_v19  ;;  %v36817_v28 = vpack.c.bf16 %v2155_v6, %v2148_v0  ;;  %v2162_v30 = vand.u32 4294901760, %v2161_v39 }
 0x22a   : > { %36812 = vmatpush3.bf16.msra.mxu0 %v36809_v40  ;;  %v2169_v31 = vand.u32 4294901760, %v2168_v2  ;;  %v2109_v34 = vand.u32 4294901760, %v2108_v23  ;;  %v36825_v40 = vpack.c.bf16 %v38769_v49, %v38763_v4  ;;  %v36869_v4 = vpack.c.bf16 %v2167_v36, %v2160_v24 }
 0x22b   : > { %36814 = vmatprep.subr.bf16.mxu0 %v36813_v10  ;;  %34436 = vmatprep.mubr.f32.mxu0 %v2099_v37 }
 0x22c   : > { %v36821_v35 = vpack.c.bf16 %v2169_v31, %v2162_v30  ;;  %34437 = vmatmul.mubr.f32.gmra.mrb[6].mxu0 %v2109_v34 }
 0x22d   : > { %34647 = vmatmul.mubr.f32.vlgmr.msra.gmra.mrb[14].mxu1 %v38695_v20  ;;  %34455 = vmatprep.mubr.f32.mxu0 %v38761_v11 }
 0x22e   : > { %34650 = vmatpush3.xpose.msra.mxu1 %v38706_v38  ;;  %34651 = vmatprep.mubr.msk.f32.mxu1 %vm38058_vm2, %v38057_v13  ;;  %v36833_v38 = vpack.c.bf16 %v38788_v45, %v38786_v61 }
 0x22f   : > { %34654 = vmatprep.subr.mxu1 %v38057_v13  ;;  %36816 = vmatpush3.bf16.msra.mxu0 %v36813_v10 }
 0x230   : > { %36818 = vmatprep.subr.bf16.mxu0 %v36817_v28 }
 0x233   : > { %36820 = vmatpush3.bf16.msra.mxu0 %v36817_v28 }
 0x234   : > { %36822 = vmatprep.subr.bf16.mxu0 %v36821_v35 }
 0x235   : > { %34652 = vmatmul.mubr.f32.vlgmr.msra.gmra.mrb[14].mxu1 %v38702_v29  ;;  %v36829_v29 = vpack.c.bf16 %v38781_v57, %v38772_v52 }
 0x236   : > { %34655 = vmatpush3.xpose.msra.mxu1 %v38697_v25  ;;  %34656 = vmatprep.mubr.msk.f32.mxu1 %vm38058_vm2, %v38057_v13 }
 0x237   : > { %34659 = vmatprep.subr.mxu1 %v38057_v13  ;;  %36824 = vmatpush3.bf16.msra.mxu0 %v36821_v35 }
 0x238   : > { %36826 = vmatprep.subr.bf16.mxu0 %v36825_v40 }
 0x23a   : > { %34456 = vmatmul.mubr.f32.vlgmr.msra.gmra.mrb[4].mxu0 %v38779_v56 }
 0x23b   : > { %36828 = vmatpush3.bf16.msra.mxu0 %v36825_v40  ;;  %34458 = vmatprep.mubr.f32.mxu0 %v38829_v33 }
 0x23c   : > { %36830 = vmatprep.subr.bf16.mxu0 %v36829_v29 }
 0x23d   : > { %34657 = vmatmul.mubr.f32.vlgmr.msra.gmra.mrb[14].mxu1 %v4103_v32  ;;  %v36861_v32 = vpack.c.bf16 %v2139_v5, %v2132_v60 }
 0x23e   : > { %34660 = vmatpush3.xpose.msra.mxu1 %v4114_v15  ;;  %34661 = vmatprep.mubr.msk.f32.mxu1 %vm38058_vm2, %v38057_v13  ;;  %v36865_v15 = vpack.c.bf16 %v2153_v50, %v2146_v7 }
 0x23f   : > { %34664 = vmatprep.subr.mxu1 %v38057_v13  ;;  %34459 = vmatmul.mubr.f32.gmra.mrb[6].mxu0 %v38850_v21 }
 0x240   : > { %34477 = vmatprep.mubr.f32.mxu0 %v38776_v53  ;;  %36832 = vmatpush3.bf16.msra.mxu0 %v36829_v29 }
 0x241   : > { %36834 = vmatprep.subr.bf16.mxu0 %v36833_v38 }
 0x244   : > { %36836 = vmatpush3.bf16.msra.mxu0 %v36833_v38 }
 0x245   : > { %34662 = vmatmul.mubr.f32.vlgmr.msra.gmra.mrb[14].mxu1 %v38695_v20 }
 0x246   : > { %34665 = vmatpush3.xpose.msra.mxu1 %v38697_v25  ;;  %34666 = vmatprep.mubr.msk.f32.mxu1 %vm38058_vm2, %v38057_v13  ;;  %v36837_v25 = vpack.c.bf16 %v38837_v41, %v38835_v48 }
 0x247   : > { %34699 = vmatprep.subr.mxu1 %v38057_v13 }
 0x248   : > { %36838 = vmatprep.subr.bf16.mxu0 %v36837_v25 }
 0x249   : > { %36840 = vmatpush3.bf16.msra.mxu0 %v36837_v25 }
 0x24a   : > { %36842 = vmatprep.subr.bf16.mxu0 %v38752_v1 }
 0x24c   : > { %34478 = vmatmul.mubr.f32.vlgmr.msra.gmra.mrb[4].mxu0 %v38797_v3 }
 0x24d   : > { %34667 = vmatmul.mubr.f32.vlgmr.msra.gmra.mrb[14].mxu1 %v38695_v20  ;;  %36844 = vmatpush3.bf16.msra.mxu0 %v38752_v1  ;;  %v36857_v20 = vpack.c.bf16 %v2125_v59, %v2118_v54 }
 0x24e   : > { %34701 = vmatprep.mubr.msk.f32.mxu1 %vm38058_vm2, %v38057_v13  ;;  %34480 = vmatprep.mubr.f32.mxu0 %v38842_v42 }
 0x24f   : > { %36846 = vmatprep.subr.bf16.mxu0 %v38759_v22 }
 0x250   : > { %34481 = vmatmul.mubr.f32.gmra.mrb[6].mxu0 %v38856_v9 }
 0x251   : > { %36848 = vmatpush3.bf16.msra.mxu0 %v38759_v22  ;;  %34499 = vmatprep.mubr.f32.mxu0 %v2077_v63 }
 0x252   : > { %36850 = vmatprep.subr.bf16.mxu0 %v38767_v44 }
 0x255   : > { %36852 = vmatpush3.bf16.msra.mxu0 %v38767_v44 }
 0x256   : > { %36854 = vmatprep.subr.bf16.mxu0 %v38816_v62 }
 0x259   : > { %36856 = vmatpush3.bf16.msra.mxu0 %v38816_v62 }
 0x25a   : > { %36858 = vmatprep.subr.bf16.mxu0 %v36857_v20 }
 0x25c   : > { %34500 = vmatmul.mubr.f32.vlgmr.msra.gmra.mrb[4].mxu0 %v2087_v12 }
 0x25d   : > { %36860 = vmatpush3.bf16.msra.mxu0 %v36857_v20  ;;  %34502 = vmatprep.mubr.f32.mxu0 %v2097_v51 }
 0x25e   : > { %36862 = vmatprep.subr.bf16.mxu0 %v36861_v32 }
 0x260   : > { %34503 = vmatmul.mubr.f32.gmra.mrb[6].mxu0 %v2107_v8 }
 0x261   : > { %36864 = vmatpush3.bf16.msra.mxu0 %v36861_v32  ;;  %34521 = vmatprep.mubr.f32.mxu0 %v38761_v11 }
 0x262   : > { %36866 = vmatprep.subr.bf16.mxu0 %v36865_v15 }
 0x265   : > { %36868 = vmatpush3.bf16.msra.mxu0 %v36865_v15 }
 0x266   : > { %36870 = vmatprep.subr.bf16.mxu0 %v36869_v4 }
 0x269   : > { %36872 = vmatpush3.bf16.msra.mxu0 %v36869_v4 }
 0x26a   : > { %36874 = vmatprep.subr.bf16.mxu0 %v38752_v1 }
 0x26c   : > { %34522 = vmatmul.mubr.f32.vlgmr.msra.gmra.mrb[4].mxu0 %v38779_v56 }
 0x26d   : > { %36876 = vmatpush3.bf16.msra.mxu0 %v38752_v1  ;;  %34524 = vmatprep.mubr.f32.mxu0 %v38829_v33 }
 0x26e   : > { %36878 = vmatprep.subr.bf16.mxu0 %v38759_v22 }
 0x270   : > { %34525 = vmatmul.mubr.f32.gmra.mrb[6].mxu0 %v38850_v21 }
 0x271   : > { %36880 = vmatpush3.bf16.msra.mxu0 %v38759_v22  ;;  %34543 = vmatprep.mubr.f32.mxu0 %v38761_v11 }
 0x272   : > { %36882 = vmatprep.subr.bf16.mxu0 %v38767_v44 }
 0x275   : > { %36884 = vmatpush3.bf16.msra.mxu0 %v38767_v44 }
 0x276   : > { %36886 = vmatprep.subr.bf16.mxu0 %v38816_v62 }
 0x279   : > { %36888 = vmatpush3.bf16.msra.mxu0 %v38816_v62  ;;  %v33081_v62 = vld [vmem:[%s41493_s7 + $0x2] ss:$0 sm:$0xff] }
 0x27a   : > { %34669 = vmatprep.subr.mxu0 %v38057_v13 }
 0x27c   : > { %34544 = vmatmul.mubr.f32.vlgmr.msra.gmra.mrb[4].mxu0 %v38779_v56 }
 0x27d   : > { %34546 = vmatprep.mubr.f32.mxu0 %v38829_v33 }
 0x280   : > { %34547 = vmatmul.mubr.f32.gmra.mrb[6].mxu0 %v38850_v21 }
 0x281   : > { %34671 = vmatprep.mubr.msk.f32.mxu0 %vm38058_vm2, %v38057_v13 }
 0x29c   : > { %v3121_v1 = vpop.f32.mrb[8].mxu1 }
 0x29d   : > { %v34578_v22 = vpop.f32.mrb[9].mxu1  ;;  %v4481_v11 = vsel %vm2672_vm3, %v3121_v1, -inf }
 0x29e   : > { %4482 = vmax.xlane.f32.xlu1 %v4481_v11 }
 0x2c8   : > { %v3573_v44 = vpop.f32.mrb[10].mxu1 }
 0x2c9   : > { %v34608_v49 = vpop.f32.mrb[11].mxu1  ;;  %v4484_v52 = vsel %vm2672_vm3, %v3573_v44, -inf }
 0x2ca   : > { %4485 = vmax.xlane.f32.xlu0 %v4484_v52 }
 0x2f4   : > { %v4025_v53 = vpop.f32.mrb[12].mxu1 }
 0x2f5   : > { %v34638_v54 = vpop.f32.mrb[13].mxu1  ;;  %v4487_v56 = vsel %vm2672_vm3, %v4025_v53, -inf }
 0x2f6   : > { %4488 = vmax.xlane.f32.xlu1 %v4487_v56 }
 0x320   : > { %v4477_v57 = vpop.f32.mrb[14].mxu1 }
 0x321   : > { %v34668_v59 = vpop.f32.mrb[15].mxu1  ;;  %v4490_v60 = vsel %vm2672_vm3, %v4477_v57, -inf }
 0x322   : > { %4491 = vmax.xlane.f32.xlu0 %v4490_v60 }
 0x32b   : > { %v4483_v61 = vpop.xlane.xlu1 %4482 }
 0x32c   : > { %v4493_v45 = vsub.f32 %v3121_v1, %v4483_v61 }
 0x32e   : > { %v4497_v63 = vmul.f32 1.442695, %v4493_v45 }
 0x330   : > { %37813 = vpow2.f32 %v4497_v63 }
 0x33a   : > { %v37814_v3 = vpop.eup %37813 }
 0x33b   : > { %v4505_v5 = vsel %vm2672_vm3, %v37814_v3, 0.0 }
 0x33c   : > { %4506 = vadd.xlane.f32.xlu1 %v4505_v5 }
 0x34f   : > { %v34545_v33 = vpop.f32.mrb[4].mxu0 }
 0x350   : > { %v2646_v48 = vpop.f32.mrb[5].mxu0  ;;  %v38968_v18 = vadd.f32 %v34545_v33, %v33081_v62 }
 0x351   : > { %v38966_v41 = vadd.f32 %v33081_v62, %v2646_v48 }
 0x352   : > { %v38975_v43 = vand.u32 4294901760, %v38968_v18 }
 0x353   : > { %v38971_v42 = vand.u32 4294901760, %v38966_v41  ;;  %v34548_v24 = vpop.f32.mrb[6].mxu0 }
 0x354   : > { %v38978_v36 = vadd.f32 %v34548_v24, %v33081_v62  ;;  %v2658_v21 = vpop.f32.mrb[7].mxu0  ;;  %34700 = vmatpush3.msra.mxu1 %v38975_v43  ;;  %v5055_v49 = vsub.f32 %v38968_v18, %v38975_v43 }
 0x355   : > { %34670 = vmatpush3.msra.mxu0 %v38971_v42  ;;  %v38981_v26 = vadd.f32 %v33081_v62, %v2658_v21  ;;  %34704 = vmatprep.subr.mxu1 %v38057_v13  ;;  %v4606_v31 = vsub.f32 %v38966_v41, %v38971_v42 }
 0x356   : > { %34674 = vmatprep.subr.mxu0 %v38057_v13  ;;  %v5056_v54 = vand.u32 4294901760, %v5055_v49  ;;  %v39061_v24 = vand.u32 4294901760, %v38978_v36 }
 0x357   : > { %v4486_v7 = vpop.xlane.xlu0 %4485  ;;  %v4607_v29 = vand.u32 4294901760, %v4606_v31  ;;  %v39033_v59 = vand.u32 4294901760, %v38981_v26 }
 0x358   : > { %v4494_v12 = vsub.f32 %v3573_v44, %v4486_v7  ;;  %v5057_v60 = vsub.f32 %v5055_v49, %v5056_v54 }
 0x359   : > { %v4608_v20 = vsub.f32 %v4606_v31, %v4607_v29 }
 0x35a   : > { %v4499_v50 = vmul.f32 1.442695, %v4494_v12  ;;  %v5058_v63 = vand.u32 4294901760, %v5057_v60  ;;  %v5504_v12 = vsub.f32 %v38981_v26, %v39033_v59 }
 0x35b   : > { %v4609_v4 = vand.u32 4294901760, %v4608_v20 }
 0x35c   : > { %37815 = vpow2.f32 %v4499_v50  ;;  %v5505_v33 = vand.u32 4294901760, %v5504_v12 }
 0x35e   : > { %v5506_v21 = vsub.f32 %v5504_v12, %v5505_v33 }
 0x366   : > { %v37816_v51 = vpop.eup %37815 }
 0x367   : > { %v4508_v0 = vsel %vm2672_vm3, %v37816_v51, 0.0 }
 0x368   : > { %4509 = vadd.xlane.f32.xlu0 %v4508_v0  ;;  %v5507_v0 = vand.u32 4294901760, %v5506_v21 }
 0x383   : > { %v4489_v6 = vpop.xlane.xlu1 %4488 }
 0x384   : > { %v4495_v9 = vsub.f32 %v4025_v53, %v4489_v6 }
 0x386   : > { %v4501_v10 = vmul.f32 1.442695, %v4495_v9 }
 0x388   : > { %37817 = vpow2.f32 %v4501_v10 }
 0x392   : > { %v38985_v19 = vpop.eup %37817 }
 0x393   : > { %v4511_v39 = vsel %vm2672_vm3, %v38985_v19, 0.0 }
 0x394   : > { %4512 = vadd.xlane.f32.xlu1 %v4511_v39 }
 0x3a5   : > { %6321 = vrot.lane.b32.xlu1 %v38604_v55, %s38059_s13 }
 0x3a9   : > { %6323 = vrot.lane.b32.xlu1 %v38619_v27, %s38059_s13 }
 0x3ad   : > { %6777 = vrot.lane.b32.xlu1 %v38639_v58, %s38059_s13 }
 0x3af   : > { %v4492_v2 = vpop.xlane.xlu0 %4491 }
 0x3b0   : > { %v4496_v8 = vsub.f32 %v4477_v57, %v4492_v2 }
 0x3b1   : > { %7229 = vrot.lane.b32.xlu1 %v38608_v47, %s38059_s13 }
 0x3b2   : > { %v4503_v37 = vmul.f32 1.442695, %v4496_v8 }
 0x3b4   : > { %37819 = vpow2.f32 %v4503_v37 }
 0x3b5   : > { %7231 = vrot.lane.b32.xlu1 %v38625_v14, %s38059_s13 }
 0x3be   : > { %v38999_v23 = vpop.eup %37819 }
 0x3bf   : > { %v4514_v28 = vsel %vm2672_vm3, %v38999_v23, 0.0 }
 0x3c0   : > { %4515 = vadd.xlane.f32.xlu0 %v4514_v28 }
 0x3c9   : > { %v4507_v30 = vpop.xlane.xlu1 %4506 }
 0x3ca   : > { %37821 = vrcp.f32 %v4507_v30 }
 0x3d4   : > { %v37822_v34 = vpop.eup %37821 }
 0x3d5   : > { %v4521_v35 = vmul.f32 %v37822_v34, %v37814_v3  ;;  %v5953_v34 = vsub.f32 %v38978_v36, %v39061_v24 }
 0x3d6   : > { %6775 = vrot.lane.b32.xlu0 %v38602_v16, %s38059_s13 }
 0x3d7   : > { %v4526_v40 = vsel %vm2672_vm3, %v4521_v35, 0 }
 0x3d8   : > { %v4594_v38 = vand.u32 4294901760, %v4526_v40 }
 0x3da   : > { %v4595_v25 = vsub.f32 %v4526_v40, %v4594_v38  ;;  %7683 = vrot.lane.b32.xlu0 %v38606_v46, %s38059_s13 }
 0x3dc   : > { %v4596_v32 = vand.u32 4294901760, %v4595_v25 }
 0x3de   : > { %7685 = vrot.lane.b32.xlu0 %v38623_v17, %s38059_s13  ;;  %v4597_v15 = vsub.f32 %v4595_v25, %v4596_v32 }
 0x3e0   : > { %v4598_v1 = vand.u32 4294901760, %v4597_v15 }
 0x3e2   : > { %34672 = vmatmul.mubr.f32.vlgmr.msra.gmra.mrb[8].mxu0 %v4598_v1 }
 0x3e3   : > { %34675 = vmatpush3.msra.mxu0 %v4609_v4  ;;  %34676 = vmatprep.mubr.msk.f32.mxu0 %vm38058_vm2, %v38057_v13 }
 0x3e4   : > { %34679 = vmatprep.subr.mxu0 %v38057_v13 }
 0x3ea   : > { %34677 = vmatmul.mubr.f32.vlgmr.msra.gmra.mrb[8].mxu0 %v4594_v38 }
 0x3eb   : > { %34680 = vmatpush3.msra.mxu0 %v4606_v31  ;;  %34681 = vmatprep.mubr.msk.f32.mxu0 %vm38058_vm2, %v38057_v13 }
 0x3ec   : > { %34684 = vmatprep.subr.mxu0 %v38057_v13 }
 0x3f2   : > { %34682 = vmatmul.mubr.f32.vlgmr.msra.gmra.mrb[8].mxu0 %v4595_v25  ;;  %v5954_v25 = vand.u32 4294901760, %v5953_v34 }
 0x3f3   : > { %34685 = vmatpush3.msra.mxu0 %v38971_v42  ;;  %34686 = vmatprep.mubr.msk.f32.mxu0 %vm38058_vm2, %v38057_v13 }
 0x3f4   : > { %34689 = vmatprep.subr.mxu0 %v38057_v13  ;;  %v5955_v4 = vsub.f32 %v5953_v34, %v5954_v25 }
 0x3f5   : > { %v4510_v22 = vpop.xlane.xlu0 %4509 }
 0x3f6   : > { %37823 = vrcp.f32 %v4510_v22 }
 0x3fa   : > { %34687 = vmatmul.mubr.f32.vlgmr.msra.gmra.mrb[8].mxu0 %v4596_v32 }
 0x3fb   : > { %34690 = vmatpush3.msra.mxu0 %v4607_v29  ;;  %34691 = vmatprep.mubr.msk.f32.mxu0 %vm38058_vm2, %v38057_v13 }
 0x3fc   : > { %34694 = vmatprep.subr.mxu0 %v38057_v13 }
 0x400   : > { %v37824_v11 = vpop.eup %37823 }
 0x401   : > { %v4522_v44 = vmul.f32 %v37824_v11, %v37816_v51 }
 0x402   : > { %34692 = vmatmul.mubr.f32.vlgmr.msra.gmra.mrb[8].mxu0 %v4594_v38 }
 0x403   : > { %34695 = vmatpush3.msra.mxu0 %v38971_v42  ;;  %34696 = vmatprep.mubr.msk.f32.mxu0 %vm38058_vm2, %v38057_v13  ;;  %v4975_v52 = vsel %vm2672_vm3, %v4522_v44, 0  ;;  %v5956_v44 = vand.u32 4294901760, %v5955_v4 }
 0x404   : > { %34729 = vmatprep.subr.mxu0 %v38057_v13  ;;  %v5043_v53 = vand.u32 4294901760, %v4975_v52 }
 0x406   : > { %v5044_v56 = vsub.f32 %v4975_v52, %v5043_v53 }
 0x408   : > { %v5045_v57 = vand.u32 4294901760, %v5044_v56 }
 0x40a   : > { %34697 = vmatmul.mubr.f32.vlgmr.msra.gmra.mrb[8].mxu0 %v4594_v38  ;;  %v5046_v61 = vsub.f32 %v5044_v56, %v5045_v57 }
 0x40b   : > { %34730 = vmatpush3.msra.mxu0 %v39033_v59  ;;  %34731 = vmatprep.mubr.msk.f32.mxu0 %vm38058_vm2, %v38057_v13 }
 0x40c   : > { %v5047_v45 = vand.u32 4294901760, %v5046_v61  ;;  %34734 = vmatprep.subr.mxu0 %v38057_v13 }
 0x40e   : > { %34702 = vmatmul.mubr.f32.vlgmr.msra.gmra.mrb[16].mxu1 %v5047_v45 }
 0x40f   : > { %34705 = vmatpush3.msra.mxu1 %v5058_v63  ;;  %34706 = vmatprep.mubr.msk.f32.mxu1 %vm38058_vm2, %v38057_v13 }
 0x410   : > { %34709 = vmatprep.subr.mxu1 %v38057_v13 }
 0x416   : > { %34707 = vmatmul.mubr.f32.vlgmr.msra.gmra.mrb[16].mxu1 %v5043_v53 }
 0x417   : > { %34710 = vmatpush3.msra.mxu1 %v5055_v49  ;;  %34711 = vmatprep.mubr.msk.f32.mxu1 %vm38058_vm2, %v38057_v13 }
 0x418   : > { %34714 = vmatprep.subr.mxu1 %v38057_v13 }
 0x41e   : > { %34712 = vmatmul.mubr.f32.vlgmr.msra.gmra.mrb[16].mxu1 %v5044_v56 }
 0x41f   : > { %34715 = vmatpush3.msra.mxu1 %v38975_v43  ;;  %34716 = vmatprep.mubr.msk.f32.mxu1 %vm38058_vm2, %v38057_v13 }
 0x420   : > { %34719 = vmatprep.subr.mxu1 %v38057_v13 }
 0x421   : > { %v4513_v3 = vpop.xlane.xlu1 %4512 }
 0x422   : > { %37825 = vrcp.f32 %v4513_v3 }
 0x425   : > { %v6322_v6 = vpop.permute.xlu1 %6321 }
 0x426   : > { %34717 = vmatmul.mubr.f32.vlgmr.msra.gmra.mrb[16].mxu1 %v5045_v57 }
 0x427   : > { %34720 = vmatpush3.msra.mxu1 %v5056_v54  ;;  %34721 = vmatprep.mubr.msk.f32.mxu1 %vm38058_vm2, %v38057_v13 }
 0x428   : > { %34724 = vmatprep.subr.mxu1 %v38057_v13 }
 0x429   : > { %v6324_v10 = vpop.permute.xlu1 %6323 }
 0x42a   : > { %v6327_v39 = vsel %vm2672_vm3, %v6324_v10, 0 }
 0x42b   : > { %v39084_v8 = vand.u32 4294901760, %v6327_v39 }
 0x42c   : > { %v37826_v5 = vpop.eup %37825 }
 0x42d   : > { %v4523_v7 = vmul.f32 %v37826_v5, %v38985_v19  ;;  %v6325_v19 = vsel %vm2672_vm3, %v6322_v6, 0  ;;  %v6407_v30 = vsub.f32 %v6327_v39, %v39084_v8  ;;  %v6778_v52 = vpop.permute.xlu1 %6777 }
 0x42e   : > { %34722 = vmatmul.mubr.f32.vlgmr.msra.gmra.mrb[16].mxu1 %v5043_v53  ;;  %v39081_v2 = vand.u32 4294901760, %v6325_v19  ;;  %v6781_v60 = vsel %vm2672_vm3, %v6778_v52, 0 }
 0x42f   : > { %34725 = vmatpush3.msra.mxu1 %v38975_v43  ;;  %34726 = vmatprep.mubr.msk.f32.mxu1 %vm38058_vm2, %v38057_v13  ;;  %v5424_v50 = vsel %vm2672_vm3, %v4523_v7, 0  ;;  %v6408_v38 = vand.u32 4294901760, %v6407_v30  ;;  %v39136_v3 = vand.u32 4294901760, %v6781_v60 }
 0x430   : > { %34759 = vmatprep.subr.mxu1 %v38057_v13  ;;  %v5492_v62 = vand.u32 4294901760, %v5424_v50  ;;  %v6396_v28 = vsub.f32 %v6325_v19, %v39081_v2 }
 0x431   : > { %v6409_v15 = vsub.f32 %v6407_v30, %v6408_v38 }
 0x432   : > { %v5493_v48 = vsub.f32 %v5424_v50, %v5492_v62  ;;  %v6397_v40 = vand.u32 4294901760, %v6396_v28  ;;  %v6861_v50 = vsub.f32 %v6781_v60, %v39136_v3 }
 0x433   : > { %v6410_v49 = vand.u32 4294901760, %v6409_v15 }
 0x434   : > { %v5494_v42 = vand.u32 4294901760, %v5493_v48  ;;  %v6398_v20 = vsub.f32 %v6396_v28, %v6397_v40 }
 0x436   : > { %34727 = vmatmul.mubr.f32.vlgmr.msra.gmra.mrb[16].mxu1 %v5043_v53  ;;  %v5495_v51 = vsub.f32 %v5493_v48, %v5494_v42  ;;  %v6399_v11 = vand.u32 4294901760, %v6398_v20  ;;  %v7230_v53 = vpop.permute.xlu1 %7229 }
 0x437   : > { %34760 = vmatpush3.msra.mxu1 %v39061_v24  ;;  %34761 = vmatprep.mubr.msk.f32.mxu1 %vm38058_vm2, %v38057_v13  ;;  %v7233_v57 = vsel %vm2672_vm3, %v7230_v53, 0 }
 0x438   : > { %v5496_v43 = vand.u32 4294901760, %v5495_v51  ;;  %34764 = vmatprep.subr.mxu1 %v38057_v13  ;;  %v39129_v45 = vand.u32 4294901760, %v7233_v57 }
 0x43a   : > { %34732 = vmatmul.mubr.f32.vlgmr.msra.gmra.mrb[10].mxu0 %v5496_v43  ;;  %v7232_v56 = vpop.permute.xlu1 %7231  ;;  %v7304_v7 = vsub.f32 %v7233_v57, %v39129_v45 }
 0x43b   : > { %34735 = vmatpush3.msra.mxu0 %v5507_v0  ;;  %34736 = vmatprep.mubr.msk.f32.mxu0 %vm38058_vm2, %v38057_v13  ;;  %v7235_v61 = vsel %vm2672_vm3, %v7232_v56, 0 }
 0x43c   : > { %34739 = vmatprep.subr.mxu0 %v38057_v13  ;;  %v39138_v5 = vand.u32 4294901760, %v7235_v61 }
 0x442   : > { %34737 = vmatmul.mubr.f32.vlgmr.msra.gmra.mrb[10].mxu0 %v5492_v62 }
 0x443   : > { %34740 = vmatpush3.msra.mxu0 %v5504_v12  ;;  %34741 = vmatprep.mubr.msk.f32.mxu0 %vm38058_vm2, %v38057_v13 }
 0x444   : > { %34744 = vmatprep.subr.mxu0 %v38057_v13 }
 0x44a   : > { %34742 = vmatmul.mubr.f32.vlgmr.msra.gmra.mrb[10].mxu0 %v5493_v48 }
 0x44b   : > { %34745 = vmatpush3.msra.mxu0 %v39033_v59  ;;  %34746 = vmatprep.mubr.msk.f32.mxu0 %vm38058_vm2, %v38057_v13 }
 0x44c   : > { %34749 = vmatprep.subr.mxu0 %v38057_v13 }
 0x44d   : > { %v4516_v9 = vpop.xlane.xlu0 %4515 }
 0x44e   : > { %37827 = vrcp.f32 %v4516_v9 }
 0x451   : > { %v6776_v54 = vpop.permute.xlu0 %6775 }
 0x452   : > { %34747 = vmatmul.mubr.f32.vlgmr.msra.gmra.mrb[10].mxu0 %v5494_v42  ;;  %v6862_v42 = vand.u32 4294901760, %v6861_v50 }
 0x453   : > { %34750 = vmatpush3.msra.mxu0 %v5505_v33  ;;  %34751 = vmatprep.mubr.msk.f32.mxu0 %vm38058_vm2, %v38057_v13  ;;  %v7305_v33 = vand.u32 4294901760, %v7304_v7 }
 0x454   : > { %34754 = vmatprep.subr.mxu0 %v38057_v13  ;;  %v6863_v0 = vsub.f32 %v6861_v50, %v6862_v42 }
 0x455   : > { %v7306_v51 = vsub.f32 %v7304_v7, %v7305_v33  ;;  %v7684_v39 = vpop.permute.xlu0 %7683 }
 0x456   : > { %v6864_v10 = vand.u32 4294901760, %v6863_v0 }
 0x457   : > { %v7307_v9 = vand.u32 4294901760, %v7306_v51 }
 0x458   : > { %v37828_v37 = vpop.eup %37827 }
 0x459   : > { %v4524_v31 = vmul.f32 %v37828_v37, %v38999_v23 }
 0x45a   : > { %34752 = vmatmul.mubr.f32.vlgmr.msra.gmra.mrb[10].mxu0 %v5492_v62 }
 0x45b   : > { %34755 = vmatpush3.msra.mxu0 %v39033_v59  ;;  %34756 = vmatprep.mubr.msk.f32.mxu0 %vm38058_vm2, %v38057_v13  ;;  %v5873_v35 = vsel %vm2672_vm3, %v4524_v31, 0  ;;  %v6779_v59 = vsel %vm2672_vm3, %v6776_v54, 0 }
 0x45c   : > { %34789 = vmatprep.subr.mxu0 %v38057_v13  ;;  %v39096_v29 = vand.u32 4294901760, %v5873_v35  ;;  %v39131_v63 = vand.u32 4294901760, %v6779_v59 }
 0x45e   : > { %v5942_v23 = vsub.f32 %v5873_v35, %v39096_v29  ;;  %v6850_v12 = vsub.f32 %v6779_v59, %v39131_v63 }
 0x460   : > { %v5943_v32 = vand.u32 4294901760, %v5942_v23  ;;  %v6851_v48 = vand.u32 4294901760, %v6850_v12 }
 0x462   : > { %34757 = vmatmul.mubr.f32.vlgmr.msra.gmra.mrb[10].mxu0 %v5492_v62  ;;  %v5944_v1 = vsub.f32 %v5942_v23, %v5943_v32  ;;  %v7315_v62 = vsub.f32 %v7235_v61, %v39138_v5  ;;  %v6852_v43 = vsub.f32 %v6850_v12, %v6851_v48 }
 0x463   : > { %34790 = vmatpush3.xpose.msra.mxu0 %v39084_v8  ;;  %34791 = vmatprep.mubr.msk.f32.mxu0 %vm38058_vm2, %v38057_v13 }
 0x464   : > { %34794 = vmatprep.subr.mxu0 %v38057_v13  ;;  %v5945_v22 = vand.u32 4294901760, %v5944_v1  ;;  %v7316_v21 = vand.u32 4294901760, %v7315_v62  ;;  %v6853_v6 = vand.u32 4294901760, %v6852_v43 }
 0x466   : > { %34762 = vmatmul.mubr.f32.vlgmr.msra.gmra.mrb[18].mxu1 %v5945_v22  ;;  %34792 = vmatmul.mubr.f32.vlgmr.msra.gmra.mrb[12].mxu0 %v6399_v11 }
 0x467   : > { %34765 = vmatpush3.msra.mxu1 %v5956_v44  ;;  %34795 = vmatpush3.xpose.msra.mxu0 %v6410_v49 }
 0x468   : > { %34766 = vmatprep.mubr.msk.f32.mxu1 %vm38058_vm2, %v38057_v13  ;;  %34769 = vmatprep.subr.mxu1 %v38057_v13 }
 0x469   : > { %34796 = vmatprep.mubr.msk.f32.mxu0 %vm38058_vm2, %v38057_v13  ;;  %34799 = vmatprep.subr.mxu0 %v38057_v13 }
 0x46e   : > { %34767 = vmatmul.mubr.f32.vlgmr.msra.gmra.mrb[18].mxu1 %v39096_v29  ;;  %34797 = vmatmul.mubr.f32.vlgmr.msra.gmra.mrb[12].mxu0 %v39081_v2 }
 0x46f   : > { %34770 = vmatpush3.msra.mxu1 %v5953_v34  ;;  %34800 = vmatpush3.xpose.msra.mxu0 %v6407_v30 }
 0x470   : > { %34771 = vmatprep.mubr.msk.f32.mxu1 %vm38058_vm2, %v38057_v13  ;;  %34774 = vmatprep.subr.mxu1 %v38057_v13 }
 0x471   : > { %34801 = vmatprep.mubr.msk.f32.mxu0 %vm38058_vm2, %v38057_v13  ;;  %34804 = vmatprep.subr.mxu0 %v38057_v13 }
 0x476   : > { %34772 = vmatmul.mubr.f32.vlgmr.msra.gmra.mrb[18].mxu1 %v5942_v23  ;;  %34802 = vmatmul.mubr.f32.vlgmr.msra.gmra.mrb[12].mxu0 %v6396_v28 }
 0x477   : > { %34775 = vmatpush3.msra.mxu1 %v39061_v24  ;;  %34805 = vmatpush3.xpose.msra.mxu0 %v39084_v8 }
 0x478   : > { %34776 = vmatprep.mubr.msk.f32.mxu1 %vm38058_vm2, %v38057_v13  ;;  %34779 = vmatprep.subr.mxu1 %v38057_v13 }
 0x479   : > { %34806 = vmatprep.mubr.msk.f32.mxu0 %vm38058_vm2, %v38057_v13  ;;  %34809 = vmatprep.subr.mxu0 %v38057_v13 }
 0x47e   : > { %34777 = vmatmul.mubr.f32.vlgmr.msra.gmra.mrb[18].mxu1 %v5943_v32  ;;  %34807 = vmatmul.mubr.f32.vlgmr.msra.gmra.mrb[12].mxu0 %v6397_v40 }
 0x47f   : > { %34780 = vmatpush3.msra.mxu1 %v5954_v25  ;;  %34810 = vmatpush3.xpose.msra.mxu0 %v6408_v38 }
 0x480   : > { %34781 = vmatprep.mubr.msk.f32.mxu1 %vm38058_vm2, %v38057_v13  ;;  %34784 = vmatprep.subr.mxu1 %v38057_v13 }
 0x481   : > { %34811 = vmatprep.mubr.msk.f32.mxu0 %vm38058_vm2, %v38057_v13  ;;  %34814 = vmatprep.subr.mxu0 %v38057_v13 }
 0x486   : > { %34782 = vmatmul.mubr.f32.vlgmr.msra.gmra.mrb[18].mxu1 %v39096_v29  ;;  %34812 = vmatmul.mubr.f32.vlgmr.msra.gmra.mrb[12].mxu0 %v39081_v2 }
 0x487   : > { %34785 = vmatpush3.msra.mxu1 %v39061_v24  ;;  %34815 = vmatpush3.xpose.msra.mxu0 %v39084_v8  ;;  %v7317_v24 = vsub.f32 %v7315_v62, %v7316_v21  ;;  %v7687_v8 = vsel %vm2672_vm3, %v7684_v39, 0 }
 0x488   : > { %34786 = vmatprep.mubr.msk.f32.mxu1 %vm38058_vm2, %v38057_v13  ;;  %34816 = vmatprep.mubr.msk.f32.mxu0 %vm38058_vm2, %v38057_v13  ;;  %v7757_v28 = vand.u32 4294901760, %v7687_v8 }
 0x489   : > { %34819 = vmatprep.subr.mxu1 %v38057_v13  ;;  %34849 = vmatprep.subr.mxu0 %v38057_v13  ;;  %v7318_v19 = vand.u32 4294901760, %v7317_v24 }
 0x48a   : > { %v7758_v31 = vsub.f32 %v7687_v8, %v7757_v28 }
 0x48c   : > { %v7759_v35 = vand.u32 4294901760, %v7758_v31 }
 0x48e   : > { %34787 = vmatmul.mubr.f32.vlgmr.msra.gmra.mrb[18].mxu1 %v39096_v29  ;;  %34817 = vmatmul.mubr.f32.vlgmr.msra.gmra.mrb[12].mxu0 %v39081_v2  ;;  %v7686_v2 = vpop.permute.xlu0 %7685  ;;  %v7760_v29 = vsub.f32 %v7758_v31, %v7759_v35 }
 0x48f   : > { %34820 = vmatpush3.xpose.msra.mxu1 %v39136_v3  ;;  %34850 = vmatpush3.xpose.msra.mxu0 %v39138_v5  ;;  %v7689_v37 = vsel %vm2672_vm3, %v7686_v2, 0 }
 0x490   : > { %34821 = vmatprep.mubr.msk.f32.mxu1 %vm38058_vm2, %v38057_v13  ;;  %34824 = vmatprep.subr.mxu1 %v38057_v13  ;;  %v7692_v30 = vand.u32 4294901760, %v7689_v37  ;;  %v7761_v25 = vand.u32 4294901760, %v7760_v29 }
 0x491   : > { %34851 = vmatprep.mubr.msk.f32.mxu0 %vm38058_vm2, %v38057_v13  ;;  %34854 = vmatprep.subr.mxu0 %v38057_v13 }
 0x492   : > { %34822 = vmatmul.mubr.f32.vlgmr.msra.gmra.mrb[20].mxu1 %v6853_v6  ;;  %34852 = vmatmul.mubr.f32.vlgmr.msra.gmra.mrb[14].mxu0 %v7307_v9  ;;  %v7769_v34 = vsub.f32 %v7689_v37, %v7692_v30 }
 0x493   : > { %34825 = vmatpush3.xpose.msra.mxu1 %v6864_v10  ;;  %34855 = vmatpush3.xpose.msra.mxu0 %v7318_v19 }
 0x494   : > { %34826 = vmatprep.mubr.msk.f32.mxu1 %vm38058_vm2, %v38057_v13  ;;  %34829 = vmatprep.subr.mxu1 %v38057_v13  ;;  %v7770_v40 = vand.u32 4294901760, %v7769_v34 }
 0x495   : > { %34856 = vmatprep.mubr.msk.f32.mxu0 %vm38058_vm2, %v38057_v13  ;;  %34859 = vmatprep.subr.mxu0 %v38057_v13 }
 0x496   : > { %v7771_v38 = vsub.f32 %v7769_v34, %v7770_v40 }
 0x498   : > { %v7772_v23 = vand.u32 4294901760, %v7771_v38 }
 0x49a   : > { %34827 = vmatmul.mubr.f32.vlgmr.msra.gmra.mrb[20].mxu1 %v39131_v63  ;;  %34857 = vmatmul.mubr.f32.vlgmr.msra.gmra.mrb[14].mxu0 %v39129_v45 }
 0x49b   : > { %34830 = vmatpush3.xpose.msra.mxu1 %v6861_v50  ;;  %34860 = vmatpush3.xpose.msra.mxu0 %v7315_v62 }
 0x49c   : > { %34831 = vmatprep.mubr.msk.f32.mxu1 %vm38058_vm2, %v38057_v13  ;;  %34834 = vmatprep.subr.mxu1 %v38057_v13 }
 0x49d   : > { %34861 = vmatprep.mubr.msk.f32.mxu0 %vm38058_vm2, %v38057_v13  ;;  %34864 = vmatprep.subr.mxu0 %v38057_v13 }
 0x4a2   : > { %34832 = vmatmul.mubr.f32.vlgmr.msra.gmra.mrb[20].mxu1 %v6850_v12  ;;  %34862 = vmatmul.mubr.f32.vlgmr.msra.gmra.mrb[14].mxu0 %v7304_v7 }
 0x4a3   : > { %34835 = vmatpush3.xpose.msra.mxu1 %v39136_v3  ;;  %34865 = vmatpush3.xpose.msra.mxu0 %v39138_v5 }
 0x4a4   : > { %34836 = vmatprep.mubr.msk.f32.mxu1 %vm38058_vm2, %v38057_v13  ;;  %34839 = vmatprep.subr.mxu1 %v38057_v13 }
 0x4a5   : > { %34866 = vmatprep.mubr.msk.f32.mxu0 %vm38058_vm2, %v38057_v13  ;;  %34869 = vmatprep.subr.mxu0 %v38057_v13 }
 0x4aa   : > { %34837 = vmatmul.mubr.f32.vlgmr.msra.gmra.mrb[20].mxu1 %v6851_v48  ;;  %34867 = vmatmul.mubr.f32.vlgmr.msra.gmra.mrb[14].mxu0 %v7305_v33 }
 0x4ab   : > { %34840 = vmatpush3.xpose.msra.mxu1 %v6862_v42  ;;  %34870 = vmatpush3.xpose.msra.mxu0 %v7316_v21 }
 0x4ac   : > { %34841 = vmatprep.mubr.msk.f32.mxu1 %vm38058_vm2, %v38057_v13  ;;  %34844 = vmatprep.subr.mxu1 %v38057_v13 }
 0x4ad   : > { %34871 = vmatprep.mubr.msk.f32.mxu0 %vm38058_vm2, %v38057_v13  ;;  %34874 = vmatprep.subr.mxu0 %v38057_v13 }
 0x4b2   : > { %34842 = vmatmul.mubr.f32.vlgmr.msra.gmra.mrb[20].mxu1 %v39131_v63  ;;  %34872 = vmatmul.mubr.f32.vlgmr.msra.gmra.mrb[14].mxu0 %v39129_v45 }
 0x4b3   : > { %34845 = vmatpush3.xpose.msra.mxu1 %v39136_v3  ;;  %34875 = vmatpush3.xpose.msra.mxu0 %v39138_v5 }
 0x4b4   : > { %34846 = vmatprep.mubr.msk.f32.mxu1 %vm38058_vm2, %v38057_v13  ;;  %34876 = vmatprep.mubr.msk.f32.mxu0 %vm38058_vm2, %v38057_v13 }
 0x4b5   : > { %34879 = vmatprep.subr.mxu1 %v38057_v13  ;;  %34909 = vmatprep.subr.mxu0 %v38057_v13 }
 0x4ba   : > { %34847 = vmatmul.mubr.f32.vlgmr.msra.gmra.mrb[20].mxu1 %v39131_v63  ;;  %34877 = vmatmul.mubr.f32.vlgmr.msra.gmra.mrb[14].mxu0 %v39129_v45 }
 0x4bb   : > { %34880 = vmatpush3.xpose.msra.mxu1 %v7692_v30  ;;  %34881 = vmatprep.mubr.msk.f32.mxu1 %vm38058_vm2, %v38057_v13 }
 0x4bc   : > { %34884 = vmatprep.subr.mxu1 %v38057_v13  ;;  %34911 = vmatprep.mubr.msk.f32.mxu0 %vm38058_vm2, %v38057_v13 }
 0x4be   : > { %34882 = vmatmul.mubr.f32.vlgmr.msra.gmra.mrb[22].mxu1 %v7761_v25 }
 0x4bf   : > { %34885 = vmatpush3.xpose.msra.mxu1 %v7772_v23  ;;  %34886 = vmatprep.mubr.msk.f32.mxu1 %vm38058_vm2, %v38057_v13 }
 0x4c0   : > { %34889 = vmatprep.subr.mxu1 %v38057_v13 }
 0x4c6   : > { %34887 = vmatmul.mubr.f32.vlgmr.msra.gmra.mrb[22].mxu1 %v7757_v28 }
 0x4c7   : > { %34890 = vmatpush3.xpose.msra.mxu1 %v7769_v34  ;;  %34891 = vmatprep.mubr.msk.f32.mxu1 %vm38058_vm2, %v38057_v13 }
 0x4c8   : > { %34894 = vmatprep.subr.mxu1 %v38057_v13 }
 0x4ce   : > { %34892 = vmatmul.mubr.f32.vlgmr.msra.gmra.mrb[22].mxu1 %v7758_v31 }
 0x4cf   : > { %34895 = vmatpush3.xpose.msra.mxu1 %v7692_v30  ;;  %34896 = vmatprep.mubr.msk.f32.mxu1 %vm38058_vm2, %v38057_v13 }
 0x4d0   : > { %34899 = vmatprep.subr.mxu1 %v38057_v13 }
 0x4d6   : > { %34897 = vmatmul.mubr.f32.vlgmr.msra.gmra.mrb[22].mxu1 %v7759_v35 }
 0x4d7   : > { %34900 = vmatpush3.xpose.msra.mxu1 %v7770_v40  ;;  %34901 = vmatprep.mubr.msk.f32.mxu1 %vm38058_vm2, %v38057_v13 }
 0x4d8   : > { %34904 = vmatprep.subr.mxu1 %v38057_v13 }
 0x4dd   : > { %v39226_v20 = vpop.f32.mrb[8].mxu0 }
 0x4de   : > { %v34698_v32 = vpop.f32.mrb[9].mxu0  ;;  %34902 = vmatmul.mubr.f32.vlgmr.msra.gmra.mrb[22].mxu1 %v7757_v28 }
 0x4df   : > { %34905 = vmatpush3.xpose.msra.mxu1 %v7692_v30  ;;  %34906 = vmatprep.mubr.msk.f32.mxu1 %vm38058_vm2, %v38057_v13 }
 0x4e0   : > { %34939 = vmatprep.subr.mxu1 %v38057_v13 }
 0x4e6   : > { %34907 = vmatmul.mubr.f32.vlgmr.msra.gmra.mrb[22].mxu1 %v7757_v28 }
 0x4e7   : > { %34941 = vmatprep.mubr.msk.f32.mxu1 %vm38058_vm2, %v38057_v13 }
 0x509   : > { %v39233_v15 = vpop.f32.mrb[16].mxu1 }
 0x50a   : > { %v34728_v4 = vpop.f32.mrb[17].mxu1 }
 0x535   : > { %v39235_v1 = vpop.f32.mrb[10].mxu0 }
 0x536   : > { %v34758_v22 = vpop.f32.mrb[11].mxu0 }
 0x561   : > { %v39237_v11 = vpop.f32.mrb[18].mxu1  ;;  %v6771_v44 = vpop.f32.mrb[12].mxu0 }
 0x562   : > { %v34788_v49 = vpop.f32.mrb[19].mxu1  ;;  %v34818_v52 = vpop.f32.mrb[13].mxu0  ;;  %v8137_v53 = vsel %vm2672_vm3, %v6771_v44, -inf }
 0x563   : > { %8138 = vmax.xlane.f32.xlu1 %v8137_v53 }
 0x58d   : > { %v7225_v54 = vpop.f32.mrb[20].mxu1  ;;  %v7679_v56 = vpop.f32.mrb[14].mxu0 }
 0x58e   : > { %v34848_v57 = vpop.f32.mrb[21].mxu1  ;;  %v34878_v59 = vpop.f32.mrb[15].mxu0  ;;  %v8140_v60 = vsel %vm2672_vm3, %v7225_v54, -inf  ;;  %v8143_v61 = vsel %vm2672_vm3, %v7679_v56, -inf }
 0x58f   : > { %8141 = vmax.xlane.f32.xlu0 %v8140_v60 }
 0x593   : > { %8144 = vmax.xlane.f32.xlu0 %v8143_v61 }
 0x5b9   : > { %v8133_v45 = vpop.f32.mrb[22].mxu1 }
 0x5ba   : > { %v34908_v63 = vpop.f32.mrb[23].mxu1  ;;  %v8146_v3 = vsel %vm2672_vm3, %v8133_v45, -inf }
 0x5bb   : > { %8147 = vmax.xlane.f32.xlu0 %v8146_v3 }
 0x5f0   : > { %v8139_v5 = vpop.xlane.xlu1 %8138 }
 0x5f1   : > { %v8149_v7 = vsub.f32 %v6771_v44, %v8139_v5 }
 0x5f3   : > { %v8153_v12 = vmul.f32 1.442695, %v8149_v7 }
 0x5f5   : > { %37829 = vpow2.f32 %v8153_v12 }
 0x5ff   : > { %v37830_v50 = vpop.eup %37829 }
 0x600   : > { %v8161_v62 = vsel %vm2672_vm3, %v37830_v50, 0.0 }
 0x601   : > { %8162 = vadd.xlane.f32.xlu1 %v8161_v62 }
 0x612   : > { %8182 = vrot.lane.b32.xlu1 %v38966_v41, %s38059_s13 }
 0x61c   : > { %v8142_v33 = vpop.xlane.xlu0 %8141 }
 0x61d   : > { %v8150_v48 = vsub.f32 %v7225_v54, %v8142_v33 }
 0x61f   : > { %v8155_v42 = vmul.f32 1.442695, %v8150_v48 }
 0x620   : > { %v8145_v21 = vpop.xlane.xlu0 %8144 }
 0x621   : > { %37831 = vpow2.f32 %v8155_v42  ;;  %v8151_v51 = vsub.f32 %v7679_v56, %v8145_v21 }
 0x623   : > { %v8157_v43 = vmul.f32 1.442695, %v8151_v51 }
 0x625   : > { %37833 = vpow2.f32 %v8157_v43 }
 0x62b   : > { %v39246_v0 = vpop.eup %37831 }
 0x62c   : > { %v8164_v24 = vsel %vm2672_vm3, %v39246_v0, 0.0 }
 0x62d   : > { %8165 = vadd.xlane.f32.xlu0 %v8164_v24 }
 0x62f   : > { %v39250_v6 = vpop.eup %37833 }
 0x630   : > { %v8167_v9 = vsel %vm2672_vm3, %v39250_v6, 0.0 }
 0x636   : > { %8168 = vadd.xlane.f32.xlu1 %v8167_v9 }
 0x643   : > { %8635 = vrot.lane.b32.xlu0 %v38968_v18, %s38059_s13 }
 0x647   : > { %9088 = vrot.lane.b32.xlu1 %v38981_v26, %s38059_s13 }
 0x648   : > { %v8148_v10 = vpop.xlane.xlu0 %8147 }
 0x649   : > { %v8152_v19 = vsub.f32 %v8133_v45, %v8148_v10 }
 0x64b   : > { %9993 = vrot.lane.b32.xlu1 %v38604_v55, %s38060_s14  ;;  %v8159_v39 = vmul.f32 1.442695, %v8152_v19 }
 0x64d   : > { %37835 = vpow2.f32 %v8159_v39 }
 0x64f   : > { %10447 = vrot.lane.b32.xlu1 %v38602_v16, %s38060_s14 }
 0x653   : > { %9995 = vrot.lane.b32.xlu1 %v38619_v27, %s38060_s14 }
 0x657   : > { %10901 = vrot.lane.b32.xlu1 %v38608_v47, %s38060_s14  ;;  %v39268_v2 = vpop.eup %37835 }
 0x658   : > { %v8170_v8 = vsel %vm2672_vm3, %v39268_v2, 0.0 }
 0x65b   : > { %10903 = vrot.lane.b32.xlu1 %v38625_v14, %s38060_s14 }
 0x662   : > { %8171 = vadd.xlane.f32.xlu0 %v8170_v8 }
 0x678   : > { %9541 = vrot.lane.b32.xlu0 %v38978_v36, %s38059_s13  ;;  %s38071_s13 = smov 48  }
 0x67c   : > { %10449 = vrot.lane.b32.xlu0 %v38639_v58, %s38060_s14 }
 0x680   : > { %11355 = vrot.lane.b32.xlu0 %v38606_v46, %s38060_s14 }
 0x684   : > { %11357 = vrot.lane.b32.xlu0 %v38623_v17, %s38060_s14 }
 0x68e   : > { %v8163_v37 = vpop.xlane.xlu1 %8162 }
 0x68f   : > { %37837 = vrcp.f32 %v8163_v37 }
 0x692   : > { %v8183_v28 = vpop.permute.xlu1 %8182 }
 0x693   : > { %v8189_v30 = vand.u32 4294901760, %v8183_v28 }
 0x695   : > { %34910 = vmatpush3.msra.mxu0 %v8189_v30  ;;  %v8266_v35 = vsub.f32 %v8183_v28, %v8189_v30 }
 0x696   : > { %34914 = vmatprep.subr.mxu0 %v38057_v13 }
 0x697   : > { %v8267_v38 = vand.u32 4294901760, %v8266_v35 }
 0x699   : > { %v37838_v31 = vpop.eup %37837  ;;  %v8268_v32 = vsub.f32 %v8266_v35, %v8267_v38 }
 0x69a   : > { %v8177_v34 = vmul.f32 %v37838_v31, %v37830_v50 }
 0x69b   : > { %v8269_v44 = vand.u32 4294901760, %v8268_v32 }
 0x69c   : > { %v8186_v40 = vsel %vm2672_vm3, %v8177_v34, 0 }
 0x69d   : > { %v8254_v29 = vand.u32 4294901760, %v8186_v40 }
 0x69f   : > { %v8255_v25 = vsub.f32 %v8186_v40, %v8254_v29 }
 0x6a1   : > { %v8256_v23 = vand.u32 4294901760, %v8255_v25 }
 0x6a3   : > { %v8257_v4 = vsub.f32 %v8255_v25, %v8256_v23 }
 0x6a5   : > { %v8258_v22 = vand.u32 4294901760, %v8257_v4 }
 0x6a7   : > { %34912 = vmatmul.mubr.f32.vlgmr.msra.gmra.mrb[16].mxu0 %v8258_v22 }
 0x6a8   : > { %34915 = vmatpush3.msra.mxu0 %v8269_v44  ;;  %34916 = vmatprep.mubr.msk.f32.mxu0 %vm38058_vm2, %v38057_v13 }
 0x6a9   : > { %34919 = vmatprep.subr.mxu0 %v38057_v13 }
 0x6af   : > { %34917 = vmatmul.mubr.f32.vlgmr.msra.gmra.mrb[16].mxu0 %v8254_v29 }
 0x6b0   : > { %34920 = vmatpush3.msra.mxu0 %v8266_v35  ;;  %34921 = vmatprep.mubr.msk.f32.mxu0 %vm38058_vm2, %v38057_v13 }
 0x6b1   : > { %34924 = vmatprep.subr.mxu0 %v38057_v13 }
 0x6b7   : > { %34922 = vmatmul.mubr.f32.vlgmr.msra.gmra.mrb[16].mxu0 %v8255_v25 }
 0x6b8   : > { %34925 = vmatpush3.msra.mxu0 %v8189_v30  ;;  %34926 = vmatprep.mubr.msk.f32.mxu0 %vm38058_vm2, %v38057_v13 }
 0x6b9   : > { %34929 = vmatprep.subr.mxu0 %v38057_v13 }
 0x6ba   : > { %v8166_v49 = vpop.xlane.xlu0 %8165 }
 0x6bb   : > { %37839 = vrcp.f32 %v8166_v49 }
 0x6be   : > { %v8636_v52 = vpop.permute.xlu0 %8635 }
 0x6bf   : > { %v39291_v53 = vand.u32 4294901760, %v8636_v52  ;;  %34927 = vmatmul.mubr.f32.vlgmr.msra.gmra.mrb[16].mxu0 %v8256_v23 }
 0x6c0   : > { %34930 = vmatpush3.msra.mxu0 %v8267_v38  ;;  %34931 = vmatprep.mubr.msk.f32.mxu0 %vm38058_vm2, %v38057_v13 }
 0x6c1   : > { %34940 = vmatpush3.msra.mxu1 %v39291_v53  ;;  %34934 = vmatprep.subr.mxu0 %v38057_v13  ;;  %v8719_v59 = vsub.f32 %v8636_v52, %v39291_v53 }
 0x6c2   : > { %34944 = vmatprep.subr.mxu1 %v38057_v13 }
 0x6c3   : > { %v8169_v54 = vpop.xlane.xlu1 %8168  ;;  %v8720_v63 = vand.u32 4294901760, %v8719_v59 }
 0x6c4   : > { %37841 = vrcp.f32 %v8169_v54 }
 0x6c5   : > { %v37840_v56 = vpop.eup %37839  ;;  %v8721_v50 = vsub.f32 %v8719_v59, %v8720_v63 }
 0x6c6   : > { %v8178_v57 = vmul.f32 %v37840_v56, %v39246_v0 }
 0x6c7   : > { %34932 = vmatmul.mubr.f32.vlgmr.msra.gmra.mrb[16].mxu0 %v8254_v29  ;;  %v9089_v60 = vpop.permute.xlu1 %9088  ;;  %v8722_v51 = vand.u32 4294901760, %v8721_v50 }
 0x6c8   : > { %34935 = vmatpush3.msra.mxu0 %v8189_v30  ;;  %34936 = vmatprep.mubr.msk.f32.mxu0 %vm38058_vm2, %v38057_v13  ;;  %v8639_v61 = vsel %vm2672_vm3, %v8178_v57, 0  ;;  %v39306_v3 = vand.u32 4294901760, %v9089_v60 }
 0x6c9   : > { %34969 = vmatprep.subr.mxu0 %v38057_v13  ;;  %v39304_v45 = vand.u32 4294901760, %v8639_v61 }
 0x6ca   : > { %v9172_v33 = vsub.f32 %v9089_v60, %v39306_v3 }
 0x6cb   : > { %v8708_v5 = vsub.f32 %v8639_v61, %v39304_v45  ;;  %v9994_v8 = vpop.permute.xlu1 %9993 }
 0x6cc   : > { %v9173_v0 = vand.u32 4294901760, %v9172_v33  ;;  %v9997_v31 = vsel %vm2672_vm3, %v9994_v8, 0 }
 0x6cd   : > { %v8709_v7 = vand.u32 4294901760, %v8708_v5  ;;  %v39352_v40 = vand.u32 4294901760, %v9997_v31 }
 0x6ce   : > { %v37842_v12 = vpop.eup %37841  ;;  %v9174_v9 = vsub.f32 %v9172_v33, %v9173_v0 }
 0x6cf   : > { %v8179_v62 = vmul.f32 %v37842_v12, %v39250_v6  ;;  %34937 = vmatmul.mubr.f32.vlgmr.msra.gmra.mrb[16].mxu0 %v8254_v29  ;;  %v8710_v48 = vsub.f32 %v8708_v5, %v8709_v7  ;;  %v39337_v37 = vpop.permute.xlu1 %10447  ;;  %v39363_v23 = vsub.f32 %v9997_v31, %v39352_v40 }
 0x6d0   : > { %34970 = vmatpush3.msra.mxu0 %v39306_v3  ;;  %34971 = vmatprep.mubr.msk.f32.mxu0 %vm38058_vm2, %v38057_v13  ;;  %v9175_v39 = vand.u32 4294901760, %v9174_v9 }
 0x6d1   : > { %v8711_v42 = vand.u32 4294901760, %v8710_v48  ;;  %34974 = vmatprep.subr.mxu0 %v38057_v13  ;;  %v9092_v21 = vsel %vm2672_vm3, %v8179_v62, 0  ;;  %v10069_v49 = vand.u32 4294901760, %v39363_v23  ;;  %v10451_v62 = vsel %vm2672_vm3, %v39337_v37, 0 }
 0x6d2   : > { %v39316_v43 = vand.u32 4294901760, %v9092_v21 }
 0x6d3   : > { %34942 = vmatmul.mubr.f32.vlgmr.msra.gmra.mrb[24].mxu1 %v8711_v42  ;;  %v9996_v30 = vpop.permute.xlu1 %9995  ;;  %v10070_v56 = vsub.f32 %v39363_v23, %v10069_v49 }
 0x6d4   : > { %34945 = vmatpush3.msra.mxu1 %v8722_v51  ;;  %34946 = vmatprep.mubr.msk.f32.mxu1 %vm38058_vm2, %v38057_v13  ;;  %v9161_v24 = vsub.f32 %v9092_v21, %v39316_v43  ;;  %v9999_v34 = vsel %vm2672_vm3, %v9996_v30, 0  ;;  %v39422_v21 = vand.u32 4294901760, %v10451_v62 }
 0x6d5   : > { %34949 = vmatprep.subr.mxu1 %v38057_v13  ;;  %v39357_v29 = vand.u32 4294901760, %v9999_v34 }
 0x6d6   : > { %v9162_v6 = vand.u32 4294901760, %v9161_v24 }
 0x6d7   : > { %v39366_v32 = vsub.f32 %v9999_v34, %v39357_v29 }
 0x6d8   : > { %v9163_v10 = vsub.f32 %v9161_v24, %v9162_v6 }
 0x6d9   : > { %v10080_v52 = vand.u32 4294901760, %v39366_v32 }
 0x6da   : > { %v9164_v19 = vand.u32 4294901760, %v9163_v10 }
 0x6db   : > { %34947 = vmatmul.mubr.f32.vlgmr.msra.gmra.mrb[24].mxu1 %v39304_v45 }
 0x6dc   : > { %34950 = vmatpush3.msra.mxu1 %v8719_v59  ;;  %34972 = vmatmul.mubr.f32.vlgmr.msra.gmra.mrb[18].mxu0 %v9164_v19  ;;  %v10081_v59 = vsub.f32 %v39366_v32, %v10080_v52 }
 0x6dd   : > { %34975 = vmatpush3.msra.mxu0 %v9175_v39  ;;  %34951 = vmatprep.mubr.msk.f32.mxu1 %vm38058_vm2, %v38057_v13 }
 0x6de   : > { %34954 = vmatprep.subr.mxu1 %v38057_v13  ;;  %34976 = vmatprep.mubr.msk.f32.mxu0 %vm38058_vm2, %v38057_v13 }
 0x6df   : > { %34979 = vmatprep.subr.mxu0 %v38057_v13 }
 0x6e3   : > { %34952 = vmatmul.mubr.f32.vlgmr.msra.gmra.mrb[24].mxu1 %v8708_v5  ;;  %v10082_v5 = vand.u32 4294901760, %v10081_v59 }
 0x6e4   : > { %34955 = vmatpush3.msra.mxu1 %v39291_v53  ;;  %34977 = vmatmul.mubr.f32.vlgmr.msra.gmra.mrb[18].mxu0 %v39316_v43 }
 0x6e5   : > { %34980 = vmatpush3.msra.mxu0 %v9172_v33  ;;  %34956 = vmatprep.mubr.msk.f32.mxu1 %vm38058_vm2, %v38057_v13 }
 0x6e6   : > { %34959 = vmatprep.subr.mxu1 %v38057_v13  ;;  %34981 = vmatprep.mubr.msk.f32.mxu0 %vm38058_vm2, %v38057_v13 }
 0x6e7   : > { %34984 = vmatprep.subr.mxu0 %v38057_v13 }
 0x6eb   : > { %34957 = vmatmul.mubr.f32.vlgmr.msra.gmra.mrb[24].mxu1 %v8709_v7  ;;  %v10902_v7 = vpop.permute.xlu1 %10901 }
 0x6ec   : > { %34960 = vmatpush3.msra.mxu1 %v8720_v63  ;;  %34982 = vmatmul.mubr.f32.vlgmr.msra.gmra.mrb[18].mxu0 %v9161_v24  ;;  %v10071_v63 = vand.u32 4294901760, %v10070_v56  ;;  %v10905_v33 = vsel %vm2672_vm3, %v10902_v7, 0  ;;  %v10522_v24 = vsub.f32 %v10451_v62, %v39422_v21 }
 0x6ed   : > { %34985 = vmatpush3.msra.mxu0 %v39306_v3  ;;  %34961 = vmatprep.mubr.msk.f32.mxu1 %vm38058_vm2, %v38057_v13  ;;  %v39424_v51 = vand.u32 4294901760, %v10905_v33 }
 0x6ee   : > { %34964 = vmatprep.subr.mxu1 %v38057_v13  ;;  %34986 = vmatprep.mubr.msk.f32.mxu0 %vm38058_vm2, %v38057_v13  ;;  %v10523_v19 = vand.u32 4294901760, %v10522_v24 }
 0x6ef   : > { %v8172_v28 = vpop.xlane.xlu0 %8171  ;;  %34989 = vmatprep.subr.mxu0 %v38057_v13  ;;  %v10904_v12 = vpop.permute.xlu1 %10903 }
 0x6f0   : > { %37843 = vrcp.f32 %v8172_v28  ;;  %v10907_v48 = vsel %vm2672_vm3, %v10904_v12, 0  ;;  %v10524_v28 = vsub.f32 %v10522_v24, %v10523_v19 }
 0x6f3   : > { %34962 = vmatmul.mubr.f32.vlgmr.msra.gmra.mrb[24].mxu1 %v39304_v45  ;;  %v9542_v35 = vpop.permute.xlu0 %9541 }
 0x6f4   : > { %34965 = vmatpush3.msra.mxu1 %v39291_v53  ;;  %34987 = vmatmul.mubr.f32.vlgmr.msra.gmra.mrb[18].mxu0 %v9162_v6  ;;  %v39359_v38 = vand.u32 4294901760, %v9542_v35  ;;  %v10976_v6 = vsub.f32 %v10905_v33, %v39424_v51 }
 0x6f5   : > { %34990 = vmatpush3.msra.mxu0 %v9173_v0  ;;  %34966 = vmatprep.mubr.msk.f32.mxu1 %vm38058_vm2, %v38057_v13 }
 0x6f6   : > { %34999 = vmatprep.subr.mxu1 %v38057_v13  ;;  %34991 = vmatprep.mubr.msk.f32.mxu0 %vm38058_vm2, %v38057_v13  ;;  %v9625_v22 = vsub.f32 %v9542_v35, %v39359_v38  ;;  %v10977_v39 = vand.u32 4294901760, %v10976_v6  ;;  %v10525_v35 = vand.u32 4294901760, %v10524_v28 }
 0x6f7   : > { %34994 = vmatprep.subr.mxu0 %v38057_v13  ;;  %v10450_v50 = vpop.permute.xlu0 %10449 }
 0x6f8   : > { %v9626_v53 = vand.u32 4294901760, %v9625_v22  ;;  %v10453_v42 = vsel %vm2672_vm3, %v10450_v50, 0  ;;  %v10978_v30 = vsub.f32 %v10976_v6, %v10977_v39 }
 0x6f9   : > { %v39431_v0 = vand.u32 4294901760, %v10453_v42 }
 0x6fa   : > { %v37844_v25 = vpop.eup %37843  ;;  %v9627_v60 = vsub.f32 %v9625_v22, %v9626_v53 }
 0x6fb   : > { %v8180_v4 = vmul.f32 %v37844_v25, %v39268_v2  ;;  %34967 = vmatmul.mubr.f32.vlgmr.msra.gmra.mrb[24].mxu1 %v39304_v45  ;;  %v10533_v10 = vsub.f32 %v10453_v42, %v39431_v0 }
 0x6fc   : > { %35000 = vmatpush3.msra.mxu1 %v39359_v38  ;;  %34992 = vmatmul.mubr.f32.vlgmr.msra.gmra.mrb[18].mxu0 %v39316_v43 }
 0x6fd   : > { %34995 = vmatpush3.msra.mxu0 %v39306_v3  ;;  %34996 = vmatprep.mubr.msk.f32.mxu0 %vm38058_vm2, %v38057_v13  ;;  %v9545_v44 = vsel %vm2672_vm3, %v8180_v4, 0  ;;  %v9628_v3 = vand.u32 4294901760, %v9627_v60  ;;  %v10534_v37 = vand.u32 4294901760, %v10533_v10 }
 0x6fe   : > { %35029 = vmatprep.subr.mxu0 %v38057_v13  ;;  %35001 = vmatprep.mubr.msk.f32.mxu1 %vm38058_vm2, %v38057_v13  ;;  %v39381_v2 = vand.u32 4294901760, %v9545_v44 }
 0x6ff   : > { %35004 = vmatprep.subr.mxu1 %v38057_v13  ;;  %v10535_v34 = vsub.f32 %v10533_v10, %v10534_v37 }
 0x700   : > { %v9614_v54 = vsub.f32 %v9545_v44, %v39381_v2 }
 0x702   : > { %v9615_v57 = vand.u32 4294901760, %v9614_v54 }
 0x704   : > { %34997 = vmatmul.mubr.f32.vlgmr.msra.gmra.mrb[18].mxu0 %v39316_v43  ;;  %v9616_v61 = vsub.f32 %v9614_v54, %v9615_v57  ;;  %v39429_v43 = vand.u32 4294901760, %v10907_v48 }
 0x705   : > { %35030 = vmatpush3.xpose.msra.mxu0 %v39357_v29  ;;  %35031 = vmatprep.mubr.msk.f32.mxu0 %vm38058_vm2, %v38057_v13 }
 0x706   : > { %35034 = vmatprep.subr.mxu0 %v38057_v13  ;;  %v9617_v45 = vand.u32 4294901760, %v9616_v61  ;;  %v10987_v9 = vsub.f32 %v10907_v48, %v39429_v43 }
 0x708   : > { %35002 = vmatmul.mubr.f32.vlgmr.msra.gmra.mrb[26].mxu1 %v9617_v45  ;;  %35032 = vmatmul.mubr.f32.vlgmr.msra.gmra.mrb[20].mxu0 %v10071_v63  ;;  %v10988_v8 = vand.u32 4294901760, %v10987_v9 }
 0x709   : > { %35005 = vmatpush3.msra.mxu1 %v9628_v3  ;;  %35035 = vmatpush3.xpose.msra.mxu0 %v10082_v5 }
 0x70a   : > { %35006 = vmatprep.mubr.msk.f32.mxu1 %vm38058_vm2, %v38057_v13  ;;  %35009 = vmatprep.subr.mxu1 %v38057_v13  ;;  %v10989_v31 = vsub.f32 %v10987_v9, %v10988_v8 }
 0x70b   : > { %35036 = vmatprep.mubr.msk.f32.mxu0 %vm38058_vm2, %v38057_v13  ;;  %35039 = vmatprep.subr.mxu0 %v38057_v13 }
 0x70c   : > { %v10990_v25 = vand.u32 4294901760, %v10989_v31 }
 0x710   : > { %35007 = vmatmul.mubr.f32.vlgmr.msra.gmra.mrb[26].mxu1 %v39381_v2  ;;  %35037 = vmatmul.mubr.f32.vlgmr.msra.gmra.mrb[20].mxu0 %v39352_v40 }
 0x711   : > { %35010 = vmatpush3.msra.mxu1 %v9625_v22  ;;  %35040 = vmatpush3.xpose.msra.mxu0 %v39366_v32 }
 0x712   : > { %35011 = vmatprep.mubr.msk.f32.mxu1 %vm38058_vm2, %v38057_v13  ;;  %35014 = vmatprep.subr.mxu1 %v38057_v13 }
 0x713   : > { %35041 = vmatprep.mubr.msk.f32.mxu0 %vm38058_vm2, %v38057_v13  ;;  %35044 = vmatprep.subr.mxu0 %v38057_v13 }
 0x718   : > { %35012 = vmatmul.mubr.f32.vlgmr.msra.gmra.mrb[26].mxu1 %v9614_v54  ;;  %35042 = vmatmul.mubr.f32.vlgmr.msra.gmra.mrb[20].mxu0 %v39363_v23 }
 0x719   : > { %35015 = vmatpush3.msra.mxu1 %v39359_v38  ;;  %35045 = vmatpush3.xpose.msra.mxu0 %v39357_v29 }
 0x71a   : > { %35016 = vmatprep.mubr.msk.f32.mxu1 %vm38058_vm2, %v38057_v13  ;;  %35019 = vmatprep.subr.mxu1 %v38057_v13 }
 0x71b   : > { %35046 = vmatprep.mubr.msk.f32.mxu0 %vm38058_vm2, %v38057_v13  ;;  %35049 = vmatprep.subr.mxu0 %v38057_v13 }
 0x720   : > { %35017 = vmatmul.mubr.f32.vlgmr.msra.gmra.mrb[26].mxu1 %v9615_v57  ;;  %35047 = vmatmul.mubr.f32.vlgmr.msra.gmra.mrb[20].mxu0 %v10069_v49 }
 0x721   : > { %35020 = vmatpush3.msra.mxu1 %v9626_v53  ;;  %35050 = vmatpush3.xpose.msra.mxu0 %v10080_v52 }
 0x722   : > { %35021 = vmatprep.mubr.msk.f32.mxu1 %vm38058_vm2, %v38057_v13  ;;  %35024 = vmatprep.subr.mxu1 %v38057_v13 }
 0x723   : > { %35051 = vmatprep.mubr.msk.f32.mxu0 %vm38058_vm2, %v38057_v13  ;;  %35054 = vmatprep.subr.mxu0 %v38057_v13 }
 0x728   : > { %35022 = vmatmul.mubr.f32.vlgmr.msra.gmra.mrb[26].mxu1 %v39381_v2  ;;  %35052 = vmatmul.mubr.f32.vlgmr.msra.gmra.mrb[20].mxu0 %v39352_v40 }
 0x729   : > { %35025 = vmatpush3.msra.mxu1 %v39359_v38  ;;  %35055 = vmatpush3.xpose.msra.mxu0 %v39357_v29  ;;  %v10979_v29 = vand.u32 4294901760, %v10978_v30  ;;  %v10536_v38 = vand.u32 4294901760, %v10535_v34 }
 0x72a   : > { %35026 = vmatprep.mubr.msk.f32.mxu1 %vm38058_vm2, %v38057_v13  ;;  %35056 = vmatprep.mubr.msk.f32.mxu0 %vm38058_vm2, %v38057_v13 }
 0x72b   : > { %35059 = vmatprep.subr.mxu1 %v38057_v13  ;;  %35089 = vmatprep.subr.mxu0 %v38057_v13 }
 0x730   : > { %35027 = vmatmul.mubr.f32.vlgmr.msra.gmra.mrb[26].mxu1 %v39381_v2  ;;  %35057 = vmatmul.mubr.f32.vlgmr.msra.gmra.mrb[20].mxu0 %v39352_v40  ;;  %v11356_v40 = vpop.permute.xlu0 %11355 }
 0x731   : > { %35060 = vmatpush3.xpose.msra.mxu1 %v39431_v0  ;;  %35090 = vmatpush3.xpose.msra.mxu0 %v39429_v43  ;;  %v11359_v32 = vsel %vm2672_vm3, %v11356_v40, 0 }
 0x732   : > { %35061 = vmatprep.mubr.msk.f32.mxu1 %vm38058_vm2, %v38057_v13  ;;  %35064 = vmatprep.subr.mxu1 %v38057_v13  ;;  %v11429_v22 = vand.u32 4294901760, %v11359_v32 }
 0x733   : > { %35091 = vmatprep.mubr.msk.f32.mxu0 %vm38058_vm2, %v38057_v13  ;;  %35094 = vmatprep.subr.mxu0 %v38057_v13 }
 0x734   : > { %35062 = vmatmul.mubr.f32.vlgmr.msra.gmra.mrb[28].mxu1 %v10525_v35  ;;  %35092 = vmatmul.mubr.f32.vlgmr.msra.gmra.mrb[22].mxu0 %v10979_v29  ;;  %v11358_v23 = vpop.permute.xlu0 %11357  ;;  %v11430_v49 = vsub.f32 %v11359_v32, %v11429_v22 }
 0x735   : > { %35065 = vmatpush3.xpose.msra.mxu1 %v10536_v38  ;;  %35095 = vmatpush3.xpose.msra.mxu0 %v10990_v25  ;;  %v11361_v4 = vsel %vm2672_vm3, %v11358_v23, 0 }
 0x736   : > { %35066 = vmatprep.mubr.msk.f32.mxu1 %vm38058_vm2, %v38057_v13  ;;  %35069 = vmatprep.subr.mxu1 %v38057_v13  ;;  %v11364_v44 = vand.u32 4294901760, %v11361_v4  ;;  %v11431_v52 = vand.u32 4294901760, %v11430_v49 }
 0x737   : > { %35096 = vmatprep.mubr.msk.f32.mxu0 %vm38058_vm2, %v38057_v13  ;;  %35099 = vmatprep.subr.mxu0 %v38057_v13 }
 0x738   : > { %v11441_v2 = vsub.f32 %v11361_v4, %v11364_v44  ;;  %v11432_v54 = vsub.f32 %v11430_v49, %v11431_v52 }
 0x73a   : > { %v11442_v53 = vand.u32 4294901760, %v11441_v2  ;;  %v11433_v57 = vand.u32 4294901760, %v11432_v54 }
 0x73c   : > { %35067 = vmatmul.mubr.f32.vlgmr.msra.gmra.mrb[28].mxu1 %v39422_v21  ;;  %35097 = vmatmul.mubr.f32.vlgmr.msra.gmra.mrb[22].mxu0 %v39424_v51  ;;  %v11443_v56 = vsub.f32 %v11441_v2, %v11442_v53 }
 0x73d   : > { %35070 = vmatpush3.xpose.msra.mxu1 %v10533_v10  ;;  %35100 = vmatpush3.xpose.msra.mxu0 %v10987_v9 }
 0x73e   : > { %35071 = vmatprep.mubr.msk.f32.mxu1 %vm38058_vm2, %v38057_v13  ;;  %35074 = vmatprep.subr.mxu1 %v38057_v13  ;;  %v11444_v59 = vand.u32 4294901760, %v11443_v56 }
 0x73f   : > { %35101 = vmatprep.mubr.msk.f32.mxu0 %vm38058_vm2, %v38057_v13  ;;  %35104 = vmatprep.subr.mxu0 %v38057_v13 }
 0x744   : > { %35072 = vmatmul.mubr.f32.vlgmr.msra.gmra.mrb[28].mxu1 %v10522_v24  ;;  %35102 = vmatmul.mubr.f32.vlgmr.msra.gmra.mrb[22].mxu0 %v10976_v6 }
 0x745   : > { %35075 = vmatpush3.xpose.msra.mxu1 %v39431_v0  ;;  %35105 = vmatpush3.xpose.msra.mxu0 %v39429_v43 }
 0x746   : > { %35076 = vmatprep.mubr.msk.f32.mxu1 %vm38058_vm2, %v38057_v13  ;;  %35079 = vmatprep.subr.mxu1 %v38057_v13 }
 0x747   : > { %35106 = vmatprep.mubr.msk.f32.mxu0 %vm38058_vm2, %v38057_v13  ;;  %35109 = vmatprep.subr.mxu0 %v38057_v13 }
 0x74c   : > { %35077 = vmatmul.mubr.f32.vlgmr.msra.gmra.mrb[28].mxu1 %v10523_v19  ;;  %35107 = vmatmul.mubr.f32.vlgmr.msra.gmra.mrb[22].mxu0 %v10977_v39 }
 0x74d   : > { %35080 = vmatpush3.xpose.msra.mxu1 %v10534_v37  ;;  %35110 = vmatpush3.xpose.msra.mxu0 %v10988_v8 }
 0x74e   : > { %35081 = vmatprep.mubr.msk.f32.mxu1 %vm38058_vm2, %v38057_v13  ;;  %35084 = vmatprep.subr.mxu1 %v38057_v13 }
 0x74f   : > { %35111 = vmatprep.mubr.msk.f32.mxu0 %vm38058_vm2, %v38057_v13  ;;  %35114 = vmatprep.subr.mxu0 %v38057_v13 }
 0x754   : > { %35082 = vmatmul.mubr.f32.vlgmr.msra.gmra.mrb[28].mxu1 %v39422_v21  ;;  %35112 = vmatmul.mubr.f32.vlgmr.msra.gmra.mrb[22].mxu0 %v39424_v51 }
 0x755   : > { %35085 = vmatpush3.xpose.msra.mxu1 %v39431_v0  ;;  %35115 = vmatpush3.xpose.msra.mxu0 %v39429_v43 }
 0x756   : > { %35086 = vmatprep.mubr.msk.f32.mxu1 %vm38058_vm2, %v38057_v13  ;;  %35116 = vmatprep.mubr.msk.f32.mxu0 %vm38058_vm2, %v38057_v13 }
 0x757   : > { %35119 = vmatprep.subr.mxu1 %v38057_v13  ;;  %35149 = vmatprep.subr.mxu0 %v38057_v13 }
 0x75c   : > { %35087 = vmatmul.mubr.f32.vlgmr.msra.gmra.mrb[28].mxu1 %v39422_v21  ;;  %35117 = vmatmul.mubr.f32.vlgmr.msra.gmra.mrb[22].mxu0 %v39424_v51 }
 0x75d   : > { %35120 = vmatpush3.xpose.msra.mxu1 %v11364_v44  ;;  %35121 = vmatprep.mubr.msk.f32.mxu1 %vm38058_vm2, %v38057_v13 }
 0x75e   : > { %35124 = vmatprep.subr.mxu1 %v38057_v13  ;;  %35151 = vmatprep.mubr.msk.f32.mxu0 %vm38058_vm2, %v38057_v13 }
 0x760   : > { %35122 = vmatmul.mubr.f32.vlgmr.msra.gmra.mrb[30].mxu1 %v11433_v57 }
 0x761   : > { %35125 = vmatpush3.xpose.msra.mxu1 %v11444_v59  ;;  %35126 = vmatprep.mubr.msk.f32.mxu1 %vm38058_vm2, %v38057_v13 }
 0x762   : > { %35129 = vmatprep.subr.mxu1 %v38057_v13 }
 0x768   : > { %35127 = vmatmul.mubr.f32.vlgmr.msra.gmra.mrb[30].mxu1 %v11429_v22 }
 0x769   : > { %35130 = vmatpush3.xpose.msra.mxu1 %v11441_v2  ;;  %35131 = vmatprep.mubr.msk.f32.mxu1 %vm38058_vm2, %v38057_v13 }
 0x76a   : > { %35134 = vmatprep.subr.mxu1 %v38057_v13 }
 0x770   : > { %35132 = vmatmul.mubr.f32.vlgmr.msra.gmra.mrb[30].mxu1 %v11430_v49 }
 0x771   : > { %35135 = vmatpush3.xpose.msra.mxu1 %v11364_v44  ;;  %35136 = vmatprep.mubr.msk.f32.mxu1 %vm38058_vm2, %v38057_v13 }
 0x772   : > { %35139 = vmatprep.subr.mxu1 %v38057_v13 }
 0x778   : > { %35137 = vmatmul.mubr.f32.vlgmr.msra.gmra.mrb[30].mxu1 %v11431_v52 }
 0x779   : > { %35140 = vmatpush3.xpose.msra.mxu1 %v11442_v53  ;;  %35141 = vmatprep.mubr.msk.f32.mxu1 %vm38058_vm2, %v38057_v13 }
 0x77a   : > { %35144 = vmatprep.subr.mxu1 %v38057_v13 }
 0x780   : > { %35142 = vmatmul.mubr.f32.vlgmr.msra.gmra.mrb[30].mxu1 %v11429_v22 }
 0x781   : > { %35145 = vmatpush3.xpose.msra.mxu1 %v11364_v44  ;;  %35146 = vmatprep.mubr.msk.f32.mxu1 %vm38058_vm2, %v38057_v13 }
 0x782   : > { %35179 = vmatprep.subr.mxu1 %v38057_v13 }
 0x788   : > { %35147 = vmatmul.mubr.f32.vlgmr.msra.gmra.mrb[30].mxu1 %v11429_v22 }
 0x789   : > { %35181 = vmatprep.mubr.msk.f32.mxu1 %vm38058_vm2, %v38057_v13 }
 0x7a2   : > { %v39524_v60 = vpop.f32.mrb[16].mxu0 }
 0x7a3   : > { %v34938_v61 = vpop.f32.mrb[17].mxu0 }
 0x7ce   : > { %v39526_v45 = vpop.f32.mrb[24].mxu1 }
 0x7cf   : > { %v34968_v63 = vpop.f32.mrb[25].mxu1 }
 0x7d7   : > { %v39528_v3 = vpop.f32.mrb[18].mxu0 }
 0x7d8   : > { %v34998_v5 = vpop.f32.mrb[19].mxu0 }
 0x803   : > { %v39530_v7 = vpop.f32.mrb[26].mxu1  ;;  %v10443_v12 = vpop.f32.mrb[20].mxu0 }
 0x804   : > { %v35028_v50 = vpop.f32.mrb[27].mxu1  ;;  %v35058_v62 = vpop.f32.mrb[21].mxu0  ;;  %v11809_v33 = vsel %vm2672_vm3, %v10443_v12, -inf }
 0x805   : > { %11810 = vmax.xlane.f32.xlu1 %v11809_v33 }
 0x82f   : > { %v10897_v48 = vpop.f32.mrb[28].mxu1  ;;  %v11351_v42 = vpop.f32.mrb[22].mxu0 }
 0x830   : > { %v35088_v21 = vpop.f32.mrb[29].mxu1  ;;  %v35118_v51 = vpop.f32.mrb[23].mxu0  ;;  %v11812_v43 = vsel %vm2672_vm3, %v10897_v48, -inf  ;;  %v11815_v0 = vsel %vm2672_vm3, %v11351_v42, -inf }
 0x831   : > { %11813 = vmax.xlane.f32.xlu0 %v11812_v43 }
 0x835   : > { %11816 = vmax.xlane.f32.xlu0 %v11815_v0 }
 0x85b   : > { %v11805_v24 = vpop.f32.mrb[30].mxu1 }
 0x85c   : > { %v35148_v6 = vpop.f32.mrb[31].mxu1  ;;  %v11818_v9 = vsel %vm2672_vm3, %v11805_v24, -inf }
 0x85d   : > { %11819 = vmax.xlane.f32.xlu0 %v11818_v9 }
 0x892   : > { %v11811_v10 = vpop.xlane.xlu1 %11810 }
 0x893   : > { %v11821_v19 = vsub.f32 %v10443_v12, %v11811_v10 }
 0x895   : > { %v11825_v39 = vmul.f32 1.442695, %v11821_v19 }
 0x897   : > { %37845 = vpow2.f32 %v11825_v39 }
 0x8a1   : > { %v37846_v8 = vpop.eup %37845 }
 0x8a2   : > { %v11833_v37 = vsel %vm2672_vm3, %v37846_v8, 0.0 }
 0x8a3   : > { %11834 = vadd.xlane.f32.xlu1 %v11833_v37 }
 0x8b4   : > { %11853 = vrot.lane.b32.xlu1 %v38966_v41, %s38060_s14 }
 0x8be   : > { %v11814_v28 = vpop.xlane.xlu0 %11813 }
 0x8bf   : > { %v11822_v30 = vsub.f32 %v10897_v48, %v11814_v28 }
 0x8c1   : > { %v11827_v31 = vmul.f32 1.442695, %v11822_v30 }
 0x8c2   : > { %v11817_v34 = vpop.xlane.xlu0 %11816 }
 0x8c3   : > { %37847 = vpow2.f32 %v11827_v31  ;;  %v11823_v35 = vsub.f32 %v11351_v42, %v11817_v34 }
 0x8c5   : > { %v11829_v29 = vmul.f32 1.442695, %v11823_v35 }
 0x8c7   : > { %37849 = vpow2.f32 %v11829_v29 }
 0x8cd   : > { %v39539_v38 = vpop.eup %37847 }
 0x8ce   : > { %v11836_v25 = vsel %vm2672_vm3, %v39539_v38, 0.0 }
 0x8cf   : > { %11837 = vadd.xlane.f32.xlu0 %v11836_v25 }
 0x8d1   : > { %v39543_v40 = vpop.eup %37849 }
 0x8d2   : > { %v11839_v23 = vsel %vm2672_vm3, %v39543_v40, 0.0 }
 0x8d8   : > { %11840 = vadd.xlane.f32.xlu1 %v11839_v23 }
 0x8e5   : > { %12305 = vrot.lane.b32.xlu0 %v38968_v18, %s38060_s14 }
 0x8e9   : > { %12757 = vrot.lane.b32.xlu1 %v38981_v26, %s38060_s14 }
 0x8ea   : > { %v11820_v32 = vpop.xlane.xlu0 %11819 }
 0x8eb   : > { %v11824_v4 = vsub.f32 %v11805_v24, %v11820_v32 }
 0x8ed   : > { %13661 = vrot.lane.b32.xlu1 %v38604_v55, %s38061_s15  ;;  %v11831_v22 = vmul.f32 1.442695, %v11824_v4 }
 0x8ef   : > { %37851 = vpow2.f32 %v11831_v22 }
 0x8f1   : > { %14115 = vrot.lane.b32.xlu1 %v38602_v16, %s38061_s15 }
 0x8f5   : > { %13663 = vrot.lane.b32.xlu1 %v38619_v27, %s38061_s15 }
 0x8f9   : > { %14569 = vrot.lane.b32.xlu1 %v38608_v47, %s38061_s15  ;;  %v39561_v44 = vpop.eup %37851 }
 0x8fa   : > { %v11842_v49 = vsel %vm2672_vm3, %v39561_v44, 0.0 }
 0x8fd   : > { %14571 = vrot.lane.b32.xlu1 %v38625_v14, %s38061_s15 }
 0x904   : > { %11843 = vadd.xlane.f32.xlu0 %v11842_v49 }
 0x91a   : > { %13209 = vrot.lane.b32.xlu0 %v38978_v36, %s38060_s14  ;;  %s495_s14 = scalar_lea.vmem %s41491_s5, %s41518_s29 }
 0x91e   : > { %14117 = vrot.lane.b32.xlu0 %v38639_v58, %s38061_s15 }
 0x922   : > { %15023 = vrot.lane.b32.xlu0 %v38606_v46, %s38061_s15 }
 0x926   : > { %15025 = vrot.lane.b32.xlu0 %v38623_v17, %s38061_s15 }
 0x930   : > { %v11835_v2 = vpop.xlane.xlu1 %11834 }
 0x931   : > { %37853 = vrcp.f32 %v11835_v2 }
 0x934   : > { %v11854_v52 = vpop.permute.xlu1 %11853 }
 0x935   : > { %v11860_v53 = vand.u32 4294901760, %v11854_v52 }
 0x937   : > { %35150 = vmatpush3.msra.mxu0 %v11860_v53  ;;  %v11937_v57 = vsub.f32 %v11854_v52, %v11860_v53 }
 0x938   : > { %35154 = vmatprep.subr.mxu0 %v38057_v13 }
 0x939   : > { %v11938_v63 = vand.u32 4294901760, %v11937_v57 }
 0x93b   : > { %v37854_v54 = vpop.eup %37853  ;;  %v11939_v50 = vsub.f32 %v11937_v57, %v11938_v63 }
 0x93c   : > { %v11849_v56 = vmul.f32 %v37854_v54, %v37846_v8 }
 0x93d   : > { %v11940_v48 = vand.u32 4294901760, %v11939_v50 }
 0x93e   : > { %v11857_v59 = vsel %vm2672_vm3, %v11849_v56, 0 }
 0x93f   : > { %v11925_v61 = vand.u32 4294901760, %v11857_v59 }
 0x941   : > { %v11926_v5 = vsub.f32 %v11857_v59, %v11925_v61 }
 0x943   : > { %v11927_v12 = vand.u32 4294901760, %v11926_v5 }
 0x945   : > { %v11928_v62 = vsub.f32 %v11926_v5, %v11927_v12 }
 0x947   : > { %v11929_v33 = vand.u32 4294901760, %v11928_v62 }
 0x949   : > { %35152 = vmatmul.mubr.f32.vlgmr.msra.gmra.mrb[24].mxu0 %v11929_v33 }
 0x94a   : > { %35155 = vmatpush3.msra.mxu0 %v11940_v48  ;;  %35156 = vmatprep.mubr.msk.f32.mxu0 %vm38058_vm2, %v38057_v13 }
 0x94b   : > { %35159 = vmatprep.subr.mxu0 %v38057_v13 }
 0x951   : > { %35157 = vmatmul.mubr.f32.vlgmr.msra.gmra.mrb[24].mxu0 %v11925_v61 }
 0x952   : > { %35160 = vmatpush3.msra.mxu0 %v11937_v57  ;;  %35161 = vmatprep.mubr.msk.f32.mxu0 %vm38058_vm2, %v38057_v13 }
 0x953   : > { %35164 = vmatprep.subr.mxu0 %v38057_v13 }
 0x959   : > { %35162 = vmatmul.mubr.f32.vlgmr.msra.gmra.mrb[24].mxu0 %v11926_v5 }
 0x95a   : > { %35165 = vmatpush3.msra.mxu0 %v11860_v53  ;;  %35166 = vmatprep.mubr.msk.f32.mxu0 %vm38058_vm2, %v38057_v13 }
 0x95b   : > { %35169 = vmatprep.subr.mxu0 %v38057_v13 }
 0x95c   : > { %v11838_v42 = vpop.xlane.xlu0 %11837 }
 0x95d   : > { %37855 = vrcp.f32 %v11838_v42 }
 0x960   : > { %v12306_v21 = vpop.permute.xlu0 %12305 }
 0x961   : > { %v39584_v51 = vand.u32 4294901760, %v12306_v21  ;;  %35167 = vmatmul.mubr.f32.vlgmr.msra.gmra.mrb[24].mxu0 %v11927_v12 }
 0x962   : > { %35170 = vmatpush3.msra.mxu0 %v11938_v63  ;;  %35171 = vmatprep.mubr.msk.f32.mxu0 %vm38058_vm2, %v38057_v13 }
 0x963   : > { %35180 = vmatpush3.msra.mxu1 %v39584_v51  ;;  %35174 = vmatprep.subr.mxu0 %v38057_v13  ;;  %v12389_v6 = vsub.f32 %v12306_v21, %v39584_v51 }
 0x964   : > { %35184 = vmatprep.subr.mxu1 %v38057_v13 }
 0x965   : > { %v11841_v43 = vpop.xlane.xlu1 %11840  ;;  %v12390_v39 = vand.u32 4294901760, %v12389_v6 }
 0x966   : > { %37857 = vrcp.f32 %v11841_v43 }
 0x967   : > { %v37856_v0 = vpop.eup %37855  ;;  %v12391_v31 = vsub.f32 %v12389_v6, %v12390_v39 }
 0x968   : > { %v11850_v24 = vmul.f32 %v37856_v0, %v39539_v38 }
 0x969   : > { %35172 = vmatmul.mubr.f32.vlgmr.msra.gmra.mrb[24].mxu0 %v11925_v61  ;;  %v12758_v9 = vpop.permute.xlu1 %12757  ;;  %v12392_v23 = vand.u32 4294901760, %v12391_v31 }
 0x96a   : > { %35175 = vmatpush3.msra.mxu0 %v11860_v53  ;;  %35176 = vmatprep.mubr.msk.f32.mxu0 %vm38058_vm2, %v38057_v13  ;;  %v12309_v10 = vsel %vm2672_vm3, %v11850_v24, 0  ;;  %v39599_v8 = vand.u32 4294901760, %v12758_v9 }
 0x96b   : > { %35209 = vmatprep.subr.mxu0 %v38057_v13  ;;  %v39597_v19 = vand.u32 4294901760, %v12309_v10 }
 0x96c   : > { %v12841_v35 = vsub.f32 %v12758_v9, %v39599_v8 }
 0x96d   : > { %v12378_v37 = vsub.f32 %v12309_v10, %v39597_v19  ;;  %v13662_v54 = vpop.permute.xlu1 %13661 }
 0x96e   : > { %v12842_v4 = vand.u32 4294901760, %v12841_v35 }
 0x96f   : > { %v12379_v28 = vand.u32 4294901760, %v12378_v37 }
 0x970   : > { %v37858_v30 = vpop.eup %37857  ;;  %v12843_v49 = vsub.f32 %v12841_v35, %v12842_v4 }
 0x971   : > { %v11851_v34 = vmul.f32 %v37858_v30, %v39543_v40  ;;  %35177 = vmatmul.mubr.f32.vlgmr.msra.gmra.mrb[24].mxu0 %v11925_v61  ;;  %v12380_v29 = vsub.f32 %v12378_v37, %v12379_v28  ;;  %v39630_v56 = vpop.permute.xlu1 %14115  ;;  %v13665_v61 = vsel %vm2672_vm3, %v13662_v54, 0 }
 0x972   : > { %35210 = vmatpush3.msra.mxu0 %v39599_v8  ;;  %35211 = vmatprep.mubr.msk.f32.mxu0 %vm38058_vm2, %v38057_v13  ;;  %v12844_v53 = vand.u32 4294901760, %v12843_v49  ;;  %v39645_v12 = vand.u32 4294901760, %v13665_v61 }
 0x973   : > { %v12381_v38 = vand.u32 4294901760, %v12380_v29  ;;  %35214 = vmatprep.subr.mxu0 %v38057_v13  ;;  %v12761_v25 = vsel %vm2672_vm3, %v11851_v34, 0 }
 0x974   : > { %v39609_v32 = vand.u32 4294901760, %v12761_v25  ;;  %v39656_v48 = vsub.f32 %v13665_v61, %v39645_v12 }
 0x975   : > { %35182 = vmatmul.mubr.f32.vlgmr.msra.gmra.mrb[32].mxu1 %v12381_v38  ;;  %v13664_v59 = vpop.permute.xlu1 %13663 }
 0x976   : > { %35185 = vmatpush3.msra.mxu1 %v12392_v23  ;;  %35186 = vmatprep.mubr.msk.f32.mxu1 %vm38058_vm2, %v38057_v13  ;;  %v12830_v40 = vsub.f32 %v12761_v25, %v39609_v32  ;;  %v13667_v63 = vsel %vm2672_vm3, %v13664_v59, 0  ;;  %v13737_v0 = vand.u32 4294901760, %v39656_v48  ;;  %v14119_v25 = vsel %vm2672_vm3, %v39630_v56, 0 }
 0x977   : > { %35189 = vmatprep.subr.mxu1 %v38057_v13  ;;  %v39650_v50 = vand.u32 4294901760, %v13667_v63 }
 0x978   : > { %v12831_v22 = vand.u32 4294901760, %v12830_v40  ;;  %v13738_v10 = vsub.f32 %v39656_v48, %v13737_v0 }
 0x979   : > { %v39659_v42 = vsub.f32 %v13667_v63, %v39650_v50 }
 0x97a   : > { %v12832_v2 = vsub.f32 %v12830_v40, %v12831_v22  ;;  %v13739_v30 = vand.u32 4294901760, %v13738_v10 }
 0x97b   : > { %v13748_v24 = vand.u32 4294901760, %v39659_v42 }
 0x97c   : > { %v12833_v52 = vand.u32 4294901760, %v12832_v2 }
 0x97d   : > { %35187 = vmatmul.mubr.f32.vlgmr.msra.gmra.mrb[32].mxu1 %v39597_v19 }
 0x97e   : > { %35190 = vmatpush3.msra.mxu1 %v12389_v6  ;;  %35212 = vmatmul.mubr.f32.vlgmr.msra.gmra.mrb[26].mxu0 %v12833_v52 }
 0x97f   : > { %35215 = vmatpush3.msra.mxu0 %v12844_v53  ;;  %35191 = vmatprep.mubr.msk.f32.mxu1 %vm38058_vm2, %v38057_v13 }
 0x980   : > { %35194 = vmatprep.subr.mxu1 %v38057_v13  ;;  %35216 = vmatprep.mubr.msk.f32.mxu0 %vm38058_vm2, %v38057_v13 }
 0x981   : > { %35219 = vmatprep.subr.mxu0 %v38057_v13 }
 0x985   : > { %35192 = vmatmul.mubr.f32.vlgmr.msra.gmra.mrb[32].mxu1 %v12378_v37 }
 0x986   : > { %35195 = vmatpush3.msra.mxu1 %v39584_v51  ;;  %35217 = vmatmul.mubr.f32.vlgmr.msra.gmra.mrb[26].mxu0 %v39609_v32 }
 0x987   : > { %35220 = vmatpush3.msra.mxu0 %v12841_v35  ;;  %35196 = vmatprep.mubr.msk.f32.mxu1 %vm38058_vm2, %v38057_v13  ;;  %v14570_v35 = vpop.permute.xlu1 %14569 }
 0x988   : > { %35199 = vmatprep.subr.mxu1 %v38057_v13  ;;  %35221 = vmatprep.mubr.msk.f32.mxu0 %vm38058_vm2, %v38057_v13  ;;  %v14573_v23 = vsel %vm2672_vm3, %v14570_v35, 0 }
 0x989   : > { %35224 = vmatprep.subr.mxu0 %v38057_v13 }
 0x98b   : > { %v14572_v29 = vpop.permute.xlu1 %14571 }
 0x98d   : > { %35197 = vmatmul.mubr.f32.vlgmr.msra.gmra.mrb[32].mxu1 %v12379_v28 }
 0x98e   : > { %35200 = vmatpush3.msra.mxu1 %v12390_v39  ;;  %35222 = vmatmul.mubr.f32.vlgmr.msra.gmra.mrb[26].mxu0 %v12830_v40  ;;  %v13749_v39 = vsub.f32 %v39659_v42, %v13748_v24  ;;  %v39715_v40 = vand.u32 4294901760, %v14119_v25 }
 0x98f   : > { %35225 = vmatpush3.msra.mxu0 %v39599_v8  ;;  %35201 = vmatprep.mubr.msk.f32.mxu1 %vm38058_vm2, %v38057_v13 }
 0x990   : > { %35204 = vmatprep.subr.mxu1 %v38057_v13  ;;  %35226 = vmatprep.mubr.msk.f32.mxu0 %vm38058_vm2, %v38057_v13  ;;  %v13750_v34 = vand.u32 4294901760, %v13749_v39  ;;  %v14190_v52 = vsub.f32 %v14119_v25, %v39715_v40 }
 0x991   : > { %v11844_v57 = vpop.xlane.xlu0 %11843  ;;  %35229 = vmatprep.subr.mxu0 %v38057_v13 }
 0x992   : > { %37859 = vrcp.f32 %v11844_v57  ;;  %v14191_v57 = vand.u32 4294901760, %v14190_v52 }
 0x995   : > { %35202 = vmatmul.mubr.f32.vlgmr.msra.gmra.mrb[32].mxu1 %v39597_v19  ;;  %v13210_v5 = vpop.permute.xlu0 %13209 }
 0x996   : > { %35205 = vmatpush3.msra.mxu1 %v39584_v51  ;;  %35227 = vmatmul.mubr.f32.vlgmr.msra.gmra.mrb[26].mxu0 %v12831_v22  ;;  %v39652_v62 = vand.u32 4294901760, %v13210_v5  ;;  %v39717_v22 = vand.u32 4294901760, %v14573_v23 }
 0x997   : > { %35230 = vmatpush3.msra.mxu0 %v12842_v4  ;;  %35206 = vmatprep.mubr.msk.f32.mxu1 %vm38058_vm2, %v38057_v13 }
 0x998   : > { %35239 = vmatprep.subr.mxu1 %v38057_v13  ;;  %35231 = vmatprep.mubr.msk.f32.mxu0 %vm38058_vm2, %v38057_v13  ;;  %v13293_v51 = vsub.f32 %v13210_v5, %v39652_v62  ;;  %v14644_v53 = vsub.f32 %v14573_v23, %v39717_v22  ;;  %v14192_v5 = vsub.f32 %v14190_v52, %v14191_v57 }
 0x999   : > { %35234 = vmatprep.subr.mxu0 %v38057_v13  ;;  %v14118_v38 = vpop.permute.xlu0 %14117 }
 0x99a   : > { %v13294_v6 = vand.u32 4294901760, %v13293_v51  ;;  %v14121_v4 = vsel %vm2672_vm3, %v14118_v38, 0  ;;  %v14645_v59 = vand.u32 4294901760, %v14644_v53 }
 0x99b   : > { %v39724_v2 = vand.u32 4294901760, %v14121_v4 }
 0x99c   : > { %v37860_v33 = vpop.eup %37859 }
 0x99d   : > { %v11852_v21 = vmul.f32 %v37860_v33, %v39561_v44  ;;  %35207 = vmatmul.mubr.f32.vlgmr.msra.gmra.mrb[32].mxu1 %v39597_v19  ;;  %v14201_v56 = vsub.f32 %v14121_v4, %v39724_v2  ;;  %v14646_v33 = vsub.f32 %v14644_v53, %v14645_v59 }
 0x99e   : > { %35240 = vmatpush3.msra.mxu1 %v39652_v62  ;;  %35232 = vmatmul.mubr.f32.vlgmr.msra.gmra.mrb[26].mxu0 %v39609_v32 }
 0x99f   : > { %35235 = vmatpush3.msra.mxu0 %v39599_v8  ;;  %35236 = vmatprep.mubr.msk.f32.mxu0 %vm38058_vm2, %v38057_v13  ;;  %v13213_v43 = vsel %vm2672_vm3, %v11852_v21, 0  ;;  %v13295_v8 = vsub.f32 %v13293_v51, %v13294_v6  ;;  %v14202_v63 = vand.u32 4294901760, %v14201_v56 }
 0x9a0   : > { %35269 = vmatprep.subr.mxu0 %v38057_v13  ;;  %35241 = vmatprep.mubr.msk.f32.mxu1 %vm38058_vm2, %v38057_v13  ;;  %v39674_v44 = vand.u32 4294901760, %v13213_v43 }
 0x9a1   : > { %35244 = vmatprep.subr.mxu1 %v38057_v13  ;;  %v13296_v31 = vand.u32 4294901760, %v13295_v8 }
 0x9a2   : > { %v13282_v9 = vsub.f32 %v13213_v43, %v39674_v44 }
 0x9a4   : > { %v13283_v19 = vand.u32 4294901760, %v13282_v9 }
 0x9a6   : > { %35237 = vmatmul.mubr.f32.vlgmr.msra.gmra.mrb[26].mxu0 %v39609_v32  ;;  %v13284_v37 = vsub.f32 %v13282_v9, %v13283_v19  ;;  %v14575_v32 = vsel %vm2672_vm3, %v14572_v29, 0 }
 0x9a7   : > { %35270 = vmatpush3.xpose.msra.mxu0 %v39650_v50  ;;  %35271 = vmatprep.mubr.msk.f32.mxu0 %vm38058_vm2, %v38057_v13  ;;  %v39722_v49 = vand.u32 4294901760, %v14575_v32 }
 0x9a8   : > { %35274 = vmatprep.subr.mxu0 %v38057_v13  ;;  %v13285_v28 = vand.u32 4294901760, %v13284_v37 }
 0x9a9   : > { %v14655_v54 = vsub.f32 %v14575_v32, %v39722_v49 }
 0x9aa   : > { %35242 = vmatmul.mubr.f32.vlgmr.msra.gmra.mrb[34].mxu1 %v13285_v28  ;;  %35272 = vmatmul.mubr.f32.vlgmr.msra.gmra.mrb[28].mxu0 %v13739_v30 }
 0x9ab   : > { %35245 = vmatpush3.msra.mxu1 %v13296_v31  ;;  %35275 = vmatpush3.xpose.msra.mxu0 %v13750_v34  ;;  %v14656_v61 = vand.u32 4294901760, %v14655_v54 }
 0x9ac   : > { %35246 = vmatprep.mubr.msk.f32.mxu1 %vm38058_vm2, %v38057_v13  ;;  %35249 = vmatprep.subr.mxu1 %v38057_v13 }
 0x9ad   : > { %35276 = vmatprep.mubr.msk.f32.mxu0 %vm38058_vm2, %v38057_v13  ;;  %35279 = vmatprep.subr.mxu0 %v38057_v13 }
 0x9b2   : > { %35247 = vmatmul.mubr.f32.vlgmr.msra.gmra.mrb[34].mxu1 %v39674_v44  ;;  %35277 = vmatmul.mubr.f32.vlgmr.msra.gmra.mrb[28].mxu0 %v39645_v12 }
 0x9b3   : > { %35250 = vmatpush3.msra.mxu1 %v13293_v51  ;;  %35280 = vmatpush3.xpose.msra.mxu0 %v39659_v42  ;;  %v14647_v42 = vand.u32 4294901760, %v14646_v33 }
 0x9b4   : > { %35251 = vmatprep.mubr.msk.f32.mxu1 %vm38058_vm2, %v38057_v13  ;;  %35254 = vmatprep.subr.mxu1 %v38057_v13 }
 0x9b5   : > { %35281 = vmatprep.mubr.msk.f32.mxu0 %vm38058_vm2, %v38057_v13  ;;  %35284 = vmatprep.subr.mxu0 %v38057_v13 }
 0x9ba   : > { %35252 = vmatmul.mubr.f32.vlgmr.msra.gmra.mrb[34].mxu1 %v13282_v9  ;;  %35282 = vmatmul.mubr.f32.vlgmr.msra.gmra.mrb[28].mxu0 %v39656_v48  ;;  %v14657_v48 = vsub.f32 %v14655_v54, %v14656_v61 }
 0x9bb   : > { %35255 = vmatpush3.msra.mxu1 %v39652_v62  ;;  %35285 = vmatpush3.xpose.msra.mxu0 %v39650_v50 }
 0x9bc   : > { %35256 = vmatprep.mubr.msk.f32.mxu1 %vm38058_vm2, %v38057_v13  ;;  %35259 = vmatprep.subr.mxu1 %v38057_v13  ;;  %v14658_v51 = vand.u32 4294901760, %v14657_v48 }
 0x9bd   : > { %35286 = vmatprep.mubr.msk.f32.mxu0 %vm38058_vm2, %v38057_v13  ;;  %35289 = vmatprep.subr.mxu0 %v38057_v13 }
 0x9c2   : > { %35257 = vmatmul.mubr.f32.vlgmr.msra.gmra.mrb[34].mxu1 %v13283_v19  ;;  %35287 = vmatmul.mubr.f32.vlgmr.msra.gmra.mrb[28].mxu0 %v13737_v0 }
 0x9c3   : > { %35260 = vmatpush3.msra.mxu1 %v13294_v6  ;;  %35290 = vmatpush3.xpose.msra.mxu0 %v13748_v24 }
 0x9c4   : > { %35261 = vmatprep.mubr.msk.f32.mxu1 %vm38058_vm2, %v38057_v13  ;;  %35264 = vmatprep.subr.mxu1 %v38057_v13 }
 0x9c5   : > { %35291 = vmatprep.mubr.msk.f32.mxu0 %vm38058_vm2, %v38057_v13  ;;  %35294 = vmatprep.subr.mxu0 %v38057_v13 }
 0x9ca   : > { %35262 = vmatmul.mubr.f32.vlgmr.msra.gmra.mrb[34].mxu1 %v39674_v44  ;;  %35292 = vmatmul.mubr.f32.vlgmr.msra.gmra.mrb[28].mxu0 %v39645_v12 }
 0x9cb   : > { %35265 = vmatpush3.msra.mxu1 %v39652_v62  ;;  %35295 = vmatpush3.xpose.msra.mxu0 %v39650_v50  ;;  %v14203_v62 = vsub.f32 %v14201_v56, %v14202_v63  ;;  %v14193_v50 = vand.u32 4294901760, %v14192_v5 }
 0x9cc   : > { %35266 = vmatprep.mubr.msk.f32.mxu1 %vm38058_vm2, %v38057_v13  ;;  %35296 = vmatprep.mubr.msk.f32.mxu0 %vm38058_vm2, %v38057_v13 }
 0x9cd   : > { %35299 = vmatprep.subr.mxu1 %v38057_v13  ;;  %35329 = vmatprep.subr.mxu0 %v38057_v13  ;;  %v14204_v21 = vand.u32 4294901760, %v14203_v62 }
 0x9d2   : > { %35267 = vmatmul.mubr.f32.vlgmr.msra.gmra.mrb[34].mxu1 %v39674_v44  ;;  %35297 = vmatmul.mubr.f32.vlgmr.msra.gmra.mrb[28].mxu0 %v39645_v12  ;;  %v15024_v12 = vpop.permute.xlu0 %15023 }
 0x9d3   : > { %35300 = vmatpush3.xpose.msra.mxu1 %v39724_v2  ;;  %35330 = vmatpush3.xpose.msra.mxu0 %v39722_v49  ;;  %v15027_v0 = vsel %vm2672_vm3, %v15024_v12, 0 }
 0x9d4   : > { %35301 = vmatprep.mubr.msk.f32.mxu1 %vm38058_vm2, %v38057_v13  ;;  %35304 = vmatprep.subr.mxu1 %v38057_v13  ;;  %v15097_v24 = vand.u32 4294901760, %v15027_v0 }
 0x9d5   : > { %35331 = vmatprep.mubr.msk.f32.mxu0 %vm38058_vm2, %v38057_v13  ;;  %35334 = vmatprep.subr.mxu0 %v38057_v13 }
 0x9d6   : > { %35302 = vmatmul.mubr.f32.vlgmr.msra.gmra.mrb[36].mxu1 %v14193_v50  ;;  %35332 = vmatmul.mubr.f32.vlgmr.msra.gmra.mrb[30].mxu0 %v14647_v42  ;;  %v15026_v43 = vpop.permute.xlu0 %15025  ;;  %v15098_v9 = vsub.f32 %v15027_v0, %v15097_v24 }
 0x9d7   : > { %35305 = vmatpush3.xpose.msra.mxu1 %v14204_v21  ;;  %35335 = vmatpush3.xpose.msra.mxu0 %v14658_v51  ;;  %v15029_v44 = vsel %vm2672_vm3, %v15026_v43, 0 }
 0x9d8   : > { %35306 = vmatprep.mubr.msk.f32.mxu1 %vm38058_vm2, %v38057_v13  ;;  %35309 = vmatprep.subr.mxu1 %v38057_v13  ;;  %v15032_v6 = vand.u32 4294901760, %v15029_v44  ;;  %v15099_v19 = vand.u32 4294901760, %v15098_v9 }
 0x9d9   : > { %35336 = vmatprep.mubr.msk.f32.mxu0 %vm38058_vm2, %v38057_v13  ;;  %35339 = vmatprep.subr.mxu0 %v38057_v13 }
 0x9da   : > { %v15109_v10 = vsub.f32 %v15029_v44, %v15032_v6  ;;  %v15100_v8 = vsub.f32 %v15098_v9, %v15099_v19 }
 0x9dc   : > { %v15110_v39 = vand.u32 4294901760, %v15109_v10  ;;  %v15101_v28 = vand.u32 4294901760, %v15100_v8 }
 0x9de   : > { %35307 = vmatmul.mubr.f32.vlgmr.msra.gmra.mrb[36].mxu1 %v39715_v40  ;;  %35337 = vmatmul.mubr.f32.vlgmr.msra.gmra.mrb[30].mxu0 %v39717_v22  ;;  %v15111_v37 = vsub.f32 %v15109_v10, %v15110_v39 }
 0x9df   : > { %35310 = vmatpush3.xpose.msra.mxu1 %v14201_v56  ;;  %35340 = vmatpush3.xpose.msra.mxu0 %v14655_v54 }
 0x9e0   : > { %35311 = vmatprep.mubr.msk.f32.mxu1 %vm38058_vm2, %v38057_v13  ;;  %35314 = vmatprep.subr.mxu1 %v38057_v13  ;;  %v15112_v30 = vand.u32 4294901760, %v15111_v37 }
 0x9e1   : > { %35341 = vmatprep.mubr.msk.f32.mxu0 %vm38058_vm2, %v38057_v13  ;;  %35344 = vmatprep.subr.mxu0 %v38057_v13 }
 0x9e6   : > { %35312 = vmatmul.mubr.f32.vlgmr.msra.gmra.mrb[36].mxu1 %v14190_v52  ;;  %35342 = vmatmul.mubr.f32.vlgmr.msra.gmra.mrb[30].mxu0 %v14644_v53 }
 0x9e7   : > { %35315 = vmatpush3.xpose.msra.mxu1 %v39724_v2  ;;  %35345 = vmatpush3.xpose.msra.mxu0 %v39722_v49 }
 0x9e8   : > { %35316 = vmatprep.mubr.msk.f32.mxu1 %vm38058_vm2, %v38057_v13  ;;  %35319 = vmatprep.subr.mxu1 %v38057_v13 }
 0x9e9   : > { %35346 = vmatprep.mubr.msk.f32.mxu0 %vm38058_vm2, %v38057_v13  ;;  %35349 = vmatprep.subr.mxu0 %v38057_v13 }
 0x9ee   : > { %35317 = vmatmul.mubr.f32.vlgmr.msra.gmra.mrb[36].mxu1 %v14191_v57  ;;  %35347 = vmatmul.mubr.f32.vlgmr.msra.gmra.mrb[30].mxu0 %v14645_v59 }
 0x9ef   : > { %35320 = vmatpush3.xpose.msra.mxu1 %v14202_v63  ;;  %35350 = vmatpush3.xpose.msra.mxu0 %v14656_v61 }
 0x9f0   : > { %35321 = vmatprep.mubr.msk.f32.mxu1 %vm38058_vm2, %v38057_v13  ;;  %35324 = vmatprep.subr.mxu1 %v38057_v13 }
 0x9f1   : > { %35351 = vmatprep.mubr.msk.f32.mxu0 %vm38058_vm2, %v38057_v13  ;;  %35354 = vmatprep.subr.mxu0 %v38057_v13 }
 0x9f6   : > { %35322 = vmatmul.mubr.f32.vlgmr.msra.gmra.mrb[36].mxu1 %v39715_v40  ;;  %35352 = vmatmul.mubr.f32.vlgmr.msra.gmra.mrb[30].mxu0 %v39717_v22 }
 0x9f7   : > { %35325 = vmatpush3.xpose.msra.mxu1 %v39724_v2  ;;  %35355 = vmatpush3.xpose.msra.mxu0 %v39722_v49 }
 0x9f8   : > { %35326 = vmatprep.mubr.msk.f32.mxu1 %vm38058_vm2, %v38057_v13  ;;  %35356 = vmatprep.mubr.msk.f32.mxu0 %vm38058_vm2, %v38057_v13 }
 0x9f9   : > { %35359 = vmatprep.subr.mxu1 %v38057_v13  ;;  %35389 = vmatprep.subr.mxu0 %v38057_v13 }
 0x9fe   : > { %35327 = vmatmul.mubr.f32.vlgmr.msra.gmra.mrb[36].mxu1 %v39715_v40  ;;  %35357 = vmatmul.mubr.f32.vlgmr.msra.gmra.mrb[30].mxu0 %v39717_v22 }
 0x9ff   : > { %35360 = vmatpush3.xpose.msra.mxu1 %v15032_v6  ;;  %35361 = vmatprep.mubr.msk.f32.mxu1 %vm38058_vm2, %v38057_v13 }
 0xa00   : > { %35364 = vmatprep.subr.mxu1 %v38057_v13  ;;  %35391 = vmatprep.mubr.msk.f32.mxu0 %vm38058_vm2, %v38057_v13 }
 0xa02   : > { %35362 = vmatmul.mubr.f32.vlgmr.msra.gmra.mrb[38].mxu1 %v15101_v28 }
 0xa03   : > { %35365 = vmatpush3.xpose.msra.mxu1 %v15112_v30  ;;  %35366 = vmatprep.mubr.msk.f32.mxu1 %vm38058_vm2, %v38057_v13 }
 0xa04   : > { %35369 = vmatprep.subr.mxu1 %v38057_v13 }
 0xa0a   : > { %35367 = vmatmul.mubr.f32.vlgmr.msra.gmra.mrb[38].mxu1 %v15097_v24 }
 0xa0b   : > { %35370 = vmatpush3.xpose.msra.mxu1 %v15109_v10  ;;  %35371 = vmatprep.mubr.msk.f32.mxu1 %vm38058_vm2, %v38057_v13 }
 0xa0c   : > { %35374 = vmatprep.subr.mxu1 %v38057_v13 }
 0xa12   : > { %35372 = vmatmul.mubr.f32.vlgmr.msra.gmra.mrb[38].mxu1 %v15098_v9 }
 0xa13   : > { %35375 = vmatpush3.xpose.msra.mxu1 %v15032_v6  ;;  %35376 = vmatprep.mubr.msk.f32.mxu1 %vm38058_vm2, %v38057_v13 }
 0xa14   : > { %35379 = vmatprep.subr.mxu1 %v38057_v13 }
 0xa1a   : > { %35377 = vmatmul.mubr.f32.vlgmr.msra.gmra.mrb[38].mxu1 %v15099_v19 }
 0xa1b   : > { %35380 = vmatpush3.xpose.msra.mxu1 %v15110_v39  ;;  %35381 = vmatprep.mubr.msk.f32.mxu1 %vm38058_vm2, %v38057_v13 }
 0xa1c   : > { %35384 = vmatprep.subr.mxu1 %v38057_v13 }
 0xa22   : > { %35382 = vmatmul.mubr.f32.vlgmr.msra.gmra.mrb[38].mxu1 %v15097_v24 }
 0xa23   : > { %35385 = vmatpush3.xpose.msra.mxu1 %v15032_v6  ;;  %35386 = vmatprep.mubr.msk.f32.mxu1 %vm38058_vm2, %v38057_v13 }
 0xa24   : > { %35419 = vmatprep.subr.mxu1 %v38057_v13 }
 0xa2a   : > { %35387 = vmatmul.mubr.f32.vlgmr.msra.gmra.mrb[38].mxu1 %v15097_v24 }
 0xa2b   : > { %35421 = vmatprep.mubr.msk.f32.mxu1 %vm38058_vm2, %v38057_v13 }
 0xa44   : > { %v39817_v31 = vpop.f32.mrb[24].mxu0 }
 0xa45   : > { %v35178_v34 = vpop.f32.mrb[25].mxu0 }
 0xa70   : > { %v39819_v35 = vpop.f32.mrb[32].mxu1 }
 0xa71   : > { %v35208_v29 = vpop.f32.mrb[33].mxu1 }
 0xa79   : > { %v39821_v38 = vpop.f32.mrb[26].mxu0 }
 0xa7a   : > { %v35238_v25 = vpop.f32.mrb[27].mxu0 }
 0xaa5   : > { %v39823_v23 = vpop.f32.mrb[34].mxu1  ;;  %v14111_v32 = vpop.f32.mrb[28].mxu0 }
 0xaa6   : > { %v35268_v4 = vpop.f32.mrb[35].mxu1  ;;  %v35298_v40 = vpop.f32.mrb[29].mxu0  ;;  %v15477_v22 = vsel %vm2672_vm3, %v14111_v32, -inf }
 0xaa7   : > { %15478 = vmax.xlane.f32.xlu1 %v15477_v22 }
 0xad1   : > { %v14565_v49 = vpop.f32.mrb[36].mxu1  ;;  %v15019_v2 = vpop.f32.mrb[30].mxu0 }
 0xad2   : > { %v35328_v52 = vpop.f32.mrb[37].mxu1  ;;  %v35358_v53 = vpop.f32.mrb[31].mxu0  ;;  %v15480_v54 = vsel %vm2672_vm3, %v14565_v49, -inf  ;;  %v15483_v56 = vsel %vm2672_vm3, %v15019_v2, -inf }
 0xad3   : > { %15481 = vmax.xlane.f32.xlu0 %v15480_v54 }
 0xad7   : > { %15484 = vmax.xlane.f32.xlu0 %v15483_v56 }
 0xafd   : > { %v15473_v57 = vpop.f32.mrb[38].mxu1 }
 0xafe   : > { %v35388_v59 = vpop.f32.mrb[39].mxu1  ;;  %v15486_v61 = vsel %vm2672_vm3, %v15473_v57, -inf }
 0xaff   : > { %15487 = vmax.xlane.f32.xlu0 %v15486_v61 }
 0xb34   : > { %v15479_v63 = vpop.xlane.xlu1 %15478 }
 0xb35   : > { %v15489_v5 = vsub.f32 %v14111_v32, %v15479_v63 }
 0xb37   : > { %v15493_v33 = vmul.f32 1.442695, %v15489_v5 }
 0xb39   : > { %37861 = vpow2.f32 %v15493_v33 }
 0xb43   : > { %v37862_v48 = vpop.eup %37861 }
 0xb44   : > { %v15501_v62 = vsel %vm2672_vm3, %v37862_v48, 0.0 }
 0xb45   : > { %15502 = vadd.xlane.f32.xlu1 %v15501_v62 }
 0xb56   : > { %15521 = vrot.lane.b32.xlu1 %v38966_v41, %s38061_s15 }
 0xb60   : > { %v15482_v50 = vpop.xlane.xlu0 %15481 }
 0xb61   : > { %v15490_v42 = vsub.f32 %v14565_v49, %v15482_v50 }
 0xb63   : > { %v15495_v21 = vmul.f32 1.442695, %v15490_v42 }
 0xb64   : > { %v15485_v51 = vpop.xlane.xlu0 %15484 }
 0xb65   : > { %37863 = vpow2.f32 %v15495_v21  ;;  %v15491_v12 = vsub.f32 %v15019_v2, %v15485_v51 }
 0xb67   : > { %v15497_v43 = vmul.f32 1.442695, %v15491_v12 }
 0xb69   : > { %37865 = vpow2.f32 %v15497_v43 }
 0xb6f   : > { %v39832_v0 = vpop.eup %37863 }
 0xb70   : > { %v15504_v44 = vsel %vm2672_vm3, %v39832_v0, 0.0 }
 0xb71   : > { %15505 = vadd.xlane.f32.xlu0 %v15504_v44 }
 0xb73   : > { %v39836_v24 = vpop.eup %37865 }
 0xb74   : > { %v15507_v6 = vsel %vm2672_vm3, %v39836_v24, 0.0 }
 0xb7a   : > { %15508 = vadd.xlane.f32.xlu1 %v15507_v6 }
 0xb87   : > { %15973 = vrot.lane.b32.xlu0 %v38968_v18, %s38061_s15 }
 0xb8b   : > { %16425 = vrot.lane.b32.xlu1 %v38981_v26, %s38061_s15 }
 0xb8c   : > { %v15488_v9 = vpop.xlane.xlu0 %15487 }
 0xb8d   : > { %v15492_v10 = vsub.f32 %v15473_v57, %v15488_v9 }
 0xb8f   : > { %17329 = vrot.lane.b32.xlu1 %v38604_v55, %s38062_s12  ;;  %v15499_v19 = vmul.f32 1.442695, %v15492_v10 }
 0xb91   : > { %37867 = vpow2.f32 %v15499_v19 }
 0xb93   : > { %17783 = vrot.lane.b32.xlu1 %v38602_v16, %s38062_s12 }
 0xb97   : > { %17331 = vrot.lane.b32.xlu1 %v38619_v27, %s38062_s12 }
 0xb9b   : > { %18237 = vrot.lane.b32.xlu1 %v38608_v47, %s38062_s12  ;;  %v39854_v39 = vpop.eup %37867 }
 0xb9c   : > { %v15510_v8 = vsel %vm2672_vm3, %v39854_v39, 0.0 }
 0xb9f   : > { %18239 = vrot.lane.b32.xlu1 %v38625_v14, %s38062_s12 }
 0xba6   : > { %15511 = vadd.xlane.f32.xlu0 %v15510_v8 }
 0xbbc   : > { %16877 = vrot.lane.b32.xlu0 %v38978_v36, %s38061_s15 }
 0xbc0   : > { %17785 = vrot.lane.b32.xlu0 %v38639_v58, %s38062_s12 }
 0xbc4   : > { %18691 = vrot.lane.b32.xlu0 %v38606_v46, %s38062_s12 }
 0xbc8   : > { %18693 = vrot.lane.b32.xlu0 %v38623_v17, %s38062_s12 }
 0xbd2   : > { %v15503_v37 = vpop.xlane.xlu1 %15502 }
 0xbd3   : > { %37869 = vrcp.f32 %v15503_v37 }
 0xbd6   : > { %v15522_v28 = vpop.permute.xlu1 %15521 }
 0xbd7   : > { %v15528_v30 = vand.u32 4294901760, %v15522_v28 }
 0xbd9   : > { %35390 = vmatpush3.msra.mxu0 %v15528_v30  ;;  %v15605_v25 = vsub.f32 %v15522_v28, %v15528_v30 }
 0xbda   : > { %35394 = vmatprep.subr.mxu0 %v38057_v13 }
 0xbdb   : > { %v15606_v40 = vand.u32 4294901760, %v15605_v25 }
 0xbdd   : > { %v37870_v34 = vpop.eup %37869  ;;  %v15607_v2 = vsub.f32 %v15605_v25, %v15606_v40 }
 0xbde   : > { %v15517_v29 = vmul.f32 %v37870_v34, %v37862_v48 }
 0xbdf   : > { %v15608_v54 = vand.u32 4294901760, %v15607_v2 }
 0xbe0   : > { %v15525_v32 = vsel %vm2672_vm3, %v15517_v29, 0 }
 0xbe1   : > { %v15593_v4 = vand.u32 4294901760, %v15525_v32 }
 0xbe3   : > { %v15594_v22 = vsub.f32 %v15525_v32, %v15593_v4 }
 0xbe5   : > { %v15595_v49 = vand.u32 4294901760, %v15594_v22 }
 0xbe7   : > { %v15596_v52 = vsub.f32 %v15594_v22, %v15595_v49 }
 0xbe9   : > { %v15597_v53 = vand.u32 4294901760, %v15596_v52 }
 0xbeb   : > { %35392 = vmatmul.mubr.f32.vlgmr.msra.gmra.mrb[32].mxu0 %v15597_v53 }
 0xbec   : > { %35395 = vmatpush3.msra.mxu0 %v15608_v54  ;;  %35396 = vmatprep.mubr.msk.f32.mxu0 %vm38058_vm2, %v38057_v13 }
 0xbed   : > { %35399 = vmatprep.subr.mxu0 %v38057_v13 }
 0xbf3   : > { %35397 = vmatmul.mubr.f32.vlgmr.msra.gmra.mrb[32].mxu0 %v15593_v4 }
 0xbf4   : > { %35400 = vmatpush3.msra.mxu0 %v15605_v25  ;;  %35401 = vmatprep.mubr.msk.f32.mxu0 %vm38058_vm2, %v38057_v13 }
 0xbf5   : > { %35404 = vmatprep.subr.mxu0 %v38057_v13 }
 0xbfb   : > { %35402 = vmatmul.mubr.f32.vlgmr.msra.gmra.mrb[32].mxu0 %v15594_v22 }
 0xbfc   : > { %35405 = vmatpush3.msra.mxu0 %v15528_v30  ;;  %35406 = vmatprep.mubr.msk.f32.mxu0 %vm38058_vm2, %v38057_v13 }
 0xbfd   : > { %35409 = vmatprep.subr.mxu0 %v38057_v13 }
 0xbfe   : > { %v15506_v56 = vpop.xlane.xlu0 %15505 }
 0xbff   : > { %37871 = vrcp.f32 %v15506_v56 }
 0xc02   : > { %v15974_v57 = vpop.permute.xlu0 %15973 }
 0xc03   : > { %v39877_v59 = vand.u32 4294901760, %v15974_v57  ;;  %35407 = vmatmul.mubr.f32.vlgmr.msra.gmra.mrb[32].mxu0 %v15595_v49 }
 0xc04   : > { %35410 = vmatpush3.msra.mxu0 %v15606_v40  ;;  %35411 = vmatprep.mubr.msk.f32.mxu0 %vm38058_vm2, %v38057_v13 }
 0xc05   : > { %35420 = vmatpush3.msra.mxu1 %v39877_v59  ;;  %35414 = vmatprep.subr.mxu0 %v38057_v13  ;;  %v16057_v33 = vsub.f32 %v15974_v57, %v39877_v59 }
 0xc06   : > { %35424 = vmatprep.subr.mxu1 %v38057_v13 }
 0xc07   : > { %v15509_v61 = vpop.xlane.xlu1 %15508  ;;  %v16058_v42 = vand.u32 4294901760, %v16057_v33 }
 0xc08   : > { %37873 = vrcp.f32 %v15509_v61 }
 0xc09   : > { %v37872_v63 = vpop.eup %37871 }
 0xc0a   : > { %v15518_v5 = vmul.f32 %v37872_v63, %v39832_v0  ;;  %v16059_v0 = vsub.f32 %v16057_v33, %v16058_v42 }
 0xc0b   : > { %35412 = vmatmul.mubr.f32.vlgmr.msra.gmra.mrb[32].mxu0 %v15593_v4  ;;  %v16426_v48 = vpop.permute.xlu1 %16425 }
 0xc0c   : > { %35415 = vmatpush3.msra.mxu0 %v15528_v30  ;;  %35416 = vmatprep.mubr.msk.f32.mxu0 %vm38058_vm2, %v38057_v13  ;;  %v15977_v62 = vsel %vm2672_vm3, %v15518_v5, 0  ;;  %v39892_v21 = vand.u32 4294901760, %v16426_v48  ;;  %v16060_v8 = vand.u32 4294901760, %v16059_v0 }
 0xc0d   : > { %35449 = vmatprep.subr.mxu0 %v38057_v13  ;;  %v39890_v50 = vand.u32 4294901760, %v15977_v62 }
 0xc0e   : > { %v16509_v6 = vsub.f32 %v16426_v48, %v39892_v21 }
 0xc0f   : > { %v16046_v51 = vsub.f32 %v15977_v62, %v39890_v50 }
 0xc10   : > { %v16510_v28 = vand.u32 4294901760, %v16509_v6 }
 0xc11   : > { %v16047_v12 = vand.u32 4294901760, %v16046_v51 }
 0xc12   : > { %v37874_v43 = vpop.eup %37873  ;;  %v16511_v34 = vsub.f32 %v16509_v6, %v16510_v28 }
 0xc13   : > { %v15519_v44 = vmul.f32 %v37874_v43, %v39836_v24  ;;  %35417 = vmatmul.mubr.f32.vlgmr.msra.gmra.mrb[32].mxu0 %v15593_v4  ;;  %v16048_v9 = vsub.f32 %v16046_v51, %v16047_v12  ;;  %v17330_v4 = vpop.permute.xlu1 %17329 }
 0xc14   : > { %35450 = vmatpush3.msra.mxu0 %v39892_v21  ;;  %35451 = vmatprep.mubr.msk.f32.mxu0 %vm38058_vm2, %v38057_v13  ;;  %v16512_v32 = vand.u32 4294901760, %v16511_v34  ;;  %v17333_v2 = vsel %vm2672_vm3, %v17330_v4, 0 }
 0xc15   : > { %v16049_v10 = vand.u32 4294901760, %v16048_v9  ;;  %35454 = vmatprep.subr.mxu0 %v38057_v13  ;;  %v16429_v19 = vsel %vm2672_vm3, %v15519_v44, 0  ;;  %v39938_v54 = vand.u32 4294901760, %v17333_v2 }
 0xc16   : > { %v39902_v37 = vand.u32 4294901760, %v16429_v19 }
 0xc17   : > { %35422 = vmatmul.mubr.f32.vlgmr.msra.gmra.mrb[40].mxu1 %v16049_v10  ;;  %v39923_v40 = vpop.permute.xlu1 %17783  ;;  %v39949_v61 = vsub.f32 %v17333_v2, %v39938_v54 }
 0xc18   : > { %35425 = vmatpush3.msra.mxu1 %v16060_v8  ;;  %35426 = vmatprep.mubr.msk.f32.mxu1 %vm38058_vm2, %v38057_v13  ;;  %v16498_v24 = vsub.f32 %v16429_v19, %v39902_v37 }
 0xc19   : > { %35429 = vmatprep.subr.mxu1 %v38057_v13  ;;  %v17405_v62 = vand.u32 4294901760, %v39949_v61 }
 0xc1a   : > { %v16499_v30 = vand.u32 4294901760, %v16498_v24 }
 0xc1b   : > { %v17332_v49 = vpop.permute.xlu1 %17331 }
 0xc1c   : > { %v16500_v29 = vsub.f32 %v16498_v24, %v16499_v30  ;;  %v17335_v52 = vsel %vm2672_vm3, %v17332_v49, 0 }
 0xc1d   : > { %v39943_v56 = vand.u32 4294901760, %v17335_v52 }
 0xc1e   : > { %v16501_v25 = vand.u32 4294901760, %v16500_v29 }
 0xc1f   : > { %35427 = vmatmul.mubr.f32.vlgmr.msra.gmra.mrb[40].mxu1 %v39890_v50  ;;  %v39952_v63 = vsub.f32 %v17335_v52, %v39943_v56  ;;  %v18238_v8 = vpop.permute.xlu1 %18237 }
 0xc20   : > { %35430 = vmatpush3.msra.mxu1 %v16057_v33  ;;  %35452 = vmatmul.mubr.f32.vlgmr.msra.gmra.mrb[34].mxu0 %v16501_v25 }
 0xc21   : > { %35455 = vmatpush3.msra.mxu0 %v16512_v32  ;;  %35431 = vmatprep.mubr.msk.f32.mxu1 %vm38058_vm2, %v38057_v13 }
 0xc22   : > { %35434 = vmatprep.subr.mxu1 %v38057_v13  ;;  %35456 = vmatprep.mubr.msk.f32.mxu0 %vm38058_vm2, %v38057_v13 }
 0xc23   : > { %35459 = vmatprep.subr.mxu0 %v38057_v13 }
 0xc27   : > { %35432 = vmatmul.mubr.f32.vlgmr.msra.gmra.mrb[40].mxu1 %v16046_v51  ;;  %v17406_v51 = vsub.f32 %v39949_v61, %v17405_v62 }
 0xc28   : > { %35435 = vmatpush3.msra.mxu1 %v39877_v59  ;;  %35457 = vmatmul.mubr.f32.vlgmr.msra.gmra.mrb[34].mxu0 %v39902_v37 }
 0xc29   : > { %35460 = vmatpush3.msra.mxu0 %v16509_v6  ;;  %35436 = vmatprep.mubr.msk.f32.mxu1 %vm38058_vm2, %v38057_v13  ;;  %v17407_v9 = vand.u32 4294901760, %v17406_v51 }
 0xc2a   : > { %35439 = vmatprep.subr.mxu1 %v38057_v13  ;;  %35461 = vmatprep.mubr.msk.f32.mxu0 %vm38058_vm2, %v38057_v13 }
 0xc2b   : > { %35464 = vmatprep.subr.mxu0 %v38057_v13 }
 0xc2f   : > { %35437 = vmatmul.mubr.f32.vlgmr.msra.gmra.mrb[40].mxu1 %v16047_v12 }
 0xc30   : > { %35440 = vmatpush3.msra.mxu1 %v16058_v42  ;;  %35462 = vmatmul.mubr.f32.vlgmr.msra.gmra.mrb[34].mxu0 %v16498_v24  ;;  %v17787_v24 = vsel %vm2672_vm3, %v39923_v40, 0 }
 0xc31   : > { %35465 = vmatpush3.msra.mxu0 %v39892_v21  ;;  %35441 = vmatprep.mubr.msk.f32.mxu1 %vm38058_vm2, %v38057_v13  ;;  %v40008_v25 = vand.u32 4294901760, %v17787_v24 }
 0xc32   : > { %35444 = vmatprep.subr.mxu1 %v38057_v13  ;;  %35466 = vmatprep.mubr.msk.f32.mxu0 %vm38058_vm2, %v38057_v13 }
 0xc33   : > { %v15512_v22 = vpop.xlane.xlu0 %15511  ;;  %35469 = vmatprep.subr.mxu0 %v38057_v13 }
 0xc34   : > { %37875 = vrcp.f32 %v15512_v22  ;;  %v17858_v22 = vsub.f32 %v17787_v24, %v40008_v25 }
 0xc37   : > { %35442 = vmatmul.mubr.f32.vlgmr.msra.gmra.mrb[40].mxu1 %v39890_v50  ;;  %v16878_v53 = vpop.permute.xlu0 %16877 }
 0xc38   : > { %35445 = vmatpush3.msra.mxu1 %v39877_v59  ;;  %35467 = vmatmul.mubr.f32.vlgmr.msra.gmra.mrb[34].mxu0 %v16499_v30  ;;  %v39945_v57 = vand.u32 4294901760, %v16878_v53  ;;  %v18241_v30 = vsel %vm2672_vm3, %v18238_v8, 0 }
 0xc39   : > { %35470 = vmatpush3.msra.mxu0 %v16510_v28  ;;  %35446 = vmatprep.mubr.msk.f32.mxu1 %vm38058_vm2, %v38057_v13  ;;  %v40010_v32 = vand.u32 4294901760, %v18241_v30 }
 0xc3a   : > { %35479 = vmatprep.subr.mxu1 %v38057_v13  ;;  %35471 = vmatprep.mubr.msk.f32.mxu0 %vm38058_vm2, %v38057_v13  ;;  %v16961_v33 = vsub.f32 %v16878_v53, %v39945_v57  ;;  %v17859_v53 = vand.u32 4294901760, %v17858_v22 }
 0xc3b   : > { %35474 = vmatprep.subr.mxu0 %v38057_v13  ;;  %v17786_v28 = vpop.permute.xlu0 %17785  ;;  %v18312_v49 = vsub.f32 %v18241_v30, %v40010_v32 }
 0xc3c   : > { %v16962_v42 = vand.u32 4294901760, %v16961_v33  ;;  %v17789_v29 = vsel %vm2672_vm3, %v17786_v28, 0 }
 0xc3d   : > { %v40017_v40 = vand.u32 4294901760, %v17789_v29 }
 0xc3e   : > { %v37876_v59 = vpop.eup %37875  ;;  %v16963_v0 = vsub.f32 %v16961_v33, %v16962_v42 }
 0xc3f   : > { %v15520_v5 = vmul.f32 %v37876_v59, %v39854_v39  ;;  %35447 = vmatmul.mubr.f32.vlgmr.msra.gmra.mrb[40].mxu1 %v39890_v50  ;;  %v17416_v50 = vand.u32 4294901760, %v39952_v63  ;;  %v17869_v52 = vsub.f32 %v17789_v29, %v40017_v40  ;;  %v18313_v59 = vand.u32 4294901760, %v18312_v49 }
 0xc40   : > { %35480 = vmatpush3.msra.mxu1 %v39945_v57  ;;  %35472 = vmatmul.mubr.f32.vlgmr.msra.gmra.mrb[34].mxu0 %v39902_v37  ;;  %v16964_v10 = vand.u32 4294901760, %v16963_v0 }
 0xc41   : > { %35475 = vmatpush3.msra.mxu0 %v39892_v21  ;;  %35476 = vmatprep.mubr.msk.f32.mxu0 %vm38058_vm2, %v38057_v13  ;;  %v16881_v48 = vsel %vm2672_vm3, %v15520_v5, 0  ;;  %v17417_v43 = vsub.f32 %v39952_v63, %v17416_v50  ;;  %v17860_v5 = vsub.f32 %v17858_v22, %v17859_v53 }
 0xc42   : > { %35509 = vmatprep.subr.mxu0 %v38057_v13  ;;  %35481 = vmatprep.mubr.msk.f32.mxu1 %vm38058_vm2, %v38057_v13  ;;  %v39967_v39 = vand.u32 4294901760, %v16881_v48 }
 0xc43   : > { %35484 = vmatprep.subr.mxu1 %v38057_v13  ;;  %v17418_v19 = vand.u32 4294901760, %v17417_v43 }
 0xc44   : > { %v16950_v21 = vsub.f32 %v16881_v48, %v39967_v39 }
 0xc46   : > { %v16951_v12 = vand.u32 4294901760, %v16950_v21 }
 0xc48   : > { %35477 = vmatmul.mubr.f32.vlgmr.msra.gmra.mrb[34].mxu0 %v39902_v37  ;;  %v16952_v44 = vsub.f32 %v16950_v21, %v16951_v12  ;;  %v18240_v37 = vpop.permute.xlu1 %18239 }
 0xc49   : > { %35510 = vmatpush3.xpose.msra.mxu0 %v39943_v56  ;;  %35511 = vmatprep.mubr.msk.f32.mxu0 %vm38058_vm2, %v38057_v13  ;;  %v18243_v34 = vsel %vm2672_vm3, %v18240_v37, 0 }
 0xc4a   : > { %35514 = vmatprep.subr.mxu0 %v38057_v13  ;;  %v16953_v6 = vand.u32 4294901760, %v16952_v44  ;;  %v40015_v4 = vand.u32 4294901760, %v18243_v34 }
 0xc4c   : > { %35482 = vmatmul.mubr.f32.vlgmr.msra.gmra.mrb[42].mxu1 %v16953_v6  ;;  %35512 = vmatmul.mubr.f32.vlgmr.msra.gmra.mrb[36].mxu0 %v17407_v9  ;;  %v18323_v2 = vsub.f32 %v18243_v34, %v40015_v4 }
 0xc4d   : > { %35485 = vmatpush3.msra.mxu1 %v16964_v10  ;;  %35515 = vmatpush3.xpose.msra.mxu0 %v17418_v19 }
 0xc4e   : > { %35486 = vmatprep.mubr.msk.f32.mxu1 %vm38058_vm2, %v38057_v13  ;;  %35489 = vmatprep.subr.mxu1 %v38057_v13 }
 0xc4f   : > { %35516 = vmatprep.mubr.msk.f32.mxu0 %vm38058_vm2, %v38057_v13  ;;  %35519 = vmatprep.subr.mxu0 %v38057_v13 }
 0xc54   : > { %35487 = vmatmul.mubr.f32.vlgmr.msra.gmra.mrb[42].mxu1 %v39967_v39  ;;  %35517 = vmatmul.mubr.f32.vlgmr.msra.gmra.mrb[36].mxu0 %v39938_v54 }
 0xc55   : > { %35490 = vmatpush3.msra.mxu1 %v16961_v33  ;;  %35520 = vmatpush3.xpose.msra.mxu0 %v39952_v63  ;;  %v17870_v63 = vand.u32 4294901760, %v17869_v52  ;;  %v18314_v33 = vsub.f32 %v18312_v49, %v18313_v59 }
 0xc56   : > { %35491 = vmatprep.mubr.msk.f32.mxu1 %vm38058_vm2, %v38057_v13  ;;  %35494 = vmatprep.subr.mxu1 %v38057_v13 }
 0xc57   : > { %35521 = vmatprep.mubr.msk.f32.mxu0 %vm38058_vm2, %v38057_v13  ;;  %35524 = vmatprep.subr.mxu0 %v38057_v13 }
 0xc5c   : > { %35492 = vmatmul.mubr.f32.vlgmr.msra.gmra.mrb[42].mxu1 %v16950_v21  ;;  %35522 = vmatmul.mubr.f32.vlgmr.msra.gmra.mrb[36].mxu0 %v39949_v61  ;;  %v18324_v61 = vand.u32 4294901760, %v18323_v2 }
 0xc5d   : > { %35495 = vmatpush3.msra.mxu1 %v39945_v57  ;;  %35525 = vmatpush3.xpose.msra.mxu0 %v39943_v56 }
 0xc5e   : > { %35496 = vmatprep.mubr.msk.f32.mxu1 %vm38058_vm2, %v38057_v13  ;;  %35499 = vmatprep.subr.mxu1 %v38057_v13  ;;  %v18325_v48 = vsub.f32 %v18323_v2, %v18324_v61 }
 0xc5f   : > { %35526 = vmatprep.mubr.msk.f32.mxu0 %vm38058_vm2, %v38057_v13  ;;  %35529 = vmatprep.subr.mxu0 %v38057_v13 }
 0xc64   : > { %35497 = vmatmul.mubr.f32.vlgmr.msra.gmra.mrb[42].mxu1 %v16951_v12  ;;  %35527 = vmatmul.mubr.f32.vlgmr.msra.gmra.mrb[36].mxu0 %v17405_v62  ;;  %v18315_v62 = vand.u32 4294901760, %v18314_v33 }
 0xc65   : > { %35500 = vmatpush3.msra.mxu1 %v16962_v42  ;;  %35530 = vmatpush3.xpose.msra.mxu0 %v17416_v50 }
 0xc66   : > { %35501 = vmatprep.mubr.msk.f32.mxu1 %vm38058_vm2, %v38057_v13  ;;  %35504 = vmatprep.subr.mxu1 %v38057_v13 }
 0xc67   : > { %35531 = vmatprep.mubr.msk.f32.mxu0 %vm38058_vm2, %v38057_v13  ;;  %35534 = vmatprep.subr.mxu0 %v38057_v13 }
 0xc6c   : > { %35502 = vmatmul.mubr.f32.vlgmr.msra.gmra.mrb[42].mxu1 %v39967_v39  ;;  %35532 = vmatmul.mubr.f32.vlgmr.msra.gmra.mrb[36].mxu0 %v39938_v54 }
 0xc6d   : > { %35505 = vmatpush3.msra.mxu1 %v39945_v57  ;;  %35535 = vmatpush3.xpose.msra.mxu0 %v39943_v56  ;;  %v17871_v57 = vsub.f32 %v17869_v52, %v17870_v63  ;;  %v17861_v56 = vand.u32 4294901760, %v17860_v5 }
 0xc6e   : > { %35506 = vmatprep.mubr.msk.f32.mxu1 %vm38058_vm2, %v38057_v13  ;;  %35536 = vmatprep.mubr.msk.f32.mxu0 %vm38058_vm2, %v38057_v13 }
 0xc6f   : > { %35539 = vmatprep.subr.mxu1 %v38057_v13  ;;  %35569 = vmatprep.subr.mxu0 %v38057_v13  ;;  %v17872_v50 = vand.u32 4294901760, %v17871_v57 }
 0xc74   : > { %35507 = vmatmul.mubr.f32.vlgmr.msra.gmra.mrb[42].mxu1 %v39967_v39  ;;  %35537 = vmatmul.mubr.f32.vlgmr.msra.gmra.mrb[36].mxu0 %v39938_v54  ;;  %v18326_v39 = vand.u32 4294901760, %v18325_v48  ;;  %v18692_v54 = vpop.permute.xlu0 %18691 }
 0xc75   : > { %35540 = vmatpush3.xpose.msra.mxu1 %v40017_v40  ;;  %35570 = vmatpush3.xpose.msra.mxu0 %v40015_v4  ;;  %v18695_v21 = vsel %vm2672_vm3, %v18692_v54, 0 }
 0xc76   : > { %35541 = vmatprep.mubr.msk.f32.mxu1 %vm38058_vm2, %v38057_v13  ;;  %35544 = vmatprep.subr.mxu1 %v38057_v13  ;;  %v18765_v12 = vand.u32 4294901760, %v18695_v21 }
 0xc77   : > { %35571 = vmatprep.mubr.msk.f32.mxu0 %vm38058_vm2, %v38057_v13  ;;  %35574 = vmatprep.subr.mxu0 %v38057_v13 }
 0xc78   : > { %35542 = vmatmul.mubr.f32.vlgmr.msra.gmra.mrb[44].mxu1 %v17861_v56  ;;  %35572 = vmatmul.mubr.f32.vlgmr.msra.gmra.mrb[38].mxu0 %v18315_v62  ;;  %v18694_v42 = vpop.permute.xlu0 %18693  ;;  %v18766_v0 = vsub.f32 %v18695_v21, %v18765_v12 }
 0xc79   : > { %35545 = vmatpush3.xpose.msra.mxu1 %v17872_v50  ;;  %35575 = vmatpush3.xpose.msra.mxu0 %v18326_v39  ;;  %v18697_v51 = vsel %vm2672_vm3, %v18694_v42, 0 }
 0xc7a   : > { %35546 = vmatprep.mubr.msk.f32.mxu1 %vm38058_vm2, %v38057_v13  ;;  %35549 = vmatprep.subr.mxu1 %v38057_v13  ;;  %v18700_v43 = vand.u32 4294901760, %v18697_v51  ;;  %v18767_v6 = vand.u32 4294901760, %v18766_v0 }
 0xc7b   : > { %35576 = vmatprep.mubr.msk.f32.mxu0 %vm38058_vm2, %v38057_v13  ;;  %35579 = vmatprep.subr.mxu0 %v38057_v13 }
 0xc7c   : > { %v18777_v44 = vsub.f32 %v18697_v51, %v18700_v43  ;;  %v18768_v10 = vsub.f32 %v18766_v0, %v18767_v6 }
 0xc7e   : > { %v18778_v9 = vand.u32 4294901760, %v18777_v44  ;;  %v18769_v8 = vand.u32 4294901760, %v18768_v10 }
 0xc80   : > { %35547 = vmatmul.mubr.f32.vlgmr.msra.gmra.mrb[44].mxu1 %v40008_v25  ;;  %35577 = vmatmul.mubr.f32.vlgmr.msra.gmra.mrb[38].mxu0 %v40010_v32  ;;  %v18779_v19 = vsub.f32 %v18777_v44, %v18778_v9 }
 0xc81   : > { %35550 = vmatpush3.xpose.msra.mxu1 %v17869_v52  ;;  %35580 = vmatpush3.xpose.msra.mxu0 %v18323_v2 }
 0xc82   : > { %35551 = vmatprep.mubr.msk.f32.mxu1 %vm38058_vm2, %v38057_v13  ;;  %35554 = vmatprep.subr.mxu1 %v38057_v13  ;;  %v18780_v37 = vand.u32 4294901760, %v18779_v19 }
 0xc83   : > { %35581 = vmatprep.mubr.msk.f32.mxu0 %vm38058_vm2, %v38057_v13  ;;  %35584 = vmatprep.subr.mxu0 %v38057_v13 }
 0xc88   : > { %35552 = vmatmul.mubr.f32.vlgmr.msra.gmra.mrb[44].mxu1 %v17858_v22  ;;  %35582 = vmatmul.mubr.f32.vlgmr.msra.gmra.mrb[38].mxu0 %v18312_v49 }
 0xc89   : > { %35555 = vmatpush3.xpose.msra.mxu1 %v40017_v40  ;;  %35585 = vmatpush3.xpose.msra.mxu0 %v40015_v4 }
 0xc8a   : > { %35556 = vmatprep.mubr.msk.f32.mxu1 %vm38058_vm2, %v38057_v13  ;;  %35559 = vmatprep.subr.mxu1 %v38057_v13 }
 0xc8b   : > { %35586 = vmatprep.mubr.msk.f32.mxu0 %vm38058_vm2, %v38057_v13  ;;  %35589 = vmatprep.subr.mxu0 %v38057_v13 }
 0xc90   : > { %35557 = vmatmul.mubr.f32.vlgmr.msra.gmra.mrb[44].mxu1 %v17859_v53  ;;  %35587 = vmatmul.mubr.f32.vlgmr.msra.gmra.mrb[38].mxu0 %v18313_v59 }
 0xc91   : > { %35560 = vmatpush3.xpose.msra.mxu1 %v17870_v63  ;;  %35590 = vmatpush3.xpose.msra.mxu0 %v18324_v61 }
 0xc92   : > { %35561 = vmatprep.mubr.msk.f32.mxu1 %vm38058_vm2, %v38057_v13  ;;  %35564 = vmatprep.subr.mxu1 %v38057_v13 }
 0xc93   : > { %35591 = vmatprep.mubr.msk.f32.mxu0 %vm38058_vm2, %v38057_v13  ;;  %35594 = vmatprep.subr.mxu0 %v38057_v13 }
 0xc98   : > { %35562 = vmatmul.mubr.f32.vlgmr.msra.gmra.mrb[44].mxu1 %v40008_v25  ;;  %35592 = vmatmul.mubr.f32.vlgmr.msra.gmra.mrb[38].mxu0 %v40010_v32 }
 0xc99   : > { %35565 = vmatpush3.xpose.msra.mxu1 %v40017_v40  ;;  %35595 = vmatpush3.xpose.msra.mxu0 %v40015_v4 }
 0xc9a   : > { %35566 = vmatprep.mubr.msk.f32.mxu1 %vm38058_vm2, %v38057_v13  ;;  %35596 = vmatprep.mubr.msk.f32.mxu0 %vm38058_vm2, %v38057_v13 }
 0xc9b   : > { %35599 = vmatprep.subr.mxu1 %v38057_v13  ;;  %35629 = vmatprep.subr.mxu0 %v38057_v13 }
 0xca0   : > { %35567 = vmatmul.mubr.f32.vlgmr.msra.gmra.mrb[44].mxu1 %v40008_v25  ;;  %35597 = vmatmul.mubr.f32.vlgmr.msra.gmra.mrb[38].mxu0 %v40010_v32 }
 0xca1   : > { %35600 = vmatpush3.xpose.msra.mxu1 %v18700_v43  ;;  %35601 = vmatprep.mubr.msk.f32.mxu1 %vm38058_vm2, %v38057_v13 }
 0xca2   : > { %35604 = vmatprep.subr.mxu1 %v38057_v13  ;;  %35631 = vmatprep.mubr.msk.f32.mxu0 %vm38058_vm2, %v38057_v13 }
 0xca4   : > { %35602 = vmatmul.mubr.f32.vlgmr.msra.gmra.mrb[46].mxu1 %v18769_v8 }
 0xca5   : > { %35605 = vmatpush3.xpose.msra.mxu1 %v18780_v37  ;;  %35606 = vmatprep.mubr.msk.f32.mxu1 %vm38058_vm2, %v38057_v13 }
 0xca6   : > { %35609 = vmatprep.subr.mxu1 %v38057_v13 }
 0xcac   : > { %35607 = vmatmul.mubr.f32.vlgmr.msra.gmra.mrb[46].mxu1 %v18765_v12 }
 0xcad   : > { %35610 = vmatpush3.xpose.msra.mxu1 %v18777_v44  ;;  %35611 = vmatprep.mubr.msk.f32.mxu1 %vm38058_vm2, %v38057_v13 }
 0xcae   : > { %35614 = vmatprep.subr.mxu1 %v38057_v13 }
 0xcb4   : > { %35612 = vmatmul.mubr.f32.vlgmr.msra.gmra.mrb[46].mxu1 %v18766_v0 }
 0xcb5   : > { %35615 = vmatpush3.xpose.msra.mxu1 %v18700_v43  ;;  %35616 = vmatprep.mubr.msk.f32.mxu1 %vm38058_vm2, %v38057_v13 }
 0xcb6   : > { %35619 = vmatprep.subr.mxu1 %v38057_v13 }
 0xcbc   : > { %35617 = vmatmul.mubr.f32.vlgmr.msra.gmra.mrb[46].mxu1 %v18767_v6 }
 0xcbd   : > { %35620 = vmatpush3.xpose.msra.mxu1 %v18778_v9  ;;  %35621 = vmatprep.mubr.msk.f32.mxu1 %vm38058_vm2, %v38057_v13 }
 0xcbe   : > { %35624 = vmatprep.subr.mxu1 %v38057_v13 }
 0xcc4   : > { %35622 = vmatmul.mubr.f32.vlgmr.msra.gmra.mrb[46].mxu1 %v18765_v12 }
 0xcc5   : > { %35625 = vmatpush3.xpose.msra.mxu1 %v18700_v43  ;;  %35626 = vmatprep.mubr.msk.f32.mxu1 %vm38058_vm2, %v38057_v13 }
 0xcc6   : > { %35659 = vmatprep.subr.mxu1 %v38057_v13 }
 0xccc   : > { %35627 = vmatmul.mubr.f32.vlgmr.msra.gmra.mrb[46].mxu1 %v18765_v12 }
 0xccd   : > { %35661 = vmatprep.mubr.msk.f32.mxu1 %vm38058_vm2, %v38057_v13 }
 0xce6   : > { %v40110_v28 = vpop.f32.mrb[32].mxu0 }
 0xce7   : > { %v35418_v24 = vpop.f32.mrb[33].mxu0 }
 0xd12   : > { %v40112_v30 = vpop.f32.mrb[40].mxu1 }
 0xd13   : > { %v35448_v34 = vpop.f32.mrb[41].mxu1 }
 0xd1b   : > { %v40114_v29 = vpop.f32.mrb[34].mxu0 }
 0xd1c   : > { %v35478_v25 = vpop.f32.mrb[35].mxu0 }
 0xd47   : > { %v40116_v32 = vpop.f32.mrb[42].mxu1  ;;  %v17779_v4 = vpop.f32.mrb[36].mxu0 }
 0xd48   : > { %v35508_v40 = vpop.f32.mrb[43].mxu1  ;;  %v35538_v22 = vpop.f32.mrb[37].mxu0  ;;  %v19145_v49 = vsel %vm2672_vm3, %v17779_v4, -inf }
 0xd49   : > { %19146 = vmax.xlane.f32.xlu1 %v19145_v49 }
 0xd73   : > { %v18233_v2 = vpop.f32.mrb[44].mxu1  ;;  %v18687_v52 = vpop.f32.mrb[38].mxu0 }
 0xd74   : > { %v35568_v53 = vpop.f32.mrb[45].mxu1  ;;  %v35598_v59 = vpop.f32.mrb[39].mxu0  ;;  %v19148_v61 = vsel %vm2672_vm3, %v18233_v2, -inf  ;;  %v19151_v63 = vsel %vm2672_vm3, %v18687_v52, -inf }
 0xd75   : > { %19149 = vmax.xlane.f32.xlu0 %v19148_v61 }
 0xd79   : > { %19152 = vmax.xlane.f32.xlu0 %v19151_v63 }
 0xd9f   : > { %v19141_v5 = vpop.f32.mrb[46].mxu1 }
 0xda0   : > { %v35628_v33 = vpop.f32.mrb[47].mxu1  ;;  %v19154_v48 = vsel %vm2672_vm3, %v19141_v5, -inf }
 0xda1   : > { %19155 = vmax.xlane.f32.xlu0 %v19154_v48 }
 0xdd6   : > { %v19147_v57 = vpop.xlane.xlu1 %19146 }
 0xdd7   : > { %v19157_v56 = vsub.f32 %v17779_v4, %v19147_v57 }
 0xdd9   : > { %v19161_v62 = vmul.f32 1.442695, %v19157_v56 }
 0xddb   : > { %37877 = vpow2.f32 %v19161_v62 }
 0xde5   : > { %v37878_v50 = vpop.eup %37877 }
 0xde6   : > { %v19169_v39 = vsel %vm2672_vm3, %v37878_v50, 0.0 }
 0xde7   : > { %19170 = vadd.xlane.f32.xlu1 %v19169_v39 }
 0xdf8   : > { %19189 = vrot.lane.b32.xlu1 %v38966_v41, %s38062_s12 }
 0xe02   : > { %v19150_v54 = vpop.xlane.xlu0 %19149 }
 0xe03   : > { %v19158_v42 = vsub.f32 %v18233_v2, %v19150_v54 }
 0xe05   : > { %v19163_v21 = vmul.f32 1.442695, %v19158_v42 }
 0xe06   : > { %v19153_v51 = vpop.xlane.xlu0 %19152 }
 0xe07   : > { %37879 = vpow2.f32 %v19163_v21  ;;  %v19159_v12 = vsub.f32 %v18687_v52, %v19153_v51 }
 0xe09   : > { %v19165_v43 = vmul.f32 1.442695, %v19159_v12 }
 0xe0b   : > { %37881 = vpow2.f32 %v19165_v43 }
 0xe11   : > { %v40125_v0 = vpop.eup %37879 }
 0xe12   : > { %v19172_v44 = vsel %vm2672_vm3, %v40125_v0, 0.0 }
 0xe13   : > { %19173 = vadd.xlane.f32.xlu0 %v19172_v44 }
 0xe15   : > { %v40129_v6 = vpop.eup %37881 }
 0xe16   : > { %v19175_v9 = vsel %vm2672_vm3, %v40129_v6, 0.0 }
 0xe1c   : > { %19176 = vadd.xlane.f32.xlu1 %v19175_v9 }
 0xe29   : > { %19641 = vrot.lane.b32.xlu0 %v38968_v18, %s38062_s12 }
 0xe2d   : > { %20093 = vrot.lane.b32.xlu1 %v38981_v26, %s38062_s12 }
 0xe2e   : > { %v19156_v10 = vpop.xlane.xlu0 %19155 }
 0xe2f   : > { %v19160_v19 = vsub.f32 %v19141_v5, %v19156_v10 }
 0xe31   : > { %20997 = vrot.lane.b32.xlu1 %v38604_v55, %s38063_s16  ;;  %v19167_v8 = vmul.f32 1.442695, %v19160_v19 }
 0xe33   : > { %37883 = vpow2.f32 %v19167_v8 }
 0xe35   : > { %21451 = vrot.lane.b32.xlu1 %v38602_v16, %s38063_s16 }
 0xe39   : > { %20999 = vrot.lane.b32.xlu1 %v38619_v27, %s38063_s16 }
 0xe3d   : > { %21905 = vrot.lane.b32.xlu1 %v38608_v47, %s38063_s16  ;;  %v40147_v37 = vpop.eup %37883 }
 0xe3e   : > { %v19178_v24 = vsel %vm2672_vm3, %v40147_v37, 0.0 }
 0xe41   : > { %21907 = vrot.lane.b32.xlu1 %v38625_v14, %s38063_s16 }
 0xe48   : > { %19179 = vadd.xlane.f32.xlu0 %v19178_v24 }
 0xe5e   : > { %20545 = vrot.lane.b32.xlu0 %v38978_v36, %s38062_s12 }
 0xe62   : > { %21453 = vrot.lane.b32.xlu0 %v38639_v58, %s38063_s16 }
 0xe66   : > { %22359 = vrot.lane.b32.xlu0 %v38606_v46, %s38063_s16 }
 0xe6a   : > { %22361 = vrot.lane.b32.xlu0 %v38623_v17, %s38063_s16 }
 0xe74   : > { %v19171_v34 = vpop.xlane.xlu1 %19170 }
 0xe75   : > { %37885 = vrcp.f32 %v19171_v34 }
 0xe78   : > { %v19190_v25 = vpop.permute.xlu1 %19189 }
 0xe79   : > { %v19196_v4 = vand.u32 4294901760, %v19190_v25 }
 0xe7b   : > { %35630 = vmatpush3.msra.mxu0 %v19196_v4  ;;  %v19273_v49 = vsub.f32 %v19190_v25, %v19196_v4 }
 0xe7c   : > { %35634 = vmatprep.subr.mxu0 %v38057_v13 }
 0xe7d   : > { %v19274_v53 = vand.u32 4294901760, %v19273_v49 }
 0xe7f   : > { %v37886_v40 = vpop.eup %37885  ;;  %v19275_v63 = vsub.f32 %v19273_v49, %v19274_v53 }
 0xe80   : > { %v19185_v22 = vmul.f32 %v37886_v40, %v37878_v50 }
 0xe81   : > { %v19276_v48 = vand.u32 4294901760, %v19275_v63 }
 0xe82   : > { %v19193_v2 = vsel %vm2672_vm3, %v19185_v22, 0 }
 0xe83   : > { %v19261_v52 = vand.u32 4294901760, %v19193_v2 }
 0xe85   : > { %v19262_v59 = vsub.f32 %v19193_v2, %v19261_v52 }
 0xe87   : > { %v19263_v61 = vand.u32 4294901760, %v19262_v59 }
 0xe89   : > { %v19264_v5 = vsub.f32 %v19262_v59, %v19263_v61 }
 0xe8b   : > { %v19265_v33 = vand.u32 4294901760, %v19264_v5 }
 0xe8d   : > { %35632 = vmatmul.mubr.f32.vlgmr.msra.gmra.mrb[40].mxu0 %v19265_v33 }
 0xe8e   : > { %35635 = vmatpush3.msra.mxu0 %v19276_v48  ;;  %35636 = vmatprep.mubr.msk.f32.mxu0 %vm38058_vm2, %v38057_v13 }
 0xe8f   : > { %35639 = vmatprep.subr.mxu0 %v38057_v13 }
 0xe95   : > { %35637 = vmatmul.mubr.f32.vlgmr.msra.gmra.mrb[40].mxu0 %v19261_v52 }
 0xe96   : > { %35640 = vmatpush3.msra.mxu0 %v19273_v49  ;;  %35641 = vmatprep.mubr.msk.f32.mxu0 %vm38058_vm2, %v38057_v13 }
 0xe97   : > { %35644 = vmatprep.subr.mxu0 %v38057_v13 }
 0xe9d   : > { %35642 = vmatmul.mubr.f32.vlgmr.msra.gmra.mrb[40].mxu0 %v19262_v59 }
 0xe9e   : > { %35645 = vmatpush3.msra.mxu0 %v19196_v4  ;;  %35646 = vmatprep.mubr.msk.f32.mxu0 %vm38058_vm2, %v38057_v13 }
 0xe9f   : > { %35649 = vmatprep.subr.mxu0 %v38057_v13 }
 0xea0   : > { %v19174_v57 = vpop.xlane.xlu0 %19173 }
 0xea1   : > { %37887 = vrcp.f32 %v19174_v57 }
 0xea4   : > { %v19642_v56 = vpop.permute.xlu0 %19641 }
 0xea5   : > { %v40170_v62 = vand.u32 4294901760, %v19642_v56  ;;  %35647 = vmatmul.mubr.f32.vlgmr.msra.gmra.mrb[40].mxu0 %v19263_v61 }
 0xea6   : > { %35650 = vmatpush3.msra.mxu0 %v19274_v53  ;;  %35651 = vmatprep.mubr.msk.f32.mxu0 %vm38058_vm2, %v38057_v13 }
 0xea7   : > { %35660 = vmatpush3.msra.mxu1 %v40170_v62  ;;  %35654 = vmatprep.subr.mxu0 %v38057_v13  ;;  %v19725_v42 = vsub.f32 %v19642_v56, %v40170_v62 }
 0xea8   : > { %35664 = vmatprep.subr.mxu1 %v38057_v13 }
 0xea9   : > { %v19177_v50 = vpop.xlane.xlu1 %19176  ;;  %v19726_v43 = vand.u32 4294901760, %v19725_v42 }
 0xeaa   : > { %37889 = vrcp.f32 %v19177_v50 }
 0xeab   : > { %v37888_v39 = vpop.eup %37887  ;;  %v19727_v19 = vsub.f32 %v19725_v42, %v19726_v43 }
 0xeac   : > { %v19186_v54 = vmul.f32 %v37888_v39, %v40125_v0 }
 0xead   : > { %35652 = vmatmul.mubr.f32.vlgmr.msra.gmra.mrb[40].mxu0 %v19261_v52  ;;  %v20094_v21 = vpop.permute.xlu1 %20093  ;;  %v19728_v40 = vand.u32 4294901760, %v19727_v19 }
 0xeae   : > { %35655 = vmatpush3.msra.mxu0 %v19196_v4  ;;  %35656 = vmatprep.mubr.msk.f32.mxu0 %vm38058_vm2, %v38057_v13  ;;  %v19645_v51 = vsel %vm2672_vm3, %v19186_v54, 0  ;;  %v40185_v44 = vand.u32 4294901760, %v20094_v21 }
 0xeaf   : > { %35689 = vmatprep.subr.mxu0 %v38057_v13  ;;  %v40183_v12 = vand.u32 4294901760, %v19645_v51 }
 0xeb0   : > { %v20177_v24 = vsub.f32 %v20094_v21, %v40185_v44 }
 0xeb1   : > { %v19714_v9 = vsub.f32 %v19645_v51, %v40183_v12  ;;  %v20998_v63 = vpop.permute.xlu1 %20997 }
 0xeb2   : > { %v20178_v49 = vand.u32 4294901760, %v20177_v24  ;;  %v21001_v57 = vsel %vm2672_vm3, %v20998_v63, 0 }
 0xeb3   : > { %v19715_v0 = vand.u32 4294901760, %v19714_v9  ;;  %v40231_v39 = vand.u32 4294901760, %v21001_v57 }
 0xeb4   : > { %v37890_v10 = vpop.eup %37889 }
 0xeb5   : > { %v19187_v8 = vmul.f32 %v37890_v10, %v40129_v6  ;;  %35657 = vmatmul.mubr.f32.vlgmr.msra.gmra.mrb[40].mxu0 %v19261_v52  ;;  %v19716_v34 = vsub.f32 %v19714_v9, %v19715_v0  ;;  %v20179_v52 = vsub.f32 %v20177_v24, %v20178_v49  ;;  %v40216_v5 = vpop.permute.xlu1 %21451  ;;  %v40242_v21 = vsub.f32 %v21001_v57, %v40231_v39 }
 0xeb6   : > { %35690 = vmatpush3.msra.mxu0 %v40185_v44  ;;  %35691 = vmatprep.mubr.msk.f32.mxu0 %vm38058_vm2, %v38057_v13 }
 0xeb7   : > { %v19717_v25 = vand.u32 4294901760, %v19716_v34  ;;  %35694 = vmatprep.subr.mxu0 %v38057_v13  ;;  %v20097_v4 = vsel %vm2672_vm3, %v19187_v8, 0  ;;  %v20180_v61 = vand.u32 4294901760, %v20179_v52  ;;  %v21073_v10 = vand.u32 4294901760, %v40242_v21 }
 0xeb8   : > { %v40195_v22 = vand.u32 4294901760, %v20097_v4 }
 0xeb9   : > { %35662 = vmatmul.mubr.f32.vlgmr.msra.gmra.mrb[48].mxu1 %v19717_v25  ;;  %v21000_v48 = vpop.permute.xlu1 %20999  ;;  %v21074_v8 = vsub.f32 %v40242_v21, %v21073_v10 }
 0xeba   : > { %35665 = vmatpush3.msra.mxu1 %v19728_v40  ;;  %35666 = vmatprep.mubr.msk.f32.mxu1 %vm38058_vm2, %v38057_v13  ;;  %v20166_v6 = vsub.f32 %v20097_v4, %v40195_v22  ;;  %v21003_v56 = vsel %vm2672_vm3, %v21000_v48, 0 }
 0xebb   : > { %35669 = vmatprep.subr.mxu1 %v38057_v13  ;;  %v40236_v54 = vand.u32 4294901760, %v21003_v56  ;;  %v21075_v40 = vand.u32 4294901760, %v21074_v8 }
 0xebc   : > { %v20167_v2 = vand.u32 4294901760, %v20166_v6 }
 0xebd   : > { %v40245_v51 = vsub.f32 %v21003_v56, %v40236_v54 }
 0xebe   : > { %v20168_v53 = vsub.f32 %v20166_v6, %v20167_v2 }
 0xec0   : > { %v20169_v59 = vand.u32 4294901760, %v20168_v53 }
 0xec1   : > { %35667 = vmatmul.mubr.f32.vlgmr.msra.gmra.mrb[48].mxu1 %v40183_v12 }
 0xec2   : > { %35670 = vmatpush3.msra.mxu1 %v19725_v42  ;;  %35692 = vmatmul.mubr.f32.vlgmr.msra.gmra.mrb[42].mxu0 %v20169_v59  ;;  %v21455_v59 = vsel %vm2672_vm3, %v40216_v5, 0 }
 0xec3   : > { %35695 = vmatpush3.msra.mxu0 %v20180_v61  ;;  %35671 = vmatprep.mubr.msk.f32.mxu1 %vm38058_vm2, %v38057_v13  ;;  %v40301_v48 = vand.u32 4294901760, %v21455_v59 }
 0xec4   : > { %35674 = vmatprep.subr.mxu1 %v38057_v13  ;;  %35696 = vmatprep.mubr.msk.f32.mxu0 %vm38058_vm2, %v38057_v13 }
 0xec5   : > { %35699 = vmatprep.subr.mxu0 %v38057_v13 }
 0xec9   : > { %35672 = vmatmul.mubr.f32.vlgmr.msra.gmra.mrb[48].mxu1 %v19714_v9 }
 0xeca   : > { %35675 = vmatpush3.msra.mxu1 %v40170_v62  ;;  %35697 = vmatmul.mubr.f32.vlgmr.msra.gmra.mrb[42].mxu0 %v40195_v22 }
 0xecb   : > { %35700 = vmatpush3.msra.mxu0 %v20177_v24  ;;  %35676 = vmatprep.mubr.msk.f32.mxu1 %vm38058_vm2, %v38057_v13 }
 0xecc   : > { %35679 = vmatprep.subr.mxu1 %v38057_v13  ;;  %35701 = vmatprep.mubr.msk.f32.mxu0 %vm38058_vm2, %v38057_v13 }
 0xecd   : > { %35704 = vmatprep.subr.mxu0 %v38057_v13 }
 0xed1   : > { %35677 = vmatmul.mubr.f32.vlgmr.msra.gmra.mrb[48].mxu1 %v19715_v0 }
 0xed2   : > { %35680 = vmatpush3.msra.mxu1 %v19726_v43  ;;  %35702 = vmatmul.mubr.f32.vlgmr.msra.gmra.mrb[42].mxu0 %v20166_v6 }
 0xed3   : > { %35705 = vmatpush3.msra.mxu0 %v40185_v44  ;;  %35681 = vmatprep.mubr.msk.f32.mxu1 %vm38058_vm2, %v38057_v13 }
 0xed4   : > { %35684 = vmatprep.subr.mxu1 %v38057_v13  ;;  %35706 = vmatprep.mubr.msk.f32.mxu0 %vm38058_vm2, %v38057_v13 }
 0xed5   : > { %v19180_v33 = vpop.xlane.xlu0 %19179  ;;  %35709 = vmatprep.subr.mxu0 %v38057_v13 }
 0xed6   : > { %37891 = vrcp.f32 %v19180_v33 }
 0xed9   : > { %35682 = vmatmul.mubr.f32.vlgmr.msra.gmra.mrb[48].mxu1 %v40183_v12  ;;  %v20546_v50 = vpop.permute.xlu0 %20545 }
 0xeda   : > { %35685 = vmatpush3.msra.mxu1 %v40170_v62  ;;  %35707 = vmatmul.mubr.f32.vlgmr.msra.gmra.mrb[42].mxu0 %v20167_v2  ;;  %v40238_v42 = vand.u32 4294901760, %v20546_v50 }
 0xedb   : > { %35710 = vmatpush3.msra.mxu0 %v20178_v49  ;;  %35686 = vmatprep.mubr.msk.f32.mxu1 %vm38058_vm2, %v38057_v13 }
 0xedc   : > { %35719 = vmatprep.subr.mxu1 %v38057_v13  ;;  %35711 = vmatprep.mubr.msk.f32.mxu0 %vm38058_vm2, %v38057_v13  ;;  %v20629_v9 = vsub.f32 %v20546_v50, %v40238_v42  ;;  %v21526_v50 = vsub.f32 %v21455_v59, %v40301_v48 }
 0xedd   : > { %35714 = vmatprep.subr.mxu0 %v38057_v13  ;;  %v21454_v53 = vpop.permute.xlu0 %21453 }
 0xede   : > { %v20630_v19 = vand.u32 4294901760, %v20629_v9  ;;  %v21457_v33 = vsel %vm2672_vm3, %v21454_v53, 0 }
 0xedf   : > { %v40310_v56 = vand.u32 4294901760, %v21457_v33 }
 0xee0   : > { %v37892_v62 = vpop.eup %37891  ;;  %v20631_v25 = vsub.f32 %v20629_v9, %v20630_v19 }
 0xee1   : > { %v19188_v43 = vmul.f32 %v37892_v62, %v40147_v37  ;;  %35687 = vmatmul.mubr.f32.vlgmr.msra.gmra.mrb[48].mxu1 %v40183_v12  ;;  %v21084_v12 = vand.u32 4294901760, %v40245_v51 }
 0xee2   : > { %35720 = vmatpush3.msra.mxu1 %v40238_v42  ;;  %35712 = vmatmul.mubr.f32.vlgmr.msra.gmra.mrb[42].mxu0 %v40195_v22  ;;  %v20632_v2 = vand.u32 4294901760, %v20631_v25 }
 0xee3   : > { %35715 = vmatpush3.msra.mxu0 %v40185_v44  ;;  %35716 = vmatprep.mubr.msk.f32.mxu0 %vm38058_vm2, %v38057_v13  ;;  %v20549_v0 = vsel %vm2672_vm3, %v19188_v43, 0  ;;  %v21085_v34 = vsub.f32 %v40245_v51, %v21084_v12  ;;  %v21527_v43 = vand.u32 4294901760, %v21526_v50 }
 0xee4   : > { %35749 = vmatprep.subr.mxu0 %v38057_v13  ;;  %35721 = vmatprep.mubr.msk.f32.mxu1 %vm38058_vm2, %v38057_v13  ;;  %v40260_v37 = vand.u32 4294901760, %v20549_v0 }
 0xee5   : > { %35724 = vmatprep.subr.mxu1 %v38057_v13  ;;  %v21086_v6 = vand.u32 4294901760, %v21085_v34 }
 0xee6   : > { %v20618_v44 = vsub.f32 %v20549_v0, %v40260_v37 }
 0xee8   : > { %v20619_v24 = vand.u32 4294901760, %v20618_v44 }
 0xeea   : > { %35717 = vmatmul.mubr.f32.vlgmr.msra.gmra.mrb[42].mxu0 %v40195_v22  ;;  %v20620_v4 = vsub.f32 %v20618_v44, %v20619_v24  ;;  %v21906_v22 = vpop.permute.xlu1 %21905 }
 0xeeb   : > { %35750 = vmatpush3.xpose.msra.mxu0 %v40236_v54  ;;  %35751 = vmatprep.mubr.msk.f32.mxu0 %vm38058_vm2, %v38057_v13  ;;  %v21909_v61 = vsel %vm2672_vm3, %v21906_v22, 0 }
 0xeec   : > { %35754 = vmatprep.subr.mxu0 %v38057_v13  ;;  %v20621_v49 = vand.u32 4294901760, %v20620_v4  ;;  %v40303_v57 = vand.u32 4294901760, %v21909_v61 }
 0xeee   : > { %35722 = vmatmul.mubr.f32.vlgmr.msra.gmra.mrb[50].mxu1 %v20621_v49  ;;  %35752 = vmatmul.mubr.f32.vlgmr.msra.gmra.mrb[44].mxu0 %v21075_v40  ;;  %v21908_v52 = vpop.permute.xlu1 %21907  ;;  %v21980_v62 = vsub.f32 %v21909_v61, %v40303_v57 }
 0xeef   : > { %35725 = vmatpush3.msra.mxu1 %v20632_v2  ;;  %35755 = vmatpush3.xpose.msra.mxu0 %v21086_v6  ;;  %v21911_v63 = vsel %vm2672_vm3, %v21908_v52, 0 }
 0xef0   : > { %35726 = vmatprep.mubr.msk.f32.mxu1 %vm38058_vm2, %v38057_v13  ;;  %35729 = vmatprep.subr.mxu1 %v38057_v13  ;;  %v40308_v5 = vand.u32 4294901760, %v21911_v63 }
 0xef1   : > { %35756 = vmatprep.mubr.msk.f32.mxu0 %vm38058_vm2, %v38057_v13  ;;  %35759 = vmatprep.subr.mxu0 %v38057_v13 }
 0xef6   : > { %35727 = vmatmul.mubr.f32.vlgmr.msra.gmra.mrb[50].mxu1 %v40260_v37  ;;  %35757 = vmatmul.mubr.f32.vlgmr.msra.gmra.mrb[44].mxu0 %v40231_v39 }
 0xef7   : > { %35730 = vmatpush3.msra.mxu1 %v20629_v9  ;;  %35760 = vmatpush3.xpose.msra.mxu0 %v40245_v51  ;;  %v21537_v51 = vsub.f32 %v21457_v33, %v40310_v56  ;;  %v21981_v9 = vand.u32 4294901760, %v21980_v62 }
 0xef8   : > { %35731 = vmatprep.mubr.msk.f32.mxu1 %vm38058_vm2, %v38057_v13  ;;  %35734 = vmatprep.subr.mxu1 %v38057_v13 }
 0xef9   : > { %35761 = vmatprep.mubr.msk.f32.mxu0 %vm38058_vm2, %v38057_v13  ;;  %35764 = vmatprep.subr.mxu0 %v38057_v13 }
 0xefe   : > { %35732 = vmatmul.mubr.f32.vlgmr.msra.gmra.mrb[50].mxu1 %v20618_v44  ;;  %35762 = vmatmul.mubr.f32.vlgmr.msra.gmra.mrb[44].mxu0 %v40242_v21  ;;  %v21991_v21 = vsub.f32 %v21911_v63, %v40308_v5 }
 0xeff   : > { %35735 = vmatpush3.msra.mxu1 %v40238_v42  ;;  %35765 = vmatpush3.xpose.msra.mxu0 %v40236_v54 }
 0xf00   : > { %35736 = vmatprep.mubr.msk.f32.mxu1 %vm38058_vm2, %v38057_v13  ;;  %35739 = vmatprep.subr.mxu1 %v38057_v13  ;;  %v21992_v0 = vand.u32 4294901760, %v21991_v21 }
 0xf01   : > { %35766 = vmatprep.mubr.msk.f32.mxu0 %vm38058_vm2, %v38057_v13  ;;  %35769 = vmatprep.subr.mxu0 %v38057_v13 }
 0xf02   : > { %v21993_v44 = vsub.f32 %v21991_v21, %v21992_v0 }
 0xf06   : > { %35737 = vmatmul.mubr.f32.vlgmr.msra.gmra.mrb[50].mxu1 %v20619_v24  ;;  %35767 = vmatmul.mubr.f32.vlgmr.msra.gmra.mrb[44].mxu0 %v21073_v10  ;;  %v21538_v10 = vand.u32 4294901760, %v21537_v51  ;;  %v21994_v24 = vand.u32 4294901760, %v21993_v44 }
 0xf07   : > { %35740 = vmatpush3.msra.mxu1 %v20630_v19  ;;  %35770 = vmatpush3.xpose.msra.mxu0 %v21084_v12  ;;  %v21528_v12 = vsub.f32 %v21526_v50, %v21527_v43  ;;  %v21982_v19 = vsub.f32 %v21980_v62, %v21981_v9 }
 0xf08   : > { %35741 = vmatprep.mubr.msk.f32.mxu1 %vm38058_vm2, %v38057_v13  ;;  %35744 = vmatprep.subr.mxu1 %v38057_v13 }
 0xf09   : > { %35771 = vmatprep.mubr.msk.f32.mxu0 %vm38058_vm2, %v38057_v13  ;;  %35774 = vmatprep.subr.mxu0 %v38057_v13  ;;  %v21983_v8 = vand.u32 4294901760, %v21982_v19 }
 0xf0e   : > { %35742 = vmatmul.mubr.f32.vlgmr.msra.gmra.mrb[50].mxu1 %v40260_v37  ;;  %35772 = vmatmul.mubr.f32.vlgmr.msra.gmra.mrb[44].mxu0 %v40231_v39 }
 0xf0f   : > { %35745 = vmatpush3.msra.mxu1 %v40238_v42  ;;  %35775 = vmatpush3.xpose.msra.mxu0 %v40236_v54  ;;  %v21539_v42 = vsub.f32 %v21537_v51, %v21538_v10  ;;  %v21529_v54 = vand.u32 4294901760, %v21528_v12 }
 0xf10   : > { %35746 = vmatprep.mubr.msk.f32.mxu1 %vm38058_vm2, %v38057_v13  ;;  %35776 = vmatprep.mubr.msk.f32.mxu0 %vm38058_vm2, %v38057_v13 }
 0xf11   : > { %35779 = vmatprep.subr.mxu1 %v38057_v13  ;;  %35809 = vmatprep.subr.mxu0 %v38057_v13  ;;  %v21540_v34 = vand.u32 4294901760, %v21539_v42 }
 0xf16   : > { %35747 = vmatmul.mubr.f32.vlgmr.msra.gmra.mrb[50].mxu1 %v40260_v37  ;;  %35777 = vmatmul.mubr.f32.vlgmr.msra.gmra.mrb[44].mxu0 %v40231_v39  ;;  %v22360_v39 = vpop.permute.xlu0 %22359 }
 0xf17   : > { %35780 = vmatpush3.xpose.msra.mxu1 %v40310_v56  ;;  %35810 = vmatpush3.xpose.msra.mxu0 %v40308_v5  ;;  %v22363_v25 = vsel %vm2672_vm3, %v22360_v39, 0 }
 0xf18   : > { %35781 = vmatprep.mubr.msk.f32.mxu1 %vm38058_vm2, %v38057_v13  ;;  %35784 = vmatprep.subr.mxu1 %v38057_v13  ;;  %v22433_v40 = vand.u32 4294901760, %v22363_v25 }
 0xf19   : > { %35811 = vmatprep.mubr.msk.f32.mxu0 %vm38058_vm2, %v38057_v13  ;;  %35814 = vmatprep.subr.mxu0 %v38057_v13 }
 0xf1a   : > { %35782 = vmatmul.mubr.f32.vlgmr.msra.gmra.mrb[52].mxu1 %v21529_v54  ;;  %35812 = vmatmul.mubr.f32.vlgmr.msra.gmra.mrb[46].mxu0 %v21983_v8  ;;  %v22362_v37 = vpop.permute.xlu0 %22361  ;;  %v22434_v6 = vsub.f32 %v22363_v25, %v22433_v40 }
 0xf1b   : > { %35785 = vmatpush3.xpose.msra.mxu1 %v21540_v34  ;;  %35815 = vmatpush3.xpose.msra.mxu0 %v21994_v24  ;;  %v22365_v4 = vsel %vm2672_vm3, %v22362_v37, 0 }
 0xf1c   : > { %35786 = vmatprep.mubr.msk.f32.mxu1 %vm38058_vm2, %v38057_v13  ;;  %35789 = vmatprep.subr.mxu1 %v38057_v13  ;;  %v22368_v49 = vand.u32 4294901760, %v22365_v4  ;;  %v22435_v22 = vand.u32 4294901760, %v22434_v6 }
 0xf1d   : > { %35816 = vmatprep.mubr.msk.f32.mxu0 %vm38058_vm2, %v38057_v13  ;;  %35819 = vmatprep.subr.mxu0 %v38057_v13 }
 0xf1e   : > { %v22445_v2 = vsub.f32 %v22365_v4, %v22368_v49  ;;  %v22436_v53 = vsub.f32 %v22434_v6, %v22435_v22 }
 0xf20   : > { %v22446_v52 = vand.u32 4294901760, %v22445_v2  ;;  %v22437_v61 = vand.u32 4294901760, %v22436_v53 }
 0xf22   : > { %35787 = vmatmul.mubr.f32.vlgmr.msra.gmra.mrb[52].mxu1 %v40301_v48  ;;  %35817 = vmatmul.mubr.f32.vlgmr.msra.gmra.mrb[46].mxu0 %v40303_v57  ;;  %v22447_v59 = vsub.f32 %v22445_v2, %v22446_v52 }
 0xf23   : > { %35790 = vmatpush3.xpose.msra.mxu1 %v21537_v51  ;;  %35820 = vmatpush3.xpose.msra.mxu0 %v21991_v21 }
 0xf24   : > { %35791 = vmatprep.mubr.msk.f32.mxu1 %vm38058_vm2, %v38057_v13  ;;  %35794 = vmatprep.subr.mxu1 %v38057_v13  ;;  %v22448_v63 = vand.u32 4294901760, %v22447_v59 }
 0xf25   : > { %35821 = vmatprep.mubr.msk.f32.mxu0 %vm38058_vm2, %v38057_v13  ;;  %35824 = vmatprep.subr.mxu0 %v38057_v13 }
 0xf2a   : > { %35792 = vmatmul.mubr.f32.vlgmr.msra.gmra.mrb[52].mxu1 %v21526_v50  ;;  %35822 = vmatmul.mubr.f32.vlgmr.msra.gmra.mrb[46].mxu0 %v21980_v62 }
 0xf2b   : > { %35795 = vmatpush3.xpose.msra.mxu1 %v40310_v56  ;;  %35825 = vmatpush3.xpose.msra.mxu0 %v40308_v5 }
 0xf2c   : > { %35796 = vmatprep.mubr.msk.f32.mxu1 %vm38058_vm2, %v38057_v13  ;;  %35799 = vmatprep.subr.mxu1 %v38057_v13 }
 0xf2d   : > { %35826 = vmatprep.mubr.msk.f32.mxu0 %vm38058_vm2, %v38057_v13  ;;  %35829 = vmatprep.subr.mxu0 %v38057_v13 }
 0xf32   : > { %35797 = vmatmul.mubr.f32.vlgmr.msra.gmra.mrb[52].mxu1 %v21527_v43  ;;  %35827 = vmatmul.mubr.f32.vlgmr.msra.gmra.mrb[46].mxu0 %v21981_v9 }
 0xf33   : > { %35800 = vmatpush3.xpose.msra.mxu1 %v21538_v10  ;;  %35830 = vmatpush3.xpose.msra.mxu0 %v21992_v0 }
 0xf34   : > { %35801 = vmatprep.mubr.msk.f32.mxu1 %vm38058_vm2, %v38057_v13  ;;  %35804 = vmatprep.subr.mxu1 %v38057_v13 }
 0xf35   : > { %35831 = vmatprep.mubr.msk.f32.mxu0 %vm38058_vm2, %v38057_v13  ;;  %35834 = vmatprep.subr.mxu0 %v38057_v13 }
 0xf3a   : > { %35802 = vmatmul.mubr.f32.vlgmr.msra.gmra.mrb[52].mxu1 %v40301_v48  ;;  %35832 = vmatmul.mubr.f32.vlgmr.msra.gmra.mrb[46].mxu0 %v40303_v57 }
 0xf3b   : > { %35805 = vmatpush3.xpose.msra.mxu1 %v40310_v56  ;;  %35835 = vmatpush3.xpose.msra.mxu0 %v40308_v5 }
 0xf3c   : > { %35806 = vmatprep.mubr.msk.f32.mxu1 %vm38058_vm2, %v38057_v13  ;;  %35836 = vmatprep.mubr.msk.f32.mxu0 %vm38058_vm2, %v38057_v13 }
 0xf3d   : > { %35839 = vmatprep.subr.mxu1 %v38057_v13  ;;  %35869 = vmatprep.subr.mxu0 %v38057_v13 }
 0xf42   : > { %35807 = vmatmul.mubr.f32.vlgmr.msra.gmra.mrb[52].mxu1 %v40301_v48  ;;  %35837 = vmatmul.mubr.f32.vlgmr.msra.gmra.mrb[46].mxu0 %v40303_v57 }
 0xf43   : > { %35840 = vmatpush3.xpose.msra.mxu1 %v22368_v49  ;;  %35841 = vmatprep.mubr.msk.f32.mxu1 %vm38058_vm2, %v38057_v13 }
 0xf44   : > { %35844 = vmatprep.subr.mxu1 %v38057_v13  ;;  %35871 = vmatprep.mubr.msk.f32.mxu0 %vm38058_vm2, %v38057_v13 }
 0xf46   : > { %35842 = vmatmul.mubr.f32.vlgmr.msra.gmra.mrb[54].mxu1 %v22437_v61 }
 0xf47   : > { %35845 = vmatpush3.xpose.msra.mxu1 %v22448_v63  ;;  %35846 = vmatprep.mubr.msk.f32.mxu1 %vm38058_vm2, %v38057_v13 }
 0xf48   : > { %35849 = vmatprep.subr.mxu1 %v38057_v13 }
 0xf4e   : > { %35847 = vmatmul.mubr.f32.vlgmr.msra.gmra.mrb[54].mxu1 %v22433_v40 }
 0xf4f   : > { %35850 = vmatpush3.xpose.msra.mxu1 %v22445_v2  ;;  %35851 = vmatprep.mubr.msk.f32.mxu1 %vm38058_vm2, %v38057_v13 }
 0xf50   : > { %35854 = vmatprep.subr.mxu1 %v38057_v13 }
 0xf56   : > { %35852 = vmatmul.mubr.f32.vlgmr.msra.gmra.mrb[54].mxu1 %v22434_v6 }
 0xf57   : > { %35855 = vmatpush3.xpose.msra.mxu1 %v22368_v49  ;;  %35856 = vmatprep.mubr.msk.f32.mxu1 %vm38058_vm2, %v38057_v13 }
 0xf58   : > { %35859 = vmatprep.subr.mxu1 %v38057_v13 }
 0xf5e   : > { %35857 = vmatmul.mubr.f32.vlgmr.msra.gmra.mrb[54].mxu1 %v22435_v22 }
 0xf5f   : > { %35860 = vmatpush3.xpose.msra.mxu1 %v22446_v52  ;;  %35861 = vmatprep.mubr.msk.f32.mxu1 %vm38058_vm2, %v38057_v13 }
 0xf60   : > { %35864 = vmatprep.subr.mxu1 %v38057_v13 }
 0xf66   : > { %35862 = vmatmul.mubr.f32.vlgmr.msra.gmra.mrb[54].mxu1 %v22433_v40 }
 0xf67   : > { %35865 = vmatpush3.xpose.msra.mxu1 %v22368_v49  ;;  %35866 = vmatprep.mubr.msk.f32.mxu1 %vm38058_vm2, %v38057_v13 }
 0xf68   : > { %35899 = vmatprep.subr.mxu1 %v38057_v13 }
 0xf6e   : > { %35867 = vmatmul.mubr.f32.vlgmr.msra.gmra.mrb[54].mxu1 %v22433_v40 }
 0xf6f   : > { %35901 = vmatprep.mubr.msk.f32.mxu1 %vm38058_vm2, %v38057_v13 }
 0xf88   : > { %v40403_v33 = vpop.f32.mrb[40].mxu0 }
 0xf89   : > { %v35658_v48 = vpop.f32.mrb[41].mxu0 }
 0xfb4   : > { %v40405_v57 = vpop.f32.mrb[48].mxu1 }
 0xfb5   : > { %v35688_v5 = vpop.f32.mrb[49].mxu1 }
 0xfbd   : > { %v40407_v56 = vpop.f32.mrb[42].mxu0 }
 0xfbe   : > { %v35718_v50 = vpop.f32.mrb[43].mxu0 }
 0xfe9   : > { %v40409_v62 = vpop.f32.mrb[50].mxu1  ;;  %v21447_v21 = vpop.f32.mrb[44].mxu0 }
 0xfea   : > { %v35748_v51 = vpop.f32.mrb[51].mxu1  ;;  %v35778_v43 = vpop.f32.mrb[45].mxu0  ;;  %v22813_v9 = vsel %vm2672_vm3, %v21447_v21, -inf }
 0xfeb   : > { %22814 = vmax.xlane.f32.xlu1 %v22813_v9 }
0x1015   : > { %v21901_v0 = vpop.f32.mrb[52].mxu1  ;;  %v22355_v10 = vpop.f32.mrb[46].mxu0 }
0x1016   : > { %v35808_v12 = vpop.f32.mrb[53].mxu1  ;;  %v35838_v19 = vpop.f32.mrb[47].mxu0  ;;  %v22816_v44 = vsel %vm2672_vm3, %v21901_v0, -inf  ;;  %v22819_v42 = vsel %vm2672_vm3, %v22355_v10, -inf }
0x1017   : > { %22817 = vmax.xlane.f32.xlu0 %v22816_v44 }
0x101b   : > { %22820 = vmax.xlane.f32.xlu0 %v22819_v42 }
0x1041   : > { %v22809_v54 = vpop.f32.mrb[54].mxu1 }
0x1042   : > { %v35868_v8 = vpop.f32.mrb[55].mxu1  ;;  %v22822_v24 = vsel %vm2672_vm3, %v22809_v54, -inf }
0x1043   : > { %22823 = vmax.xlane.f32.xlu0 %v22822_v24 }
0x1078   : > { %v22815_v34 = vpop.xlane.xlu1 %22814 }
0x1079   : > { %v22825_v39 = vsub.f32 %v21447_v21, %v22815_v34 }
0x107b   : > { %v22829_v37 = vmul.f32 1.442695, %v22825_v39 }
0x107d   : > { %37893 = vpow2.f32 %v22829_v37 }
0x1087   : > { %v37894_v25 = vpop.eup %37893 }
0x1088   : > { %v22837_v4 = vsel %vm2672_vm3, %v37894_v25, 0.0 }
0x1089   : > { %22838 = vadd.xlane.f32.xlu1 %v22837_v4 }
0x109a   : > { %22857 = vrot.lane.b32.xlu1 %v38966_v41, %s38063_s16 }
0x10a4   : > { %v22818_v40 = vpop.xlane.xlu0 %22817 }
0x10a5   : > { %v22826_v49 = vsub.f32 %v21901_v0, %v22818_v40 }
0x10a7   : > { %v22831_v6 = vmul.f32 1.442695, %v22826_v49 }
0x10a8   : > { %v22821_v2 = vpop.xlane.xlu0 %22820 }
0x10a9   : > { %37895 = vpow2.f32 %v22831_v6  ;;  %v22827_v22 = vsub.f32 %v22355_v10, %v22821_v2 }
0x10ab   : > { %v22833_v52 = vmul.f32 1.442695, %v22827_v22 }
0x10ad   : > { %37897 = vpow2.f32 %v22833_v52 }
0x10b3   : > { %v40418_v53 = vpop.eup %37895 }
0x10b4   : > { %v22840_v59 = vsel %vm2672_vm3, %v40418_v53, 0.0 }
0x10b5   : > { %22841 = vadd.xlane.f32.xlu0 %v22840_v59 }
0x10b7   : > { %v40422_v61 = vpop.eup %37897 }
0x10b8   : > { %v22843_v63 = vsel %vm2672_vm3, %v40422_v61, 0.0 }
0x10be   : > { %22844 = vadd.xlane.f32.xlu1 %v22843_v63 }
0x10cb   : > { %23309 = vrot.lane.b32.xlu0 %v38968_v18, %s38063_s16 }
0x10cf   : > { %23761 = vrot.lane.b32.xlu1 %v38981_v26, %s38063_s16 }
0x10d0   : > { %v22824_v48 = vpop.xlane.xlu0 %22823 }
0x10d1   : > { %v22828_v5 = vsub.f32 %v22809_v54, %v22824_v48 }
0x10d3   : > { %24665 = vrot.lane.b32.xlu1 %v38604_v55, %s38064_s0  ;;  %v22835_v50 = vmul.f32 1.442695, %v22828_v5 }
0x10d5   : > { %37899 = vpow2.f32 %v22835_v50 }
0x10d7   : > { %25119 = vrot.lane.b32.xlu1 %v38602_v16, %s38064_s0 }
0x10db   : > { %24667 = vrot.lane.b32.xlu1 %v38619_v27, %s38064_s0 }
0x10df   : > { %25573 = vrot.lane.b32.xlu1 %v38608_v47, %s38064_s0  ;;  %v40440_v21 = vpop.eup %37899 }
0x10e0   : > { %v22846_v51 = vsel %vm2672_vm3, %v40440_v21, 0.0 }
0x10e3   : > { %25575 = vrot.lane.b32.xlu1 %v38625_v14, %s38064_s0 }
0x10ea   : > { %22847 = vadd.xlane.f32.xlu0 %v22846_v51 }
0x1100   : > { %24213 = vrot.lane.b32.xlu0 %v38978_v36, %s38063_s16 }
0x1104   : > { %25121 = vrot.lane.b32.xlu0 %v38639_v58, %s38064_s0 }
0x1108   : > { %26027 = vrot.lane.b32.xlu0 %v38606_v46, %s38064_s0 }
0x110c   : > { %26029 = vrot.lane.b32.xlu0 %v38623_v17, %s38064_s0 }
0x1116   : > { %v22839_v43 = vpop.xlane.xlu1 %22838 }
0x1117   : > { %37901 = vrcp.f32 %v22839_v43 }
0x111a   : > { %v22858_v9 = vpop.permute.xlu1 %22857 }
0x111b   : > { %v22864_v0 = vand.u32 4294901760, %v22858_v9 }
0x111d   : > { %35870 = vmatpush3.msra.mxu0 %v22864_v0  ;;  %v22941_v19 = vsub.f32 %v22858_v9, %v22864_v0 }
0x111e   : > { %35874 = vmatprep.subr.mxu0 %v38057_v13 }
0x111f   : > { %v22942_v54 = vand.u32 4294901760, %v22941_v19 }
0x1121   : > { %v37902_v10 = vpop.eup %37901  ;;  %v22943_v34 = vsub.f32 %v22941_v19, %v22942_v54 }
0x1122   : > { %v22853_v12 = vmul.f32 %v37902_v10, %v37894_v25 }
0x1123   : > { %v22944_v4 = vand.u32 4294901760, %v22943_v34 }
0x1124   : > { %v22861_v44 = vsel %vm2672_vm3, %v22853_v12, 0 }
0x1125   : > { %v22929_v42 = vand.u32 4294901760, %v22861_v44 }
0x1127   : > { %v22930_v8 = vsub.f32 %v22861_v44, %v22929_v42 }
0x1129   : > { %v22931_v24 = vand.u32 4294901760, %v22930_v8 }
0x112b   : > { %v22932_v39 = vsub.f32 %v22930_v8, %v22931_v24 }
0x112d   : > { %v22933_v37 = vand.u32 4294901760, %v22932_v39 }
0x112f   : > { %35872 = vmatmul.mubr.f32.vlgmr.msra.gmra.mrb[48].mxu0 %v22933_v37 }
0x1130   : > { %35875 = vmatpush3.msra.mxu0 %v22944_v4  ;;  %35876 = vmatprep.mubr.msk.f32.mxu0 %vm38058_vm2, %v38057_v13 }
0x1131   : > { %35879 = vmatprep.subr.mxu0 %v38057_v13 }
0x1137   : > { %35877 = vmatmul.mubr.f32.vlgmr.msra.gmra.mrb[48].mxu0 %v22929_v42 }
0x1138   : > { %35880 = vmatpush3.msra.mxu0 %v22941_v19  ;;  %35881 = vmatprep.mubr.msk.f32.mxu0 %vm38058_vm2, %v38057_v13 }
0x1139   : > { %35884 = vmatprep.subr.mxu0 %v38057_v13 }
0x113f   : > { %35882 = vmatmul.mubr.f32.vlgmr.msra.gmra.mrb[48].mxu0 %v22930_v8 }
0x1140   : > { %35885 = vmatpush3.msra.mxu0 %v22864_v0  ;;  %35886 = vmatprep.mubr.msk.f32.mxu0 %vm38058_vm2, %v38057_v13 }
0x1141   : > { %35889 = vmatprep.subr.mxu0 %v38057_v13 }
0x1142   : > { %v22842_v25 = vpop.xlane.xlu0 %22841 }
0x1143   : > { %37903 = vrcp.f32 %v22842_v25 }
0x1146   : > { %v23310_v40 = vpop.permute.xlu0 %23309 }
0x1147   : > { %v40463_v49 = vand.u32 4294901760, %v23310_v40  ;;  %35887 = vmatmul.mubr.f32.vlgmr.msra.gmra.mrb[48].mxu0 %v22931_v24 }
0x1148   : > { %35890 = vmatpush3.msra.mxu0 %v22942_v54  ;;  %35891 = vmatprep.mubr.msk.f32.mxu0 %vm38058_vm2, %v38057_v13 }
0x1149   : > { %35900 = vmatpush3.msra.mxu1 %v40463_v49  ;;  %35894 = vmatprep.subr.mxu0 %v38057_v13  ;;  %v23393_v52 = vsub.f32 %v23310_v40, %v40463_v49 }
0x114a   : > { %35904 = vmatprep.subr.mxu1 %v38057_v13 }
0x114b   : > { %v22845_v6 = vpop.xlane.xlu1 %22844  ;;  %v23394_v5 = vand.u32 4294901760, %v23393_v52 }
0x114c   : > { %37905 = vrcp.f32 %v22845_v6 }
0x114d   : > { %v37904_v2 = vpop.eup %37903  ;;  %v23395_v9 = vsub.f32 %v23393_v52, %v23394_v5 }
0x114e   : > { %v22854_v22 = vmul.f32 %v37904_v2, %v40418_v53 }
0x114f   : > { %35892 = vmatmul.mubr.f32.vlgmr.msra.gmra.mrb[48].mxu0 %v22929_v42  ;;  %v23762_v59 = vpop.permute.xlu1 %23761  ;;  %v23396_v54 = vand.u32 4294901760, %v23395_v9 }
0x1150   : > { %35895 = vmatpush3.msra.mxu0 %v22864_v0  ;;  %35896 = vmatprep.mubr.msk.f32.mxu0 %vm38058_vm2, %v38057_v13  ;;  %v23313_v63 = vsel %vm2672_vm3, %v22854_v22, 0  ;;  %v40478_v50 = vand.u32 4294901760, %v23762_v59 }
0x1151   : > { %35929 = vmatprep.subr.mxu0 %v38057_v13  ;;  %v40476_v48 = vand.u32 4294901760, %v23313_v63 }
0x1152   : > { %v23845_v10 = vsub.f32 %v23762_v59, %v40478_v50 }
0x1153   : > { %v23382_v51 = vsub.f32 %v23313_v63, %v40476_v48  ;;  %v24666_v25 = vpop.permute.xlu1 %24665 }
0x1154   : > { %v23846_v24 = vand.u32 4294901760, %v23845_v10  ;;  %v24669_v22 = vsel %vm2672_vm3, %v24666_v25, 0 }
0x1155   : > { %v23383_v53 = vand.u32 4294901760, %v23382_v51  ;;  %v40524_v63 = vand.u32 4294901760, %v24669_v22 }
0x1156   : > { %v37906_v43 = vpop.eup %37905  ;;  %v23847_v34 = vsub.f32 %v23845_v10, %v23846_v24 }
0x1157   : > { %v22855_v0 = vmul.f32 %v37906_v43, %v40422_v61  ;;  %35897 = vmatmul.mubr.f32.vlgmr.msra.gmra.mrb[48].mxu0 %v22929_v42  ;;  %v23384_v12 = vsub.f32 %v23382_v51, %v23383_v53  ;;  %v40509_v40 = vpop.permute.xlu1 %25119 }
0x1158   : > { %35930 = vmatpush3.msra.mxu0 %v40478_v50  ;;  %35931 = vmatprep.mubr.msk.f32.mxu0 %vm38058_vm2, %v38057_v13  ;;  %v23848_v4 = vand.u32 4294901760, %v23847_v34 }
0x1159   : > { %v23385_v19 = vand.u32 4294901760, %v23384_v12  ;;  %35934 = vmatprep.subr.mxu0 %v38057_v13  ;;  %v23765_v44 = vsel %vm2672_vm3, %v22855_v0, 0 }
0x115a   : > { %v40488_v8 = vand.u32 4294901760, %v23765_v44 }
0x115b   : > { %35902 = vmatmul.mubr.f32.vlgmr.msra.gmra.mrb[56].mxu1 %v23385_v19  ;;  %v24668_v2 = vpop.permute.xlu1 %24667 }
0x115c   : > { %35905 = vmatpush3.msra.mxu1 %v23396_v54  ;;  %35906 = vmatprep.mubr.msk.f32.mxu1 %vm38058_vm2, %v38057_v13  ;;  %v23834_v61 = vsub.f32 %v23765_v44, %v40488_v8 }
0x115d   : > { %35909 = vmatprep.subr.mxu1 %v38057_v13 }
0x115e   : > { %v23835_v42 = vand.u32 4294901760, %v23834_v61 }
0x1160   : > { %v23836_v39 = vsub.f32 %v23834_v61, %v23835_v42 }
0x1162   : > { %v23837_v37 = vand.u32 4294901760, %v23836_v39 }
0x1163   : > { %35907 = vmatmul.mubr.f32.vlgmr.msra.gmra.mrb[56].mxu1 %v40476_v48 }
0x1164   : > { %35910 = vmatpush3.msra.mxu1 %v23393_v52  ;;  %35932 = vmatmul.mubr.f32.vlgmr.msra.gmra.mrb[50].mxu0 %v23837_v37  ;;  %v24671_v52 = vsel %vm2672_vm3, %v24668_v2, 0  ;;  %v25123_v2 = vsel %vm2672_vm3, %v40509_v40, 0 }
0x1165   : > { %35935 = vmatpush3.msra.mxu0 %v23848_v4  ;;  %35911 = vmatprep.mubr.msk.f32.mxu1 %vm38058_vm2, %v38057_v13 }
0x1166   : > { %35914 = vmatprep.subr.mxu1 %v38057_v13  ;;  %35936 = vmatprep.mubr.msk.f32.mxu0 %vm38058_vm2, %v38057_v13 }
0x1167   : > { %35939 = vmatprep.subr.mxu0 %v38057_v13 }
0x116b   : > { %35912 = vmatmul.mubr.f32.vlgmr.msra.gmra.mrb[56].mxu1 %v23382_v51 }
0x116c   : > { %35915 = vmatpush3.msra.mxu1 %v40463_v49  ;;  %35937 = vmatmul.mubr.f32.vlgmr.msra.gmra.mrb[50].mxu0 %v40488_v8 }
0x116d   : > { %35940 = vmatpush3.msra.mxu0 %v23845_v10  ;;  %35916 = vmatprep.mubr.msk.f32.mxu1 %vm38058_vm2, %v38057_v13 }
0x116e   : > { %35919 = vmatprep.subr.mxu1 %v38057_v13  ;;  %35941 = vmatprep.mubr.msk.f32.mxu0 %vm38058_vm2, %v38057_v13 }
0x116f   : > { %35944 = vmatprep.subr.mxu0 %v38057_v13 }
0x1173   : > { %35917 = vmatmul.mubr.f32.vlgmr.msra.gmra.mrb[56].mxu1 %v23383_v53  ;;  %v40535_v53 = vsub.f32 %v24669_v22, %v40524_v63 }
0x1174   : > { %35920 = vmatpush3.msra.mxu1 %v23394_v5  ;;  %35942 = vmatmul.mubr.f32.vlgmr.msra.gmra.mrb[50].mxu0 %v23834_v61  ;;  %v40529_v5 = vand.u32 4294901760, %v24671_v52 }
0x1175   : > { %35945 = vmatpush3.msra.mxu0 %v40478_v50  ;;  %35921 = vmatprep.mubr.msk.f32.mxu1 %vm38058_vm2, %v38057_v13  ;;  %v24741_v12 = vand.u32 4294901760, %v40535_v53 }
0x1176   : > { %35924 = vmatprep.subr.mxu1 %v38057_v13  ;;  %35946 = vmatprep.mubr.msk.f32.mxu0 %vm38058_vm2, %v38057_v13  ;;  %v40538_v43 = vsub.f32 %v24671_v52, %v40529_v5 }
0x1177   : > { %v22848_v6 = vpop.xlane.xlu0 %22847  ;;  %35949 = vmatprep.subr.mxu0 %v38057_v13  ;;  %v24742_v44 = vsub.f32 %v40535_v53, %v24741_v12 }
0x1178   : > { %37907 = vrcp.f32 %v22848_v6 }
0x1179   : > { %v24743_v34 = vand.u32 4294901760, %v24742_v44 }
0x117b   : > { %35922 = vmatmul.mubr.f32.vlgmr.msra.gmra.mrb[56].mxu1 %v40476_v48  ;;  %v24214_v59 = vpop.permute.xlu0 %24213 }
0x117c   : > { %35925 = vmatpush3.msra.mxu1 %v40463_v49  ;;  %35947 = vmatmul.mubr.f32.vlgmr.msra.gmra.mrb[50].mxu0 %v23835_v42  ;;  %v40531_v51 = vand.u32 4294901760, %v24214_v59 }
0x117d   : > { %35950 = vmatpush3.msra.mxu0 %v23846_v24  ;;  %35926 = vmatprep.mubr.msk.f32.mxu1 %vm38058_vm2, %v38057_v13 }
0x117e   : > { %35959 = vmatprep.subr.mxu1 %v38057_v13  ;;  %35951 = vmatprep.mubr.msk.f32.mxu0 %vm38058_vm2, %v38057_v13  ;;  %v24297_v0 = vsub.f32 %v24214_v59, %v40531_v51 }
0x117f   : > { %35954 = vmatprep.subr.mxu0 %v38057_v13  ;;  %v25122_v6 = vpop.permute.xlu0 %25121 }
0x1180   : > { %v24298_v19 = vand.u32 4294901760, %v24297_v0  ;;  %v25125_v59 = vsel %vm2672_vm3, %v25122_v6, 0 }
0x1182   : > { %v37908_v49 = vpop.eup %37907  ;;  %v24299_v61 = vsub.f32 %v24297_v0, %v24298_v19 }
0x1183   : > { %v22856_v9 = vmul.f32 %v37908_v49, %v40440_v21  ;;  %35927 = vmatmul.mubr.f32.vlgmr.msra.gmra.mrb[56].mxu1 %v40476_v48  ;;  %v24752_v48 = vand.u32 4294901760, %v40538_v43  ;;  %v40594_v49 = vand.u32 4294901760, %v25123_v2 }
0x1184   : > { %35960 = vmatpush3.msra.mxu1 %v40531_v51  ;;  %35952 = vmatmul.mubr.f32.vlgmr.msra.gmra.mrb[50].mxu0 %v40488_v8  ;;  %v24300_v4 = vand.u32 4294901760, %v24299_v61 }
0x1185   : > { %35955 = vmatpush3.msra.mxu0 %v40478_v50  ;;  %35956 = vmatprep.mubr.msk.f32.mxu0 %vm38058_vm2, %v38057_v13  ;;  %v24217_v10 = vsel %vm2672_vm3, %v22856_v9, 0  ;;  %v24753_v24 = vsub.f32 %v40538_v43, %v24752_v48  ;;  %v25194_v9 = vsub.f32 %v25123_v2, %v40594_v49 }
0x1186   : > { %35989 = vmatprep.subr.mxu0 %v38057_v13  ;;  %35961 = vmatprep.mubr.msk.f32.mxu1 %vm38058_vm2, %v38057_v13  ;;  %v40553_v21 = vand.u32 4294901760, %v24217_v10 }
0x1187   : > { %35964 = vmatprep.subr.mxu1 %v38057_v13  ;;  %v24754_v37 = vand.u32 4294901760, %v24753_v24 }
0x1188   : > { %v24286_v50 = vsub.f32 %v24217_v10, %v40553_v21 }
0x118a   : > { %v24287_v54 = vand.u32 4294901760, %v24286_v50 }
0x118c   : > { %35957 = vmatmul.mubr.f32.vlgmr.msra.gmra.mrb[50].mxu0 %v40488_v8  ;;  %v24288_v42 = vsub.f32 %v24286_v50, %v24287_v54  ;;  %v25574_v8 = vpop.permute.xlu1 %25573 }
0x118d   : > { %35990 = vmatpush3.xpose.msra.mxu0 %v40529_v5  ;;  %35991 = vmatprep.mubr.msk.f32.mxu0 %vm38058_vm2, %v38057_v13  ;;  %v25577_v22 = vsel %vm2672_vm3, %v25574_v8, 0 }
0x118e   : > { %35994 = vmatprep.subr.mxu0 %v38057_v13  ;;  %v24289_v39 = vand.u32 4294901760, %v24288_v42 }
0x1190   : > { %35962 = vmatmul.mubr.f32.vlgmr.msra.gmra.mrb[58].mxu1 %v24289_v39  ;;  %35992 = vmatmul.mubr.f32.vlgmr.msra.gmra.mrb[52].mxu0 %v24743_v34  ;;  %v25576_v25 = vpop.permute.xlu1 %25575 }
0x1191   : > { %35965 = vmatpush3.msra.mxu1 %v24300_v4  ;;  %35995 = vmatpush3.xpose.msra.mxu0 %v24754_v37  ;;  %v25579_v52 = vsel %vm2672_vm3, %v25576_v25, 0 }
0x1192   : > { %35966 = vmatprep.mubr.msk.f32.mxu1 %vm38058_vm2, %v38057_v13  ;;  %35969 = vmatprep.subr.mxu1 %v38057_v13  ;;  %v40601_v40 = vand.u32 4294901760, %v25579_v52 }
0x1193   : > { %35996 = vmatprep.mubr.msk.f32.mxu0 %vm38058_vm2, %v38057_v13  ;;  %35999 = vmatprep.subr.mxu0 %v38057_v13 }
0x1194   : > { %v25659_v10 = vsub.f32 %v25579_v52, %v40601_v40 }
0x1198   : > { %35967 = vmatmul.mubr.f32.vlgmr.msra.gmra.mrb[58].mxu1 %v40553_v21  ;;  %35997 = vmatmul.mubr.f32.vlgmr.msra.gmra.mrb[52].mxu0 %v40524_v63 }
0x1199   : > { %35970 = vmatpush3.msra.mxu1 %v24297_v0  ;;  %36000 = vmatpush3.xpose.msra.mxu0 %v40538_v43  ;;  %v40603_v43 = vand.u32 4294901760, %v25125_v59 }
0x119a   : > { %35971 = vmatprep.mubr.msk.f32.mxu1 %vm38058_vm2, %v38057_v13  ;;  %35974 = vmatprep.subr.mxu1 %v38057_v13 }
0x119b   : > { %36001 = vmatprep.mubr.msk.f32.mxu0 %vm38058_vm2, %v38057_v13  ;;  %36004 = vmatprep.subr.mxu0 %v38057_v13 }
0x11a0   : > { %35972 = vmatmul.mubr.f32.vlgmr.msra.gmra.mrb[58].mxu1 %v24286_v50  ;;  %36002 = vmatmul.mubr.f32.vlgmr.msra.gmra.mrb[52].mxu0 %v40535_v53  ;;  %v40596_v53 = vand.u32 4294901760, %v25577_v22  ;;  %v25660_v50 = vand.u32 4294901760, %v25659_v10 }
0x11a1   : > { %35975 = vmatpush3.msra.mxu1 %v40531_v51  ;;  %36005 = vmatpush3.xpose.msra.mxu0 %v40529_v5 }
0x11a2   : > { %35976 = vmatprep.mubr.msk.f32.mxu1 %vm38058_vm2, %v38057_v13  ;;  %35979 = vmatprep.subr.mxu1 %v38057_v13  ;;  %v25648_v0 = vsub.f32 %v25577_v22, %v40596_v53  ;;  %v25661_v61 = vsub.f32 %v25659_v10, %v25660_v50 }
0x11a3   : > { %36006 = vmatprep.mubr.msk.f32.mxu0 %vm38058_vm2, %v38057_v13  ;;  %36009 = vmatprep.subr.mxu0 %v38057_v13 }
0x11a4   : > { %v25662_v34 = vand.u32 4294901760, %v25661_v61 }
0x11a8   : > { %35977 = vmatmul.mubr.f32.vlgmr.msra.gmra.mrb[58].mxu1 %v24287_v54  ;;  %36007 = vmatmul.mubr.f32.vlgmr.msra.gmra.mrb[52].mxu0 %v24741_v12  ;;  %v25205_v12 = vsub.f32 %v25125_v59, %v40603_v43 }
0x11a9   : > { %35980 = vmatpush3.msra.mxu1 %v24298_v19  ;;  %36010 = vmatpush3.xpose.msra.mxu0 %v24752_v48  ;;  %v25195_v48 = vand.u32 4294901760, %v25194_v9  ;;  %v25649_v19 = vand.u32 4294901760, %v25648_v0 }
0x11aa   : > { %35981 = vmatprep.mubr.msk.f32.mxu1 %vm38058_vm2, %v38057_v13  ;;  %35984 = vmatprep.subr.mxu1 %v38057_v13  ;;  %v25206_v44 = vand.u32 4294901760, %v25205_v12 }
0x11ab   : > { %36011 = vmatprep.mubr.msk.f32.mxu0 %vm38058_vm2, %v38057_v13  ;;  %36014 = vmatprep.subr.mxu0 %v38057_v13  ;;  %v25196_v54 = vsub.f32 %v25194_v9, %v25195_v48  ;;  %v25650_v24 = vsub.f32 %v25648_v0, %v25649_v19 }
0x11ad   : > { %v25651_v42 = vand.u32 4294901760, %v25650_v24 }
0x11b0   : > { %35982 = vmatmul.mubr.f32.vlgmr.msra.gmra.mrb[58].mxu1 %v40553_v21  ;;  %36012 = vmatmul.mubr.f32.vlgmr.msra.gmra.mrb[52].mxu0 %v40524_v63 }
0x11b1   : > { %35985 = vmatpush3.msra.mxu1 %v40531_v51  ;;  %36015 = vmatpush3.xpose.msra.mxu0 %v40529_v5  ;;  %v25207_v51 = vsub.f32 %v25205_v12, %v25206_v44  ;;  %v25197_v5 = vand.u32 4294901760, %v25196_v54 }
0x11b2   : > { %35986 = vmatprep.mubr.msk.f32.mxu1 %vm38058_vm2, %v38057_v13  ;;  %36016 = vmatprep.mubr.msk.f32.mxu0 %vm38058_vm2, %v38057_v13 }
0x11b3   : > { %36019 = vmatprep.subr.mxu1 %v38057_v13  ;;  %36049 = vmatprep.subr.mxu0 %v38057_v13  ;;  %v25208_v39 = vand.u32 4294901760, %v25207_v51 }
0x11b8   : > { %35987 = vmatmul.mubr.f32.vlgmr.msra.gmra.mrb[58].mxu1 %v40553_v21  ;;  %36017 = vmatmul.mubr.f32.vlgmr.msra.gmra.mrb[52].mxu0 %v40524_v63  ;;  %v26028_v63 = vpop.permute.xlu0 %26027 }
0x11b9   : > { %36020 = vmatpush3.xpose.msra.mxu1 %v40603_v43  ;;  %36050 = vmatpush3.xpose.msra.mxu0 %v40601_v40  ;;  %v26031_v37 = vsel %vm2672_vm3, %v26028_v63, 0 }
0x11ba   : > { %36021 = vmatprep.mubr.msk.f32.mxu1 %vm38058_vm2, %v38057_v13  ;;  %36024 = vmatprep.subr.mxu1 %v38057_v13  ;;  %v26101_v8 = vand.u32 4294901760, %v26031_v37 }
0x11bb   : > { %36051 = vmatprep.mubr.msk.f32.mxu0 %vm38058_vm2, %v38057_v13  ;;  %36054 = vmatprep.subr.mxu0 %v38057_v13 }
0x11bc   : > { %36022 = vmatmul.mubr.f32.vlgmr.msra.gmra.mrb[60].mxu1 %v25197_v5  ;;  %36052 = vmatmul.mubr.f32.vlgmr.msra.gmra.mrb[54].mxu0 %v25651_v42  ;;  %v26030_v21 = vpop.permute.xlu0 %26029  ;;  %v26102_v6 = vsub.f32 %v26031_v37, %v26101_v8 }
0x11bd   : > { %36025 = vmatpush3.xpose.msra.mxu1 %v25208_v39  ;;  %36055 = vmatpush3.xpose.msra.mxu0 %v25662_v34  ;;  %v26033_v4 = vsel %vm2672_vm3, %v26030_v21, 0 }
0x11be   : > { %36026 = vmatprep.mubr.msk.f32.mxu1 %vm38058_vm2, %v38057_v13  ;;  %36029 = vmatprep.subr.mxu1 %v38057_v13  ;;  %v26036_v25 = vand.u32 4294901760, %v26033_v4  ;;  %v26103_v22 = vand.u32 4294901760, %v26102_v6 }
0x11bf   : > { %36056 = vmatprep.mubr.msk.f32.mxu0 %vm38058_vm2, %v38057_v13  ;;  %36059 = vmatprep.subr.mxu0 %v38057_v13 }
0x11c0   : > { %v26113_v2 = vsub.f32 %v26033_v4, %v26036_v25  ;;  %v26104_v59 = vsub.f32 %v26102_v6, %v26103_v22 }
0x11c2   : > { %v26114_v52 = vand.u32 4294901760, %v26113_v2 }
0x11c4   : > { %36027 = vmatmul.mubr.f32.vlgmr.msra.gmra.mrb[60].mxu1 %v40594_v49  ;;  %36057 = vmatmul.mubr.f32.vlgmr.msra.gmra.mrb[54].mxu0 %v40596_v53 }
0x11c5   : > { %36030 = vmatpush3.xpose.msra.mxu1 %v25205_v12  ;;  %36060 = vmatpush3.xpose.msra.mxu0 %v25659_v10 }
0x11c6   : > { %36031 = vmatprep.mubr.msk.f32.mxu1 %vm38058_vm2, %v38057_v13  ;;  %36034 = vmatprep.subr.mxu1 %v38057_v13 }
0x11c7   : > { %36061 = vmatprep.mubr.msk.f32.mxu0 %vm38058_vm2, %v38057_v13  ;;  %36064 = vmatprep.subr.mxu0 %v38057_v13 }
0x11cc   : > { %36032 = vmatmul.mubr.f32.vlgmr.msra.gmra.mrb[60].mxu1 %v25194_v9  ;;  %36062 = vmatmul.mubr.f32.vlgmr.msra.gmra.mrb[54].mxu0 %v25648_v0  ;;  %v26115_v9 = vsub.f32 %v26113_v2, %v26114_v52 }
0x11cd   : > { %36035 = vmatpush3.xpose.msra.mxu1 %v40603_v43  ;;  %36065 = vmatpush3.xpose.msra.mxu0 %v40601_v40 }
0x11ce   : > { %36036 = vmatprep.mubr.msk.f32.mxu1 %vm38058_vm2, %v38057_v13  ;;  %36039 = vmatprep.subr.mxu1 %v38057_v13 }
0x11cf   : > { %36066 = vmatprep.mubr.msk.f32.mxu0 %vm38058_vm2, %v38057_v13  ;;  %36069 = vmatprep.subr.mxu0 %v38057_v13 }
0x11d4   : > { %36037 = vmatmul.mubr.f32.vlgmr.msra.gmra.mrb[60].mxu1 %v25195_v48  ;;  %36067 = vmatmul.mubr.f32.vlgmr.msra.gmra.mrb[54].mxu0 %v25649_v19 }
0x11d5   : > { %36040 = vmatpush3.xpose.msra.mxu1 %v25206_v44  ;;  %36070 = vmatpush3.xpose.msra.mxu0 %v25660_v50 }
0x11d6   : > { %36041 = vmatprep.mubr.msk.f32.mxu1 %vm38058_vm2, %v38057_v13  ;;  %36044 = vmatprep.subr.mxu1 %v38057_v13 }
0x11d7   : > { %36071 = vmatprep.mubr.msk.f32.mxu0 %vm38058_vm2, %v38057_v13  ;;  %36074 = vmatprep.subr.mxu0 %v38057_v13 }
0x11dc   : > { %36042 = vmatmul.mubr.f32.vlgmr.msra.gmra.mrb[60].mxu1 %v40594_v49  ;;  %36072 = vmatmul.mubr.f32.vlgmr.msra.gmra.mrb[54].mxu0 %v40596_v53 }
0x11dd   : > { %36045 = vmatpush3.xpose.msra.mxu1 %v40603_v43  ;;  %36075 = vmatpush3.xpose.msra.mxu0 %v40601_v40  ;;  %v26105_v40 = vand.u32 4294901760, %v26104_v59  ;;  %v26116_v43 = vand.u32 4294901760, %v26115_v9 }
0x11de   : > { %36046 = vmatprep.mubr.msk.f32.mxu1 %vm38058_vm2, %v38057_v13  ;;  %36076 = vmatprep.mubr.msk.f32.mxu0 %vm38058_vm2, %v38057_v13 }
0x11df   : > { %36079 = vmatprep.subr.mxu1 %v38057_v13  ;;  %36109 = vmatprep.subr.mxu0 %v38057_v13 }
0x11e4   : > { %36047 = vmatmul.mubr.f32.vlgmr.msra.gmra.mrb[60].mxu1 %v40594_v49  ;;  %36077 = vmatmul.mubr.f32.vlgmr.msra.gmra.mrb[54].mxu0 %v40596_v53 }
0x11e5   : > { %36080 = vmatpush3.xpose.msra.mxu1 %v26036_v25  ;;  %36081 = vmatprep.mubr.msk.f32.mxu1 %vm38058_vm2, %v38057_v13 }
0x11e6   : > { %36084 = vmatprep.subr.mxu1 %v38057_v13  ;;  %36111 = vmatprep.mubr.msk.f32.mxu0 %vm38058_vm2, %v38057_v13 }
0x11e8   : > { %36082 = vmatmul.mubr.f32.vlgmr.msra.gmra.mrb[62].mxu1 %v26105_v40 }
0x11e9   : > { %36085 = vmatpush3.xpose.msra.mxu1 %v26116_v43  ;;  %36086 = vmatprep.mubr.msk.f32.mxu1 %vm38058_vm2, %v38057_v13 }
0x11ea   : > { %36089 = vmatprep.subr.mxu1 %v38057_v13 }
0x11f0   : > { %36087 = vmatmul.mubr.f32.vlgmr.msra.gmra.mrb[62].mxu1 %v26101_v8 }
0x11f1   : > { %36090 = vmatpush3.xpose.msra.mxu1 %v26113_v2  ;;  %36091 = vmatprep.mubr.msk.f32.mxu1 %vm38058_vm2, %v38057_v13 }
0x11f2   : > { %36094 = vmatprep.subr.mxu1 %v38057_v13 }
0x11f8   : > { %36092 = vmatmul.mubr.f32.vlgmr.msra.gmra.mrb[62].mxu1 %v26102_v6 }
0x11f9   : > { %36095 = vmatpush3.xpose.msra.mxu1 %v26036_v25  ;;  %36096 = vmatprep.mubr.msk.f32.mxu1 %vm38058_vm2, %v38057_v13 }
0x11fa   : > { %36099 = vmatprep.subr.mxu1 %v38057_v13 }
0x1200   : > { %36097 = vmatmul.mubr.f32.vlgmr.msra.gmra.mrb[62].mxu1 %v26103_v22 }
0x1201   : > { %36100 = vmatpush3.xpose.msra.mxu1 %v26114_v52  ;;  %36101 = vmatprep.mubr.msk.f32.mxu1 %vm38058_vm2, %v38057_v13 }
0x1202   : > { %36104 = vmatprep.subr.mxu1 %v38057_v13 }
0x1208   : > { %36102 = vmatmul.mubr.f32.vlgmr.msra.gmra.mrb[62].mxu1 %v26101_v8 }
0x1209   : > { %36105 = vmatpush3.xpose.msra.mxu1 %v26036_v25  ;;  %36106 = vmatprep.mubr.msk.f32.mxu1 %vm38058_vm2, %v38057_v13 }
0x120a   : > { %36139 = vmatprep.subr.mxu1 %v38057_v13 }
0x1210   : > { %36107 = vmatmul.mubr.f32.vlgmr.msra.gmra.mrb[62].mxu1 %v26101_v8 }
0x1211   : > { %36141 = vmatprep.mubr.msk.f32.mxu1 %vm38058_vm2, %v38057_v13 }
0x122a   : > { %v40696_v49 = vpop.f32.mrb[48].mxu0 }
0x122b   : > { %v35898_v53 = vpop.f32.mrb[49].mxu0 }
0x1256   : > { %v40698_v0 = vpop.f32.mrb[56].mxu1 }
0x1257   : > { %v35928_v10 = vpop.f32.mrb[57].mxu1 }
0x125f   : > { %v40700_v12 = vpop.f32.mrb[50].mxu0 }
0x1260   : > { %v35958_v48 = vpop.f32.mrb[51].mxu0 }
0x128b   : > { %v40702_v19 = vpop.f32.mrb[58].mxu1  ;;  %v25115_v50 = vpop.f32.mrb[52].mxu0 }
0x128c   : > { %v35988_v44 = vpop.f32.mrb[59].mxu1  ;;  %v36018_v54 = vpop.f32.mrb[53].mxu0  ;;  %v26481_v24 = vsel %vm2672_vm3, %v25115_v50, -inf }
0x128d   : > { %26482 = vmax.xlane.f32.xlu1 %v26481_v24 }
0x12b7   : > { %v25569_v61 = vpop.f32.mrb[60].mxu1  ;;  %v26023_v51 = vpop.f32.mrb[54].mxu0 }
0x12b8   : > { %v36048_v5 = vpop.f32.mrb[61].mxu1  ;;  %v36078_v42 = vpop.f32.mrb[55].mxu0  ;;  %v26484_v34 = vsel %vm2672_vm3, %v25569_v61, -inf  ;;  %v26487_v39 = vsel %vm2672_vm3, %v26023_v51, -inf }
0x12b9   : > { %26485 = vmax.xlane.f32.xlu0 %v26484_v34 }
0x12bd   : > { %26488 = vmax.xlane.f32.xlu0 %v26487_v39 }
0x12e3   : > { %v26477_v63 = vpop.f32.mrb[62].mxu1 }
0x12e4   : > { %v36108_v21 = vpop.f32.mrb[63].mxu1  ;;  %v26490_v37 = vsel %vm2672_vm3, %v26477_v63, -inf }
0x12e5   : > { %26491 = vmax.xlane.f32.xlu0 %v26490_v37 }
0x131a   : > { %v26483_v4 = vpop.xlane.xlu1 %26482 }
0x131b   : > { %v26493_v8 = vsub.f32 %v25115_v50, %v26483_v4 }
0x131d   : > { %v26497_v25 = vmul.f32 1.442695, %v26493_v8 }
0x131f   : > { %37909 = vpow2.f32 %v26497_v25 }
0x1329   : > { %v37910_v6 = vpop.eup %37909 }
0x132a   : > { %v26505_v2 = vsel %vm2672_vm3, %v37910_v6, 0.0 }
0x132b   : > { %26506 = vadd.xlane.f32.xlu1 %v26505_v2 }
0x133c   : > { %26525 = vrot.lane.b32.xlu1 %v38966_v41, %s38064_s0 }
0x1346   : > { %v26486_v22 = vpop.xlane.xlu0 %26485 }
0x1347   : > { %v26494_v52 = vsub.f32 %v25569_v61, %v26486_v22 }
0x1349   : > { %v26499_v59 = vmul.f32 1.442695, %v26494_v52 }
0x134a   : > { %v26489_v9 = vpop.xlane.xlu0 %26488 }
0x134b   : > { %37911 = vpow2.f32 %v26499_v59  ;;  %v26495_v40 = vsub.f32 %v26023_v51, %v26489_v9 }
0x134d   : > { %v26501_v43 = vmul.f32 1.442695, %v26495_v40 }
0x134f   : > { %37913 = vpow2.f32 %v26501_v43 }
0x1355   : > { %v40711_v53 = vpop.eup %37911 }
0x1356   : > { %v26508_v10 = vsel %vm2672_vm3, %v40711_v53, 0.0 }
0x1357   : > { %26509 = vadd.xlane.f32.xlu0 %v26508_v10 }
0x1359   : > { %v40715_v48 = vpop.eup %37913 }
0x135a   : > { %v26511_v50 = vsel %vm2672_vm3, %v40715_v48, 0.0 }
0x1360   : > { %26512 = vadd.xlane.f32.xlu1 %v26511_v50 }
0x136d   : > { %26977 = vrot.lane.b32.xlu0 %v38968_v18, %s38064_s0 }
0x1371   : > { %27429 = vrot.lane.b32.xlu1 %v38981_v26, %s38064_s0 }
0x1372   : > { %v26492_v44 = vpop.xlane.xlu0 %26491 }
0x1373   : > { %v26496_v54 = vsub.f32 %v26477_v63, %v26492_v44 }
0x1375   : > { %28333 = vrot.lane.b32.xlu1 %v38604_v55, %s38065_s9  ;;  %v26503_v24 = vmul.f32 1.442695, %v26496_v54 }
0x1377   : > { %37915 = vpow2.f32 %v26503_v24 }
0x1379   : > { %28787 = vrot.lane.b32.xlu1 %v38602_v16, %s38065_s9 }
0x137d   : > { %28335 = vrot.lane.b32.xlu1 %v38619_v27, %s38065_s9 }
0x1381   : > { %29241 = vrot.lane.b32.xlu1 %v38608_v47, %s38065_s9  ;;  %v40733_v61 = vpop.eup %37915 }
0x1382   : > { %v26514_v55 = vsel %vm2672_vm3, %v40733_v61, 0.0 }
0x1385   : > { %29243 = vrot.lane.b32.xlu1 %v38625_v14, %s38065_s9 }
0x138c   : > { %26515 = vadd.xlane.f32.xlu0 %v26514_v55 }
0x13a2   : > { %27881 = vrot.lane.b32.xlu0 %v38978_v36, %s38064_s0  ;;  %s38072_s0 = smov 56  }
0x13a6   : > { %28789 = vrot.lane.b32.xlu0 %v38639_v58, %s38065_s9 }
0x13aa   : > { %29695 = vrot.lane.b32.xlu0 %v38606_v46, %s38065_s9 }
0x13ae   : > { %29697 = vrot.lane.b32.xlu0 %v38623_v17, %s38065_s9 }
0x13b8   : > { %v26507_v16 = vpop.xlane.xlu1 %26506 }
0x13b9   : > { %37917 = vrcp.f32 %v26507_v16 }
0x13bc   : > { %v26526_v47 = vpop.permute.xlu1 %26525 }
0x13bd   : > { %v26532_v27 = vand.u32 4294901760, %v26526_v47 }
0x13bf   : > { %36110 = vmatpush3.msra.mxu0 %v26532_v27  ;;  %v26609_v5 = vsub.f32 %v26526_v47, %v26532_v27 }
0x13c0   : > { %36114 = vmatprep.subr.mxu0 %v38057_v13 }
0x13c1   : > { %v26610_v58 = vand.u32 4294901760, %v26609_v5 }
0x13c3   : > { %v37918_v14 = vpop.eup %37917  ;;  %v26611_v46 = vsub.f32 %v26609_v5, %v26610_v58 }
0x13c4   : > { %v26521_v51 = vmul.f32 %v37918_v14, %v37910_v6 }
0x13c5   : > { %v26612_v17 = vand.u32 4294901760, %v26611_v46 }
0x13c6   : > { %v26529_v42 = vsel %vm2672_vm3, %v26521_v51, 0 }
0x13c7   : > { %v26597_v34 = vand.u32 4294901760, %v26529_v42 }
0x13c9   : > { %v26598_v39 = vsub.f32 %v26529_v42, %v26597_v34 }
0x13cb   : > { %v26599_v63 = vand.u32 4294901760, %v26598_v39 }
0x13cd   : > { %v26600_v21 = vsub.f32 %v26598_v39, %v26599_v63 }
0x13cf   : > { %v26601_v37 = vand.u32 4294901760, %v26600_v21 }
0x13d1   : > { %36112 = vmatmul.mubr.f32.vlgmr.msra.gmra.mrb[56].mxu0 %v26601_v37 }
0x13d2   : > { %36115 = vmatpush3.msra.mxu0 %v26612_v17  ;;  %36116 = vmatprep.mubr.msk.f32.mxu0 %vm38058_vm2, %v38057_v13 }
0x13d3   : > { %36119 = vmatprep.subr.mxu0 %v38057_v13 }
0x13d9   : > { %36117 = vmatmul.mubr.f32.vlgmr.msra.gmra.mrb[56].mxu0 %v26597_v34 }
0x13da   : > { %36120 = vmatpush3.msra.mxu0 %v26609_v5  ;;  %36121 = vmatprep.mubr.msk.f32.mxu0 %vm38058_vm2, %v38057_v13 }
0x13db   : > { %36124 = vmatprep.subr.mxu0 %v38057_v13 }
0x13e1   : > { %36122 = vmatmul.mubr.f32.vlgmr.msra.gmra.mrb[56].mxu0 %v26598_v39 }
0x13e2   : > { %36125 = vmatpush3.msra.mxu0 %v26532_v27  ;;  %36126 = vmatprep.mubr.msk.f32.mxu0 %vm38058_vm2, %v38057_v13 }
0x13e3   : > { %36129 = vmatprep.subr.mxu0 %v38057_v13 }
0x13e4   : > { %v26510_v4 = vpop.xlane.xlu0 %26509 }
0x13e5   : > { %37919 = vrcp.f32 %v26510_v4 }
0x13e8   : > { %v26978_v8 = vpop.permute.xlu0 %26977 }
0x13e9   : > { %v40756_v25 = vand.u32 4294901760, %v26978_v8  ;;  %36127 = vmatmul.mubr.f32.vlgmr.msra.gmra.mrb[56].mxu0 %v26599_v63 }
0x13ea   : > { %36130 = vmatpush3.msra.mxu0 %v26610_v58  ;;  %36131 = vmatprep.mubr.msk.f32.mxu0 %vm38058_vm2, %v38057_v13 }
0x13eb   : > { %36140 = vmatpush3.msra.mxu1 %v40756_v25  ;;  %36134 = vmatprep.subr.mxu0 %v38057_v13  ;;  %v27061_v52 = vsub.f32 %v26978_v8, %v40756_v25 }
0x13ec   : > { %36144 = vmatprep.subr.mxu1 %v38057_v13 }
0x13ed   : > { %v26513_v6 = vpop.xlane.xlu1 %26512  ;;  %v27062_v43 = vand.u32 4294901760, %v27061_v52 }
0x13ee   : > { %37921 = vrcp.f32 %v26513_v6 }
0x13ef   : > { %v37920_v2 = vpop.eup %37919  ;;  %v27063_v54 = vsub.f32 %v27061_v52, %v27062_v43 }
0x13f0   : > { %v26522_v22 = vmul.f32 %v37920_v2, %v40711_v53 }
0x13f1   : > { %36132 = vmatmul.mubr.f32.vlgmr.msra.gmra.mrb[56].mxu0 %v26597_v34  ;;  %v27430_v59 = vpop.permute.xlu1 %27429  ;;  %v27064_v14 = vand.u32 4294901760, %v27063_v54 }
0x13f2   : > { %36135 = vmatpush3.msra.mxu0 %v26532_v27  ;;  %36136 = vmatprep.mubr.msk.f32.mxu0 %vm38058_vm2, %v38057_v13  ;;  %v26981_v9 = vsel %vm2672_vm3, %v26522_v22, 0  ;;  %v40771_v10 = vand.u32 4294901760, %v27430_v59 }
0x13f3   : > { %36169 = vmatprep.subr.mxu0 %v38057_v13  ;;  %v40769_v40 = vand.u32 4294901760, %v26981_v9 }
0x13f4   : > { %v27513_v55 = vsub.f32 %v27430_v59, %v40771_v10 }
0x13f5   : > { %v27050_v50 = vsub.f32 %v26981_v9, %v40769_v40  ;;  %v28334_v46 = vpop.permute.xlu1 %28333 }
0x13f6   : > { %v27514_v5 = vand.u32 4294901760, %v27513_v55  ;;  %v28337_v4 = vsel %vm2672_vm3, %v28334_v46, 0 }
0x13f7   : > { %v27051_v53 = vand.u32 4294901760, %v27050_v50  ;;  %v40817_v2 = vand.u32 4294901760, %v28337_v4 }
0x13f8   : > { %v37922_v44 = vpop.eup %37921 }
0x13f9   : > { %v26523_v24 = vmul.f32 %v37922_v44, %v40715_v48  ;;  %36137 = vmatmul.mubr.f32.vlgmr.msra.gmra.mrb[56].mxu0 %v26597_v34  ;;  %v27052_v16 = vsub.f32 %v27050_v50, %v27051_v53  ;;  %v27515_v34 = vsub.f32 %v27513_v55, %v27514_v5  ;;  %v40802_v21 = vpop.permute.xlu1 %28787  ;;  %v40828_v59 = vsub.f32 %v28337_v4, %v40817_v2 }
0x13fa   : > { %36170 = vmatpush3.msra.mxu0 %v40771_v10  ;;  %36171 = vmatprep.mubr.msk.f32.mxu0 %vm38058_vm2, %v38057_v13 }
0x13fb   : > { %v27053_v47 = vand.u32 4294901760, %v27052_v16  ;;  %36174 = vmatprep.subr.mxu0 %v38057_v13  ;;  %v27433_v27 = vsel %vm2672_vm3, %v26523_v24, 0  ;;  %v27516_v63 = vand.u32 4294901760, %v27515_v34  ;;  %v28409_v44 = vand.u32 4294901760, %v40828_v59 }
0x13fc   : > { %v40781_v51 = vand.u32 4294901760, %v27433_v27 }
0x13fd   : > { %36142 = vmatmul.mubr.f32.vlgmr.msra.gmra.mrb[64].mxu1 %v27053_v47  ;;  %v28336_v17 = vpop.permute.xlu1 %28335  ;;  %v28410_v24 = vsub.f32 %v40828_v59, %v28409_v44 }
0x13fe   : > { %36145 = vmatpush3.msra.mxu1 %v27064_v14  ;;  %36146 = vmatprep.mubr.msk.f32.mxu1 %vm38058_vm2, %v38057_v13  ;;  %v27502_v48 = vsub.f32 %v27433_v27, %v40781_v51  ;;  %v28339_v8 = vsel %vm2672_vm3, %v28336_v17, 0 }
0x13ff   : > { %36149 = vmatprep.subr.mxu1 %v38057_v13  ;;  %v40822_v22 = vand.u32 4294901760, %v28339_v8  ;;  %v28411_v14 = vand.u32 4294901760, %v28410_v24 }
0x1400   : > { %v27503_v42 = vand.u32 4294901760, %v27502_v48 }
0x1401   : > { %v40831_v9 = vsub.f32 %v28339_v8, %v40822_v22 }
0x1402   : > { %v27504_v58 = vsub.f32 %v27502_v48, %v27503_v42 }
0x1404   : > { %v27505_v39 = vand.u32 4294901760, %v27504_v58 }
0x1405   : > { %36147 = vmatmul.mubr.f32.vlgmr.msra.gmra.mrb[64].mxu1 %v40769_v40 }
0x1406   : > { %36150 = vmatpush3.msra.mxu1 %v27061_v52  ;;  %36172 = vmatmul.mubr.f32.vlgmr.msra.gmra.mrb[58].mxu0 %v27505_v39  ;;  %v28791_v39 = vsel %vm2672_vm3, %v40802_v21, 0 }
0x1407   : > { %36175 = vmatpush3.msra.mxu0 %v27516_v63  ;;  %36151 = vmatprep.mubr.msk.f32.mxu1 %vm38058_vm2, %v38057_v13  ;;  %v40887_v17 = vand.u32 4294901760, %v28791_v39 }
0x1408   : > { %36154 = vmatprep.subr.mxu1 %v38057_v13  ;;  %36176 = vmatprep.mubr.msk.f32.mxu0 %vm38058_vm2, %v38057_v13 }
0x1409   : > { %36179 = vmatprep.subr.mxu0 %v38057_v13 }
0x140d   : > { %36152 = vmatmul.mubr.f32.vlgmr.msra.gmra.mrb[64].mxu1 %v27050_v50 }
0x140e   : > { %36155 = vmatpush3.msra.mxu1 %v40756_v25  ;;  %36177 = vmatmul.mubr.f32.vlgmr.msra.gmra.mrb[58].mxu0 %v40781_v51 }
0x140f   : > { %36180 = vmatpush3.msra.mxu0 %v27513_v55  ;;  %36156 = vmatprep.mubr.msk.f32.mxu1 %vm38058_vm2, %v38057_v13 }
0x1410   : > { %36159 = vmatprep.subr.mxu1 %v38057_v13  ;;  %36181 = vmatprep.mubr.msk.f32.mxu0 %vm38058_vm2, %v38057_v13 }
0x1411   : > { %36184 = vmatprep.subr.mxu0 %v38057_v13 }
0x1415   : > { %36157 = vmatmul.mubr.f32.vlgmr.msra.gmra.mrb[64].mxu1 %v27051_v53 }
0x1416   : > { %36160 = vmatpush3.msra.mxu1 %v27062_v43  ;;  %36182 = vmatmul.mubr.f32.vlgmr.msra.gmra.mrb[58].mxu0 %v27502_v48 }
0x1417   : > { %36185 = vmatpush3.msra.mxu0 %v40771_v10  ;;  %36161 = vmatprep.mubr.msk.f32.mxu1 %vm38058_vm2, %v38057_v13 }
0x1418   : > { %36164 = vmatprep.subr.mxu1 %v38057_v13  ;;  %36186 = vmatprep.mubr.msk.f32.mxu0 %vm38058_vm2, %v38057_v13 }
0x1419   : > { %v26516_v37 = vpop.xlane.xlu0 %26515  ;;  %36189 = vmatprep.subr.mxu0 %v38057_v13 }
0x141a   : > { %37923 = vrcp.f32 %v26516_v37 }
0x141d   : > { %36162 = vmatmul.mubr.f32.vlgmr.msra.gmra.mrb[64].mxu1 %v40769_v40  ;;  %v27882_v6 = vpop.permute.xlu0 %27881 }
0x141e   : > { %36165 = vmatpush3.msra.mxu1 %v40756_v25  ;;  %36187 = vmatmul.mubr.f32.vlgmr.msra.gmra.mrb[58].mxu0 %v27503_v42  ;;  %v40824_v52 = vand.u32 4294901760, %v27882_v6 }
0x141f   : > { %36190 = vmatpush3.msra.mxu0 %v27514_v5  ;;  %36166 = vmatprep.mubr.msk.f32.mxu1 %vm38058_vm2, %v38057_v13 }
0x1420   : > { %36199 = vmatprep.subr.mxu1 %v38057_v13  ;;  %36191 = vmatprep.mubr.msk.f32.mxu0 %vm38058_vm2, %v38057_v13  ;;  %v27965_v50 = vsub.f32 %v27882_v6, %v40824_v52  ;;  %v28862_v6 = vsub.f32 %v28791_v39, %v40887_v17 }
0x1421   : > { %36194 = vmatprep.subr.mxu0 %v38057_v13  ;;  %v28790_v58 = vpop.permute.xlu0 %28789 }
0x1422   : > { %v27966_v54 = vand.u32 4294901760, %v27965_v50  ;;  %v28793_v37 = vsel %vm2672_vm3, %v28790_v58, 0 }
0x1423   : > { %v40896_v8 = vand.u32 4294901760, %v28793_v37 }
0x1424   : > { %v37924_v25 = vpop.eup %37923  ;;  %v27967_v47 = vsub.f32 %v27965_v50, %v27966_v54 }
0x1425   : > { %v26524_v43 = vmul.f32 %v37924_v25, %v40733_v61  ;;  %36167 = vmatmul.mubr.f32.vlgmr.msra.gmra.mrb[64].mxu1 %v40769_v40  ;;  %v28420_v40 = vand.u32 4294901760, %v40831_v9 }
0x1426   : > { %36200 = vmatpush3.msra.mxu1 %v40824_v52  ;;  %36192 = vmatmul.mubr.f32.vlgmr.msra.gmra.mrb[58].mxu0 %v40781_v51  ;;  %v27968_v42 = vand.u32 4294901760, %v27967_v47 }
0x1427   : > { %36195 = vmatpush3.msra.mxu0 %v40771_v10  ;;  %36196 = vmatprep.mubr.msk.f32.mxu0 %vm38058_vm2, %v38057_v13  ;;  %v27885_v53 = vsel %vm2672_vm3, %v26524_v43, 0  ;;  %v28421_v16 = vsub.f32 %v40831_v9, %v28420_v40  ;;  %v28863_v43 = vand.u32 4294901760, %v28862_v6 }
0x1428   : > { %36229 = vmatprep.subr.mxu0 %v38057_v13  ;;  %36201 = vmatprep.mubr.msk.f32.mxu1 %vm38058_vm2, %v38057_v13  ;;  %v40846_v61 = vand.u32 4294901760, %v27885_v53 }
0x1429   : > { %36204 = vmatprep.subr.mxu1 %v38057_v13  ;;  %v28422_v48 = vand.u32 4294901760, %v28421_v16 }
0x142a   : > { %v27954_v10 = vsub.f32 %v27885_v53, %v40846_v61 }
0x142c   : > { %v27955_v55 = vand.u32 4294901760, %v27954_v10 }
0x142e   : > { %36197 = vmatmul.mubr.f32.vlgmr.msra.gmra.mrb[58].mxu0 %v40781_v51  ;;  %v27956_v27 = vsub.f32 %v27954_v10, %v27955_v55  ;;  %v29242_v51 = vpop.permute.xlu1 %29241 }
0x142f   : > { %36230 = vmatpush3.xpose.msra.mxu0 %v40822_v22  ;;  %36231 = vmatprep.mubr.msk.f32.mxu0 %vm38058_vm2, %v38057_v13  ;;  %v29245_v63 = vsel %vm2672_vm3, %v29242_v51, 0 }
0x1430   : > { %36234 = vmatprep.subr.mxu0 %v38057_v13  ;;  %v27957_v5 = vand.u32 4294901760, %v27956_v27  ;;  %v40889_v4 = vand.u32 4294901760, %v29245_v63 }
0x1432   : > { %36202 = vmatmul.mubr.f32.vlgmr.msra.gmra.mrb[66].mxu1 %v27957_v5  ;;  %36232 = vmatmul.mubr.f32.vlgmr.msra.gmra.mrb[60].mxu0 %v28411_v14  ;;  %v29244_v34 = vpop.permute.xlu1 %29243  ;;  %v29316_v25 = vsub.f32 %v29245_v63, %v40889_v4 }
0x1433   : > { %36205 = vmatpush3.msra.mxu1 %v27968_v42  ;;  %36235 = vmatpush3.xpose.msra.mxu0 %v28422_v48  ;;  %v29247_v46 = vsel %vm2672_vm3, %v29244_v34, 0 }
0x1434   : > { %36206 = vmatprep.mubr.msk.f32.mxu1 %vm38058_vm2, %v38057_v13  ;;  %36209 = vmatprep.subr.mxu1 %v38057_v13  ;;  %v40894_v21 = vand.u32 4294901760, %v29247_v46 }
0x1435   : > { %36236 = vmatprep.mubr.msk.f32.mxu0 %vm38058_vm2, %v38057_v13  ;;  %36239 = vmatprep.subr.mxu0 %v38057_v13 }
0x143a   : > { %36207 = vmatmul.mubr.f32.vlgmr.msra.gmra.mrb[66].mxu1 %v40846_v61  ;;  %36237 = vmatmul.mubr.f32.vlgmr.msra.gmra.mrb[60].mxu0 %v40817_v2 }
0x143b   : > { %36210 = vmatpush3.msra.mxu1 %v27965_v50  ;;  %36240 = vmatpush3.xpose.msra.mxu0 %v40831_v9  ;;  %v28873_v9 = vsub.f32 %v28793_v37, %v40896_v8  ;;  %v29317_v50 = vand.u32 4294901760, %v29316_v25 }
0x143c   : > { %36211 = vmatprep.mubr.msk.f32.mxu1 %vm38058_vm2, %v38057_v13  ;;  %36214 = vmatprep.subr.mxu1 %v38057_v13 }
0x143d   : > { %36241 = vmatprep.mubr.msk.f32.mxu0 %vm38058_vm2, %v38057_v13  ;;  %36244 = vmatprep.subr.mxu0 %v38057_v13 }
0x1442   : > { %36212 = vmatmul.mubr.f32.vlgmr.msra.gmra.mrb[66].mxu1 %v27954_v10  ;;  %36242 = vmatmul.mubr.f32.vlgmr.msra.gmra.mrb[60].mxu0 %v40828_v59  ;;  %v29327_v59 = vsub.f32 %v29247_v46, %v40894_v21 }
0x1443   : > { %36215 = vmatpush3.msra.mxu1 %v40824_v52  ;;  %36245 = vmatpush3.xpose.msra.mxu0 %v40822_v22 }
0x1444   : > { %36216 = vmatprep.mubr.msk.f32.mxu1 %vm38058_vm2, %v38057_v13  ;;  %36219 = vmatprep.subr.mxu1 %v38057_v13  ;;  %v29328_v53 = vand.u32 4294901760, %v29327_v59 }
0x1445   : > { %36246 = vmatprep.mubr.msk.f32.mxu0 %vm38058_vm2, %v38057_v13  ;;  %36249 = vmatprep.subr.mxu0 %v38057_v13 }
0x1446   : > { %v29329_v10 = vsub.f32 %v29327_v59, %v29328_v53 }
0x144a   : > { %36217 = vmatmul.mubr.f32.vlgmr.msra.gmra.mrb[66].mxu1 %v27955_v55  ;;  %36247 = vmatmul.mubr.f32.vlgmr.msra.gmra.mrb[60].mxu0 %v28409_v44  ;;  %v28874_v44 = vand.u32 4294901760, %v28873_v9  ;;  %v29330_v55 = vand.u32 4294901760, %v29329_v10 }
0x144b   : > { %36220 = vmatpush3.msra.mxu1 %v27966_v54  ;;  %36250 = vmatpush3.xpose.msra.mxu0 %v28420_v40  ;;  %v28864_v40 = vsub.f32 %v28862_v6, %v28863_v43  ;;  %v29318_v54 = vsub.f32 %v29316_v25, %v29317_v50 }
0x144c   : > { %36221 = vmatprep.mubr.msk.f32.mxu1 %vm38058_vm2, %v38057_v13  ;;  %36224 = vmatprep.subr.mxu1 %v38057_v13 }
0x144d   : > { %36251 = vmatprep.mubr.msk.f32.mxu0 %vm38058_vm2, %v38057_v13  ;;  %36254 = vmatprep.subr.mxu0 %v38057_v13  ;;  %v29319_v24 = vand.u32 4294901760, %v29318_v54 }
0x1452   : > { %36222 = vmatmul.mubr.f32.vlgmr.msra.gmra.mrb[66].mxu1 %v40846_v61  ;;  %36252 = vmatmul.mubr.f32.vlgmr.msra.gmra.mrb[60].mxu0 %v40817_v2 }
0x1453   : > { %36225 = vmatpush3.msra.mxu1 %v40824_v52  ;;  %36255 = vmatpush3.xpose.msra.mxu0 %v40822_v22  ;;  %v28875_v52 = vsub.f32 %v28873_v9, %v28874_v44  ;;  %v28865_v22 = vand.u32 4294901760, %v28864_v40 }
0x1454   : > { %36226 = vmatprep.mubr.msk.f32.mxu1 %vm38058_vm2, %v38057_v13  ;;  %36256 = vmatprep.mubr.msk.f32.mxu0 %vm38058_vm2, %v38057_v13 }
0x1455   : > { %36259 = vmatprep.subr.mxu1 %v38057_v13  ;;  %36289 = vmatprep.subr.mxu0 %v38057_v13  ;;  %v28876_v16 = vand.u32 4294901760, %v28875_v52 }
0x145a   : > { %36227 = vmatmul.mubr.f32.vlgmr.msra.gmra.mrb[66].mxu1 %v40846_v61  ;;  %36257 = vmatmul.mubr.f32.vlgmr.msra.gmra.mrb[60].mxu0 %v40817_v2  ;;  %v29696_v2 = vpop.permute.xlu0 %29695 }
0x145b   : > { %36260 = vmatpush3.xpose.msra.mxu1 %v40896_v8  ;;  %36290 = vmatpush3.xpose.msra.mxu0 %v40894_v21  ;;  %v29699_v47 = vsel %vm2672_vm3, %v29696_v2, 0 }
0x145c   : > { %36261 = vmatprep.mubr.msk.f32.mxu1 %vm38058_vm2, %v38057_v13  ;;  %36264 = vmatprep.subr.mxu1 %v38057_v13  ;;  %v29769_v14 = vand.u32 4294901760, %v29699_v47 }
0x145d   : > { %36291 = vmatprep.mubr.msk.f32.mxu0 %vm38058_vm2, %v38057_v13  ;;  %36294 = vmatprep.subr.mxu0 %v38057_v13 }
0x145e   : > { %36262 = vmatmul.mubr.f32.vlgmr.msra.gmra.mrb[68].mxu1 %v28865_v22  ;;  %36292 = vmatmul.mubr.f32.vlgmr.msra.gmra.mrb[62].mxu0 %v29319_v24  ;;  %v29698_v61 = vpop.permute.xlu0 %29697  ;;  %v29770_v48 = vsub.f32 %v29699_v47, %v29769_v14 }
0x145f   : > { %36265 = vmatpush3.xpose.msra.mxu1 %v28876_v16  ;;  %36295 = vmatpush3.xpose.msra.mxu0 %v29330_v55  ;;  %v29701_v27 = vsel %vm2672_vm3, %v29698_v61, 0 }
0x1460   : > { %36266 = vmatprep.mubr.msk.f32.mxu1 %vm38058_vm2, %v38057_v13  ;;  %36269 = vmatprep.subr.mxu1 %v38057_v13  ;;  %v29704_v5 = vand.u32 4294901760, %v29701_v27  ;;  %v29771_v51 = vand.u32 4294901760, %v29770_v48 }
0x1461   : > { %36296 = vmatprep.mubr.msk.f32.mxu0 %vm38058_vm2, %v38057_v13  ;;  %36299 = vmatprep.subr.mxu0 %v38057_v13 }
0x1462   : > { %v29781_v42 = vsub.f32 %v29701_v27, %v29704_v5  ;;  %v29772_v58 = vsub.f32 %v29770_v48, %v29771_v51 }
0x1464   : > { %v29782_v34 = vand.u32 4294901760, %v29781_v42  ;;  %v29773_v63 = vand.u32 4294901760, %v29772_v58 }
0x1466   : > { %36267 = vmatmul.mubr.f32.vlgmr.msra.gmra.mrb[68].mxu1 %v40887_v17  ;;  %36297 = vmatmul.mubr.f32.vlgmr.msra.gmra.mrb[62].mxu0 %v40889_v4  ;;  %v29783_v39 = vsub.f32 %v29781_v42, %v29782_v34 }
0x1467   : > { %36270 = vmatpush3.xpose.msra.mxu1 %v28873_v9  ;;  %36300 = vmatpush3.xpose.msra.mxu0 %v29327_v59 }
0x1468   : > { %36271 = vmatprep.mubr.msk.f32.mxu1 %vm38058_vm2, %v38057_v13  ;;  %36274 = vmatprep.subr.mxu1 %v38057_v13  ;;  %v29784_v46 = vand.u32 4294901760, %v29783_v39 }
0x1469   : > { %36301 = vmatprep.mubr.msk.f32.mxu0 %vm38058_vm2, %v38057_v13  ;;  %36304 = vmatprep.subr.mxu0 %v38057_v13 }
0x146e   : > { %36272 = vmatmul.mubr.f32.vlgmr.msra.gmra.mrb[68].mxu1 %v28862_v6  ;;  %36302 = vmatmul.mubr.f32.vlgmr.msra.gmra.mrb[62].mxu0 %v29316_v25 }
0x146f   : > { %36275 = vmatpush3.xpose.msra.mxu1 %v40896_v8  ;;  %36305 = vmatpush3.xpose.msra.mxu0 %v40894_v21 }
0x1470   : > { %36276 = vmatprep.mubr.msk.f32.mxu1 %vm38058_vm2, %v38057_v13  ;;  %36279 = vmatprep.subr.mxu1 %v38057_v13 }
0x1471   : > { %36306 = vmatprep.mubr.msk.f32.mxu0 %vm38058_vm2, %v38057_v13  ;;  %36309 = vmatprep.subr.mxu0 %v38057_v13 }
0x1476   : > { %36277 = vmatmul.mubr.f32.vlgmr.msra.gmra.mrb[68].mxu1 %v28863_v43  ;;  %36307 = vmatmul.mubr.f32.vlgmr.msra.gmra.mrb[62].mxu0 %v29317_v50 }
0x1477   : > { %36280 = vmatpush3.xpose.msra.mxu1 %v28874_v44  ;;  %36310 = vmatpush3.xpose.msra.mxu0 %v29328_v53 }
0x1478   : > { %36281 = vmatprep.mubr.msk.f32.mxu1 %vm38058_vm2, %v38057_v13  ;;  %36284 = vmatprep.subr.mxu1 %v38057_v13 }
0x1479   : > { %36311 = vmatprep.mubr.msk.f32.mxu0 %vm38058_vm2, %v38057_v13  ;;  %36314 = vmatprep.subr.mxu0 %v38057_v13 }
0x147e   : > { %36282 = vmatmul.mubr.f32.vlgmr.msra.gmra.mrb[68].mxu1 %v40887_v17  ;;  %36312 = vmatmul.mubr.f32.vlgmr.msra.gmra.mrb[62].mxu0 %v40889_v4 }
0x147f   : > { %36285 = vmatpush3.xpose.msra.mxu1 %v40896_v8  ;;  %36315 = vmatpush3.xpose.msra.mxu0 %v40894_v21 }
0x1480   : > { %36286 = vmatprep.mubr.msk.f32.mxu1 %vm38058_vm2, %v38057_v13  ;;  %36316 = vmatprep.mubr.msk.f32.mxu0 %vm38058_vm2, %v38057_v13 }
0x1481   : > { %36319 = vmatprep.subr.mxu1 %v38057_v13  ;;  %36349 = vmatprep.subr.mxu0 %v38057_v13 }
0x1486   : > { %36287 = vmatmul.mubr.f32.vlgmr.msra.gmra.mrb[68].mxu1 %v40887_v17  ;;  %36317 = vmatmul.mubr.f32.vlgmr.msra.gmra.mrb[62].mxu0 %v40889_v4 }
0x1487   : > { %36320 = vmatpush3.xpose.msra.mxu1 %v29704_v5  ;;  %36321 = vmatprep.mubr.msk.f32.mxu1 %vm38058_vm2, %v38057_v13 }
0x1488   : > { %36324 = vmatprep.subr.mxu1 %v38057_v13  ;;  %36351 = vmatprep.mubr.msk.f32.mxu0 %vm38058_vm2, %v38057_v13 }
0x148a   : > { %36322 = vmatmul.mubr.f32.vlgmr.msra.gmra.mrb[70].mxu1 %v29773_v63 }
0x148b   : > { %36325 = vmatpush3.xpose.msra.mxu1 %v29784_v46  ;;  %36326 = vmatprep.mubr.msk.f32.mxu1 %vm38058_vm2, %v38057_v13 }
0x148c   : > { %36329 = vmatprep.subr.mxu1 %v38057_v13 }
0x1492   : > { %36327 = vmatmul.mubr.f32.vlgmr.msra.gmra.mrb[70].mxu1 %v29769_v14 }
0x1493   : > { %36330 = vmatpush3.xpose.msra.mxu1 %v29781_v42  ;;  %36331 = vmatprep.mubr.msk.f32.mxu1 %vm38058_vm2, %v38057_v13 }
0x1494   : > { %36334 = vmatprep.subr.mxu1 %v38057_v13 }
0x149a   : > { %36332 = vmatmul.mubr.f32.vlgmr.msra.gmra.mrb[70].mxu1 %v29770_v48 }
0x149b   : > { %36335 = vmatpush3.xpose.msra.mxu1 %v29704_v5  ;;  %36336 = vmatprep.mubr.msk.f32.mxu1 %vm38058_vm2, %v38057_v13 }
0x149c   : > { %36339 = vmatprep.subr.mxu1 %v38057_v13 }
0x14a2   : > { %36337 = vmatmul.mubr.f32.vlgmr.msra.gmra.mrb[70].mxu1 %v29771_v51 }
0x14a3   : > { %36340 = vmatpush3.xpose.msra.mxu1 %v29782_v34  ;;  %36341 = vmatprep.mubr.msk.f32.mxu1 %vm38058_vm2, %v38057_v13 }
0x14a4   : > { %36344 = vmatprep.subr.mxu1 %v38057_v13 }
0x14aa   : > { %36342 = vmatmul.mubr.f32.vlgmr.msra.gmra.mrb[70].mxu1 %v29769_v14 }
0x14ab   : > { %36345 = vmatpush3.xpose.msra.mxu1 %v29704_v5  ;;  %36346 = vmatprep.mubr.msk.f32.mxu1 %vm38058_vm2, %v38057_v13 }
0x14ac   : > { %36379 = vmatprep.subr.mxu1 %v38057_v13 }
0x14b2   : > { %36347 = vmatmul.mubr.f32.vlgmr.msra.gmra.mrb[70].mxu1 %v29769_v14 }
0x14b3   : > { %36381 = vmatprep.mubr.msk.f32.mxu1 %vm38058_vm2, %v38057_v13 }
0x14cc   : > { %v40989_v37 = vpop.f32.mrb[56].mxu0 }
0x14cd   : > { %v36138_v17 = vpop.f32.mrb[57].mxu0 }
0x14f8   : > { %v40991_v4 = vpop.f32.mrb[64].mxu1 }
0x14f9   : > { %v36168_v21 = vpop.f32.mrb[65].mxu1 }
0x1501   : > { %v40993_v8 = vpop.f32.mrb[58].mxu0 }
0x1502   : > { %v36198_v6 = vpop.f32.mrb[59].mxu0 }
0x152d   : > { %v40995_v25 = vpop.f32.mrb[66].mxu1  ;;  %v28783_v59 = vpop.f32.mrb[60].mxu0 }
0x152e   : > { %v36228_v9 = vpop.f32.mrb[67].mxu1  ;;  %v36258_v43 = vpop.f32.mrb[61].mxu0  ;;  %v30149_v50 = vsel %vm2672_vm3, %v28783_v59, -inf }
0x152f   : > { %30150 = vmax.xlane.f32.xlu1 %v30149_v50 }
0x1559   : > { %v29237_v53 = vpop.f32.mrb[68].mxu1  ;;  %v29691_v44 = vpop.f32.mrb[62].mxu0 }
0x155a   : > { %v36288_v40 = vpop.f32.mrb[69].mxu1  ;;  %v36318_v54 = vpop.f32.mrb[63].mxu0  ;;  %v30152_v10 = vsel %vm2672_vm3, %v29237_v53, -inf  ;;  %v30155_v52 = vsel %vm2672_vm3, %v29691_v44, -inf }
0x155b   : > { %30153 = vmax.xlane.f32.xlu0 %v30152_v10 }
0x155f   : > { %30156 = vmax.xlane.f32.xlu0 %v30155_v52 }
0x1585   : > { %v30145_v22 = vpop.f32.mrb[70].mxu1 }
0x1586   : > { %v36348_v24 = vpop.f32.mrb[71].mxu1  ;;  %v30158_v55 = vsel %vm2672_vm3, %v30145_v22, -inf }
0x1587   : > { %30159 = vmax.xlane.f32.xlu0 %v30158_v55 }
0x15bc   : > { %v30151_v16 = vpop.xlane.xlu1 %30150 }
0x15bd   : > { %v30161_v2 = vsub.f32 %v28783_v59, %v30151_v16 }
0x15bf   : > { %v30165_v61 = vmul.f32 1.442695, %v30161_v2 }
0x15c1   : > { %37925 = vpow2.f32 %v30165_v61 }
0x15cb   : > { %v37926_v47 = vpop.eup %37925 }
0x15cc   : > { %v30173_v27 = vsel %vm2672_vm3, %v37926_v47, 0.0 }
0x15cd   : > { %30174 = vadd.xlane.f32.xlu1 %v30173_v27 }
0x15de   : > { %30193 = vrot.lane.b32.xlu1 %v38966_v41, %s38065_s9 }
0x15e8   : > { %v30154_v14 = vpop.xlane.xlu0 %30153 }
0x15e9   : > { %v30162_v5 = vsub.f32 %v29237_v53, %v30154_v14 }
0x15eb   : > { %v30167_v48 = vmul.f32 1.442695, %v30162_v5 }
0x15ec   : > { %v30157_v42 = vpop.xlane.xlu0 %30156 }
0x15ed   : > { %37927 = vpow2.f32 %v30167_v48  ;;  %v30163_v51 = vsub.f32 %v29691_v44, %v30157_v42 }
0x15ef   : > { %v30169_v34 = vmul.f32 1.442695, %v30163_v51 }
0x15f1   : > { %37929 = vpow2.f32 %v30169_v34 }
0x15f7   : > { %v41004_v58 = vpop.eup %37927 }
0x15f8   : > { %v30176_v39 = vsel %vm2672_vm3, %v41004_v58, 0.0 }
0x15f9   : > { %30177 = vadd.xlane.f32.xlu0 %v30176_v39 }
0x15fb   : > { %v41008_v63 = vpop.eup %37929 }
0x15fc   : > { %v30179_v46 = vsel %vm2672_vm3, %v41008_v63, 0.0 }
0x1602   : > { %30180 = vadd.xlane.f32.xlu1 %v30179_v46 }
0x160f   : > { %30645 = vrot.lane.b32.xlu0 %v38968_v18, %s38065_s9 }
0x1613   : > { %31097 = vrot.lane.b32.xlu1 %v38981_v26, %s38065_s9 }
0x1614   : > { %v30160_v41 = vpop.xlane.xlu0 %30159 }
0x1615   : > { %v30164_v17 = vsub.f32 %v30145_v22, %v30160_v41 }
0x1617   : > { %32005 = vrot.lane.b32.xlu1 %v39524_v60, %s38066_s24  ;;  %v30171_v21 = vmul.f32 1.442695, %v30164_v17 }
0x1619   : > { %37931 = vpow2.f32 %v30171_v21 }
0x161b   : > { %32007 = vrot.lane.b32.xlu1 %v39526_v45, %s38066_s24 }
0x161f   : > { %32021 = vrot.lane.b32.xlu1 %v39817_v31, %s38067_s22 }
0x1623   : > { %32037 = vrot.lane.b32.xlu1 %v40110_v28, %s38068_s1  ;;  %v41024_v18 = vpop.eup %37931 }
0x1624   : > { %v30182_v26 = vsel %vm2672_vm3, %v41024_v18, 0.0 }
0x1627   : > { %32053 = vrot.lane.b32.xlu1 %v40403_v33, %s38069_s25 }
0x162b   : > { %32069 = vrot.lane.b32.xlu1 %v40696_v49, %s38070_s30 }
0x162e   : > { %30183 = vadd.xlane.f32.xlu0 %v30182_v26 }
0x162f   : > { %32085 = vrot.lane.b32.xlu1 %v40989_v37, %s38071_s13 }
0x1633   : > { %32009 = vrot.lane.b32.xlu1 %v39528_v3, %s38066_s24 }
0x1637   : > { %32025 = vrot.lane.b32.xlu1 %v39821_v38, %s38067_s22 }
0x163b   : > { %32041 = vrot.lane.b32.xlu1 %v40114_v29, %s38068_s1 }
0x163f   : > { %32057 = vrot.lane.b32.xlu1 %v40407_v56, %s38069_s25 }
0x1644   : > { %31549 = vrot.lane.b32.xlu0 %v38978_v36, %s38065_s9  ;;  %s41498_s9 = sshll.u32 %s38157_s21, 9 }
0x1648   : > { %32023 = vrot.lane.b32.xlu0 %v39819_v35, %s38067_s22 }
0x164c   : > { %32039 = vrot.lane.b32.xlu0 %v40112_v30, %s38068_s1 }
0x1650   : > { %32055 = vrot.lane.b32.xlu0 %v40405_v57, %s38069_s25 }
0x1654   : > { %32071 = vrot.lane.b32.xlu0 %v40698_v0, %s38070_s30 }
0x1658   : > { %32087 = vrot.lane.b32.xlu0 %v40991_v4, %s38071_s13 }
0x165a   : > { %v30175_v60 = vpop.xlane.xlu1 %30174 }
0x165b   : > { %37933 = vrcp.f32 %v30175_v60 }
0x165c   : > { %32011 = vrot.lane.b32.xlu0 %v39530_v7, %s38066_s24 }
0x165e   : > { %v30194_v45 = vpop.permute.xlu1 %30193 }
0x165f   : > { %v30200_v36 = vand.u32 4294901760, %v30194_v45 }
0x1660   : > { %32027 = vrot.lane.b32.xlu0 %v39823_v23, %s38067_s22 }
0x1661   : > { %36350 = vmatpush3.msra.mxu0 %v30200_v36  ;;  %v30277_v35 = vsub.f32 %v30194_v45, %v30200_v36 }
0x1662   : > { %36354 = vmatprep.subr.mxu0 %v38057_v13 }
0x1663   : > { %v30278_v30 = vand.u32 4294901760, %v30277_v35 }
0x1664   : > { %32043 = vrot.lane.b32.xlu0 %v40116_v32, %s38068_s1  ;;  %s41393_s1 = scalar_lea.hbm %s41497_s11, %s41498_s9 }
0x1665   : > { %v37934_v3 = vpop.eup %37933  ;;  %v30279_v33 = vsub.f32 %v30277_v35, %v30278_v30 }
0x1666   : > { %v30189_v31 = vmul.f32 %v37934_v3, %v37926_v47 }
0x1667   : > { %v30280_v56 = vand.u32 4294901760, %v30279_v33 }
0x1668   : > { %32059 = vrot.lane.b32.xlu0 %v40409_v62, %s38069_s25  ;;  %v30197_v38 = vsel %vm2672_vm3, %v30189_v31, 0 }
0x1669   : > { %v30265_v28 = vand.u32 4294901760, %v30197_v38 }
0x166b   : > { %v30266_v7 = vsub.f32 %v30197_v38, %v30265_v28 }
0x166d   : > { %v30267_v29 = vand.u32 4294901760, %v30266_v7 }
0x166f   : > { %v30268_v57 = vsub.f32 %v30266_v7, %v30267_v29 }
0x1671   : > { %v30269_v23 = vand.u32 4294901760, %v30268_v57 }
0x1673   : > { %36352 = vmatmul.mubr.f32.vlgmr.msra.gmra.mrb[64].mxu0 %v30269_v23 }
0x1674   : > { %36355 = vmatpush3.msra.mxu0 %v30280_v56  ;;  %36356 = vmatprep.mubr.msk.f32.mxu0 %vm38058_vm2, %v38057_v13 }
0x1675   : > { %36359 = vmatprep.subr.mxu0 %v38057_v13 }
0x167b   : > { %36357 = vmatmul.mubr.f32.vlgmr.msra.gmra.mrb[64].mxu0 %v30265_v28 }
0x167c   : > { %36360 = vmatpush3.msra.mxu0 %v30277_v35  ;;  %36361 = vmatprep.mubr.msk.f32.mxu0 %vm38058_vm2, %v38057_v13 }
0x167d   : > { %36364 = vmatprep.subr.mxu0 %v38057_v13 }
0x1683   : > { %36362 = vmatmul.mubr.f32.vlgmr.msra.gmra.mrb[64].mxu0 %v30266_v7 }
0x1684   : > { %36365 = vmatpush3.msra.mxu0 %v30200_v36  ;;  %36366 = vmatprep.mubr.msk.f32.mxu0 %vm38058_vm2, %v38057_v13 }
0x1685   : > { %36369 = vmatprep.subr.mxu0 %v38057_v13 }
0x1686   : > { %v30178_v32 = vpop.xlane.xlu0 %30177 }
0x1687   : > { %37935 = vrcp.f32 %v30178_v32 }
0x168a   : > { %v30646_v62 = vpop.permute.xlu0 %30645 }
0x168b   : > { %v41065_v49 = vand.u32 4294901760, %v30646_v62  ;;  %36367 = vmatmul.mubr.f32.vlgmr.msra.gmra.mrb[64].mxu0 %v30267_v29 }
0x168c   : > { %36370 = vmatpush3.msra.mxu0 %v30278_v30  ;;  %36371 = vmatprep.mubr.msk.f32.mxu0 %vm38058_vm2, %v38057_v13 }
0x168d   : > { %36380 = vmatpush3.msra.mxu1 %v41065_v49  ;;  %36374 = vmatprep.subr.mxu0 %v38057_v13  ;;  %v30729_v6 = vsub.f32 %v30646_v62, %v41065_v49 }
0x168e   : > { %36384 = vmatprep.subr.mxu1 %v38057_v13 }
0x168f   : > { %v30181_v0 = vpop.xlane.xlu1 %30180  ;;  %v30730_v50 = vand.u32 4294901760, %v30729_v6 }
0x1690   : > { %37937 = vrcp.f32 %v30181_v0  ;;  %v32146_v0 = vld [vmem:[%s41492_s6 + $0xc0] sm:$0xff] }
0x1691   : > { %v37936_v37 = vpop.eup %37935  ;;  %v30731_v52 = vsub.f32 %v30729_v6, %v30730_v50 }
0x1692   : > { %v30190_v4 = vmul.f32 %v37936_v37, %v41004_v58  ;;  %v32147_v37 = vld [vmem:[%s41492_s6 + $0xc8] sm:$0xff] }
0x1693   : > { %36372 = vmatmul.mubr.f32.vlgmr.msra.gmra.mrb[64].mxu0 %v30265_v28  ;;  %v31098_v59 = vpop.permute.xlu1 %31097  ;;  %v30732_v27 = vand.u32 4294901760, %v30731_v52 }
0x1694   : > { %36375 = vmatpush3.msra.mxu0 %v30200_v36  ;;  %36376 = vmatprep.mubr.msk.f32.mxu0 %vm38058_vm2, %v38057_v13  ;;  %v30649_v9 = vsel %vm2672_vm3, %v30190_v4, 0  ;;  %v41080_v53 = vand.u32 4294901760, %v31098_v59 }
0x1695   : > { %36409 = vmatprep.subr.mxu0 %v38057_v13  ;;  %v41078_v43 = vand.u32 4294901760, %v30649_v9 }
0x1696   : > { %v31181_v24 = vsub.f32 %v31098_v59, %v41080_v53  ;;  %v32175_v59 = vand.u32 4294901760, %v32147_v37 }
0x1697   : > { %v41082_v44 = vpop.permute.xlu1 %32005  ;;  %v30718_v40 = vsub.f32 %v30649_v9, %v41078_v43 }
0x1698   : > { %v31182_v5 = vand.u32 4294901760, %v31181_v24 }
0x1699   : > { %v30719_v54 = vand.u32 4294901760, %v30718_v40 }
0x169a   : > { %v37938_v10 = vpop.eup %37937  ;;  %v31183_v42 = vsub.f32 %v31181_v24, %v31182_v5 }
0x169b   : > { %v30191_v22 = vmul.f32 %v37938_v10, %v41008_v63  ;;  %36377 = vmatmul.mubr.f32.vlgmr.msra.gmra.mrb[64].mxu0 %v30265_v28  ;;  %v32008_v55 = vpop.permute.xlu1 %32007  ;;  %v30720_v16 = vsub.f32 %v30718_v40, %v30719_v54 }
0x169c   : > { %36410 = vmatpush3.msra.mxu0 %v41080_v53  ;;  %v41090_v2 = vsel %vm2672_vm3, %v39233_v15, %v32008_v55  ;;  %36411 = vmatprep.mubr.msk.f32.mxu0 %vm38058_vm2, %v38057_v13  ;;  %v31184_v58 = vand.u32 4294901760, %v31183_v42 }
0x169d   : > { %v30721_v61 = vand.u32 4294901760, %v30720_v16  ;;  %36414 = vmatprep.subr.mxu0 %v38057_v13  ;;  %v31101_v47 = vsel %vm2672_vm3, %v30191_v22, 0  ;;  %v32152_v22 = vld [vmem:[%s41492_s6 + $0xf0] sm:$0xff] }
0x169e   : > { %v41096_v14 = vand.u32 4294901760, %v31101_v47  ;;  %v32190_v55 = vand.u32 4294901760, %v32152_v22 }
0x169f   : > { %36382 = vmatmul.mubr.f32.vlgmr.msra.gmra.mrb[72].mxu1 %v30721_v61 }
0x16a0   : > { %36385 = vmatpush3.msra.mxu1 %v30732_v27  ;;  %36386 = vmatprep.mubr.msk.f32.mxu1 %vm38058_vm2, %v38057_v13  ;;  %v31170_v15 = vsub.f32 %v31101_v47, %v41096_v14 }
0x16a1   : > { %36389 = vmatprep.subr.mxu1 %v38057_v13 }
0x16a2   : > { %v31171_v48 = vand.u32 4294901760, %v31170_v15 }
0x16a4   : > { %v31172_v51 = vsub.f32 %v31170_v15, %v31171_v48 }
0x16a6   : > { %v31173_v34 = vand.u32 4294901760, %v31172_v51 }
0x16a7   : > { %36387 = vmatmul.mubr.f32.vlgmr.msra.gmra.mrb[72].mxu1 %v41078_v43 }
0x16a8   : > { %36390 = vmatpush3.msra.mxu1 %v30729_v6  ;;  %36412 = vmatmul.mubr.f32.vlgmr.msra.gmra.mrb[66].mxu0 %v31173_v34  ;;  %v32172_v6 = vand.u32 4294901760, %v32146_v0 }
0x16a9   : > { %36415 = vmatpush3.msra.mxu0 %v31184_v58  ;;  %36391 = vmatprep.mubr.msk.f32.mxu1 %vm38058_vm2, %v38057_v13 }
0x16aa   : > { %36394 = vmatprep.subr.mxu1 %v38057_v13  ;;  %36416 = vmatprep.mubr.msk.f32.mxu0 %vm38058_vm2, %v38057_v13  ;;  %v41180_v9 = vpack.c.bf16 %v32175_v59, %v32172_v6 }
0x16ab   : > { %36419 = vmatprep.subr.mxu0 %v38057_v13 }
0x16af   : > { %36392 = vmatmul.mubr.f32.vlgmr.msra.gmra.mrb[72].mxu1 %v30718_v40 }
0x16b0   : > { %36395 = vmatpush3.msra.mxu1 %v41065_v49  ;;  %36417 = vmatmul.mubr.f32.vlgmr.msra.gmra.mrb[66].mxu0 %v41096_v14 }
0x16b1   : > { %36420 = vmatpush3.msra.mxu0 %v31181_v24  ;;  %36396 = vmatprep.mubr.msk.f32.mxu1 %vm38058_vm2, %v38057_v13  ;;  %v32153_v24 = vld [vmem:[%s41492_s6 + $0xf8] sm:$0xff] }
0x16b2   : > { %36399 = vmatprep.subr.mxu1 %v38057_v13  ;;  %36421 = vmatprep.mubr.msk.f32.mxu0 %vm38058_vm2, %v38057_v13  ;;  %v32193_v16 = vand.u32 4294901760, %v32153_v24 }
0x16b3   : > { %36424 = vmatprep.subr.mxu0 %v38057_v13 }
0x16b4   : > { %v41214_v61 = vpack.c.bf16 %v32193_v16, %v32190_v55 }
0x16b7   : > { %36397 = vmatmul.mubr.f32.vlgmr.msra.gmra.mrb[72].mxu1 %v30719_v54 }
0x16b8   : > { %36400 = vmatpush3.msra.mxu1 %v30730_v50  ;;  %36422 = vmatmul.mubr.f32.vlgmr.msra.gmra.mrb[66].mxu0 %v31170_v15  ;;  %v41225_v15 = vsub.f32 %v32147_v37, %v32175_v59  ;;  %v32335_v37 = vsub.f32 %v32153_v24, %v32193_v16 }
0x16b9   : > { %36425 = vmatpush3.msra.mxu0 %v41080_v53  ;;  %36401 = vmatprep.mubr.msk.f32.mxu1 %vm38058_vm2, %v38057_v13 }
0x16ba   : > { %36404 = vmatprep.subr.mxu1 %v38057_v13  ;;  %36426 = vmatprep.mubr.msk.f32.mxu0 %vm38058_vm2, %v38057_v13  ;;  %v32294_v51 = vand.u32 4294901760, %v41225_v15 }
0x16bb   : > { %v30184_v39 = vpop.xlane.xlu0 %30183  ;;  %36429 = vmatprep.subr.mxu0 %v38057_v13 }
0x16bc   : > { %37939 = vrcp.f32 %v30184_v39 }
0x16bf   : > { %36402 = vmatmul.mubr.f32.vlgmr.msra.gmra.mrb[72].mxu1 %v41078_v43  ;;  %v31550_v63 = vpop.permute.xlu0 %31549 }
0x16c0   : > { %36405 = vmatpush3.msra.mxu1 %v41065_v49  ;;  %36427 = vmatmul.mubr.f32.vlgmr.msra.gmra.mrb[66].mxu0 %v31171_v48  ;;  %v31556_v46 = vand.u32 4294901760, %v31550_v63 }
0x16c1   : > { %36430 = vmatpush3.msra.mxu0 %v31182_v5  ;;  %36406 = vmatprep.mubr.msk.f32.mxu1 %vm38058_vm2, %v38057_v13  ;;  %v41223_v5 = vsub.f32 %v32146_v0, %v32172_v6  ;;  %v32328_v0 = vsub.f32 %v32152_v22, %v32190_v55 }
0x16c2   : > { %36439 = vmatprep.subr.mxu1 %v38057_v13  ;;  %36431 = vmatprep.mubr.msk.f32.mxu0 %vm38058_vm2, %v38057_v13  ;;  %v31633_v26 = vsub.f32 %v31550_v63, %v31556_v46  ;;  %v32022_v63 = vpop.permute.xlu1 %32021 }
0x16c3   : > { %v41131_v41 = vpop.permute.xlu0 %32023  ;;  %36434 = vmatprep.subr.mxu0 %v38057_v13  ;;  %v32287_v42 = vand.u32 4294901760, %v41223_v5  ;;  %v32329_v59 = vand.u32 4294901760, %v32328_v0  ;;  %v41248_v22 = vpack.c.bf16 %v41225_v15, %v41223_v5 }
0x16c4   : > { %v31634_v36 = vand.u32 4294901760, %v31633_v26 }
0x16c5   : > { %v32288_v34 = vsub.f32 %v41223_v5, %v32287_v42 }
0x16c6   : > { %v37940_v17 = vpop.eup %37939  ;;  %v31635_v38 = vsub.f32 %v31633_v26, %v31634_v36 }
0x16c7   : > { %v30192_v21 = vmul.f32 %v37940_v17, %v41024_v18  ;;  %36407 = vmatmul.mubr.f32.vlgmr.msra.gmra.mrb[72].mxu1 %v41078_v43  ;;  %v41136_v60 = vpop.permute.xlu0 %32039  ;;  %v32149_v43 = vld [vmem:[%s41492_s6 + $0xd8] sm:$0xff] }
0x16c8   : > { %36440 = vmatpush3.msra.mxu1 %v31556_v46  ;;  %36432 = vmatmul.mubr.f32.vlgmr.msra.gmra.mrb[66].mxu0 %v41096_v14  ;;  %v31636_v29 = vand.u32 4294901760, %v31635_v38 }
0x16c9   : > { %36435 = vmatpush3.msra.mxu0 %v41080_v53  ;;  %36436 = vmatprep.mubr.msk.f32.mxu0 %vm38058_vm2, %v38057_v13  ;;  %v31553_v45 = vsel %vm2672_vm3, %v30192_v21, 0  ;;  %v32181_v53 = vand.u32 4294901760, %v32149_v43 }
0x16ca   : > { %36441 = vmatprep.mubr.msk.f32.mxu1 %vm38058_vm2, %v38057_v13  ;;  %36444 = vmatprep.subr.mxu1 %v38057_v13  ;;  %v31621_v18 = vand.u32 4294901760, %v31553_v45 }
0x16cb   : > { %v41146_v3 = vpop.permute.xlu0 %32055  ;;  %36890 = vmatprep.subr.bf16.mxu0 %v41180_v9 }
0x16cc   : > { %v31622_v31 = vsub.f32 %v31553_v45, %v31621_v18 }
0x16ce   : > { %v31623_v35 = vand.u32 4294901760, %v31622_v31 }
0x16cf   : > { %v41148_v28 = vpop.permute.xlu0 %32071 }
0x16d0   : > { %36437 = vmatmul.mubr.f32.vlgmr.msra.gmra.mrb[66].mxu0 %v41096_v14  ;;  %v31624_v30 = vsub.f32 %v31622_v31, %v31623_v35 }
0x16d1   : > { %36892 = vmatpush3.bf16.msra.mxu0 %v41180_v9 }
0x16d2   : > { %v31625_v7 = vand.u32 4294901760, %v31624_v30 }
0x16d3   : > { %v41151_v33 = vpop.permute.xlu0 %32087 }
0x16d4   : > { %36442 = vmatmul.mubr.f32.vlgmr.msra.gmra.mrb[74].mxu1 %v31625_v7 }
0x16d5   : > { %36445 = vmatpush3.msra.mxu1 %v31636_v29  ;;  %36446 = vmatprep.mubr.msk.f32.mxu1 %vm38058_vm2, %v38057_v13 }
0x16d6   : > { %36449 = vmatprep.subr.mxu1 %v38057_v13 }
0x16d7   : > { %v32012_v57 = vpop.permute.xlu0 %32011 }
0x16d8   : > { %v32116_v23 = vsel %vm2672_vm3, %v39237_v11, %v32012_v57 }
0x16db   : > { %v32028_v56 = vpop.permute.xlu0 %32027 }
0x16dc   : > { %v32121_v32 = vsel %vm32117_vm4, %v32116_v23, %v32028_v56  ;;  %36447 = vmatmul.mubr.f32.vlgmr.msra.gmra.mrb[74].mxu1 %v31621_v18 }
0x16dd   : > { %36450 = vmatpush3.msra.mxu1 %v31633_v26  ;;  %36451 = vmatprep.mubr.msk.f32.mxu1 %vm38058_vm2, %v38057_v13  ;;  %v32307_v26 = vsub.f32 %v32149_v43, %v32181_v53 }
0x16de   : > { %36454 = vmatprep.subr.mxu1 %v38057_v13 }
0x16df   : > { %v32044_v62 = vpop.permute.xlu0 %32043 }
0x16e0   : > { %v41163_v49 = vsel %vm32122_vm5, %v32121_v32, %v32044_v62 }
0x16e4   : > { %36452 = vmatmul.mubr.f32.vlgmr.msra.gmra.mrb[74].mxu1 %v31622_v31 }
0x16e5   : > { %36455 = vmatpush3.msra.mxu1 %v31556_v46  ;;  %36456 = vmatprep.mubr.msk.f32.mxu1 %vm38058_vm2, %v38057_v13 }
0x16e6   : > { %36459 = vmatprep.subr.mxu1 %v38057_v13 }
0x16ec   : > { %36457 = vmatmul.mubr.f32.vlgmr.msra.gmra.mrb[74].mxu1 %v31623_v35 }
0x16ed   : > { %36460 = vmatpush3.msra.mxu1 %v31634_v36  ;;  %36461 = vmatprep.mubr.msk.f32.mxu1 %vm38058_vm2, %v38057_v13  ;;  %v32308_v36 = vand.u32 4294901760, %v32307_v26 }
0x16ee   : > { %36464 = vmatprep.subr.mxu1 %v38057_v13 }
0x16ef   : > { %v32309_v35 = vsub.f32 %v32307_v26, %v32308_v36 }
0x16f1   : > { %v32310_v29 = vand.u32 4294901760, %v32309_v35 }
0x16f4   : > { %36462 = vmatmul.mubr.f32.vlgmr.msra.gmra.mrb[74].mxu1 %v31621_v18 }
0x16f5   : > { %36465 = vmatpush3.msra.mxu1 %v31556_v46  ;;  %36466 = vmatprep.mubr.msk.f32.mxu1 %vm38058_vm2, %v38057_v13  ;;  %v32148_v13 = vld [vmem:[%s41492_s6 + $0xd0] sm:$0xff]  ;;  %v32038_v46 = vpop.permute.xlu1 %32037 }
0x16f6   : > { %v32178_v50 = vand.u32 4294901760, %v32148_v13 }
0x16f8   : > { %v41194_v40 = vpack.c.bf16 %v32181_v53, %v32178_v50  ;;  %v32300_v21 = vsub.f32 %v32148_v13, %v32178_v50  ;;  %v32336_v13 = vand.u32 4294901760, %v32335_v37  ;;  %v32330_v50 = vsub.f32 %v32328_v0, %v32329_v59 }
0x16f9   : > { %v32054_v17 = vpop.permute.xlu1 %32053 }
0x16fa   : > { %36894 = vmatprep.subr.bf16.mxu0 %v41194_v40  ;;  %v32337_v53 = vsub.f32 %v32335_v37, %v32336_v13  ;;  %v41250_v55 = vpack.c.bf16 %v32307_v26, %v32300_v21 }
0x16fb   : > { %36896 = vmatpush3.bf16.msra.mxu0 %v41194_v40 }
0x16fc   : > { %36467 = vmatmul.mubr.f32.vlgmr.msra.gmra.mrb[74].mxu1 %v31621_v18  ;;  %v32301_v18 = vand.u32 4294901760, %v32300_v21 }
0x16fd   : > { %v32070_v45 = vpop.permute.xlu1 %32069 }
0x16fe   : > { %v32302_v31 = vsub.f32 %v32300_v21, %v32301_v18 }
0x1700   : > { %v32303_v7 = vand.u32 4294901760, %v32302_v31 }
0x1701   : > { %v32086_v56 = vpop.permute.xlu1 %32085 }
0x1702   : > { %v41239_v32 = vpack.c.bf16 %v32310_v29, %v32303_v7  ;;  %v41279_v29 = vpack.c.bf16 %v32336_v13, %v32329_v59 }
0x176e   : > { %v30641_v11 = vpop.f32.mrb[64].mxu0 }
0x176f   : > { %v36378_v4 = vpop.f32.mrb[65].mxu0  ;;  %32101 = vrot.lane.b32.xlu1 %v30641_v11, %s38072_s0 }
0x1773   : > { %32073 = vrot.lane.b32.xlu1 %v40700_v12, %s38070_s30  ;;  %v32150_v12 = vld [vmem:[%s41492_s6 + $0xe0] sm:$0xff] }
0x1774   : > { %v32184_v54 = vand.u32 4294901760, %v32150_v12 }
0x1776   : > { %v32314_v38 = vsub.f32 %v32150_v12, %v32184_v54  ;;  %v32010_v12 = vpop.permute.xlu1 %32009 }
0x1777   : > { %32089 = vrot.lane.b32.xlu1 %v40993_v8, %s38071_s13  ;;  %v32151_v8 = vld [vmem:[%s41492_s6 + $0xe8] sm:$0xff] }
0x1778   : > { %v32187_v10 = vand.u32 4294901760, %v32151_v8  ;;  %v32315_v57 = vand.u32 4294901760, %v32314_v38 }
0x177a   : > { %v41204_v52 = vpack.c.bf16 %v32187_v10, %v32184_v54  ;;  %v32321_v30 = vsub.f32 %v32151_v8, %v32187_v10  ;;  %v32316_v62 = vsub.f32 %v32314_v38, %v32315_v57  ;;  %v32331_v8 = vand.u32 4294901760, %v32330_v50  ;;  %v32026_v24 = vpop.permute.xlu1 %32025 }
0x177b   : > { %v32338_v54 = vand.u32 4294901760, %v32337_v53 }
0x177c   : > { %36898 = vmatprep.subr.bf16.mxu0 %v41204_v52  ;;  %v32322_v23 = vand.u32 4294901760, %v32321_v30  ;;  %v32317_v4 = vand.u32 4294901760, %v32316_v62  ;;  %v32060_v62 = vpop.permute.xlu0 %32059 }
0x177d   : > { %36900 = vmatpush3.bf16.msra.mxu0 %v41204_v52  ;;  %v41243_v10 = vpack.c.bf16 %v32338_v54, %v32331_v8 }
0x177e   : > { %36902 = vmatprep.subr.bf16.mxu0 %v41214_v61  ;;  %v32323_v11 = vsub.f32 %v32321_v30, %v32322_v23  ;;  %v32042_v16 = vpop.permute.xlu1 %32041  ;;  %v41277_v7 = vpack.c.bf16 %v32322_v23, %v32315_v57 }
0x1780   : > { %v32324_v6 = vand.u32 4294901760, %v32323_v11 }
0x1781   : > { %36904 = vmatpush3.bf16.msra.mxu0 %v41214_v61 }
0x1782   : > { %v41241_v43 = vpack.c.bf16 %v32324_v6, %v32317_v4 }
0x179a   : > { %v31093_v47 = vpop.f32.mrb[72].mxu1 }
0x179b   : > { %32103 = vrot.lane.b32.xlu0 %v31093_v47, %s38072_s0  ;;  %v36408_v27 = vpop.f32.mrb[73].mxu1 }
0x179f   : > { %32075 = vrot.lane.b32.xlu0 %v40702_v19, %s38070_s30  ;;  %v32295_v19 = vsub.f32 %v41225_v15, %v32294_v51  ;;  %s41374_s30 = sand.u32 1, %s38046_s18  }
0x17a0   : > { %s41499_s15 = sshll.u32 %s41374_s30, 5  ;;  %s32879_s25 = scalar_lea.sflag [#allocation7], %s41374_s30 }
0x17a1   : > { %v32296_v58 = vand.u32 4294901760, %v32295_v19  ;;  %s467_s12 = scalar_lea.vmem [#allocation6], %s41499_s15 }
0x17a2   : > { %s32908_s16 = sshll.u32 %s467_s12, 4  ;;  %s41395_s16 = int_to_ptr.vmem [resolvable:$true] %s32908_s16 }
0x17a3   : > { %v31545_v14 = vpop.f32.mrb[66].mxu0  ;;  %32091 = vrot.lane.b32.xlu0 %v40995_v25, %s38071_s13  ;;  %v32289_v25 = vand.u32 4294901760, %v32288_v34  ;;  %v41257_v34 = vpack.c.bf16 %v32335_v37, %v32328_v0  ;;  %s37956_s13 = scalar_lea.vmem %s41395_s16, 512 }
0x17a4   : > { %32105 = vrot.lane.b32.xlu1 %v31545_v14, %s38072_s0  ;;  %v36438_v48 = vpop.f32.mrb[67].mxu0  ;;  %v41252_v14 = vpack.c.bf16 %v32321_v30, %v32314_v38  ;;  %p37957_p10 = scmp.ne.s32.totalorder %s41395_s16, %s37956_s13 }
0x17a5   : > { %v41236_v39 = vpack.c.bf16 %v32296_v58, %v32289_v25  ;;  %v32113_v48 = vsel %vm2672_vm3, %v39226_v20, %v41082_v44  ;;  %v32058_v25 = vpop.permute.xlu1 %32057 }
0x17a6   : > { %v32118_v19 = vsel %vm32117_vm4, %v32113_v48, %v32022_v63  ;;  %p37958_p11 = pnand %p37957_p10, %p38174_p5 }
0x17a7   : > { %36906 = vmatprep.subr.bf16.mxu0 %v41236_v39  ;;  %v32123_v58 = vsel %vm32122_vm5, %v32118_v19, %v32038_v46 }
0x17a8   : > { %v32127_v31 = vsel %vm512_vm1, %v32123_v58, %v32054_v17  ;;  %p37959_p12 = pneg %p37958_p11 }
0x17a9   : > { %v32132_v21 = vsel %vm32131_vm6, %v32127_v31, %v32070_v45  ;;  %v41275_v45 = vpack.c.bf16 %v32308_v36, %v32301_v18 }
0x17aa   : > { %v32137_v26 = vsel %vm32136_vm7, %v32132_v21, %v32086_v56  ;;  %v32119_v56 = vsel %vm32117_vm4, %v41090_v2, %v41131_v41  ;;  %v32115_v41 = vsel %vm2672_vm3, %v39235_v1, %v32010_v12 }
0x17ab   : > { %v32124_v11 = vsel %vm32122_vm5, %v32119_v56, %v41136_v60  ;;  %v32120_v60 = vsel %vm32117_vm4, %v32115_v41, %v32026_v24 }
0x17ac   : > { %v32128_v0 = vsel %vm512_vm1, %v32124_v11, %v41146_v3 }
0x17ad   : > { %v32133_v37 = vsel %vm32131_vm6, %v32128_v0, %v41148_v28  ;;  %v32125_v28 = vsel %vm32122_vm5, %v32120_v60, %v32042_v16 }
0x17ae   : > { %v32138_v36 = vsel %vm32136_vm7, %v32133_v37, %v41151_v33  ;;  %v32129_v33 = vsel %vm512_vm1, %v32125_v28, %v32058_v25  ;;  %v32130_v25 = vsel %vm512_vm1, %v41163_v49, %v32060_v62  ;;  %v36953_v49 = vpack.c.bf16 %v32294_v51, %v32287_v42 }
0x17cf   : > { %v31997_v47 = vpop.f32.mrb[74].mxu1 }
0x17d0   : > { %32107 = vrot.lane.b32.xlu0 %v31997_v47, %s38072_s0  ;;  %v36468_v27 = vpop.f32.mrb[75].mxu1  ;;  %s38073_s0 = smov [#allocation6]  }
0x17e1   : > { %v32102_v35 = vpop.permute.xlu1 %32101 }
0x17e2   : > { %v32142_v38 = vsel %vm32141_vm8, %v32137_v26, %v32102_v35 }
0x17e3   : > { %v32160_v20 = vsel %vm607_vm0, %v32142_v38, 0 }
0x17e4   : > { %v41266_v44 = vand.u32 4294901760, %v32160_v20 }
0x17e5   : > { %v32074_v18 = vpop.permute.xlu1 %32073 }
0x17e6   : > { %v41269_v63 = vsub.f32 %v32160_v20, %v41266_v44  ;;  %v32134_v13 = vsel %vm32131_vm6, %v32129_v33, %v32074_v18 }
0x17e8   : > { %v32246_v46 = vand.u32 4294901760, %v41269_v63 }
0x17e9   : > { %v32090_v3 = vpop.permute.xlu1 %32089 }
0x17ea   : > { %v32247_v17 = vsub.f32 %v41269_v63, %v32246_v46  ;;  %v32139_v50 = vsel %vm32136_vm7, %v32134_v13, %v32090_v3 }
0x17ec   : > { %v32248_v30 = vand.u32 4294901760, %v32247_v17 }
0x17ee   : > { %36485 = vmatprep.mubr.f32.mxu0 %v32248_v30 }
0x180d   : > { %v32104_v57 = vpop.permute.xlu0 %32103 }
0x180e   : > { %v32143_v23 = vsel %vm32141_vm8, %v32138_v36, %v32104_v57 }
0x180f   : > { %v32163_v4 = vsel %vm607_vm0, %v32143_v23, 0 }
0x1810   : > { %v41294_v2 = vand.u32 4294901760, %v32163_v4 }
0x1811   : > { %v32076_v19 = vpop.permute.xlu0 %32075 }
0x1812   : > { %v41300_v6 = vsub.f32 %v32163_v4, %v41294_v2  ;;  %v32135_v58 = vsel %vm32131_vm6, %v32130_v25, %v32076_v19 }
0x1814   : > { %v32256_v59 = vand.u32 4294901760, %v41300_v6 }
0x1816   : > { %v32106_v53 = vpop.permute.xlu1 %32105  ;;  %v32257_v8 = vsub.f32 %v41300_v6, %v32256_v59 }
0x1817   : > { %v32144_v1 = vsel %vm32141_vm8, %v32139_v50, %v32106_v53 }
0x1818   : > { %v32166_v12 = vsel %vm607_vm0, %v32144_v1, 0  ;;  %v32258_v54 = vand.u32 4294901760, %v32257_v8 }
0x1819   : > { %v41310_v47 = vand.u32 4294901760, %v32166_v12 }
0x181a   : > { %36486 = vmatmul.mubr.f32.vlgmr.msra.gmra.mrb[68].mxu0 %v32258_v54 }
0x181b   : > { %v32265_v27 = vsub.f32 %v32166_v12, %v41310_v47  ;;  %36908 = vmatpush3.bf16.msra.mxu0 %v41236_v39  ;;  %v32092_v39 = vpop.permute.xlu0 %32091 }
0x181c   : > { %36910 = vmatprep.subr.bf16.mxu0 %v41239_v32 }
0x181d   : > { %v32266_v24 = vand.u32 4294901760, %v32265_v27 }
0x181f   : > { %v32267_v16 = vsub.f32 %v32265_v27, %v32266_v24  ;;  %36912 = vmatpush3.bf16.msra.mxu0 %v41239_v32  ;;  %v32140_v32 = vsel %vm32136_vm7, %v32135_v58, %v32092_v39 }
0x1820   : > { %36914 = vmatprep.subr.bf16.mxu0 %v41241_v43 }
0x1821   : > { %v32268_v48 = vand.u32 4294901760, %v32267_v16 }
0x1823   : > { %36488 = vmatprep.mubr.f32.mxu0 %v32268_v48  ;;  %36916 = vmatpush3.bf16.msra.mxu0 %v41241_v43 }
0x1824   : > { %36918 = vmatprep.subr.bf16.mxu0 %v41243_v10 }
0x1827   : > { %36920 = vmatpush3.bf16.msra.mxu0 %v41243_v10 }
0x1828   : > { %36922 = vmatprep.subr.bf16.mxu0 %v41248_v22 }
0x1842   : > { %v32108_v31 = vpop.permute.xlu0 %32107 }
0x1843   : > { %v32145_v21 = vsel %vm32141_vm8, %v32140_v32, %v32108_v31 }
0x1844   : > { %v32169_v43 = vsel %vm607_vm0, %v32145_v21, 0 }
0x1845   : > { %v32274_v26 = vand.u32 4294901760, %v32169_v43 }
0x1847   : > { %v32275_v35 = vsub.f32 %v32169_v43, %v32274_v26 }
0x1849   : > { %v32276_v38 = vand.u32 4294901760, %v32275_v35 }
0x184b   : > { %v32277_v10 = vsub.f32 %v32275_v35, %v32276_v38 }
0x184d   : > { %v32278_v20 = vand.u32 4294901760, %v32277_v10 }
0x184f   : > { %36489 = vmatmul.mubr.f32.gmra.mrb[70].mxu0 %v32278_v20 }
0x1850   : > { %36507 = vmatprep.mubr.f32.mxu0 %v41266_v44 }
0x1853   : > { %36508 = vmatmul.mubr.f32.vlgmr.msra.gmra.mrb[68].mxu0 %v41294_v2 }
0x1854   : > { %36924 = vmatpush3.bf16.msra.mxu0 %v41248_v22  ;;  %36510 = vmatprep.mubr.f32.mxu0 %v41310_v47 }
0x1855   : > { %36926 = vmatprep.subr.bf16.mxu0 %v41250_v55 }
0x1857   : > { %36511 = vmatmul.mubr.f32.gmra.mrb[70].mxu0 %v32274_v26 }
0x1858   : > { %36928 = vmatpush3.bf16.msra.mxu0 %v41250_v55  ;;  %36529 = vmatprep.mubr.f32.mxu0 %v41269_v63 }
0x1859   : > { %36930 = vmatprep.subr.bf16.mxu0 %v41252_v14 }
0x185c   : > { %36932 = vmatpush3.bf16.msra.mxu0 %v41252_v14 }
0x185d   : > { %36934 = vmatprep.subr.bf16.mxu0 %v41257_v34 }
0x1860   : > { %36936 = vmatpush3.bf16.msra.mxu0 %v41257_v34 }
0x1861   : > { %36938 = vmatprep.subr.bf16.mxu0 %v41180_v9 }
0x1863   : > { %36530 = vmatmul.mubr.f32.vlgmr.msra.gmra.mrb[68].mxu0 %v41300_v6 }
0x1864   : > { %36532 = vmatprep.mubr.f32.mxu0 %v32265_v27  ;;  %36940 = vmatpush3.bf16.msra.mxu0 %v41180_v9 }
0x1865   : > { %36942 = vmatprep.subr.bf16.mxu0 %v41194_v40 }
0x1867   : > { %36533 = vmatmul.mubr.f32.gmra.mrb[70].mxu0 %v32275_v35 }
0x1868   : > { %36944 = vmatpush3.bf16.msra.mxu0 %v41194_v40  ;;  %36551 = vmatprep.mubr.f32.mxu0 %v32246_v46 }
0x1869   : > { %36946 = vmatprep.subr.bf16.mxu0 %v41204_v52 }
0x186c   : > { %36948 = vmatpush3.bf16.msra.mxu0 %v41204_v52 }
0x186d   : > { %36950 = vmatprep.subr.bf16.mxu0 %v41214_v61 }
0x1870   : > { %36952 = vmatpush3.bf16.msra.mxu0 %v41214_v61 }
0x1871   : > { %36954 = vmatprep.subr.bf16.mxu0 %v36953_v49 }
0x1873   : > { %36552 = vmatmul.mubr.f32.vlgmr.msra.gmra.mrb[68].mxu0 %v32256_v59 }
0x1874   : > { %36554 = vmatprep.mubr.f32.mxu0 %v32266_v24  ;;  %36956 = vmatpush3.bf16.msra.mxu0 %v36953_v49 }
0x1875   : > { %36958 = vmatprep.subr.bf16.mxu0 %v41275_v45 }
0x1877   : > { %36555 = vmatmul.mubr.f32.gmra.mrb[70].mxu0 %v32276_v38 }
0x1878   : > { %36960 = vmatpush3.bf16.msra.mxu0 %v41275_v45  ;;  %36573 = vmatprep.mubr.f32.mxu0 %v41266_v44 }
0x1879   : > { %36962 = vmatprep.subr.bf16.mxu0 %v41277_v7 }
0x187c   : > { %36964 = vmatpush3.bf16.msra.mxu0 %v41277_v7 }
0x187d   : > { %36966 = vmatprep.subr.bf16.mxu0 %v41279_v29 }
0x1880   : > { %36968 = vmatpush3.bf16.msra.mxu0 %v41279_v29 }
0x1881   : > { %36970 = vmatprep.subr.bf16.mxu0 %v41180_v9 }
0x1883   : > { %36574 = vmatmul.mubr.f32.vlgmr.msra.gmra.mrb[68].mxu0 %v41294_v2 }
0x1884   : > { %36576 = vmatprep.mubr.f32.mxu0 %v41310_v47  ;;  %36972 = vmatpush3.bf16.msra.mxu0 %v41180_v9  ;;  %v33083_v9 = vld [vmem:[%s495_s14] ss:$0 sm:$0xff] }
0x1885   : > { %36974 = vmatprep.subr.bf16.mxu0 %v41194_v40  ;;  %32869 = vst.msk [vmem:[%s467_s12] sm:$0xff] %vm512_vm1, %v33083_v9 }
0x1887   : > { %36577 = vmatmul.mubr.f32.gmra.mrb[70].mxu0 %v32274_v26 }
0x1888   : > { %36976 = vmatpush3.bf16.msra.mxu0 %v41194_v40  ;;  %36595 = vmatprep.mubr.f32.mxu0 %v41266_v44  ;;  %v33084_v40 = vld [vmem:[%s495_s14 + $0x1] ss:$0 sm:$0xff] }
0x1889   : > { %36978 = vmatprep.subr.bf16.mxu0 %v41204_v52  ;;  %32870 = vst.msk [vmem:[%s467_s12 + $0x8] sm:$0xff] %vm512_vm1, %v33084_v40 }
0x188c   : > { %36980 = vmatpush3.bf16.msra.mxu0 %v41204_v52  ;;  %v33085_v52 = vld [vmem:[%s495_s14 + $0x2] ss:$0 sm:$0xff] }
0x188d   : > { %36982 = vmatprep.subr.bf16.mxu0 %v41214_v61  ;;  %32871 = vst.msk [vmem:[%s467_s12 + $0x10] sm:$0xff] %vm512_vm1, %v33085_v52 }
0x1890   : > { %36984 = vmatpush3.bf16.msra.mxu0 %v41214_v61  ;;  %v33086_v61 = vld [vmem:[%s495_s14 + $0x3] ss:$0 sm:$0xff]  ;;  %s37960_s14 = sshll.u32 %s38073_s0, 4  ;;  %s37961_s14 = int_to_ptr.vmem [resolvable:$false] %s37960_s14 }
0x1891   : > { %32872 = vst.msk [vmem:[%s467_s12 + $0x18] sm:$0xff] %vm512_vm1, %v33086_v61  ;;  %s37962_s12 = scalar_lea.vmem %s37961_s14, 1024  ;;  %p37963_p13 = scmp.lt.s32.totalorder %s41395_s16, %s37961_s14 }
0x1892   : > { %p37964_p0 = scmp.lt.s32.totalorder %s37962_s12, %s37956_s13 }
0x1893   : > { %36596 = vmatmul.mubr.f32.vlgmr.msra.gmra.mrb[68].mxu0 %v41294_v2 }
0x1894   : > { %36598 = vmatprep.mubr.f32.mxu0 %v41310_v47  ;;  %p37965_p1 = por %p37964_p0, %p37963_p13 }
0x1896   : > { %p37966_p2 = pnand %p37965_p1, %p37959_p12 }
0x1897   : > { %36599 = vmatmul.mubr.f32.gmra.mrb[70].mxu0 %v32274_v26 }
0x1898   : > { %37969 = shalt.err (!%p37966_p2)
}
0x1899   : > { %s37970_s29 = scalar_lea.hbm %s41393_s1, 512  ;;  %s37974_s0 = scalar_lea.hbm %s41497_s11, 1024 }
0x189a   : > { %p37971_p3 = scmp.ne.s32.totalorder %s41393_s1, %s37970_s29  ;;  %p37975_p8 = scmp.lt.u32.totalorder %s41393_s1, %s41497_s11 }
0x189b   : > { %p37976_p9 = scmp.lt.u32.totalorder %s37974_s0, %s37970_s29  ;;  %p37978_p11 = scmp.lt.u32.totalorder %s37970_s29, %s41393_s1 }
0x189c   : > { %p37972_p4 = pnand %p37971_p3, %p38174_p5 }
0x189d   : > { %p37977_p10 = por %p37976_p9, %p37975_p8 }
0x189e   : > { %p37973_p7 = pneg %p37972_p4 }
0x189f   : > { %p37979_p12 = por %p37978_p11, %p37977_p10 }
0x18a1   : > { %p37980_p13 = pnand %p37979_p12, %p37973_p7 }
0x18a3   : > { %37983 = shalt.err (!%p37980_p13)
}
0x18a4   : > { %s41500_s13 = smov 128   ;;  %v33082_v5 = vld [vmem:[%s41493_s7 + $0x3] ss:$0 sm:$0xff]  ;;  %s41510_s12 = sshll.u32 %s41374_s30, 5 }
0x18a5   : > { %37726 = dma.vmem_to_hbm [thread:$0]  (%p38174_p5), %s41395_s16, 512, %s41393_s1, %s32879_s25, %s41500_s13, %s41500_s13, %s38066_s24  }
0x18a6   : > { %s460_s29 = scalar_lea.vmem [#allocation5], %s41510_s12  ;;  %s41511_s16 = sshll.u32 %s38157_s21, 9 }
0x18a7   : > { %s32892_s22 = sshll.u32 %s460_s29, 4  ;;  %s41438_s0 = scalar_lea.hbm %s41496_s10, %s41511_s16  ;;  %s41431_s22 = int_to_ptr.vmem [resolvable:$true] %s32892_s22 }
0x18a8   : > { %s32874_s14 = scalar_lea.sflag [#allocation3], %s41374_s30  ;;  %s37984_s15 = scalar_lea.vmem %s41431_s22, 512 }
0x18a9   : > { %p37985_p0 = scmp.ne.s32.totalorder %s41431_s22, %s37984_s15  ;;  %s38075_s9 = smov [#allocation5]  }
0x18aa   : > { %s37988_s12 = sshll.u32 %s38075_s9, 4  ;;  %s37989_s12 = int_to_ptr.vmem [resolvable:$false] %s37988_s12 }
0x18ab   : > { %p37986_p1 = pnand %p37985_p0, %p38174_p5  ;;  %s37990_s13 = scalar_lea.vmem %s37989_s12, 1024 }
0x18ac   : > { %p37991_p3 = scmp.lt.s32.totalorder %s41431_s22, %s37989_s12  ;;  %p37992_p4 = scmp.lt.s32.totalorder %s37990_s13, %s37984_s15 }
0x18ad   : > { %p37987_p2 = pneg %p37986_p1 }
0x18ae   : > { %p37993_p7 = por %p37992_p4, %p37991_p3 }
0x18b0   : > { %p37994_p8 = pnand %p37993_p7, %p37987_p2 }
0x1966   : > { %v36597_v15 = vpop.f32.mrb[68].mxu0 }
0x1967   : > { %v37001_v42 = vadd.f32 %v36597_v15, %v33082_v5  ;;  %v32815_v51 = vpop.f32.mrb[69].mxu0 }
0x1968   : > { %v37002_v22 = vadd.f32 %v33082_v5, %v32815_v51 }
0x1969   : > { %32838 = vst.msk [vmem:[%s460_s29 + $0x8] sm:$0xff] %vm607_vm0, %v37001_v42 }
0x196a   : > { %32837 = vst.msk [vmem:[%s460_s29] sm:$0xff] %vm607_vm0, %v37002_v22  ;;  %v36600_v55 = vpop.f32.mrb[70].mxu0 }
0x196b   : > { %v37003_v14 = vadd.f32 %v36600_v55, %v33082_v5  ;;  %v32827_v34 = vpop.f32.mrb[71].mxu0 }
0x196c   : > { %v37004_v44 = vadd.f32 %v33082_v5, %v32827_v34 }
0x196d   : > { %32840 = vst.msk [vmem:[%s460_s29 + $0x18] sm:$0xff] %vm607_vm0, %v37003_v14 }
0x196e   : > { %32839 = vst.msk [vmem:[%s460_s29 + $0x10] sm:$0xff] %vm607_vm0, %v37004_v44 }
0x196f   : > { %37997 = shalt.err (!%p37994_p8)
}
0x1970   : > { %s37998_s21 = scalar_lea.hbm %s41438_s0, 512  ;;  %s38002_s1 = scalar_lea.hbm %s41496_s10, 1024 }
0x1971   : > { %p37999_p9 = scmp.ne.s32.totalorder %s41438_s0, %s37998_s21  ;;  %p38003_p12 = scmp.lt.u32.totalorder %s41438_s0, %s41496_s10 }
0x1972   : > { %p38004_p13 = scmp.lt.u32.totalorder %s38002_s1, %s37998_s21  ;;  %p38006_p1 = scmp.lt.u32.totalorder %s37998_s21, %s41438_s0 }
0x1973   : > { %p38000_p10 = pnand %p37999_p9, %p38174_p5 }
0x1974   : > { %p38005_p0 = por %p38004_p13, %p38003_p12 }
0x1975   : > { %p38001_p11 = pneg %p38000_p10 }
0x1976   : > { %p38007_p2 = por %p38006_p1, %p38005_p0 }
0x1978   : > { %p38008_p3 = pnand %p38007_p2, %p38001_p11 }
0x197a   : > { %38011 = shalt.err (!%p38008_p3)
}
0x197b   : > { %s41512_s13 = smov 128  }
0x197c   : > { %37725 = dma.vmem_to_hbm [thread:$0]  (%p38174_p5), %s41431_s22, 512, %s41438_s0, %s32874_s14, %s41512_s13, %s41512_s13, %s38066_s24  }
0x197d PF: > { %p37742_p4 = scmp.ge.s32.totalorder %s38054_s20, 2  ;;  %s32923_s15 = sand.u32 1, %s38042_s17  }
0x197e   : > { %s32924_s12 = scalar_lea.sflag [#allocation3], %s32923_s15 }
0x197f   : > { %p37734_p7 = pnand %p37742_p4, %p38178_p6 }
0x1981   : > { %38033 = dma.done.wait (!%p37734_p7), %s32924_s12, 512  }
0x1982   : > { %38035 = vsyncadd (!%p37734_p7), %s32924_s12, 4294966784  ;;  %s32933_s27 = scalar_lea.sflag [#allocation7], %s32923_s15 }
0x1983   : > { %38037 = dma.done.wait (!%p37734_p7), %s32933_s27, 512  }
0x1984   : > { %38039 = vsyncadd (!%p37734_p7), %s32933_s27, 4294966784  ;;  %p26_p5 = scmp.ge.s32.totalorder %s38161_s23, 4   ;;  %s41513_s17 = smov %s38046_s18 }
0x1985   : > { %s41514_s18 = smov %s38050_s19  ;;  %s41515_s19 = smov %s38172_s26 }
0x1986   : > { %s41516_s20 = smov %s38161_s23  ;;  %28 = sbr.rel (!%p26_p5) target bundleno = 10 (0xa), region = 129 }
0x198d   :  { %32938 = vsyncpa [#allocation3], 1 }
0x198e   :  { %32940 = vsyncpa [#allocation3 + $0x1], 1 }
0x198f   :  { %32941 = vsyncpa [#allocation7], 1 }
0x1990   :  { %32943 = vsyncpa [#allocation7 + $0x1], 1 }
0x1991   :  { %32944 = vsyncpa [#allocation4], 1 }
0x1992   :  { %32946 = vsyncpa [#allocation4 + $0x1], 1 }

</bundles_post_ra>
